<compile_context>
chip_gen: v7x
topology: tpu7x:2x2x1
jax: 0.10.0
libtpu: 0.0.40
codegen_flags: <defaults>
</compile_context>

<pallas_src>
import functools

import jax
import jax.numpy as jnp
from jax.experimental import pallas as pl
from jax.experimental.pallas import tpu as pltpu


# ----------------------------------------------------------------------------
# Fused whole-model kernel (one grid step = one batch element, all layers)
# ----------------------------------------------------------------------------

def _fused_decoder_kernel(
    # inputs -----------------------------------------------------------------
    x_ref,        # (S, K*Cin)   bf16  im2col'd causal-conv input (this batch)
    bpe_ref,      # (S, d)       f32   conv bias + positional encoding
    mask_ref,     # (S, S)       f32   causal additive mask (0 / -1e30)
    convw_ref,    # (K*Cin, d)   bf16  flattened conv weight
    sa_wqkv_ref, sa_bqkv_ref, sa_wo_ref, sa_bo_ref,          # (L, ...) stacks
    ca_wq_ref, ca_bq_ref, ca_wkv_ref, ca_bkv_ref, ca_wo_ref, ca_bo_ref,
    ln1_g_ref, ln1_b_ref, ln2_g_ref, ln2_b_ref, ln3_g_ref, ln3_b_ref,
    ff_w1_ref, ff_b1_ref, ff_w2_ref, ff_b2_ref,
    # output -----------------------------------------------------------------
    out_ref,      # (S, d)       f32   final decoder hidden state
    *, d_model, num_layers,
):
    bf16 = jnp.bfloat16
    scale = 1.0 / (d_model ** 0.5)

    def layernorm(x, g, b):
        mean = jnp.mean(x, axis=-1, keepdims=True)
        xc = x - mean
        var = jnp.mean(xc * xc, axis=-1, keepdims=True)
        return xc * jax.lax.rsqrt(var + 1e-5) * g + b

    def attend(q, k, v):
        # scores = q @ k^T : contract feature dim of both (no explicit .T)
        s = jax.lax.dot_general(
            q.astype(bf16), k.astype(bf16),
            dimension_numbers=(((1,), (1,)), ((), ())),
            preferred_element_type=jnp.float32) * scale + mask_ref[...]
        smax = jnp.max(s, axis=-1, keepdims=True)
        p = jnp.exp(s - smax)
        denom = jnp.sum(p, axis=-1, keepdims=True)
        p = p * pl.reciprocal(denom, approx=True)            # divide on EUP
        return jnp.dot(p.astype(bf16), v.astype(bf16),
                       preferred_element_type=jnp.float32)

    def proj(x_f32, w, b):
        # bf16 MXU operands, f32 accumulation
        return jnp.dot(x_f32.astype(bf16), w,
                       preferred_element_type=jnp.float32) + b

    # --- causal Conv1d as im2col matmul, + bias + positional encoding -------
    h = jnp.dot(x_ref[...], convw_ref[...],
                preferred_element_type=jnp.float32) + bpe_ref[...]
    mem = h.astype(bf16)          # cross-attention memory (fixed across layers)

    # --- decoder layers, fully unrolled, weights resident in VMEM -----------
    for l in range(num_layers):
        # self-attention block (post-norm), fused QKV projection
        qkv = proj(h, sa_wqkv_ref[l], sa_bqkv_ref[l])          # (S, 3d)
        q = qkv[:, :d_model]
        k = qkv[:, d_model:2 * d_model]
        v = qkv[:, 2 * d_model:]
        a = attend(q, k, v)
        a = proj(a, sa_wo_ref[l], sa_bo_ref[l])
        h = layernorm(h + a, ln1_g_ref[l], ln1_b_ref[l])

        # cross-attention block (memory = conv+PE output), fused K/V proj
        q = proj(h, ca_wq_ref[l], ca_bq_ref[l])
        kv = jnp.dot(mem, ca_wkv_ref[l],
                     preferred_element_type=jnp.float32) + ca_bkv_ref[l]
        k = kv[:, :d_model]
        v = kv[:, d_model:]
        a = attend(q, k, v)
        a = proj(a, ca_wo_ref[l], ca_bo_ref[l])
        h = layernorm(h + a, ln2_g_ref[l], ln2_b_ref[l])

        # feed-forward block: bias+ReLU fused, hidden slab kept in bf16
        f = jnp.maximum(proj(h, ff_w1_ref[l], ff_b1_ref[l]), 0.0).astype(bf16)
        f = jnp.dot(f, ff_w2_ref[l],
                    preferred_element_type=jnp.float32) + ff_b2_ref[l]
        h = layernorm(h + f, ln3_g_ref[l], ln3_b_ref[l])

    out_ref[...] = h


# ----------------------------------------------------------------------------
# Model glue: params, positional encoding, forward orchestration
# ----------------------------------------------------------------------------

def positional_encoding(seq_len, d_model):
    pos = jnp.arange(seq_len, dtype=jnp.float32)[:, None]
    div = jnp.exp(jnp.arange(0, d_model, 2, dtype=jnp.float32)
                  * (-jnp.log(10000.0) / d_model))
    ang = pos * div
    pe = jnp.zeros((seq_len, d_model), jnp.float32)
    pe = pe.at[:, 0::2].set(jnp.sin(ang))
    pe = pe.at[:, 1::2].set(jnp.cos(ang))
    return pe


def init_params(key, input_dim, conv_channels, d_model, num_layers, dff, ksize):
    keys = iter(jax.random.split(key, 64))

    def uni(k, fan_in, shape):
        bound = 1.0 / (fan_in ** 0.5)
        return jax.random.uniform(k, shape, jnp.float32, -bound, bound)

    L = num_layers
    params = {
        # conv weight stored pre-transposed as (K, Cin, Cout)
        "conv_w": uni(next(keys), input_dim * ksize,
                      (ksize, input_dim, conv_channels)),
        "conv_b": uni(next(keys), input_dim * ksize, (1, conv_channels)),
        # per-layer weights stacked on a leading L axis
        "sa_wqkv": uni(next(keys), d_model, (L, d_model, 3 * d_model)),
        "sa_bqkv": uni(next(keys), d_model, (L, 1, 3 * d_model)),
        "sa_wo":   uni(next(keys), d_model, (L, d_model, d_model)),
        "sa_bo":   uni(next(keys), d_model, (L, 1, d_model)),
        "ca_wq":   uni(next(keys), d_model, (L, d_model, d_model)),
        "ca_bq":   uni(next(keys), d_model, (L, 1, d_model)),
        "ca_wkv":  uni(next(keys), d_model, (L, d_model, 2 * d_model)),
        "ca_bkv":  uni(next(keys), d_model, (L, 1, 2 * d_model)),
        "ca_wo":   uni(next(keys), d_model, (L, d_model, d_model)),
        "ca_bo":   uni(next(keys), d_model, (L, 1, d_model)),
        "ln1_g": jnp.ones((L, 1, d_model), jnp.float32),
        "ln1_b": jnp.zeros((L, 1, d_model), jnp.float32),
        "ln2_g": jnp.ones((L, 1, d_model), jnp.float32),
        "ln2_b": jnp.zeros((L, 1, d_model), jnp.float32),
        "ln3_g": jnp.ones((L, 1, d_model), jnp.float32),
        "ln3_b": jnp.zeros((L, 1, d_model), jnp.float32),
        "ff_w1": uni(next(keys), d_model, (L, d_model, dff)),
        "ff_b1": uni(next(keys), d_model, (L, 1, dff)),
        "ff_w2": uni(next(keys), dff, (L, dff, d_model)),
        "ff_b2": uni(next(keys), dff, (L, 1, d_model)),
        "fc_w": uni(next(keys), d_model, (1, d_model)),
        "fc_b": uni(next(keys), d_model, (1, 1)),
    }
    return params


def forward(params, x, ksize=11):
    # x: (B, S, input_dim), batch-major / channels-last
    B, S, cin = x.shape
    L, _, d3 = params["sa_wqkv"].shape
    d = d3 // 3
    dff = params["ff_w1"].shape[2]
    K = ksize
    bf16 = jnp.bfloat16

    # causal left-pad + im2col (layout plumbing, done once in the wrapper)
    xp = jnp.pad(x, ((0, 0), (K - 1, 0), (0, 0)))
    cols = jnp.concatenate([xp[:, k:k + S, :] for k in range(K)], axis=-1)
    cols = cols.astype(bf16)                                   # (B, S, K*cin)

    conv_w = params["conv_w"].reshape(K * cin, d).astype(bf16)
    bias_pe = positional_encoding(S, d) + params["conv_b"]     # (S, d) f32
    # square subsequent mask (used as both tgt_mask and memory_mask).  A large
    # finite negative avoids any inf-arithmetic edge cases in the softmax.
    mask = jnp.where(jnp.arange(S)[None, :] > jnp.arange(S)[:, None],
                     -1e30, 0.0).astype(jnp.float32)

    def wl(name):  # per-layer matmul weights: bf16 MXU operands
        return params[name].astype(bf16)

    def full_spec(shape):
        # Whole-array block with a constant index_map: fetched once into VMEM,
        # stays resident across the batch grid axis (no per-step re-DMA).
        nd = len(shape)
        return pl.BlockSpec(shape, lambda b, _nd=nd: (0,) * _nd)

    hidden = pl.pallas_call(
        functools.partial(_fused_decoder_kernel, d_model=d, num_layers=L),
        grid=(B,),
        in_specs=[
            pl.BlockSpec((None, S, K * cin), lambda b: (b, 0, 0)),   # cols
            full_spec((S, d)),            # conv bias + positional encoding
            full_spec((S, S)),            # causal mask
            full_spec((K * cin, d)),      # conv weight (flattened)
            full_spec((L, d, 3 * d)), full_spec((L, 1, 3 * d)),      # sa qkv
            full_spec((L, d, d)), full_spec((L, 1, d)),              # sa out
            full_spec((L, d, d)), full_spec((L, 1, d)),              # ca q
            full_spec((L, d, 2 * d)), full_spec((L, 1, 2 * d)),      # ca kv
            full_spec((L, d, d)), full_spec((L, 1, d)),              # ca out
            full_spec((L, 1, d)), full_spec((L, 1, d)),              # ln1
            full_spec((L, 1, d)), full_spec((L, 1, d)),              # ln2
            full_spec((L, 1, d)), full_spec((L, 1, d)),              # ln3
            full_spec((L, d, dff)), full_spec((L, 1, dff)),          # ff1
            full_spec((L, dff, d)), full_spec((L, 1, d)),            # ff2
        ],
        out_specs=pl.BlockSpec((None, S, d), lambda b: (b, 0, 0)),
        out_shape=jax.ShapeDtypeStruct((B, S, d), jnp.float32),
        compiler_params=pltpu.CompilerParams(
            dimension_semantics=("parallel",),
            vmem_limit_bytes=32 * 1024 * 1024),
    )(
        cols, bias_pe, mask, conv_w,
        wl("sa_wqkv"), params["sa_bqkv"], wl("sa_wo"), params["sa_bo"],
        wl("ca_wq"), params["ca_bq"], wl("ca_wkv"), params["ca_bkv"],
        wl("ca_wo"), params["ca_bo"],
        params["ln1_g"], params["ln1_b"], params["ln2_g"], params["ln2_b"],
        params["ln3_g"], params["ln3_b"],
        wl("ff_w1"), params["ff_b1"], wl("ff_w2"), params["ff_b2"],
    )

    # final fc (d_model -> 1) on the lane-dense hidden state, in the wrapper;
    # equals the PyTorch output .permute(1, 0) -> (batch, seq)
    out = jnp.einsum("bsd,d->bs", hidden, params["fc_w"][0]) + params["fc_b"][0, 0]
    return out


# ----------------------------------------------------------------------------
# main
# ----------------------------------------------------------------------------

if __name__ == "__main__":
    key = jax.random.PRNGKey(0)
    kp, kx = jax.random.split(key)

    # shapes consistent with the module: 8 input features, d_model=64,
    # conv_channels=64, nhead=1, num_layers=4, dim_feedforward=2048 (default)
    B, S, input_dim = 2, 16, 8
    d_model = 64
    conv_channels = 64
    num_layers = 4
    dff = 2048
    ksize = 11

    params = init_params(kp, input_dim, conv_channels, d_model,
                         num_layers, dff, ksize)
    x = jax.random.normal(kx, (B, S, input_dim), jnp.float32)

    fwd = jax.jit(functools.partial(forward, ksize=ksize))
    out = jax.block_until_ready(fwd(params, x))

    assert out.shape == (B, S)
    assert bool(jnp.all(jnp.isfinite(out)))
    print("KERNEL_OK")
</pallas_src>

<mosaic_0001>
module attributes {stable_mosaic.version = 11 : i64} {
  func.func @_fused_decoder_kernel(%arg0: i32, %arg1: memref<1x16x88xbf16, #tpu.memory_space<vmem>>, %arg2: memref<16x64xf32, #tpu.memory_space<vmem>>, %arg3: memref<16x16xf32, #tpu.memory_space<vmem>>, %arg4: memref<88x64xbf16, #tpu.memory_space<vmem>>, %arg5: memref<4x64x192xbf16, #tpu.memory_space<vmem>>, %arg6: memref<4x1x192xf32, #tpu.memory_space<vmem>>, %arg7: memref<4x64x64xbf16, #tpu.memory_space<vmem>>, %arg8: memref<4x1x64xf32, #tpu.memory_space<vmem>>, %arg9: memref<4x64x64xbf16, #tpu.memory_space<vmem>>, %arg10: memref<4x1x64xf32, #tpu.memory_space<vmem>>, %arg11: memref<4x64x128xbf16, #tpu.memory_space<vmem>>, %arg12: memref<4x1x128xf32, #tpu.memory_space<vmem>>, %arg13: memref<4x64x64xbf16, #tpu.memory_space<vmem>>, %arg14: memref<4x1x64xf32, #tpu.memory_space<vmem>>, %arg15: memref<4x1x64xf32, #tpu.memory_space<vmem>>, %arg16: memref<4x1x64xf32, #tpu.memory_space<vmem>>, %arg17: memref<4x1x64xf32, #tpu.memory_space<vmem>>, %arg18: memref<4x1x64xf32, #tpu.memory_space<vmem>>, %arg19: memref<4x1x64xf32, #tpu.memory_space<vmem>>, %arg20: memref<4x1x64xf32, #tpu.memory_space<vmem>>, %arg21: memref<4x64x2048xbf16, #tpu.memory_space<vmem>>, %arg22: memref<4x1x2048xf32, #tpu.memory_space<vmem>>, %arg23: memref<4x2048x64xbf16, #tpu.memory_space<vmem>>, %arg24: memref<4x1x64xf32, #tpu.memory_space<vmem>>, %arg25: memref<1x16x64xf32, #tpu.memory_space<vmem>>) attributes {dimension_semantics = [#tpu.dimension_semantics<parallel>], iteration_bounds = array<i64: 2>, scalar_prefetch = 0 : i64, scratch_operands = 0 : i64, tpu.core_type = #tpu.core_type<tc>, window_params = [{transform_indices = @transform_0, window_bounds = array<i64: 1, 16, 88>}, {pipeline_mode = #tpu.pipeline_mode<synchronous>, transform_indices = @transform_1, window_bounds = array<i64: 16, 64>}, {pipeline_mode = #tpu.pipeline_mode<synchronous>, transform_indices = @transform_2, window_bounds = array<i64: 16, 16>}, {pipeline_mode = #tpu.pipeline_mode<synchronous>, transform_indices = @transform_3, window_bounds = array<i64: 88, 64>}, {pipeline_mode = #tpu.pipeline_mode<synchronous>, transform_indices = @transform_4, window_bounds = array<i64: 4, 64, 192>}, {pipeline_mode = #tpu.pipeline_mode<synchronous>, transform_indices = @transform_5, window_bounds = array<i64: 4, 1, 192>}, {pipeline_mode = #tpu.pipeline_mode<synchronous>, transform_indices = @transform_6, window_bounds = array<i64: 4, 64, 64>}, {pipeline_mode = #tpu.pipeline_mode<synchronous>, transform_indices = @transform_7, window_bounds = array<i64: 4, 1, 64>}, {pipeline_mode = #tpu.pipeline_mode<synchronous>, transform_indices = @transform_8, window_bounds = array<i64: 4, 64, 64>}, {pipeline_mode = #tpu.pipeline_mode<synchronous>, transform_indices = @transform_9, window_bounds = array<i64: 4, 1, 64>}, {pipeline_mode = #tpu.pipeline_mode<synchronous>, transform_indices = @transform_10, window_bounds = array<i64: 4, 64, 128>}, {pipeline_mode = #tpu.pipeline_mode<synchronous>, transform_indices = @transform_11, window_bounds = array<i64: 4, 1, 128>}, {pipeline_mode = #tpu.pipeline_mode<synchronous>, transform_indices = @transform_12, window_bounds = array<i64: 4, 64, 64>}, {pipeline_mode = #tpu.pipeline_mode<synchronous>, transform_indices = @transform_13, window_bounds = array<i64: 4, 1, 64>}, {pipeline_mode = #tpu.pipeline_mode<synchronous>, transform_indices = @transform_14, window_bounds = array<i64: 4, 1, 64>}, {pipeline_mode = #tpu.pipeline_mode<synchronous>, transform_indices = @transform_15, window_bounds = array<i64: 4, 1, 64>}, {pipeline_mode = #tpu.pipeline_mode<synchronous>, transform_indices = @transform_16, window_bounds = array<i64: 4, 1, 64>}, {pipeline_mode = #tpu.pipeline_mode<synchronous>, transform_indices = @transform_17, window_bounds = array<i64: 4, 1, 64>}, {pipeline_mode = #tpu.pipeline_mode<synchronous>, transform_indices = @transform_18, window_bounds = array<i64: 4, 1, 64>}, {pipeline_mode = #tpu.pipeline_mode<synchronous>, transform_indices = @transform_19, window_bounds = array<i64: 4, 1, 64>}, {pipeline_mode = #tpu.pipeline_mode<synchronous>, transform_indices = @transform_20, window_bounds = array<i64: 4, 64, 2048>}, {pipeline_mode = #tpu.pipeline_mode<synchronous>, transform_indices = @transform_21, window_bounds = array<i64: 4, 1, 2048>}, {pipeline_mode = #tpu.pipeline_mode<synchronous>, transform_indices = @transform_22, window_bounds = array<i64: 4, 2048, 64>}, {pipeline_mode = #tpu.pipeline_mode<synchronous>, transform_indices = @transform_23, window_bounds = array<i64: 4, 1, 64>}, {transform_indices = @transform_24, window_bounds = array<i64: 1, 16, 64>}]} {
    %c0 = arith.constant 0 : index
    %c0_0 = arith.constant 0 : index
    %c0_1 = arith.constant 0 : index
    %0 = vector.load %arg1[%c0, %c0_0, %c0_1] : memref<1x16x88xbf16, #tpu.memory_space<vmem>>, vector<1x16x88xbf16>
    %1 = vector.shape_cast %0 : vector<1x16x88xbf16> to vector<16x88xbf16>
    %c0_2 = arith.constant 0 : index
    %c0_3 = arith.constant 0 : index
    %2 = vector.load %arg4[%c0_2, %c0_3] : memref<88x64xbf16, #tpu.memory_space<vmem>>, vector<88x64xbf16>
    %cst = arith.constant dense<0.000000e+00> : vector<16x64xf32>
    %3 = tpu.matmul %1, %2, %cst {dimension_numbers = #tpu.dot_dimension_numbers<[1], [0], [0], [1], [0, 0, 1, 1], [], []>} : vector<16x88xbf16>, vector<88x64xbf16>, vector<16x64xf32> -> vector<16x64xf32>
    %c0_4 = arith.constant 0 : index
    %c0_5 = arith.constant 0 : index
    %4 = vector.load %arg2[%c0_4, %c0_5] : memref<16x64xf32, #tpu.memory_space<vmem>>, vector<16x64xf32>
    %5 = arith.addf %3, %4 : vector<16x64xf32>
    %6 = arith.truncf %5 : vector<16x64xf32> to vector<16x64xbf16>
    %c0_6 = arith.constant 0 : index
    %c0_7 = arith.constant 0 : index
    %c0_8 = arith.constant 0 : index
    %7 = vector.load %arg5[%c0_6, %c0_7, %c0_8] : memref<4x64x192xbf16, #tpu.memory_space<vmem>>, vector<1x64x192xbf16>
    %8 = vector.shape_cast %7 : vector<1x64x192xbf16> to vector<64x192xbf16>
    %c0_9 = arith.constant 0 : index
    %c0_10 = arith.constant 0 : index
    %c0_11 = arith.constant 0 : index
    %9 = vector.load %arg6[%c0_9, %c0_10, %c0_11] : memref<4x1x192xf32, #tpu.memory_space<vmem>>, vector<1x1x192xf32>
    %10 = vector.shape_cast %9 : vector<1x1x192xf32> to vector<1x192xf32>
    %11 = arith.truncf %5 : vector<16x64xf32> to vector<16x64xbf16>
    %cst_12 = arith.constant dense<0.000000e+00> : vector<16x192xf32>
    %12 = tpu.matmul %11, %8, %cst_12 {dimension_numbers = #tpu.dot_dimension_numbers<[1], [0], [0], [1], [0, 0, 1, 1], [], []>} : vector<16x64xbf16>, vector<64x192xbf16>, vector<16x192xf32> -> vector<16x192xf32>
    %13 = vector.broadcast %10 : vector<1x192xf32> to vector<16x192xf32>
    %14 = arith.addf %12, %13 : vector<16x192xf32>
    %15 = vector.extract_strided_slice %14 {offsets = [0, 0], sizes = [16, 64], strides = [1, 1]} : vector<16x192xf32> to vector<16x64xf32>
    %16 = vector.extract_strided_slice %14 {offsets = [0, 64], sizes = [16, 64], strides = [1, 1]} : vector<16x192xf32> to vector<16x64xf32>
    %17 = vector.extract_strided_slice %14 {offsets = [0, 128], sizes = [16, 64], strides = [1, 1]} : vector<16x192xf32> to vector<16x64xf32>
    %18 = arith.truncf %15 : vector<16x64xf32> to vector<16x64xbf16>
    %19 = arith.truncf %16 : vector<16x64xf32> to vector<16x64xbf16>
    %cst_13 = arith.constant dense<0.000000e+00> : vector<16x16xf32>
    %20 = tpu.matmul %18, %19, %cst_13 {dimension_numbers = #tpu.dot_dimension_numbers<[1], [1], [0], [0], [0, 0, 1, 0], [], []>} : vector<16x64xbf16>, vector<16x64xbf16>, vector<16x16xf32> -> vector<16x16xf32>
    %cst_14 = arith.constant 1.250000e-01 : f32
    %21 = vector.broadcast %cst_14 : f32 to vector<16x16xf32>
    %22 = arith.mulf %20, %21 : vector<16x16xf32>
    %c0_15 = arith.constant 0 : index
    %c0_16 = arith.constant 0 : index
    %23 = vector.load %arg3[%c0_15, %c0_16] : memref<16x16xf32, #tpu.memory_space<vmem>>, vector<16x16xf32>
    %24 = arith.addf %22, %23 : vector<16x16xf32>
    %cst_17 = arith.constant dense<0xFF800000> : vector<16xf32>
    %25 = vector.multi_reduction <maximumf>, %24, %cst_17 [1] : vector<16x16xf32> to vector<16xf32>
    %26 = vector.shape_cast %25 : vector<16xf32> to vector<16x1xf32>
    %27 = vector.broadcast %26 : vector<16x1xf32> to vector<16x16xf32>
    %28 = arith.subf %24, %27 : vector<16x16xf32>
    %29 = math.exp %28 : vector<16x16xf32>
    %cst_18 = arith.constant dense<0.000000e+00> : vector<16xf32>
    %30 = vector.multi_reduction <add>, %29, %cst_18 [1] : vector<16x16xf32> to vector<16xf32>
    %31 = vector.shape_cast %30 : vector<16xf32> to vector<16x1xf32>
    %32 = tpu.reciprocal %31 {approx = true} : vector<16x1xf32> -> vector<16x1xf32>
    %33 = vector.broadcast %32 : vector<16x1xf32> to vector<16x16xf32>
    %34 = arith.mulf %29, %33 : vector<16x16xf32>
    %35 = arith.truncf %34 : vector<16x16xf32> to vector<16x16xbf16>
    %36 = arith.truncf %17 : vector<16x64xf32> to vector<16x64xbf16>
    %cst_19 = arith.constant dense<0.000000e+00> : vector<16x64xf32>
    %37 = tpu.matmul %35, %36, %cst_19 {dimension_numbers = #tpu.dot_dimension_numbers<[1], [0], [0], [1], [0, 0, 1, 1], [], []>} : vector<16x16xbf16>, vector<16x64xbf16>, vector<16x64xf32> -> vector<16x64xf32>
    %c0_20 = arith.constant 0 : index
    %c0_21 = arith.constant 0 : index
    %c0_22 = arith.constant 0 : index
    %38 = vector.load %arg7[%c0_20, %c0_21, %c0_22] : memref<4x64x64xbf16, #tpu.memory_space<vmem>>, vector<1x64x64xbf16>
    %39 = vector.shape_cast %38 : vector<1x64x64xbf16> to vector<64x64xbf16>
    %c0_23 = arith.constant 0 : index
    %c0_24 = arith.constant 0 : index
    %c0_25 = arith.constant 0 : index
    %40 = vector.load %arg8[%c0_23, %c0_24, %c0_25] : memref<4x1x64xf32, #tpu.memory_space<vmem>>, vector<1x1x64xf32>
    %41 = vector.shape_cast %40 : vector<1x1x64xf32> to vector<1x64xf32>
    %42 = arith.truncf %37 : vector<16x64xf32> to vector<16x64xbf16>
    %cst_26 = arith.constant dense<0.000000e+00> : vector<16x64xf32>
    %43 = tpu.matmul %42, %39, %cst_26 {dimension_numbers = #tpu.dot_dimension_numbers<[1], [0], [0], [1], [0, 0, 1, 1], [], []>} : vector<16x64xbf16>, vector<64x64xbf16>, vector<16x64xf32> -> vector<16x64xf32>
    %44 = vector.broadcast %41 : vector<1x64xf32> to vector<16x64xf32>
    %45 = arith.addf %43, %44 : vector<16x64xf32>
    %46 = arith.addf %5, %45 : vector<16x64xf32>
    %c0_27 = arith.constant 0 : index
    %c0_28 = arith.constant 0 : index
    %c0_29 = arith.constant 0 : index
    %47 = vector.load %arg15[%c0_27, %c0_28, %c0_29] : memref<4x1x64xf32, #tpu.memory_space<vmem>>, vector<1x1x64xf32>
    %48 = vector.shape_cast %47 : vector<1x1x64xf32> to vector<1x64xf32>
    %c0_30 = arith.constant 0 : index
    %c0_31 = arith.constant 0 : index
    %c0_32 = arith.constant 0 : index
    %49 = vector.load %arg16[%c0_30, %c0_31, %c0_32] : memref<4x1x64xf32, #tpu.memory_space<vmem>>, vector<1x1x64xf32>
    %50 = vector.shape_cast %49 : vector<1x1x64xf32> to vector<1x64xf32>
    %cst_33 = arith.constant dense<0.000000e+00> : vector<16xf32>
    %51 = vector.multi_reduction <add>, %46, %cst_33 [1] : vector<16x64xf32> to vector<16xf32>
    %52 = vector.shape_cast %51 : vector<16xf32> to vector<16x1xf32>
    %cst_34 = arith.constant 6.400000e+01 : f32
    %53 = vector.broadcast %cst_34 : f32 to vector<16x1xf32>
    %54 = arith.divf %52, %53 : vector<16x1xf32>
    %55 = vector.broadcast %54 : vector<16x1xf32> to vector<16x64xf32>
    %56 = arith.subf %46, %55 : vector<16x64xf32>
    %57 = arith.mulf %56, %56 : vector<16x64xf32>
    %cst_35 = arith.constant dense<0.000000e+00> : vector<16xf32>
    %58 = vector.multi_reduction <add>, %57, %cst_35 [1] : vector<16x64xf32> to vector<16xf32>
    %59 = vector.shape_cast %58 : vector<16xf32> to vector<16x1xf32>
    %cst_36 = arith.constant 6.400000e+01 : f32
    %60 = vector.broadcast %cst_36 : f32 to vector<16x1xf32>
    %61 = arith.divf %59, %60 : vector<16x1xf32>
    %cst_37 = arith.constant 9.99999974E-6 : f32
    %62 = vector.broadcast %cst_37 : f32 to vector<16x1xf32>
    %63 = arith.addf %61, %62 : vector<16x1xf32>
    %64 = math.rsqrt %63 : vector<16x1xf32>
    %65 = vector.broadcast %64 : vector<16x1xf32> to vector<16x64xf32>
    %66 = arith.mulf %56, %65 : vector<16x64xf32>
    %67 = vector.broadcast %48 : vector<1x64xf32> to vector<16x64xf32>
    %68 = arith.mulf %66, %67 : vector<16x64xf32>
    %69 = vector.broadcast %50 : vector<1x64xf32> to vector<16x64xf32>
    %70 = arith.addf %68, %69 : vector<16x64xf32>
    %c0_38 = arith.constant 0 : index
    %c0_39 = arith.constant 0 : index
    %c0_40 = arith.constant 0 : index
    %71 = vector.load %arg9[%c0_38, %c0_39, %c0_40] : memref<4x64x64xbf16, #tpu.memory_space<vmem>>, vector<1x64x64xbf16>
    %72 = vector.shape_cast %71 : vector<1x64x64xbf16> to vector<64x64xbf16>
    %c0_41 = arith.constant 0 : index
    %c0_42 = arith.constant 0 : index
    %c0_43 = arith.constant 0 : index
    %73 = vector.load %arg10[%c0_41, %c0_42, %c0_43] : memref<4x1x64xf32, #tpu.memory_space<vmem>>, vector<1x1x64xf32>
    %74 = vector.shape_cast %73 : vector<1x1x64xf32> to vector<1x64xf32>
    %75 = arith.truncf %70 : vector<16x64xf32> to vector<16x64xbf16>
    %cst_44 = arith.constant dense<0.000000e+00> : vector<16x64xf32>
    %76 = tpu.matmul %75, %72, %cst_44 {dimension_numbers = #tpu.dot_dimension_numbers<[1], [0], [0], [1], [0, 0, 1, 1], [], []>} : vector<16x64xbf16>, vector<64x64xbf16>, vector<16x64xf32> -> vector<16x64xf32>
    %77 = vector.broadcast %74 : vector<1x64xf32> to vector<16x64xf32>
    %78 = arith.addf %76, %77 : vector<16x64xf32>
    %c0_45 = arith.constant 0 : index
    %c0_46 = arith.constant 0 : index
    %c0_47 = arith.constant 0 : index
    %79 = vector.load %arg11[%c0_45, %c0_46, %c0_47] : memref<4x64x128xbf16, #tpu.memory_space<vmem>>, vector<1x64x128xbf16>
    %80 = vector.shape_cast %79 : vector<1x64x128xbf16> to vector<64x128xbf16>
    %cst_48 = arith.constant dense<0.000000e+00> : vector<16x128xf32>
    %81 = tpu.matmul %6, %80, %cst_48 {dimension_numbers = #tpu.dot_dimension_numbers<[1], [0], [0], [1], [0, 0, 1, 1], [], []>} : vector<16x64xbf16>, vector<64x128xbf16>, vector<16x128xf32> -> vector<16x128xf32>
    %c0_49 = arith.constant 0 : index
    %c0_50 = arith.constant 0 : index
    %c0_51 = arith.constant 0 : index
    %82 = vector.load %arg12[%c0_49, %c0_50, %c0_51] : memref<4x1x128xf32, #tpu.memory_space<vmem>>, vector<1x1x128xf32>
    %83 = vector.shape_cast %82 : vector<1x1x128xf32> to vector<1x128xf32>
    %84 = vector.broadcast %83 : vector<1x128xf32> to vector<16x128xf32>
    %85 = arith.addf %81, %84 : vector<16x128xf32>
    %86 = vector.extract_strided_slice %85 {offsets = [0, 0], sizes = [16, 64], strides = [1, 1]} : vector<16x128xf32> to vector<16x64xf32>
    %87 = vector.extract_strided_slice %85 {offsets = [0, 64], sizes = [16, 64], strides = [1, 1]} : vector<16x128xf32> to vector<16x64xf32>
    %88 = arith.truncf %78 : vector<16x64xf32> to vector<16x64xbf16>
    %89 = arith.truncf %86 : vector<16x64xf32> to vector<16x64xbf16>
    %cst_52 = arith.constant dense<0.000000e+00> : vector<16x16xf32>
    %90 = tpu.matmul %88, %89, %cst_52 {dimension_numbers = #tpu.dot_dimension_numbers<[1], [1], [0], [0], [0, 0, 1, 0], [], []>} : vector<16x64xbf16>, vector<16x64xbf16>, vector<16x16xf32> -> vector<16x16xf32>
    %cst_53 = arith.constant 1.250000e-01 : f32
    %91 = vector.broadcast %cst_53 : f32 to vector<16x16xf32>
    %92 = arith.mulf %90, %91 : vector<16x16xf32>
    %c0_54 = arith.constant 0 : index
    %c0_55 = arith.constant 0 : index
    %93 = vector.load %arg3[%c0_54, %c0_55] : memref<16x16xf32, #tpu.memory_space<vmem>>, vector<16x16xf32>
    %94 = arith.addf %92, %93 : vector<16x16xf32>
    %cst_56 = arith.constant dense<0xFF800000> : vector<16xf32>
    %95 = vector.multi_reduction <maximumf>, %94, %cst_56 [1] : vector<16x16xf32> to vector<16xf32>
    %96 = vector.shape_cast %95 : vector<16xf32> to vector<16x1xf32>
    %97 = vector.broadcast %96 : vector<16x1xf32> to vector<16x16xf32>
    %98 = arith.subf %94, %97 : vector<16x16xf32>
    %99 = math.exp %98 : vector<16x16xf32>
    %cst_57 = arith.constant dense<0.000000e+00> : vector<16xf32>
    %100 = vector.multi_reduction <add>, %99, %cst_57 [1] : vector<16x16xf32> to vector<16xf32>
    %101 = vector.shape_cast %100 : vector<16xf32> to vector<16x1xf32>
    %102 = tpu.reciprocal %101 {approx = true} : vector<16x1xf32> -> vector<16x1xf32>
    %103 = vector.broadcast %102 : vector<16x1xf32> to vector<16x16xf32>
    %104 = arith.mulf %99, %103 : vector<16x16xf32>
    %105 = arith.truncf %104 : vector<16x16xf32> to vector<16x16xbf16>
    %106 = arith.truncf %87 : vector<16x64xf32> to vector<16x64xbf16>
    %cst_58 = arith.constant dense<0.000000e+00> : vector<16x64xf32>
    %107 = tpu.matmul %105, %106, %cst_58 {dimension_numbers = #tpu.dot_dimension_numbers<[1], [0], [0], [1], [0, 0, 1, 1], [], []>} : vector<16x16xbf16>, vector<16x64xbf16>, vector<16x64xf32> -> vector<16x64xf32>
    %c0_59 = arith.constant 0 : index
    %c0_60 = arith.constant 0 : index
    %c0_61 = arith.constant 0 : index
    %108 = vector.load %arg13[%c0_59, %c0_60, %c0_61] : memref<4x64x64xbf16, #tpu.memory_space<vmem>>, vector<1x64x64xbf16>
    %109 = vector.shape_cast %108 : vector<1x64x64xbf16> to vector<64x64xbf16>
    %c0_62 = arith.constant 0 : index
    %c0_63 = arith.constant 0 : index
    %c0_64 = arith.constant 0 : index
    %110 = vector.load %arg14[%c0_62, %c0_63, %c0_64] : memref<4x1x64xf32, #tpu.memory_space<vmem>>, vector<1x1x64xf32>
    %111 = vector.shape_cast %110 : vector<1x1x64xf32> to vector<1x64xf32>
    %112 = arith.truncf %107 : vector<16x64xf32> to vector<16x64xbf16>
    %cst_65 = arith.constant dense<0.000000e+00> : vector<16x64xf32>
    %113 = tpu.matmul %112, %109, %cst_65 {dimension_numbers = #tpu.dot_dimension_numbers<[1], [0], [0], [1], [0, 0, 1, 1], [], []>} : vector<16x64xbf16>, vector<64x64xbf16>, vector<16x64xf32> -> vector<16x64xf32>
    %114 = vector.broadcast %111 : vector<1x64xf32> to vector<16x64xf32>
    %115 = arith.addf %113, %114 : vector<16x64xf32>
    %116 = arith.addf %70, %115 : vector<16x64xf32>
    %c0_66 = arith.constant 0 : index
    %c0_67 = arith.constant 0 : index
    %c0_68 = arith.constant 0 : index
    %117 = vector.load %arg17[%c0_66, %c0_67, %c0_68] : memref<4x1x64xf32, #tpu.memory_space<vmem>>, vector<1x1x64xf32>
    %118 = vector.shape_cast %117 : vector<1x1x64xf32> to vector<1x64xf32>
    %c0_69 = arith.constant 0 : index
    %c0_70 = arith.constant 0 : index
    %c0_71 = arith.constant 0 : index
    %119 = vector.load %arg18[%c0_69, %c0_70, %c0_71] : memref<4x1x64xf32, #tpu.memory_space<vmem>>, vector<1x1x64xf32>
    %120 = vector.shape_cast %119 : vector<1x1x64xf32> to vector<1x64xf32>
    %cst_72 = arith.constant dense<0.000000e+00> : vector<16xf32>
    %121 = vector.multi_reduction <add>, %116, %cst_72 [1] : vector<16x64xf32> to vector<16xf32>
    %122 = vector.shape_cast %121 : vector<16xf32> to vector<16x1xf32>
    %cst_73 = arith.constant 6.400000e+01 : f32
    %123 = vector.broadcast %cst_73 : f32 to vector<16x1xf32>
    %124 = arith.divf %122, %123 : vector<16x1xf32>
    %125 = vector.broadcast %124 : vector<16x1xf32> to vector<16x64xf32>
    %126 = arith.subf %116, %125 : vector<16x64xf32>
    %127 = arith.mulf %126, %126 : vector<16x64xf32>
    %cst_74 = arith.constant dense<0.000000e+00> : vector<16xf32>
    %128 = vector.multi_reduction <add>, %127, %cst_74 [1] : vector<16x64xf32> to vector<16xf32>
    %129 = vector.shape_cast %128 : vector<16xf32> to vector<16x1xf32>
    %cst_75 = arith.constant 6.400000e+01 : f32
    %130 = vector.broadcast %cst_75 : f32 to vector<16x1xf32>
    %131 = arith.divf %129, %130 : vector<16x1xf32>
    %cst_76 = arith.constant 9.99999974E-6 : f32
    %132 = vector.broadcast %cst_76 : f32 to vector<16x1xf32>
    %133 = arith.addf %131, %132 : vector<16x1xf32>
    %134 = math.rsqrt %133 : vector<16x1xf32>
    %135 = vector.broadcast %134 : vector<16x1xf32> to vector<16x64xf32>
    %136 = arith.mulf %126, %135 : vector<16x64xf32>
    %137 = vector.broadcast %118 : vector<1x64xf32> to vector<16x64xf32>
    %138 = arith.mulf %136, %137 : vector<16x64xf32>
    %139 = vector.broadcast %120 : vector<1x64xf32> to vector<16x64xf32>
    %140 = arith.addf %138, %139 : vector<16x64xf32>
    %c0_77 = arith.constant 0 : index
    %c0_78 = arith.constant 0 : index
    %c0_79 = arith.constant 0 : index
    %141 = vector.load %arg21[%c0_77, %c0_78, %c0_79] : memref<4x64x2048xbf16, #tpu.memory_space<vmem>>, vector<1x64x2048xbf16>
    %142 = vector.shape_cast %141 : vector<1x64x2048xbf16> to vector<64x2048xbf16>
    %c0_80 = arith.constant 0 : index
    %c0_81 = arith.constant 0 : index
    %c0_82 = arith.constant 0 : index
    %143 = vector.load %arg22[%c0_80, %c0_81, %c0_82] : memref<4x1x2048xf32, #tpu.memory_space<vmem>>, vector<1x1x2048xf32>
    %144 = vector.shape_cast %143 : vector<1x1x2048xf32> to vector<1x2048xf32>
    %145 = arith.truncf %140 : vector<16x64xf32> to vector<16x64xbf16>
    %cst_83 = arith.constant dense<0.000000e+00> : vector<16x2048xf32>
    %146 = tpu.matmul %145, %142, %cst_83 {dimension_numbers = #tpu.dot_dimension_numbers<[1], [0], [0], [1], [0, 0, 1, 1], [], []>} : vector<16x64xbf16>, vector<64x2048xbf16>, vector<16x2048xf32> -> vector<16x2048xf32>
    %147 = vector.broadcast %144 : vector<1x2048xf32> to vector<16x2048xf32>
    %148 = arith.addf %146, %147 : vector<16x2048xf32>
    %cst_84 = arith.constant 0.000000e+00 : f32
    %149 = vector.broadcast %cst_84 : f32 to vector<16x2048xf32>
    %150 = arith.maximumf %148, %149 : vector<16x2048xf32>
    %151 = arith.truncf %150 : vector<16x2048xf32> to vector<16x2048xbf16>
    %c0_85 = arith.constant 0 : index
    %c0_86 = arith.constant 0 : index
    %c0_87 = arith.constant 0 : index
    %152 = vector.load %arg23[%c0_85, %c0_86, %c0_87] : memref<4x2048x64xbf16, #tpu.memory_space<vmem>>, vector<1x2048x64xbf16>
    %153 = vector.shape_cast %152 : vector<1x2048x64xbf16> to vector<2048x64xbf16>
    %cst_88 = arith.constant dense<0.000000e+00> : vector<16x64xf32>
    %154 = tpu.matmul %151, %153, %cst_88 {dimension_numbers = #tpu.dot_dimension_numbers<[1], [0], [0], [1], [0, 0, 1, 1], [], []>} : vector<16x2048xbf16>, vector<2048x64xbf16>, vector<16x64xf32> -> vector<16x64xf32>
    %c0_89 = arith.constant 0 : index
    %c0_90 = arith.constant 0 : index
    %c0_91 = arith.constant 0 : index
    %155 = vector.load %arg24[%c0_89, %c0_90, %c0_91] : memref<4x1x64xf32, #tpu.memory_space<vmem>>, vector<1x1x64xf32>
    %156 = vector.shape_cast %155 : vector<1x1x64xf32> to vector<1x64xf32>
    %157 = vector.broadcast %156 : vector<1x64xf32> to vector<16x64xf32>
    %158 = arith.addf %154, %157 : vector<16x64xf32>
    %159 = arith.addf %140, %158 : vector<16x64xf32>
    %c0_92 = arith.constant 0 : index
    %c0_93 = arith.constant 0 : index
    %c0_94 = arith.constant 0 : index
    %160 = vector.load %arg19[%c0_92, %c0_93, %c0_94] : memref<4x1x64xf32, #tpu.memory_space<vmem>>, vector<1x1x64xf32>
    %161 = vector.shape_cast %160 : vector<1x1x64xf32> to vector<1x64xf32>
    %c0_95 = arith.constant 0 : index
    %c0_96 = arith.constant 0 : index
    %c0_97 = arith.constant 0 : index
    %162 = vector.load %arg20[%c0_95, %c0_96, %c0_97] : memref<4x1x64xf32, #tpu.memory_space<vmem>>, vector<1x1x64xf32>
    %163 = vector.shape_cast %162 : vector<1x1x64xf32> to vector<1x64xf32>
    %cst_98 = arith.constant dense<0.000000e+00> : vector<16xf32>
    %164 = vector.multi_reduction <add>, %159, %cst_98 [1] : vector<16x64xf32> to vector<16xf32>
    %165 = vector.shape_cast %164 : vector<16xf32> to vector<16x1xf32>
    %cst_99 = arith.constant 6.400000e+01 : f32
    %166 = vector.broadcast %cst_99 : f32 to vector<16x1xf32>
    %167 = arith.divf %165, %166 : vector<16x1xf32>
    %168 = vector.broadcast %167 : vector<16x1xf32> to vector<16x64xf32>
    %169 = arith.subf %159, %168 : vector<16x64xf32>
    %170 = arith.mulf %169, %169 : vector<16x64xf32>
    %cst_100 = arith.constant dense<0.000000e+00> : vector<16xf32>
    %171 = vector.multi_reduction <add>, %170, %cst_100 [1] : vector<16x64xf32> to vector<16xf32>
    %172 = vector.shape_cast %171 : vector<16xf32> to vector<16x1xf32>
    %cst_101 = arith.constant 6.400000e+01 : f32
    %173 = vector.broadcast %cst_101 : f32 to vector<16x1xf32>
    %174 = arith.divf %172, %173 : vector<16x1xf32>
    %cst_102 = arith.constant 9.99999974E-6 : f32
    %175 = vector.broadcast %cst_102 : f32 to vector<16x1xf32>
    %176 = arith.addf %174, %175 : vector<16x1xf32>
    %177 = math.rsqrt %176 : vector<16x1xf32>
    %178 = vector.broadcast %177 : vector<16x1xf32> to vector<16x64xf32>
    %179 = arith.mulf %169, %178 : vector<16x64xf32>
    %180 = vector.broadcast %161 : vector<1x64xf32> to vector<16x64xf32>
    %181 = arith.mulf %179, %180 : vector<16x64xf32>
    %182 = vector.broadcast %163 : vector<1x64xf32> to vector<16x64xf32>
    %183 = arith.addf %181, %182 : vector<16x64xf32>
    %c1 = arith.constant 1 : index
    %c0_103 = arith.constant 0 : index
    %c0_104 = arith.constant 0 : index
    %184 = vector.load %arg5[%c1, %c0_103, %c0_104] : memref<4x64x192xbf16, #tpu.memory_space<vmem>>, vector<1x64x192xbf16>
    %185 = vector.shape_cast %184 : vector<1x64x192xbf16> to vector<64x192xbf16>
    %c1_105 = arith.constant 1 : index
    %c0_106 = arith.constant 0 : index
    %c0_107 = arith.constant 0 : index
    %186 = vector.load %arg6[%c1_105, %c0_106, %c0_107] : memref<4x1x192xf32, #tpu.memory_space<vmem>>, vector<1x1x192xf32>
    %187 = vector.shape_cast %186 : vector<1x1x192xf32> to vector<1x192xf32>
    %188 = arith.truncf %183 : vector<16x64xf32> to vector<16x64xbf16>
    %cst_108 = arith.constant dense<0.000000e+00> : vector<16x192xf32>
    %189 = tpu.matmul %188, %185, %cst_108 {dimension_numbers = #tpu.dot_dimension_numbers<[1], [0], [0], [1], [0, 0, 1, 1], [], []>} : vector<16x64xbf16>, vector<64x192xbf16>, vector<16x192xf32> -> vector<16x192xf32>
    %190 = vector.broadcast %187 : vector<1x192xf32> to vector<16x192xf32>
    %191 = arith.addf %189, %190 : vector<16x192xf32>
    %192 = vector.extract_strided_slice %191 {offsets = [0, 0], sizes = [16, 64], strides = [1, 1]} : vector<16x192xf32> to vector<16x64xf32>
    %193 = vector.extract_strided_slice %191 {offsets = [0, 64], sizes = [16, 64], strides = [1, 1]} : vector<16x192xf32> to vector<16x64xf32>
    %194 = vector.extract_strided_slice %191 {offsets = [0, 128], sizes = [16, 64], strides = [1, 1]} : vector<16x192xf32> to vector<16x64xf32>
    %195 = arith.truncf %192 : vector<16x64xf32> to vector<16x64xbf16>
    %196 = arith.truncf %193 : vector<16x64xf32> to vector<16x64xbf16>
    %cst_109 = arith.constant dense<0.000000e+00> : vector<16x16xf32>
    %197 = tpu.matmul %195, %196, %cst_109 {dimension_numbers = #tpu.dot_dimension_numbers<[1], [1], [0], [0], [0, 0, 1, 0], [], []>} : vector<16x64xbf16>, vector<16x64xbf16>, vector<16x16xf32> -> vector<16x16xf32>
    %cst_110 = arith.constant 1.250000e-01 : f32
    %198 = vector.broadcast %cst_110 : f32 to vector<16x16xf32>
    %199 = arith.mulf %197, %198 : vector<16x16xf32>
    %c0_111 = arith.constant 0 : index
    %c0_112 = arith.constant 0 : index
    %200 = vector.load %arg3[%c0_111, %c0_112] : memref<16x16xf32, #tpu.memory_space<vmem>>, vector<16x16xf32>
    %201 = arith.addf %199, %200 : vector<16x16xf32>
    %cst_113 = arith.constant dense<0xFF800000> : vector<16xf32>
    %202 = vector.multi_reduction <maximumf>, %201, %cst_113 [1] : vector<16x16xf32> to vector<16xf32>
    %203 = vector.shape_cast %202 : vector<16xf32> to vector<16x1xf32>
    %204 = vector.broadcast %203 : vector<16x1xf32> to vector<16x16xf32>
    %205 = arith.subf %201, %204 : vector<16x16xf32>
    %206 = math.exp %205 : vector<16x16xf32>
    %cst_114 = arith.constant dense<0.000000e+00> : vector<16xf32>
    %207 = vector.multi_reduction <add>, %206, %cst_114 [1] : vector<16x16xf32> to vector<16xf32>
    %208 = vector.shape_cast %207 : vector<16xf32> to vector<16x1xf32>
    %209 = tpu.reciprocal %208 {approx = true} : vector<16x1xf32> -> vector<16x1xf32>
    %210 = vector.broadcast %209 : vector<16x1xf32> to vector<16x16xf32>
    %211 = arith.mulf %206, %210 : vector<16x16xf32>
    %212 = arith.truncf %211 : vector<16x16xf32> to vector<16x16xbf16>
    %213 = arith.truncf %194 : vector<16x64xf32> to vector<16x64xbf16>
    %cst_115 = arith.constant dense<0.000000e+00> : vector<16x64xf32>
    %214 = tpu.matmul %212, %213, %cst_115 {dimension_numbers = #tpu.dot_dimension_numbers<[1], [0], [0], [1], [0, 0, 1, 1], [], []>} : vector<16x16xbf16>, vector<16x64xbf16>, vector<16x64xf32> -> vector<16x64xf32>
    %c1_116 = arith.constant 1 : index
    %c0_117 = arith.constant 0 : index
    %c0_118 = arith.constant 0 : index
    %215 = vector.load %arg7[%c1_116, %c0_117, %c0_118] : memref<4x64x64xbf16, #tpu.memory_space<vmem>>, vector<1x64x64xbf16>
    %216 = vector.shape_cast %215 : vector<1x64x64xbf16> to vector<64x64xbf16>
    %c1_119 = arith.constant 1 : index
    %c0_120 = arith.constant 0 : index
    %c0_121 = arith.constant 0 : index
    %217 = vector.load %arg8[%c1_119, %c0_120, %c0_121] : memref<4x1x64xf32, #tpu.memory_space<vmem>>, vector<1x1x64xf32>
    %218 = vector.shape_cast %217 : vector<1x1x64xf32> to vector<1x64xf32>
    %219 = arith.truncf %214 : vector<16x64xf32> to vector<16x64xbf16>
    %cst_122 = arith.constant dense<0.000000e+00> : vector<16x64xf32>
    %220 = tpu.matmul %219, %216, %cst_122 {dimension_numbers = #tpu.dot_dimension_numbers<[1], [0], [0], [1], [0, 0, 1, 1], [], []>} : vector<16x64xbf16>, vector<64x64xbf16>, vector<16x64xf32> -> vector<16x64xf32>
    %221 = vector.broadcast %218 : vector<1x64xf32> to vector<16x64xf32>
    %222 = arith.addf %220, %221 : vector<16x64xf32>
    %223 = arith.addf %183, %222 : vector<16x64xf32>
    %c1_123 = arith.constant 1 : index
    %c0_124 = arith.constant 0 : index
    %c0_125 = arith.constant 0 : index
    %224 = vector.load %arg15[%c1_123, %c0_124, %c0_125] : memref<4x1x64xf32, #tpu.memory_space<vmem>>, vector<1x1x64xf32>
    %225 = vector.shape_cast %224 : vector<1x1x64xf32> to vector<1x64xf32>
    %c1_126 = arith.constant 1 : index
    %c0_127 = arith.constant 0 : index
    %c0_128 = arith.constant 0 : index
    %226 = vector.load %arg16[%c1_126, %c0_127, %c0_128] : memref<4x1x64xf32, #tpu.memory_space<vmem>>, vector<1x1x64xf32>
    %227 = vector.shape_cast %226 : vector<1x1x64xf32> to vector<1x64xf32>
    %cst_129 = arith.constant dense<0.000000e+00> : vector<16xf32>
    %228 = vector.multi_reduction <add>, %223, %cst_129 [1] : vector<16x64xf32> to vector<16xf32>
    %229 = vector.shape_cast %228 : vector<16xf32> to vector<16x1xf32>
    %cst_130 = arith.constant 6.400000e+01 : f32
    %230 = vector.broadcast %cst_130 : f32 to vector<16x1xf32>
    %231 = arith.divf %229, %230 : vector<16x1xf32>
    %232 = vector.broadcast %231 : vector<16x1xf32> to vector<16x64xf32>
    %233 = arith.subf %223, %232 : vector<16x64xf32>
    %234 = arith.mulf %233, %233 : vector<16x64xf32>
    %cst_131 = arith.constant dense<0.000000e+00> : vector<16xf32>
    %235 = vector.multi_reduction <add>, %234, %cst_131 [1] : vector<16x64xf32> to vector<16xf32>
    %236 = vector.shape_cast %235 : vector<16xf32> to vector<16x1xf32>
    %cst_132 = arith.constant 6.400000e+01 : f32
    %237 = vector.broadcast %cst_132 : f32 to vector<16x1xf32>
    %238 = arith.divf %236, %237 : vector<16x1xf32>
    %cst_133 = arith.constant 9.99999974E-6 : f32
    %239 = vector.broadcast %cst_133 : f32 to vector<16x1xf32>
    %240 = arith.addf %238, %239 : vector<16x1xf32>
    %241 = math.rsqrt %240 : vector<16x1xf32>
    %242 = vector.broadcast %241 : vector<16x1xf32> to vector<16x64xf32>
    %243 = arith.mulf %233, %242 : vector<16x64xf32>
    %244 = vector.broadcast %225 : vector<1x64xf32> to vector<16x64xf32>
    %245 = arith.mulf %243, %244 : vector<16x64xf32>
    %246 = vector.broadcast %227 : vector<1x64xf32> to vector<16x64xf32>
    %247 = arith.addf %245, %246 : vector<16x64xf32>
    %c1_134 = arith.constant 1 : index
    %c0_135 = arith.constant 0 : index
    %c0_136 = arith.constant 0 : index
    %248 = vector.load %arg9[%c1_134, %c0_135, %c0_136] : memref<4x64x64xbf16, #tpu.memory_space<vmem>>, vector<1x64x64xbf16>
    %249 = vector.shape_cast %248 : vector<1x64x64xbf16> to vector<64x64xbf16>
    %c1_137 = arith.constant 1 : index
    %c0_138 = arith.constant 0 : index
    %c0_139 = arith.constant 0 : index
    %250 = vector.load %arg10[%c1_137, %c0_138, %c0_139] : memref<4x1x64xf32, #tpu.memory_space<vmem>>, vector<1x1x64xf32>
    %251 = vector.shape_cast %250 : vector<1x1x64xf32> to vector<1x64xf32>
    %252 = arith.truncf %247 : vector<16x64xf32> to vector<16x64xbf16>
    %cst_140 = arith.constant dense<0.000000e+00> : vector<16x64xf32>
    %253 = tpu.matmul %252, %249, %cst_140 {dimension_numbers = #tpu.dot_dimension_numbers<[1], [0], [0], [1], [0, 0, 1, 1], [], []>} : vector<16x64xbf16>, vector<64x64xbf16>, vector<16x64xf32> -> vector<16x64xf32>
    %254 = vector.broadcast %251 : vector<1x64xf32> to vector<16x64xf32>
    %255 = arith.addf %253, %254 : vector<16x64xf32>
    %c1_141 = arith.constant 1 : index
    %c0_142 = arith.constant 0 : index
    %c0_143 = arith.constant 0 : index
    %256 = vector.load %arg11[%c1_141, %c0_142, %c0_143] : memref<4x64x128xbf16, #tpu.memory_space<vmem>>, vector<1x64x128xbf16>
    %257 = vector.shape_cast %256 : vector<1x64x128xbf16> to vector<64x128xbf16>
    %cst_144 = arith.constant dense<0.000000e+00> : vector<16x128xf32>
    %258 = tpu.matmul %6, %257, %cst_144 {dimension_numbers = #tpu.dot_dimension_numbers<[1], [0], [0], [1], [0, 0, 1, 1], [], []>} : vector<16x64xbf16>, vector<64x128xbf16>, vector<16x128xf32> -> vector<16x128xf32>
    %c1_145 = arith.constant 1 : index
    %c0_146 = arith.constant 0 : index
    %c0_147 = arith.constant 0 : index
    %259 = vector.load %arg12[%c1_145, %c0_146, %c0_147] : memref<4x1x128xf32, #tpu.memory_space<vmem>>, vector<1x1x128xf32>
    %260 = vector.shape_cast %259 : vector<1x1x128xf32> to vector<1x128xf32>
    %261 = vector.broadcast %260 : vector<1x128xf32> to vector<16x128xf32>
    %262 = arith.addf %258, %261 : vector<16x128xf32>
    %263 = vector.extract_strided_slice %262 {offsets = [0, 0], sizes = [16, 64], strides = [1, 1]} : vector<16x128xf32> to vector<16x64xf32>
    %264 = vector.extract_strided_slice %262 {offsets = [0, 64], sizes = [16, 64], strides = [1, 1]} : vector<16x128xf32> to vector<16x64xf32>
    %265 = arith.truncf %255 : vector<16x64xf32> to vector<16x64xbf16>
    %266 = arith.truncf %263 : vector<16x64xf32> to vector<16x64xbf16>
    %cst_148 = arith.constant dense<0.000000e+00> : vector<16x16xf32>
    %267 = tpu.matmul %265, %266, %cst_148 {dimension_numbers = #tpu.dot_dimension_numbers<[1], [1], [0], [0], [0, 0, 1, 0], [], []>} : vector<16x64xbf16>, vector<16x64xbf16>, vector<16x16xf32> -> vector<16x16xf32>
    %cst_149 = arith.constant 1.250000e-01 : f32
    %268 = vector.broadcast %cst_149 : f32 to vector<16x16xf32>
    %269 = arith.mulf %267, %268 : vector<16x16xf32>
    %c0_150 = arith.constant 0 : index
    %c0_151 = arith.constant 0 : index
    %270 = vector.load %arg3[%c0_150, %c0_151] : memref<16x16xf32, #tpu.memory_space<vmem>>, vector<16x16xf32>
    %271 = arith.addf %269, %270 : vector<16x16xf32>
    %cst_152 = arith.constant dense<0xFF800000> : vector<16xf32>
    %272 = vector.multi_reduction <maximumf>, %271, %cst_152 [1] : vector<16x16xf32> to vector<16xf32>
    %273 = vector.shape_cast %272 : vector<16xf32> to vector<16x1xf32>
    %274 = vector.broadcast %273 : vector<16x1xf32> to vector<16x16xf32>
    %275 = arith.subf %271, %274 : vector<16x16xf32>
    %276 = math.exp %275 : vector<16x16xf32>
    %cst_153 = arith.constant dense<0.000000e+00> : vector<16xf32>
    %277 = vector.multi_reduction <add>, %276, %cst_153 [1] : vector<16x16xf32> to vector<16xf32>
    %278 = vector.shape_cast %277 : vector<16xf32> to vector<16x1xf32>
    %279 = tpu.reciprocal %278 {approx = true} : vector<16x1xf32> -> vector<16x1xf32>
    %280 = vector.broadcast %279 : vector<16x1xf32> to vector<16x16xf32>
    %281 = arith.mulf %276, %280 : vector<16x16xf32>
    %282 = arith.truncf %281 : vector<16x16xf32> to vector<16x16xbf16>
    %283 = arith.truncf %264 : vector<16x64xf32> to vector<16x64xbf16>
    %cst_154 = arith.constant dense<0.000000e+00> : vector<16x64xf32>
    %284 = tpu.matmul %282, %283, %cst_154 {dimension_numbers = #tpu.dot_dimension_numbers<[1], [0], [0], [1], [0, 0, 1, 1], [], []>} : vector<16x16xbf16>, vector<16x64xbf16>, vector<16x64xf32> -> vector<16x64xf32>
    %c1_155 = arith.constant 1 : index
    %c0_156 = arith.constant 0 : index
    %c0_157 = arith.constant 0 : index
    %285 = vector.load %arg13[%c1_155, %c0_156, %c0_157] : memref<4x64x64xbf16, #tpu.memory_space<vmem>>, vector<1x64x64xbf16>
    %286 = vector.shape_cast %285 : vector<1x64x64xbf16> to vector<64x64xbf16>
    %c1_158 = arith.constant 1 : index
    %c0_159 = arith.constant 0 : index
    %c0_160 = arith.constant 0 : index
    %287 = vector.load %arg14[%c1_158, %c0_159, %c0_160] : memref<4x1x64xf32, #tpu.memory_space<vmem>>, vector<1x1x64xf32>
    %288 = vector.shape_cast %287 : vector<1x1x64xf32> to vector<1x64xf32>
    %289 = arith.truncf %284 : vector<16x64xf32> to vector<16x64xbf16>
    %cst_161 = arith.constant dense<0.000000e+00> : vector<16x64xf32>
    %290 = tpu.matmul %289, %286, %cst_161 {dimension_numbers = #tpu.dot_dimension_numbers<[1], [0], [0], [1], [0, 0, 1, 1], [], []>} : vector<16x64xbf16>, vector<64x64xbf16>, vector<16x64xf32> -> vector<16x64xf32>
    %291 = vector.broadcast %288 : vector<1x64xf32> to vector<16x64xf32>
    %292 = arith.addf %290, %291 : vector<16x64xf32>
    %293 = arith.addf %247, %292 : vector<16x64xf32>
    %c1_162 = arith.constant 1 : index
    %c0_163 = arith.constant 0 : index
    %c0_164 = arith.constant 0 : index
    %294 = vector.load %arg17[%c1_162, %c0_163, %c0_164] : memref<4x1x64xf32, #tpu.memory_space<vmem>>, vector<1x1x64xf32>
    %295 = vector.shape_cast %294 : vector<1x1x64xf32> to vector<1x64xf32>
    %c1_165 = arith.constant 1 : index
    %c0_166 = arith.constant 0 : index
    %c0_167 = arith.constant 0 : index
    %296 = vector.load %arg18[%c1_165, %c0_166, %c0_167] : memref<4x1x64xf32, #tpu.memory_space<vmem>>, vector<1x1x64xf32>
    %297 = vector.shape_cast %296 : vector<1x1x64xf32> to vector<1x64xf32>
    %cst_168 = arith.constant dense<0.000000e+00> : vector<16xf32>
    %298 = vector.multi_reduction <add>, %293, %cst_168 [1] : vector<16x64xf32> to vector<16xf32>
    %299 = vector.shape_cast %298 : vector<16xf32> to vector<16x1xf32>
    %cst_169 = arith.constant 6.400000e+01 : f32
    %300 = vector.broadcast %cst_169 : f32 to vector<16x1xf32>
    %301 = arith.divf %299, %300 : vector<16x1xf32>
    %302 = vector.broadcast %301 : vector<16x1xf32> to vector<16x64xf32>
    %303 = arith.subf %293, %302 : vector<16x64xf32>
    %304 = arith.mulf %303, %303 : vector<16x64xf32>
    %cst_170 = arith.constant dense<0.000000e+00> : vector<16xf32>
    %305 = vector.multi_reduction <add>, %304, %cst_170 [1] : vector<16x64xf32> to vector<16xf32>
    %306 = vector.shape_cast %305 : vector<16xf32> to vector<16x1xf32>
    %cst_171 = arith.constant 6.400000e+01 : f32
    %307 = vector.broadcast %cst_171 : f32 to vector<16x1xf32>
    %308 = arith.divf %306, %307 : vector<16x1xf32>
    %cst_172 = arith.constant 9.99999974E-6 : f32
    %309 = vector.broadcast %cst_172 : f32 to vector<16x1xf32>
    %310 = arith.addf %308, %309 : vector<16x1xf32>
    %311 = math.rsqrt %310 : vector<16x1xf32>
    %312 = vector.broadcast %311 : vector<16x1xf32> to vector<16x64xf32>
    %313 = arith.mulf %303, %312 : vector<16x64xf32>
    %314 = vector.broadcast %295 : vector<1x64xf32> to vector<16x64xf32>
    %315 = arith.mulf %313, %314 : vector<16x64xf32>
    %316 = vector.broadcast %297 : vector<1x64xf32> to vector<16x64xf32>
    %317 = arith.addf %315, %316 : vector<16x64xf32>
    %c1_173 = arith.constant 1 : index
    %c0_174 = arith.constant 0 : index
    %c0_175 = arith.constant 0 : index
    %318 = vector.load %arg21[%c1_173, %c0_174, %c0_175] : memref<4x64x2048xbf16, #tpu.memory_space<vmem>>, vector<1x64x2048xbf16>
    %319 = vector.shape_cast %318 : vector<1x64x2048xbf16> to vector<64x2048xbf16>
    %c1_176 = arith.constant 1 : index
    %c0_177 = arith.constant 0 : index
    %c0_178 = arith.constant 0 : index
    %320 = vector.load %arg22[%c1_176, %c0_177, %c0_178] : memref<4x1x2048xf32, #tpu.memory_space<vmem>>, vector<1x1x2048xf32>
    %321 = vector.shape_cast %320 : vector<1x1x2048xf32> to vector<1x2048xf32>
    %322 = arith.truncf %317 : vector<16x64xf32> to vector<16x64xbf16>
    %cst_179 = arith.constant dense<0.000000e+00> : vector<16x2048xf32>
    %323 = tpu.matmul %322, %319, %cst_179 {dimension_numbers = #tpu.dot_dimension_numbers<[1], [0], [0], [1], [0, 0, 1, 1], [], []>} : vector<16x64xbf16>, vector<64x2048xbf16>, vector<16x2048xf32> -> vector<16x2048xf32>
    %324 = vector.broadcast %321 : vector<1x2048xf32> to vector<16x2048xf32>
    %325 = arith.addf %323, %324 : vector<16x2048xf32>
    %cst_180 = arith.constant 0.000000e+00 : f32
    %326 = vector.broadcast %cst_180 : f32 to vector<16x2048xf32>
    %327 = arith.maximumf %325, %326 : vector<16x2048xf32>
    %328 = arith.truncf %327 : vector<16x2048xf32> to vector<16x2048xbf16>
    %c1_181 = arith.constant 1 : index
    %c0_182 = arith.constant 0 : index
    %c0_183 = arith.constant 0 : index
    %329 = vector.load %arg23[%c1_181, %c0_182, %c0_183] : memref<4x2048x64xbf16, #tpu.memory_space<vmem>>, vector<1x2048x64xbf16>
    %330 = vector.shape_cast %329 : vector<1x2048x64xbf16> to vector<2048x64xbf16>
    %cst_184 = arith.constant dense<0.000000e+00> : vector<16x64xf32>
    %331 = tpu.matmul %328, %330, %cst_184 {dimension_numbers = #tpu.dot_dimension_numbers<[1], [0], [0], [1], [0, 0, 1, 1], [], []>} : vector<16x2048xbf16>, vector<2048x64xbf16>, vector<16x64xf32> -> vector<16x64xf32>
    %c1_185 = arith.constant 1 : index
    %c0_186 = arith.constant 0 : index
    %c0_187 = arith.constant 0 : index
    %332 = vector.load %arg24[%c1_185, %c0_186, %c0_187] : memref<4x1x64xf32, #tpu.memory_space<vmem>>, vector<1x1x64xf32>
    %333 = vector.shape_cast %332 : vector<1x1x64xf32> to vector<1x64xf32>
    %334 = vector.broadcast %333 : vector<1x64xf32> to vector<16x64xf32>
    %335 = arith.addf %331, %334 : vector<16x64xf32>
    %336 = arith.addf %317, %335 : vector<16x64xf32>
    %c1_188 = arith.constant 1 : index
    %c0_189 = arith.constant 0 : index
    %c0_190 = arith.constant 0 : index
    %337 = vector.load %arg19[%c1_188, %c0_189, %c0_190] : memref<4x1x64xf32, #tpu.memory_space<vmem>>, vector<1x1x64xf32>
    %338 = vector.shape_cast %337 : vector<1x1x64xf32> to vector<1x64xf32>
    %c1_191 = arith.constant 1 : index
    %c0_192 = arith.constant 0 : index
    %c0_193 = arith.constant 0 : index
    %339 = vector.load %arg20[%c1_191, %c0_192, %c0_193] : memref<4x1x64xf32, #tpu.memory_space<vmem>>, vector<1x1x64xf32>
    %340 = vector.shape_cast %339 : vector<1x1x64xf32> to vector<1x64xf32>
    %cst_194 = arith.constant dense<0.000000e+00> : vector<16xf32>
    %341 = vector.multi_reduction <add>, %336, %cst_194 [1] : vector<16x64xf32> to vector<16xf32>
    %342 = vector.shape_cast %341 : vector<16xf32> to vector<16x1xf32>
    %cst_195 = arith.constant 6.400000e+01 : f32
    %343 = vector.broadcast %cst_195 : f32 to vector<16x1xf32>
    %344 = arith.divf %342, %343 : vector<16x1xf32>
    %345 = vector.broadcast %344 : vector<16x1xf32> to vector<16x64xf32>
    %346 = arith.subf %336, %345 : vector<16x64xf32>
    %347 = arith.mulf %346, %346 : vector<16x64xf32>
    %cst_196 = arith.constant dense<0.000000e+00> : vector<16xf32>
    %348 = vector.multi_reduction <add>, %347, %cst_196 [1] : vector<16x64xf32> to vector<16xf32>
    %349 = vector.shape_cast %348 : vector<16xf32> to vector<16x1xf32>
    %cst_197 = arith.constant 6.400000e+01 : f32
    %350 = vector.broadcast %cst_197 : f32 to vector<16x1xf32>
    %351 = arith.divf %349, %350 : vector<16x1xf32>
    %cst_198 = arith.constant 9.99999974E-6 : f32
    %352 = vector.broadcast %cst_198 : f32 to vector<16x1xf32>
    %353 = arith.addf %351, %352 : vector<16x1xf32>
    %354 = math.rsqrt %353 : vector<16x1xf32>
    %355 = vector.broadcast %354 : vector<16x1xf32> to vector<16x64xf32>
    %356 = arith.mulf %346, %355 : vector<16x64xf32>
    %357 = vector.broadcast %338 : vector<1x64xf32> to vector<16x64xf32>
    %358 = arith.mulf %356, %357 : vector<16x64xf32>
    %359 = vector.broadcast %340 : vector<1x64xf32> to vector<16x64xf32>
    %360 = arith.addf %358, %359 : vector<16x64xf32>
    %c2 = arith.constant 2 : index
    %c0_199 = arith.constant 0 : index
    %c0_200 = arith.constant 0 : index
    %361 = vector.load %arg5[%c2, %c0_199, %c0_200] : memref<4x64x192xbf16, #tpu.memory_space<vmem>>, vector<1x64x192xbf16>
    %362 = vector.shape_cast %361 : vector<1x64x192xbf16> to vector<64x192xbf16>
    %c2_201 = arith.constant 2 : index
    %c0_202 = arith.constant 0 : index
    %c0_203 = arith.constant 0 : index
    %363 = vector.load %arg6[%c2_201, %c0_202, %c0_203] : memref<4x1x192xf32, #tpu.memory_space<vmem>>, vector<1x1x192xf32>
    %364 = vector.shape_cast %363 : vector<1x1x192xf32> to vector<1x192xf32>
    %365 = arith.truncf %360 : vector<16x64xf32> to vector<16x64xbf16>
    %cst_204 = arith.constant dense<0.000000e+00> : vector<16x192xf32>
    %366 = tpu.matmul %365, %362, %cst_204 {dimension_numbers = #tpu.dot_dimension_numbers<[1], [0], [0], [1], [0, 0, 1, 1], [], []>} : vector<16x64xbf16>, vector<64x192xbf16>, vector<16x192xf32> -> vector<16x192xf32>
    %367 = vector.broadcast %364 : vector<1x192xf32> to vector<16x192xf32>
    %368 = arith.addf %366, %367 : vector<16x192xf32>
    %369 = vector.extract_strided_slice %368 {offsets = [0, 0], sizes = [16, 64], strides = [1, 1]} : vector<16x192xf32> to vector<16x64xf32>
    %370 = vector.extract_strided_slice %368 {offsets = [0, 64], sizes = [16, 64], strides = [1, 1]} : vector<16x192xf32> to vector<16x64xf32>
    %371 = vector.extract_strided_slice %368 {offsets = [0, 128], sizes = [16, 64], strides = [1, 1]} : vector<16x192xf32> to vector<16x64xf32>
    %372 = arith.truncf %369 : vector<16x64xf32> to vector<16x64xbf16>
    %373 = arith.truncf %370 : vector<16x64xf32> to vector<16x64xbf16>
    %cst_205 = arith.constant dense<0.000000e+00> : vector<16x16xf32>
    %374 = tpu.matmul %372, %373, %cst_205 {dimension_numbers = #tpu.dot_dimension_numbers<[1], [1], [0], [0], [0, 0, 1, 0], [], []>} : vector<16x64xbf16>, vector<16x64xbf16>, vector<16x16xf32> -> vector<16x16xf32>
    %cst_206 = arith.constant 1.250000e-01 : f32
    %375 = vector.broadcast %cst_206 : f32 to vector<16x16xf32>
    %376 = arith.mulf %374, %375 : vector<16x16xf32>
    %c0_207 = arith.constant 0 : index
    %c0_208 = arith.constant 0 : index
    %377 = vector.load %arg3[%c0_207, %c0_208] : memref<16x16xf32, #tpu.memory_space<vmem>>, vector<16x16xf32>
    %378 = arith.addf %376, %377 : vector<16x16xf32>
    %cst_209 = arith.constant dense<0xFF800000> : vector<16xf32>
    %379 = vector.multi_reduction <maximumf>, %378, %cst_209 [1] : vector<16x16xf32> to vector<16xf32>
    %380 = vector.shape_cast %379 : vector<16xf32> to vector<16x1xf32>
    %381 = vector.broadcast %380 : vector<16x1xf32> to vector<16x16xf32>
    %382 = arith.subf %378, %381 : vector<16x16xf32>
    %383 = math.exp %382 : vector<16x16xf32>
    %cst_210 = arith.constant dense<0.000000e+00> : vector<16xf32>
    %384 = vector.multi_reduction <add>, %383, %cst_210 [1] : vector<16x16xf32> to vector<16xf32>
    %385 = vector.shape_cast %384 : vector<16xf32> to vector<16x1xf32>
    %386 = tpu.reciprocal %385 {approx = true} : vector<16x1xf32> -> vector<16x1xf32>
    %387 = vector.broadcast %386 : vector<16x1xf32> to vector<16x16xf32>
    %388 = arith.mulf %383, %387 : vector<16x16xf32>
    %389 = arith.truncf %388 : vector<16x16xf32> to vector<16x16xbf16>
    %390 = arith.truncf %371 : vector<16x64xf32> to vector<16x64xbf16>
    %cst_211 = arith.constant dense<0.000000e+00> : vector<16x64xf32>
    %391 = tpu.matmul %389, %390, %cst_211 {dimension_numbers = #tpu.dot_dimension_numbers<[1], [0], [0], [1], [0, 0, 1, 1], [], []>} : vector<16x16xbf16>, vector<16x64xbf16>, vector<16x64xf32> -> vector<16x64xf32>
    %c2_212 = arith.constant 2 : index
    %c0_213 = arith.constant 0 : index
    %c0_214 = arith.constant 0 : index
    %392 = vector.load %arg7[%c2_212, %c0_213, %c0_214] : memref<4x64x64xbf16, #tpu.memory_space<vmem>>, vector<1x64x64xbf16>
    %393 = vector.shape_cast %392 : vector<1x64x64xbf16> to vector<64x64xbf16>
    %c2_215 = arith.constant 2 : index
    %c0_216 = arith.constant 0 : index
    %c0_217 = arith.constant 0 : index
    %394 = vector.load %arg8[%c2_215, %c0_216, %c0_217] : memref<4x1x64xf32, #tpu.memory_space<vmem>>, vector<1x1x64xf32>
    %395 = vector.shape_cast %394 : vector<1x1x64xf32> to vector<1x64xf32>
    %396 = arith.truncf %391 : vector<16x64xf32> to vector<16x64xbf16>
    %cst_218 = arith.constant dense<0.000000e+00> : vector<16x64xf32>
    %397 = tpu.matmul %396, %393, %cst_218 {dimension_numbers = #tpu.dot_dimension_numbers<[1], [0], [0], [1], [0, 0, 1, 1], [], []>} : vector<16x64xbf16>, vector<64x64xbf16>, vector<16x64xf32> -> vector<16x64xf32>
    %398 = vector.broadcast %395 : vector<1x64xf32> to vector<16x64xf32>
    %399 = arith.addf %397, %398 : vector<16x64xf32>
    %400 = arith.addf %360, %399 : vector<16x64xf32>
    %c2_219 = arith.constant 2 : index
    %c0_220 = arith.constant 0 : index
    %c0_221 = arith.constant 0 : index
    %401 = vector.load %arg15[%c2_219, %c0_220, %c0_221] : memref<4x1x64xf32, #tpu.memory_space<vmem>>, vector<1x1x64xf32>
    %402 = vector.shape_cast %401 : vector<1x1x64xf32> to vector<1x64xf32>
    %c2_222 = arith.constant 2 : index
    %c0_223 = arith.constant 0 : index
    %c0_224 = arith.constant 0 : index
    %403 = vector.load %arg16[%c2_222, %c0_223, %c0_224] : memref<4x1x64xf32, #tpu.memory_space<vmem>>, vector<1x1x64xf32>
    %404 = vector.shape_cast %403 : vector<1x1x64xf32> to vector<1x64xf32>
    %cst_225 = arith.constant dense<0.000000e+00> : vector<16xf32>
    %405 = vector.multi_reduction <add>, %400, %cst_225 [1] : vector<16x64xf32> to vector<16xf32>
    %406 = vector.shape_cast %405 : vector<16xf32> to vector<16x1xf32>
    %cst_226 = arith.constant 6.400000e+01 : f32
    %407 = vector.broadcast %cst_226 : f32 to vector<16x1xf32>
    %408 = arith.divf %406, %407 : vector<16x1xf32>
    %409 = vector.broadcast %408 : vector<16x1xf32> to vector<16x64xf32>
    %410 = arith.subf %400, %409 : vector<16x64xf32>
    %411 = arith.mulf %410, %410 : vector<16x64xf32>
    %cst_227 = arith.constant dense<0.000000e+00> : vector<16xf32>
    %412 = vector.multi_reduction <add>, %411, %cst_227 [1] : vector<16x64xf32> to vector<16xf32>
    %413 = vector.shape_cast %412 : vector<16xf32> to vector<16x1xf32>
    %cst_228 = arith.constant 6.400000e+01 : f32
    %414 = vector.broadcast %cst_228 : f32 to vector<16x1xf32>
    %415 = arith.divf %413, %414 : vector<16x1xf32>
    %cst_229 = arith.constant 9.99999974E-6 : f32
    %416 = vector.broadcast %cst_229 : f32 to vector<16x1xf32>
    %417 = arith.addf %415, %416 : vector<16x1xf32>
    %418 = math.rsqrt %417 : vector<16x1xf32>
    %419 = vector.broadcast %418 : vector<16x1xf32> to vector<16x64xf32>
    %420 = arith.mulf %410, %419 : vector<16x64xf32>
    %421 = vector.broadcast %402 : vector<1x64xf32> to vector<16x64xf32>
    %422 = arith.mulf %420, %421 : vector<16x64xf32>
    %423 = vector.broadcast %404 : vector<1x64xf32> to vector<16x64xf32>
    %424 = arith.addf %422, %423 : vector<16x64xf32>
    %c2_230 = arith.constant 2 : index
    %c0_231 = arith.constant 0 : index
    %c0_232 = arith.constant 0 : index
    %425 = vector.load %arg9[%c2_230, %c0_231, %c0_232] : memref<4x64x64xbf16, #tpu.memory_space<vmem>>, vector<1x64x64xbf16>
    %426 = vector.shape_cast %425 : vector<1x64x64xbf16> to vector<64x64xbf16>
    %c2_233 = arith.constant 2 : index
    %c0_234 = arith.constant 0 : index
    %c0_235 = arith.constant 0 : index
    %427 = vector.load %arg10[%c2_233, %c0_234, %c0_235] : memref<4x1x64xf32, #tpu.memory_space<vmem>>, vector<1x1x64xf32>
    %428 = vector.shape_cast %427 : vector<1x1x64xf32> to vector<1x64xf32>
    %429 = arith.truncf %424 : vector<16x64xf32> to vector<16x64xbf16>
    %cst_236 = arith.constant dense<0.000000e+00> : vector<16x64xf32>
    %430 = tpu.matmul %429, %426, %cst_236 {dimension_numbers = #tpu.dot_dimension_numbers<[1], [0], [0], [1], [0, 0, 1, 1], [], []>} : vector<16x64xbf16>, vector<64x64xbf16>, vector<16x64xf32> -> vector<16x64xf32>
    %431 = vector.broadcast %428 : vector<1x64xf32> to vector<16x64xf32>
    %432 = arith.addf %430, %431 : vector<16x64xf32>
    %c2_237 = arith.constant 2 : index
    %c0_238 = arith.constant 0 : index
    %c0_239 = arith.constant 0 : index
    %433 = vector.load %arg11[%c2_237, %c0_238, %c0_239] : memref<4x64x128xbf16, #tpu.memory_space<vmem>>, vector<1x64x128xbf16>
    %434 = vector.shape_cast %433 : vector<1x64x128xbf16> to vector<64x128xbf16>
    %cst_240 = arith.constant dense<0.000000e+00> : vector<16x128xf32>
    %435 = tpu.matmul %6, %434, %cst_240 {dimension_numbers = #tpu.dot_dimension_numbers<[1], [0], [0], [1], [0, 0, 1, 1], [], []>} : vector<16x64xbf16>, vector<64x128xbf16>, vector<16x128xf32> -> vector<16x128xf32>
    %c2_241 = arith.constant 2 : index
    %c0_242 = arith.constant 0 : index
    %c0_243 = arith.constant 0 : index
    %436 = vector.load %arg12[%c2_241, %c0_242, %c0_243] : memref<4x1x128xf32, #tpu.memory_space<vmem>>, vector<1x1x128xf32>
    %437 = vector.shape_cast %436 : vector<1x1x128xf32> to vector<1x128xf32>
    %438 = vector.broadcast %437 : vector<1x128xf32> to vector<16x128xf32>
    %439 = arith.addf %435, %438 : vector<16x128xf32>
    %440 = vector.extract_strided_slice %439 {offsets = [0, 0], sizes = [16, 64], strides = [1, 1]} : vector<16x128xf32> to vector<16x64xf32>
    %441 = vector.extract_strided_slice %439 {offsets = [0, 64], sizes = [16, 64], strides = [1, 1]} : vector<16x128xf32> to vector<16x64xf32>
    %442 = arith.truncf %432 : vector<16x64xf32> to vector<16x64xbf16>
    %443 = arith.truncf %440 : vector<16x64xf32> to vector<16x64xbf16>
    %cst_244 = arith.constant dense<0.000000e+00> : vector<16x16xf32>
    %444 = tpu.matmul %442, %443, %cst_244 {dimension_numbers = #tpu.dot_dimension_numbers<[1], [1], [0], [0], [0, 0, 1, 0], [], []>} : vector<16x64xbf16>, vector<16x64xbf16>, vector<16x16xf32> -> vector<16x16xf32>
    %cst_245 = arith.constant 1.250000e-01 : f32
    %445 = vector.broadcast %cst_245 : f32 to vector<16x16xf32>
    %446 = arith.mulf %444, %445 : vector<16x16xf32>
    %c0_246 = arith.constant 0 : index
    %c0_247 = arith.constant 0 : index
    %447 = vector.load %arg3[%c0_246, %c0_247] : memref<16x16xf32, #tpu.memory_space<vmem>>, vector<16x16xf32>
    %448 = arith.addf %446, %447 : vector<16x16xf32>
    %cst_248 = arith.constant dense<0xFF800000> : vector<16xf32>
    %449 = vector.multi_reduction <maximumf>, %448, %cst_248 [1] : vector<16x16xf32> to vector<16xf32>
    %450 = vector.shape_cast %449 : vector<16xf32> to vector<16x1xf32>
    %451 = vector.broadcast %450 : vector<16x1xf32> to vector<16x16xf32>
    %452 = arith.subf %448, %451 : vector<16x16xf32>
    %453 = math.exp %452 : vector<16x16xf32>
    %cst_249 = arith.constant dense<0.000000e+00> : vector<16xf32>
    %454 = vector.multi_reduction <add>, %453, %cst_249 [1] : vector<16x16xf32> to vector<16xf32>
    %455 = vector.shape_cast %454 : vector<16xf32> to vector<16x1xf32>
    %456 = tpu.reciprocal %455 {approx = true} : vector<16x1xf32> -> vector<16x1xf32>
    %457 = vector.broadcast %456 : vector<16x1xf32> to vector<16x16xf32>
    %458 = arith.mulf %453, %457 : vector<16x16xf32>
    %459 = arith.truncf %458 : vector<16x16xf32> to vector<16x16xbf16>
    %460 = arith.truncf %441 : vector<16x64xf32> to vector<16x64xbf16>
    %cst_250 = arith.constant dense<0.000000e+00> : vector<16x64xf32>
    %461 = tpu.matmul %459, %460, %cst_250 {dimension_numbers = #tpu.dot_dimension_numbers<[1], [0], [0], [1], [0, 0, 1, 1], [], []>} : vector<16x16xbf16>, vector<16x64xbf16>, vector<16x64xf32> -> vector<16x64xf32>
    %c2_251 = arith.constant 2 : index
    %c0_252 = arith.constant 0 : index
    %c0_253 = arith.constant 0 : index
    %462 = vector.load %arg13[%c2_251, %c0_252, %c0_253] : memref<4x64x64xbf16, #tpu.memory_space<vmem>>, vector<1x64x64xbf16>
    %463 = vector.shape_cast %462 : vector<1x64x64xbf16> to vector<64x64xbf16>
    %c2_254 = arith.constant 2 : index
    %c0_255 = arith.constant 0 : index
    %c0_256 = arith.constant 0 : index
    %464 = vector.load %arg14[%c2_254, %c0_255, %c0_256] : memref<4x1x64xf32, #tpu.memory_space<vmem>>, vector<1x1x64xf32>
    %465 = vector.shape_cast %464 : vector<1x1x64xf32> to vector<1x64xf32>
    %466 = arith.truncf %461 : vector<16x64xf32> to vector<16x64xbf16>
    %cst_257 = arith.constant dense<0.000000e+00> : vector<16x64xf32>
    %467 = tpu.matmul %466, %463, %cst_257 {dimension_numbers = #tpu.dot_dimension_numbers<[1], [0], [0], [1], [0, 0, 1, 1], [], []>} : vector<16x64xbf16>, vector<64x64xbf16>, vector<16x64xf32> -> vector<16x64xf32>
    %468 = vector.broadcast %465 : vector<1x64xf32> to vector<16x64xf32>
    %469 = arith.addf %467, %468 : vector<16x64xf32>
    %470 = arith.addf %424, %469 : vector<16x64xf32>
    %c2_258 = arith.constant 2 : index
    %c0_259 = arith.constant 0 : index
    %c0_260 = arith.constant 0 : index
    %471 = vector.load %arg17[%c2_258, %c0_259, %c0_260] : memref<4x1x64xf32, #tpu.memory_space<vmem>>, vector<1x1x64xf32>
    %472 = vector.shape_cast %471 : vector<1x1x64xf32> to vector<1x64xf32>
    %c2_261 = arith.constant 2 : index
    %c0_262 = arith.constant 0 : index
    %c0_263 = arith.constant 0 : index
    %473 = vector.load %arg18[%c2_261, %c0_262, %c0_263] : memref<4x1x64xf32, #tpu.memory_space<vmem>>, vector<1x1x64xf32>
    %474 = vector.shape_cast %473 : vector<1x1x64xf32> to vector<1x64xf32>
    %cst_264 = arith.constant dense<0.000000e+00> : vector<16xf32>
    %475 = vector.multi_reduction <add>, %470, %cst_264 [1] : vector<16x64xf32> to vector<16xf32>
    %476 = vector.shape_cast %475 : vector<16xf32> to vector<16x1xf32>
    %cst_265 = arith.constant 6.400000e+01 : f32
    %477 = vector.broadcast %cst_265 : f32 to vector<16x1xf32>
    %478 = arith.divf %476, %477 : vector<16x1xf32>
    %479 = vector.broadcast %478 : vector<16x1xf32> to vector<16x64xf32>
    %480 = arith.subf %470, %479 : vector<16x64xf32>
    %481 = arith.mulf %480, %480 : vector<16x64xf32>
    %cst_266 = arith.constant dense<0.000000e+00> : vector<16xf32>
    %482 = vector.multi_reduction <add>, %481, %cst_266 [1] : vector<16x64xf32> to vector<16xf32>
    %483 = vector.shape_cast %482 : vector<16xf32> to vector<16x1xf32>
    %cst_267 = arith.constant 6.400000e+01 : f32
    %484 = vector.broadcast %cst_267 : f32 to vector<16x1xf32>
    %485 = arith.divf %483, %484 : vector<16x1xf32>
    %cst_268 = arith.constant 9.99999974E-6 : f32
    %486 = vector.broadcast %cst_268 : f32 to vector<16x1xf32>
    %487 = arith.addf %485, %486 : vector<16x1xf32>
    %488 = math.rsqrt %487 : vector<16x1xf32>
    %489 = vector.broadcast %488 : vector<16x1xf32> to vector<16x64xf32>
    %490 = arith.mulf %480, %489 : vector<16x64xf32>
    %491 = vector.broadcast %472 : vector<1x64xf32> to vector<16x64xf32>
    %492 = arith.mulf %490, %491 : vector<16x64xf32>
    %493 = vector.broadcast %474 : vector<1x64xf32> to vector<16x64xf32>
    %494 = arith.addf %492, %493 : vector<16x64xf32>
    %c2_269 = arith.constant 2 : index
    %c0_270 = arith.constant 0 : index
    %c0_271 = arith.constant 0 : index
    %495 = vector.load %arg21[%c2_269, %c0_270, %c0_271] : memref<4x64x2048xbf16, #tpu.memory_space<vmem>>, vector<1x64x2048xbf16>
    %496 = vector.shape_cast %495 : vector<1x64x2048xbf16> to vector<64x2048xbf16>
    %c2_272 = arith.constant 2 : index
    %c0_273 = arith.constant 0 : index
    %c0_274 = arith.constant 0 : index
    %497 = vector.load %arg22[%c2_272, %c0_273, %c0_274] : memref<4x1x2048xf32, #tpu.memory_space<vmem>>, vector<1x1x2048xf32>
    %498 = vector.shape_cast %497 : vector<1x1x2048xf32> to vector<1x2048xf32>
    %499 = arith.truncf %494 : vector<16x64xf32> to vector<16x64xbf16>
    %cst_275 = arith.constant dense<0.000000e+00> : vector<16x2048xf32>
    %500 = tpu.matmul %499, %496, %cst_275 {dimension_numbers = #tpu.dot_dimension_numbers<[1], [0], [0], [1], [0, 0, 1, 1], [], []>} : vector<16x64xbf16>, vector<64x2048xbf16>, vector<16x2048xf32> -> vector<16x2048xf32>
    %501 = vector.broadcast %498 : vector<1x2048xf32> to vector<16x2048xf32>
    %502 = arith.addf %500, %501 : vector<16x2048xf32>
    %cst_276 = arith.constant 0.000000e+00 : f32
    %503 = vector.broadcast %cst_276 : f32 to vector<16x2048xf32>
    %504 = arith.maximumf %502, %503 : vector<16x2048xf32>
    %505 = arith.truncf %504 : vector<16x2048xf32> to vector<16x2048xbf16>
    %c2_277 = arith.constant 2 : index
    %c0_278 = arith.constant 0 : index
    %c0_279 = arith.constant 0 : index
    %506 = vector.load %arg23[%c2_277, %c0_278, %c0_279] : memref<4x2048x64xbf16, #tpu.memory_space<vmem>>, vector<1x2048x64xbf16>
    %507 = vector.shape_cast %506 : vector<1x2048x64xbf16> to vector<2048x64xbf16>
    %cst_280 = arith.constant dense<0.000000e+00> : vector<16x64xf32>
    %508 = tpu.matmul %505, %507, %cst_280 {dimension_numbers = #tpu.dot_dimension_numbers<[1], [0], [0], [1], [0, 0, 1, 1], [], []>} : vector<16x2048xbf16>, vector<2048x64xbf16>, vector<16x64xf32> -> vector<16x64xf32>
    %c2_281 = arith.constant 2 : index
    %c0_282 = arith.constant 0 : index
    %c0_283 = arith.constant 0 : index
    %509 = vector.load %arg24[%c2_281, %c0_282, %c0_283] : memref<4x1x64xf32, #tpu.memory_space<vmem>>, vector<1x1x64xf32>
    %510 = vector.shape_cast %509 : vector<1x1x64xf32> to vector<1x64xf32>
    %511 = vector.broadcast %510 : vector<1x64xf32> to vector<16x64xf32>
    %512 = arith.addf %508, %511 : vector<16x64xf32>
    %513 = arith.addf %494, %512 : vector<16x64xf32>
    %c2_284 = arith.constant 2 : index
    %c0_285 = arith.constant 0 : index
    %c0_286 = arith.constant 0 : index
    %514 = vector.load %arg19[%c2_284, %c0_285, %c0_286] : memref<4x1x64xf32, #tpu.memory_space<vmem>>, vector<1x1x64xf32>
    %515 = vector.shape_cast %514 : vector<1x1x64xf32> to vector<1x64xf32>
    %c2_287 = arith.constant 2 : index
    %c0_288 = arith.constant 0 : index
    %c0_289 = arith.constant 0 : index
    %516 = vector.load %arg20[%c2_287, %c0_288, %c0_289] : memref<4x1x64xf32, #tpu.memory_space<vmem>>, vector<1x1x64xf32>
    %517 = vector.shape_cast %516 : vector<1x1x64xf32> to vector<1x64xf32>
    %cst_290 = arith.constant dense<0.000000e+00> : vector<16xf32>
    %518 = vector.multi_reduction <add>, %513, %cst_290 [1] : vector<16x64xf32> to vector<16xf32>
    %519 = vector.shape_cast %518 : vector<16xf32> to vector<16x1xf32>
    %cst_291 = arith.constant 6.400000e+01 : f32
    %520 = vector.broadcast %cst_291 : f32 to vector<16x1xf32>
    %521 = arith.divf %519, %520 : vector<16x1xf32>
    %522 = vector.broadcast %521 : vector<16x1xf32> to vector<16x64xf32>
    %523 = arith.subf %513, %522 : vector<16x64xf32>
    %524 = arith.mulf %523, %523 : vector<16x64xf32>
    %cst_292 = arith.constant dense<0.000000e+00> : vector<16xf32>
    %525 = vector.multi_reduction <add>, %524, %cst_292 [1] : vector<16x64xf32> to vector<16xf32>
    %526 = vector.shape_cast %525 : vector<16xf32> to vector<16x1xf32>
    %cst_293 = arith.constant 6.400000e+01 : f32
    %527 = vector.broadcast %cst_293 : f32 to vector<16x1xf32>
    %528 = arith.divf %526, %527 : vector<16x1xf32>
    %cst_294 = arith.constant 9.99999974E-6 : f32
    %529 = vector.broadcast %cst_294 : f32 to vector<16x1xf32>
    %530 = arith.addf %528, %529 : vector<16x1xf32>
    %531 = math.rsqrt %530 : vector<16x1xf32>
    %532 = vector.broadcast %531 : vector<16x1xf32> to vector<16x64xf32>
    %533 = arith.mulf %523, %532 : vector<16x64xf32>
    %534 = vector.broadcast %515 : vector<1x64xf32> to vector<16x64xf32>
    %535 = arith.mulf %533, %534 : vector<16x64xf32>
    %536 = vector.broadcast %517 : vector<1x64xf32> to vector<16x64xf32>
    %537 = arith.addf %535, %536 : vector<16x64xf32>
    %c3 = arith.constant 3 : index
    %c0_295 = arith.constant 0 : index
    %c0_296 = arith.constant 0 : index
    %538 = vector.load %arg5[%c3, %c0_295, %c0_296] : memref<4x64x192xbf16, #tpu.memory_space<vmem>>, vector<1x64x192xbf16>
    %539 = vector.shape_cast %538 : vector<1x64x192xbf16> to vector<64x192xbf16>
    %c3_297 = arith.constant 3 : index
    %c0_298 = arith.constant 0 : index
    %c0_299 = arith.constant 0 : index
    %540 = vector.load %arg6[%c3_297, %c0_298, %c0_299] : memref<4x1x192xf32, #tpu.memory_space<vmem>>, vector<1x1x192xf32>
    %541 = vector.shape_cast %540 : vector<1x1x192xf32> to vector<1x192xf32>
    %542 = arith.truncf %537 : vector<16x64xf32> to vector<16x64xbf16>
    %cst_300 = arith.constant dense<0.000000e+00> : vector<16x192xf32>
    %543 = tpu.matmul %542, %539, %cst_300 {dimension_numbers = #tpu.dot_dimension_numbers<[1], [0], [0], [1], [0, 0, 1, 1], [], []>} : vector<16x64xbf16>, vector<64x192xbf16>, vector<16x192xf32> -> vector<16x192xf32>
    %544 = vector.broadcast %541 : vector<1x192xf32> to vector<16x192xf32>
    %545 = arith.addf %543, %544 : vector<16x192xf32>
    %546 = vector.extract_strided_slice %545 {offsets = [0, 0], sizes = [16, 64], strides = [1, 1]} : vector<16x192xf32> to vector<16x64xf32>
    %547 = vector.extract_strided_slice %545 {offsets = [0, 64], sizes = [16, 64], strides = [1, 1]} : vector<16x192xf32> to vector<16x64xf32>
    %548 = vector.extract_strided_slice %545 {offsets = [0, 128], sizes = [16, 64], strides = [1, 1]} : vector<16x192xf32> to vector<16x64xf32>
    %549 = arith.truncf %546 : vector<16x64xf32> to vector<16x64xbf16>
    %550 = arith.truncf %547 : vector<16x64xf32> to vector<16x64xbf16>
    %cst_301 = arith.constant dense<0.000000e+00> : vector<16x16xf32>
    %551 = tpu.matmul %549, %550, %cst_301 {dimension_numbers = #tpu.dot_dimension_numbers<[1], [1], [0], [0], [0, 0, 1, 0], [], []>} : vector<16x64xbf16>, vector<16x64xbf16>, vector<16x16xf32> -> vector<16x16xf32>
    %cst_302 = arith.constant 1.250000e-01 : f32
    %552 = vector.broadcast %cst_302 : f32 to vector<16x16xf32>
    %553 = arith.mulf %551, %552 : vector<16x16xf32>
    %c0_303 = arith.constant 0 : index
    %c0_304 = arith.constant 0 : index
    %554 = vector.load %arg3[%c0_303, %c0_304] : memref<16x16xf32, #tpu.memory_space<vmem>>, vector<16x16xf32>
    %555 = arith.addf %553, %554 : vector<16x16xf32>
    %cst_305 = arith.constant dense<0xFF800000> : vector<16xf32>
    %556 = vector.multi_reduction <maximumf>, %555, %cst_305 [1] : vector<16x16xf32> to vector<16xf32>
    %557 = vector.shape_cast %556 : vector<16xf32> to vector<16x1xf32>
    %558 = vector.broadcast %557 : vector<16x1xf32> to vector<16x16xf32>
    %559 = arith.subf %555, %558 : vector<16x16xf32>
    %560 = math.exp %559 : vector<16x16xf32>
    %cst_306 = arith.constant dense<0.000000e+00> : vector<16xf32>
    %561 = vector.multi_reduction <add>, %560, %cst_306 [1] : vector<16x16xf32> to vector<16xf32>
    %562 = vector.shape_cast %561 : vector<16xf32> to vector<16x1xf32>
    %563 = tpu.reciprocal %562 {approx = true} : vector<16x1xf32> -> vector<16x1xf32>
    %564 = vector.broadcast %563 : vector<16x1xf32> to vector<16x16xf32>
    %565 = arith.mulf %560, %564 : vector<16x16xf32>
    %566 = arith.truncf %565 : vector<16x16xf32> to vector<16x16xbf16>
    %567 = arith.truncf %548 : vector<16x64xf32> to vector<16x64xbf16>
    %cst_307 = arith.constant dense<0.000000e+00> : vector<16x64xf32>
    %568 = tpu.matmul %566, %567, %cst_307 {dimension_numbers = #tpu.dot_dimension_numbers<[1], [0], [0], [1], [0, 0, 1, 1], [], []>} : vector<16x16xbf16>, vector<16x64xbf16>, vector<16x64xf32> -> vector<16x64xf32>
    %c3_308 = arith.constant 3 : index
    %c0_309 = arith.constant 0 : index
    %c0_310 = arith.constant 0 : index
    %569 = vector.load %arg7[%c3_308, %c0_309, %c0_310] : memref<4x64x64xbf16, #tpu.memory_space<vmem>>, vector<1x64x64xbf16>
    %570 = vector.shape_cast %569 : vector<1x64x64xbf16> to vector<64x64xbf16>
    %c3_311 = arith.constant 3 : index
    %c0_312 = arith.constant 0 : index
    %c0_313 = arith.constant 0 : index
    %571 = vector.load %arg8[%c3_311, %c0_312, %c0_313] : memref<4x1x64xf32, #tpu.memory_space<vmem>>, vector<1x1x64xf32>
    %572 = vector.shape_cast %571 : vector<1x1x64xf32> to vector<1x64xf32>
    %573 = arith.truncf %568 : vector<16x64xf32> to vector<16x64xbf16>
    %cst_314 = arith.constant dense<0.000000e+00> : vector<16x64xf32>
    %574 = tpu.matmul %573, %570, %cst_314 {dimension_numbers = #tpu.dot_dimension_numbers<[1], [0], [0], [1], [0, 0, 1, 1], [], []>} : vector<16x64xbf16>, vector<64x64xbf16>, vector<16x64xf32> -> vector<16x64xf32>
    %575 = vector.broadcast %572 : vector<1x64xf32> to vector<16x64xf32>
    %576 = arith.addf %574, %575 : vector<16x64xf32>
    %577 = arith.addf %537, %576 : vector<16x64xf32>
    %c3_315 = arith.constant 3 : index
    %c0_316 = arith.constant 0 : index
    %c0_317 = arith.constant 0 : index
    %578 = vector.load %arg15[%c3_315, %c0_316, %c0_317] : memref<4x1x64xf32, #tpu.memory_space<vmem>>, vector<1x1x64xf32>
    %579 = vector.shape_cast %578 : vector<1x1x64xf32> to vector<1x64xf32>
    %c3_318 = arith.constant 3 : index
    %c0_319 = arith.constant 0 : index
    %c0_320 = arith.constant 0 : index
    %580 = vector.load %arg16[%c3_318, %c0_319, %c0_320] : memref<4x1x64xf32, #tpu.memory_space<vmem>>, vector<1x1x64xf32>
    %581 = vector.shape_cast %580 : vector<1x1x64xf32> to vector<1x64xf32>
    %cst_321 = arith.constant dense<0.000000e+00> : vector<16xf32>
    %582 = vector.multi_reduction <add>, %577, %cst_321 [1] : vector<16x64xf32> to vector<16xf32>
    %583 = vector.shape_cast %582 : vector<16xf32> to vector<16x1xf32>
    %cst_322 = arith.constant 6.400000e+01 : f32
    %584 = vector.broadcast %cst_322 : f32 to vector<16x1xf32>
    %585 = arith.divf %583, %584 : vector<16x1xf32>
    %586 = vector.broadcast %585 : vector<16x1xf32> to vector<16x64xf32>
    %587 = arith.subf %577, %586 : vector<16x64xf32>
    %588 = arith.mulf %587, %587 : vector<16x64xf32>
    %cst_323 = arith.constant dense<0.000000e+00> : vector<16xf32>
    %589 = vector.multi_reduction <add>, %588, %cst_323 [1] : vector<16x64xf32> to vector<16xf32>
    %590 = vector.shape_cast %589 : vector<16xf32> to vector<16x1xf32>
    %cst_324 = arith.constant 6.400000e+01 : f32
    %591 = vector.broadcast %cst_324 : f32 to vector<16x1xf32>
    %592 = arith.divf %590, %591 : vector<16x1xf32>
    %cst_325 = arith.constant 9.99999974E-6 : f32
    %593 = vector.broadcast %cst_325 : f32 to vector<16x1xf32>
    %594 = arith.addf %592, %593 : vector<16x1xf32>
    %595 = math.rsqrt %594 : vector<16x1xf32>
    %596 = vector.broadcast %595 : vector<16x1xf32> to vector<16x64xf32>
    %597 = arith.mulf %587, %596 : vector<16x64xf32>
    %598 = vector.broadcast %579 : vector<1x64xf32> to vector<16x64xf32>
    %599 = arith.mulf %597, %598 : vector<16x64xf32>
    %600 = vector.broadcast %581 : vector<1x64xf32> to vector<16x64xf32>
    %601 = arith.addf %599, %600 : vector<16x64xf32>
    %c3_326 = arith.constant 3 : index
    %c0_327 = arith.constant 0 : index
    %c0_328 = arith.constant 0 : index
    %602 = vector.load %arg9[%c3_326, %c0_327, %c0_328] : memref<4x64x64xbf16, #tpu.memory_space<vmem>>, vector<1x64x64xbf16>
    %603 = vector.shape_cast %602 : vector<1x64x64xbf16> to vector<64x64xbf16>
    %c3_329 = arith.constant 3 : index
    %c0_330 = arith.constant 0 : index
    %c0_331 = arith.constant 0 : index
    %604 = vector.load %arg10[%c3_329, %c0_330, %c0_331] : memref<4x1x64xf32, #tpu.memory_space<vmem>>, vector<1x1x64xf32>
    %605 = vector.shape_cast %604 : vector<1x1x64xf32> to vector<1x64xf32>
    %606 = arith.truncf %601 : vector<16x64xf32> to vector<16x64xbf16>
    %cst_332 = arith.constant dense<0.000000e+00> : vector<16x64xf32>
    %607 = tpu.matmul %606, %603, %cst_332 {dimension_numbers = #tpu.dot_dimension_numbers<[1], [0], [0], [1], [0, 0, 1, 1], [], []>} : vector<16x64xbf16>, vector<64x64xbf16>, vector<16x64xf32> -> vector<16x64xf32>
    %608 = vector.broadcast %605 : vector<1x64xf32> to vector<16x64xf32>
    %609 = arith.addf %607, %608 : vector<16x64xf32>
    %c3_333 = arith.constant 3 : index
    %c0_334 = arith.constant 0 : index
    %c0_335 = arith.constant 0 : index
    %610 = vector.load %arg11[%c3_333, %c0_334, %c0_335] : memref<4x64x128xbf16, #tpu.memory_space<vmem>>, vector<1x64x128xbf16>
    %611 = vector.shape_cast %610 : vector<1x64x128xbf16> to vector<64x128xbf16>
    %cst_336 = arith.constant dense<0.000000e+00> : vector<16x128xf32>
    %612 = tpu.matmul %6, %611, %cst_336 {dimension_numbers = #tpu.dot_dimension_numbers<[1], [0], [0], [1], [0, 0, 1, 1], [], []>} : vector<16x64xbf16>, vector<64x128xbf16>, vector<16x128xf32> -> vector<16x128xf32>
    %c3_337 = arith.constant 3 : index
    %c0_338 = arith.constant 0 : index
    %c0_339 = arith.constant 0 : index
    %613 = vector.load %arg12[%c3_337, %c0_338, %c0_339] : memref<4x1x128xf32, #tpu.memory_space<vmem>>, vector<1x1x128xf32>
    %614 = vector.shape_cast %613 : vector<1x1x128xf32> to vector<1x128xf32>
    %615 = vector.broadcast %614 : vector<1x128xf32> to vector<16x128xf32>
    %616 = arith.addf %612, %615 : vector<16x128xf32>
    %617 = vector.extract_strided_slice %616 {offsets = [0, 0], sizes = [16, 64], strides = [1, 1]} : vector<16x128xf32> to vector<16x64xf32>
    %618 = vector.extract_strided_slice %616 {offsets = [0, 64], sizes = [16, 64], strides = [1, 1]} : vector<16x128xf32> to vector<16x64xf32>
    %619 = arith.truncf %609 : vector<16x64xf32> to vector<16x64xbf16>
    %620 = arith.truncf %617 : vector<16x64xf32> to vector<16x64xbf16>
    %cst_340 = arith.constant dense<0.000000e+00> : vector<16x16xf32>
    %621 = tpu.matmul %619, %620, %cst_340 {dimension_numbers = #tpu.dot_dimension_numbers<[1], [1], [0], [0], [0, 0, 1, 0], [], []>} : vector<16x64xbf16>, vector<16x64xbf16>, vector<16x16xf32> -> vector<16x16xf32>
    %cst_341 = arith.constant 1.250000e-01 : f32
    %622 = vector.broadcast %cst_341 : f32 to vector<16x16xf32>
    %623 = arith.mulf %621, %622 : vector<16x16xf32>
    %c0_342 = arith.constant 0 : index
    %c0_343 = arith.constant 0 : index
    %624 = vector.load %arg3[%c0_342, %c0_343] : memref<16x16xf32, #tpu.memory_space<vmem>>, vector<16x16xf32>
    %625 = arith.addf %623, %624 : vector<16x16xf32>
    %cst_344 = arith.constant dense<0xFF800000> : vector<16xf32>
    %626 = vector.multi_reduction <maximumf>, %625, %cst_344 [1] : vector<16x16xf32> to vector<16xf32>
    %627 = vector.shape_cast %626 : vector<16xf32> to vector<16x1xf32>
    %628 = vector.broadcast %627 : vector<16x1xf32> to vector<16x16xf32>
    %629 = arith.subf %625, %628 : vector<16x16xf32>
    %630 = math.exp %629 : vector<16x16xf32>
    %cst_345 = arith.constant dense<0.000000e+00> : vector<16xf32>
    %631 = vector.multi_reduction <add>, %630, %cst_345 [1] : vector<16x16xf32> to vector<16xf32>
    %632 = vector.shape_cast %631 : vector<16xf32> to vector<16x1xf32>
    %633 = tpu.reciprocal %632 {approx = true} : vector<16x1xf32> -> vector<16x1xf32>
    %634 = vector.broadcast %633 : vector<16x1xf32> to vector<16x16xf32>
    %635 = arith.mulf %630, %634 : vector<16x16xf32>
    %636 = arith.truncf %635 : vector<16x16xf32> to vector<16x16xbf16>
    %637 = arith.truncf %618 : vector<16x64xf32> to vector<16x64xbf16>
    %cst_346 = arith.constant dense<0.000000e+00> : vector<16x64xf32>
    %638 = tpu.matmul %636, %637, %cst_346 {dimension_numbers = #tpu.dot_dimension_numbers<[1], [0], [0], [1], [0, 0, 1, 1], [], []>} : vector<16x16xbf16>, vector<16x64xbf16>, vector<16x64xf32> -> vector<16x64xf32>
    %c3_347 = arith.constant 3 : index
    %c0_348 = arith.constant 0 : index
    %c0_349 = arith.constant 0 : index
    %639 = vector.load %arg13[%c3_347, %c0_348, %c0_349] : memref<4x64x64xbf16, #tpu.memory_space<vmem>>, vector<1x64x64xbf16>
    %640 = vector.shape_cast %639 : vector<1x64x64xbf16> to vector<64x64xbf16>
    %c3_350 = arith.constant 3 : index
    %c0_351 = arith.constant 0 : index
    %c0_352 = arith.constant 0 : index
    %641 = vector.load %arg14[%c3_350, %c0_351, %c0_352] : memref<4x1x64xf32, #tpu.memory_space<vmem>>, vector<1x1x64xf32>
    %642 = vector.shape_cast %641 : vector<1x1x64xf32> to vector<1x64xf32>
    %643 = arith.truncf %638 : vector<16x64xf32> to vector<16x64xbf16>
    %cst_353 = arith.constant dense<0.000000e+00> : vector<16x64xf32>
    %644 = tpu.matmul %643, %640, %cst_353 {dimension_numbers = #tpu.dot_dimension_numbers<[1], [0], [0], [1], [0, 0, 1, 1], [], []>} : vector<16x64xbf16>, vector<64x64xbf16>, vector<16x64xf32> -> vector<16x64xf32>
    %645 = vector.broadcast %642 : vector<1x64xf32> to vector<16x64xf32>
    %646 = arith.addf %644, %645 : vector<16x64xf32>
    %647 = arith.addf %601, %646 : vector<16x64xf32>
    %c3_354 = arith.constant 3 : index
    %c0_355 = arith.constant 0 : index
    %c0_356 = arith.constant 0 : index
    %648 = vector.load %arg17[%c3_354, %c0_355, %c0_356] : memref<4x1x64xf32, #tpu.memory_space<vmem>>, vector<1x1x64xf32>
    %649 = vector.shape_cast %648 : vector<1x1x64xf32> to vector<1x64xf32>
    %c3_357 = arith.constant 3 : index
    %c0_358 = arith.constant 0 : index
    %c0_359 = arith.constant 0 : index
    %650 = vector.load %arg18[%c3_357, %c0_358, %c0_359] : memref<4x1x64xf32, #tpu.memory_space<vmem>>, vector<1x1x64xf32>
    %651 = vector.shape_cast %650 : vector<1x1x64xf32> to vector<1x64xf32>
    %cst_360 = arith.constant dense<0.000000e+00> : vector<16xf32>
    %652 = vector.multi_reduction <add>, %647, %cst_360 [1] : vector<16x64xf32> to vector<16xf32>
    %653 = vector.shape_cast %652 : vector<16xf32> to vector<16x1xf32>
    %cst_361 = arith.constant 6.400000e+01 : f32
    %654 = vector.broadcast %cst_361 : f32 to vector<16x1xf32>
    %655 = arith.divf %653, %654 : vector<16x1xf32>
    %656 = vector.broadcast %655 : vector<16x1xf32> to vector<16x64xf32>
    %657 = arith.subf %647, %656 : vector<16x64xf32>
    %658 = arith.mulf %657, %657 : vector<16x64xf32>
    %cst_362 = arith.constant dense<0.000000e+00> : vector<16xf32>
    %659 = vector.multi_reduction <add>, %658, %cst_362 [1] : vector<16x64xf32> to vector<16xf32>
    %660 = vector.shape_cast %659 : vector<16xf32> to vector<16x1xf32>
    %cst_363 = arith.constant 6.400000e+01 : f32
    %661 = vector.broadcast %cst_363 : f32 to vector<16x1xf32>
    %662 = arith.divf %660, %661 : vector<16x1xf32>
    %cst_364 = arith.constant 9.99999974E-6 : f32
    %663 = vector.broadcast %cst_364 : f32 to vector<16x1xf32>
    %664 = arith.addf %662, %663 : vector<16x1xf32>
    %665 = math.rsqrt %664 : vector<16x1xf32>
    %666 = vector.broadcast %665 : vector<16x1xf32> to vector<16x64xf32>
    %667 = arith.mulf %657, %666 : vector<16x64xf32>
    %668 = vector.broadcast %649 : vector<1x64xf32> to vector<16x64xf32>
    %669 = arith.mulf %667, %668 : vector<16x64xf32>
    %670 = vector.broadcast %651 : vector<1x64xf32> to vector<16x64xf32>
    %671 = arith.addf %669, %670 : vector<16x64xf32>
    %c3_365 = arith.constant 3 : index
    %c0_366 = arith.constant 0 : index
    %c0_367 = arith.constant 0 : index
    %672 = vector.load %arg21[%c3_365, %c0_366, %c0_367] : memref<4x64x2048xbf16, #tpu.memory_space<vmem>>, vector<1x64x2048xbf16>
    %673 = vector.shape_cast %672 : vector<1x64x2048xbf16> to vector<64x2048xbf16>
    %c3_368 = arith.constant 3 : index
    %c0_369 = arith.constant 0 : index
    %c0_370 = arith.constant 0 : index
    %674 = vector.load %arg22[%c3_368, %c0_369, %c0_370] : memref<4x1x2048xf32, #tpu.memory_space<vmem>>, vector<1x1x2048xf32>
    %675 = vector.shape_cast %674 : vector<1x1x2048xf32> to vector<1x2048xf32>
    %676 = arith.truncf %671 : vector<16x64xf32> to vector<16x64xbf16>
    %cst_371 = arith.constant dense<0.000000e+00> : vector<16x2048xf32>
    %677 = tpu.matmul %676, %673, %cst_371 {dimension_numbers = #tpu.dot_dimension_numbers<[1], [0], [0], [1], [0, 0, 1, 1], [], []>} : vector<16x64xbf16>, vector<64x2048xbf16>, vector<16x2048xf32> -> vector<16x2048xf32>
    %678 = vector.broadcast %675 : vector<1x2048xf32> to vector<16x2048xf32>
    %679 = arith.addf %677, %678 : vector<16x2048xf32>
    %cst_372 = arith.constant 0.000000e+00 : f32
    %680 = vector.broadcast %cst_372 : f32 to vector<16x2048xf32>
    %681 = arith.maximumf %679, %680 : vector<16x2048xf32>
    %682 = arith.truncf %681 : vector<16x2048xf32> to vector<16x2048xbf16>
    %c3_373 = arith.constant 3 : index
    %c0_374 = arith.constant 0 : index
    %c0_375 = arith.constant 0 : index
    %683 = vector.load %arg23[%c3_373, %c0_374, %c0_375] : memref<4x2048x64xbf16, #tpu.memory_space<vmem>>, vector<1x2048x64xbf16>
    %684 = vector.shape_cast %683 : vector<1x2048x64xbf16> to vector<2048x64xbf16>
    %cst_376 = arith.constant dense<0.000000e+00> : vector<16x64xf32>
    %685 = tpu.matmul %682, %684, %cst_376 {dimension_numbers = #tpu.dot_dimension_numbers<[1], [0], [0], [1], [0, 0, 1, 1], [], []>} : vector<16x2048xbf16>, vector<2048x64xbf16>, vector<16x64xf32> -> vector<16x64xf32>
    %c3_377 = arith.constant 3 : index
    %c0_378 = arith.constant 0 : index
    %c0_379 = arith.constant 0 : index
    %686 = vector.load %arg24[%c3_377, %c0_378, %c0_379] : memref<4x1x64xf32, #tpu.memory_space<vmem>>, vector<1x1x64xf32>
    %687 = vector.shape_cast %686 : vector<1x1x64xf32> to vector<1x64xf32>
    %688 = vector.broadcast %687 : vector<1x64xf32> to vector<16x64xf32>
    %689 = arith.addf %685, %688 : vector<16x64xf32>
    %690 = arith.addf %671, %689 : vector<16x64xf32>
    %c3_380 = arith.constant 3 : index
    %c0_381 = arith.constant 0 : index
    %c0_382 = arith.constant 0 : index
    %691 = vector.load %arg19[%c3_380, %c0_381, %c0_382] : memref<4x1x64xf32, #tpu.memory_space<vmem>>, vector<1x1x64xf32>
    %692 = vector.shape_cast %691 : vector<1x1x64xf32> to vector<1x64xf32>
    %c3_383 = arith.constant 3 : index
    %c0_384 = arith.constant 0 : index
    %c0_385 = arith.constant 0 : index
    %693 = vector.load %arg20[%c3_383, %c0_384, %c0_385] : memref<4x1x64xf32, #tpu.memory_space<vmem>>, vector<1x1x64xf32>
    %694 = vector.shape_cast %693 : vector<1x1x64xf32> to vector<1x64xf32>
    %cst_386 = arith.constant dense<0.000000e+00> : vector<16xf32>
    %695 = vector.multi_reduction <add>, %690, %cst_386 [1] : vector<16x64xf32> to vector<16xf32>
    %696 = vector.shape_cast %695 : vector<16xf32> to vector<16x1xf32>
    %cst_387 = arith.constant 6.400000e+01 : f32
    %697 = vector.broadcast %cst_387 : f32 to vector<16x1xf32>
    %698 = arith.divf %696, %697 : vector<16x1xf32>
    %699 = vector.broadcast %698 : vector<16x1xf32> to vector<16x64xf32>
    %700 = arith.subf %690, %699 : vector<16x64xf32>
    %701 = arith.mulf %700, %700 : vector<16x64xf32>
    %cst_388 = arith.constant dense<0.000000e+00> : vector<16xf32>
    %702 = vector.multi_reduction <add>, %701, %cst_388 [1] : vector<16x64xf32> to vector<16xf32>
    %703 = vector.shape_cast %702 : vector<16xf32> to vector<16x1xf32>
    %cst_389 = arith.constant 6.400000e+01 : f32
    %704 = vector.broadcast %cst_389 : f32 to vector<16x1xf32>
    %705 = arith.divf %703, %704 : vector<16x1xf32>
    %cst_390 = arith.constant 9.99999974E-6 : f32
    %706 = vector.broadcast %cst_390 : f32 to vector<16x1xf32>
    %707 = arith.addf %705, %706 : vector<16x1xf32>
    %708 = math.rsqrt %707 : vector<16x1xf32>
    %709 = vector.broadcast %708 : vector<16x1xf32> to vector<16x64xf32>
    %710 = arith.mulf %700, %709 : vector<16x64xf32>
    %711 = vector.broadcast %692 : vector<1x64xf32> to vector<16x64xf32>
    %712 = arith.mulf %710, %711 : vector<16x64xf32>
    %713 = vector.broadcast %694 : vector<1x64xf32> to vector<16x64xf32>
    %714 = arith.addf %712, %713 : vector<16x64xf32>
    %c0_391 = arith.constant 0 : index
    %c0_392 = arith.constant 0 : index
    %c0_393 = arith.constant 0 : index
    %715 = vector.load %arg25[%c0_391, %c0_392, %c0_393] : memref<1x16x64xf32, #tpu.memory_space<vmem>>, vector<1x16x64xf32>
    %716 = vector.shape_cast %715 : vector<1x16x64xf32> to vector<16x64xf32>
    %717 = vector.shape_cast %714 : vector<16x64xf32> to vector<1x16x64xf32>
    tpu.vector_store %arg25[%c0_391, %c0_392, %c0_393], %717 {strides = array<i32>} : memref<1x16x64xf32, #tpu.memory_space<vmem>>, vector<1x16x64xf32>,
    return
  }
  func.func @transform_0(%arg0: i32) -> (i32, i32, i32) {
    %c0_i32 = arith.constant 0 : i32
    %c0_i32_0 = arith.constant 0 : i32
    %c0_i32_1 = arith.constant 0 : i32
    return %arg0, %c0_i32, %c0_i32_0 : i32, i32, i32
  }
  func.func @transform_1(%arg0: i32) -> (i32, i32) {
    %c0_i32 = arith.constant 0 : i32
    %c0_i32_0 = arith.constant 0 : i32
    %c0_i32_1 = arith.constant 0 : i32
    return %c0_i32, %c0_i32_0 : i32, i32
  }
  func.func @transform_2(%arg0: i32) -> (i32, i32) {
    %c0_i32 = arith.constant 0 : i32
    %c0_i32_0 = arith.constant 0 : i32
    %c0_i32_1 = arith.constant 0 : i32
    return %c0_i32, %c0_i32_0 : i32, i32
  }
  func.func @transform_3(%arg0: i32) -> (i32, i32) {
    %c0_i32 = arith.constant 0 : i32
    %c0_i32_0 = arith.constant 0 : i32
    %c0_i32_1 = arith.constant 0 : i32
    return %c0_i32, %c0_i32_0 : i32, i32
  }
  func.func @transform_4(%arg0: i32) -> (i32, i32, i32) {
    %c0_i32 = arith.constant 0 : i32
    %c0_i32_0 = arith.constant 0 : i32
    %c0_i32_1 = arith.constant 0 : i32
    %c0_i32_2 = arith.constant 0 : i32
    return %c0_i32, %c0_i32_0, %c0_i32_1 : i32, i32, i32
  }
  func.func @transform_5(%arg0: i32) -> (i32, i32, i32) {
    %c0_i32 = arith.constant 0 : i32
    %c0_i32_0 = arith.constant 0 : i32
    %c0_i32_1 = arith.constant 0 : i32
    %c0_i32_2 = arith.constant 0 : i32
    return %c0_i32, %c0_i32_0, %c0_i32_1 : i32, i32, i32
  }
  func.func @transform_6(%arg0: i32) -> (i32, i32, i32) {
    %c0_i32 = arith.constant 0 : i32
    %c0_i32_0 = arith.constant 0 : i32
    %c0_i32_1 = arith.constant 0 : i32
    %c0_i32_2 = arith.constant 0 : i32
    return %c0_i32, %c0_i32_0, %c0_i32_1 : i32, i32, i32
  }
  func.func @transform_7(%arg0: i32) -> (i32, i32, i32) {
    %c0_i32 = arith.constant 0 : i32
    %c0_i32_0 = arith.constant 0 : i32
    %c0_i32_1 = arith.constant 0 : i32
    %c0_i32_2 = arith.constant 0 : i32
    return %c0_i32, %c0_i32_0, %c0_i32_1 : i32, i32, i32
  }
  func.func @transform_8(%arg0: i32) -> (i32, i32, i32) {
    %c0_i32 = arith.constant 0 : i32
    %c0_i32_0 = arith.constant 0 : i32
    %c0_i32_1 = arith.constant 0 : i32
    %c0_i32_2 = arith.constant 0 : i32
    return %c0_i32, %c0_i32_0, %c0_i32_1 : i32, i32, i32
  }
  func.func @transform_9(%arg0: i32) -> (i32, i32, i32) {
    %c0_i32 = arith.constant 0 : i32
    %c0_i32_0 = arith.constant 0 : i32
    %c0_i32_1 = arith.constant 0 : i32
    %c0_i32_2 = arith.constant 0 : i32
    return %c0_i32, %c0_i32_0, %c0_i32_1 : i32, i32, i32
  }
  func.func @transform_10(%arg0: i32) -> (i32, i32, i32) {
    %c0_i32 = arith.constant 0 : i32
    %c0_i32_0 = arith.constant 0 : i32
    %c0_i32_1 = arith.constant 0 : i32
    %c0_i32_2 = arith.constant 0 : i32
    return %c0_i32, %c0_i32_0, %c0_i32_1 : i32, i32, i32
  }
  func.func @transform_11(%arg0: i32) -> (i32, i32, i32) {
    %c0_i32 = arith.constant 0 : i32
    %c0_i32_0 = arith.constant 0 : i32
    %c0_i32_1 = arith.constant 0 : i32
    %c0_i32_2 = arith.constant 0 : i32
    return %c0_i32, %c0_i32_0, %c0_i32_1 : i32, i32, i32
  }
  func.func @transform_12(%arg0: i32) -> (i32, i32, i32) {
    %c0_i32 = arith.constant 0 : i32
    %c0_i32_0 = arith.constant 0 : i32
    %c0_i32_1 = arith.constant 0 : i32
    %c0_i32_2 = arith.constant 0 : i32
    return %c0_i32, %c0_i32_0, %c0_i32_1 : i32, i32, i32
  }
  func.func @transform_13(%arg0: i32) -> (i32, i32, i32) {
    %c0_i32 = arith.constant 0 : i32
    %c0_i32_0 = arith.constant 0 : i32
    %c0_i32_1 = arith.constant 0 : i32
    %c0_i32_2 = arith.constant 0 : i32
    return %c0_i32, %c0_i32_0, %c0_i32_1 : i32, i32, i32
  }
  func.func @transform_14(%arg0: i32) -> (i32, i32, i32) {
    %c0_i32 = arith.constant 0 : i32
    %c0_i32_0 = arith.constant 0 : i32
    %c0_i32_1 = arith.constant 0 : i32
    %c0_i32_2 = arith.constant 0 : i32
    return %c0_i32, %c0_i32_0, %c0_i32_1 : i32, i32, i32
  }
  func.func @transform_15(%arg0: i32) -> (i32, i32, i32) {
    %c0_i32 = arith.constant 0 : i32
    %c0_i32_0 = arith.constant 0 : i32
    %c0_i32_1 = arith.constant 0 : i32
    %c0_i32_2 = arith.constant 0 : i32
    return %c0_i32, %c0_i32_0, %c0_i32_1 : i32, i32, i32
  }
  func.func @transform_16(%arg0: i32) -> (i32, i32, i32) {
    %c0_i32 = arith.constant 0 : i32
    %c0_i32_0 = arith.constant 0 : i32
    %c0_i32_1 = arith.constant 0 : i32
    %c0_i32_2 = arith.constant 0 : i32
    return %c0_i32, %c0_i32_0, %c0_i32_1 : i32, i32, i32
  }
  func.func @transform_17(%arg0: i32) -> (i32, i32, i32) {
    %c0_i32 = arith.constant 0 : i32
    %c0_i32_0 = arith.constant 0 : i32
    %c0_i32_1 = arith.constant 0 : i32
    %c0_i32_2 = arith.constant 0 : i32
    return %c0_i32, %c0_i32_0, %c0_i32_1 : i32, i32, i32
  }
  func.func @transform_18(%arg0: i32) -> (i32, i32, i32) {
    %c0_i32 = arith.constant 0 : i32
    %c0_i32_0 = arith.constant 0 : i32
    %c0_i32_1 = arith.constant 0 : i32
    %c0_i32_2 = arith.constant 0 : i32
    return %c0_i32, %c0_i32_0, %c0_i32_1 : i32, i32, i32
  }
  func.func @transform_19(%arg0: i32) -> (i32, i32, i32) {
    %c0_i32 = arith.constant 0 : i32
    %c0_i32_0 = arith.constant 0 : i32
    %c0_i32_1 = arith.constant 0 : i32
    %c0_i32_2 = arith.constant 0 : i32
    return %c0_i32, %c0_i32_0, %c0_i32_1 : i32, i32, i32
  }
  func.func @transform_20(%arg0: i32) -> (i32, i32, i32) {
    %c0_i32 = arith.constant 0 : i32
    %c0_i32_0 = arith.constant 0 : i32
    %c0_i32_1 = arith.constant 0 : i32
    %c0_i32_2 = arith.constant 0 : i32
    return %c0_i32, %c0_i32_0, %c0_i32_1 : i32, i32, i32
  }
  func.func @transform_21(%arg0: i32) -> (i32, i32, i32) {
    %c0_i32 = arith.constant 0 : i32
    %c0_i32_0 = arith.constant 0 : i32
    %c0_i32_1 = arith.constant 0 : i32
    %c0_i32_2 = arith.constant 0 : i32
    return %c0_i32, %c0_i32_0, %c0_i32_1 : i32, i32, i32
  }
  func.func @transform_22(%arg0: i32) -> (i32, i32, i32) {
    %c0_i32 = arith.constant 0 : i32
    %c0_i32_0 = arith.constant 0 : i32
    %c0_i32_1 = arith.constant 0 : i32
    %c0_i32_2 = arith.constant 0 : i32
    return %c0_i32, %c0_i32_0, %c0_i32_1 : i32, i32, i32
  }
  func.func @transform_23(%arg0: i32) -> (i32, i32, i32) {
    %c0_i32 = arith.constant 0 : i32
    %c0_i32_0 = arith.constant 0 : i32
    %c0_i32_1 = arith.constant 0 : i32
    %c0_i32_2 = arith.constant 0 : i32
    return %c0_i32, %c0_i32_0, %c0_i32_1 : i32, i32, i32
  }
  func.func @transform_24(%arg0: i32) -> (i32, i32, i32) {
    %c0_i32 = arith.constant 0 : i32
    %c0_i32_0 = arith.constant 0 : i32
    %c0_i32_1 = arith.constant 0 : i32
    return %arg0, %c0_i32, %c0_i32_0 : i32, i32, i32
  }
}

</mosaic_0001>

<bundles_post_ra>
// kernel: forward.1
= control target key start
LH: loop header
LB: loop body
LE: loop exit
PB: predicated region body
PF: predicated region fallthrough
CT: control target
= control target key end

     0   :  { %s20919_s0 = inlined_call_operand.vmem [shape: bf16[2,16,88], index: 0, kind: input, shape index: {}]   ;;  %s20920_s1 = inlined_call_operand.vmem [shape: f32[16,64], index: 1, kind: input, shape index: {}]   ;;  %s20921_s2 = inlined_call_operand.vmem [shape: f32[16,16], index: 2, kind: input, shape index: {}]   ;;  %s20922_s3 = inlined_call_operand.vmem [shape: bf16[88,64], index: 3, kind: input, shape index: {}]   ;;  %s20923_s4 = inlined_call_operand.vmem [shape: bf16[4,64,192], index: 4, kind: input, shape index: {}]   ;;  %s20924_s5 = inlined_call_operand.vmem [shape: f32[4,1,192], index: 5, kind: input, shape index: {}]   ;;  %s20925_s6 = inlined_call_operand.vmem [shape: bf16[4,64,64], index: 6, kind: input, shape index: {}]   ;;  %s20926_s7 = inlined_call_operand.vmem [shape: f32[4,1,64], index: 7, kind: input, shape index: {}]   ;;  %s20927_s8 = inlined_call_operand.vmem [shape: bf16[4,64,64], index: 8, kind: input, shape index: {}]   ;;  %s20928_s9 = inlined_call_operand.vmem [shape: f32[4,1,64], index: 9, kind: input, shape index: {}]   ;;  %s20929_s10 = inlined_call_operand.vmem [shape: bf16[4,64,128], index: 10, kind: input, shape index: {}]   ;;  %s20930_s11 = inlined_call_operand.vmem [shape: f32[4,1,128], index: 11, kind: input, shape index: {}]   ;;  %s20931_s12 = inlined_call_operand.vmem [shape: bf16[4,64,64], index: 12, kind: input, shape index: {}]   ;;  %s20932_s13 = inlined_call_operand.vmem [shape: f32[4,1,64], index: 13, kind: input, shape index: {}]   ;;  %s20933_s14 = inlined_call_operand.vmem [shape: f32[4,1,64], index: 14, kind: input, shape index: {}]   ;;  %s20934_s15 = inlined_call_operand.vmem [shape: f32[4,1,64], index: 15, kind: input, shape index: {}]   ;;  %s20935_s16 = inlined_call_operand.vmem [shape: f32[4,1,64], index: 16, kind: input, shape index: {}]   ;;  %s20936_s17 = inlined_call_operand.vmem [shape: f32[4,1,64], index: 17, kind: input, shape index: {}]   ;;  %s20937_s18 = inlined_call_operand.vmem [shape: f32[4,1,64], index: 18, kind: input, shape index: {}]   ;;  %s20938_s19 = inlined_call_operand.vmem [shape: f32[4,1,64], index: 19, kind: input, shape index: {}]   ;;  %s20939_s20 = inlined_call_operand.vmem [shape: bf16[4,64,2048], index: 20, kind: input, shape index: {}]   ;;  %s20940_s21 = inlined_call_operand.vmem [shape: f32[4,1,2048], index: 21, kind: input, shape index: {}]   ;;  %s20941_s22 = inlined_call_operand.vmem [shape: bf16[4,2048,64], index: 22, kind: input, shape index: {}]   ;;  %s20942_s23 = inlined_call_operand.vmem [shape: f32[4,1,64], index: 23, kind: input, shape index: {}]   ;;  %s20943_s24 = inlined_call_operand.vmem [shape: f32[2,16,64], index: 24, kind: output, shape index: {}]  }
   0x1   :  { %20959 = sst [smem:[#allocation4_spill]] %s20919_s0 }
   0x2   :  { %20960 = sst [smem:[#allocation5_spill]] %s20920_s1 }
   0x3   :  { %20961 = sst [smem:[#allocation6_spill]] %s20921_s2 }
   0x4   :  { %20962 = sst [smem:[#allocation7_spill]] %s20922_s3 }
   0x5   :  { %20963 = sst [smem:[#allocation8_spill]] %s20923_s4 }
   0x6   :  { %20964 = sst [smem:[#allocation9_spill]] %s20924_s5  ;;  %s17295_s5 = smov 0  }
   0x7   :  { %20965 = sst [smem:[#allocation10_spill]] %s20925_s6 }
   0x8   :  { %20966 = sst [smem:[#allocation11_spill]] %s20926_s7 }
   0x9   :  { %20967 = sst [smem:[#allocation12_spill]] %s20927_s8 }
   0xa   :  { %20968 = sst [smem:[#allocation13_spill]] %s20935_s16 }
   0xb   :  { %20969 = sst [smem:[#allocation14_spill]] %s20943_s24 }
   0xc LB: > { %20970 = sst [smem:[#allocation2_spill]] %s17164_s5  ;;  %s13151_s26 = sadd.s32 4294967295, %s17164_s5   ;;  %s17164_s5 = sphi %s17295_s5, %s34_s5  }
   0xd   : > { %p13155_p0 = scmp.ge.s32.totalorder %s17164_s5, 1  ;;  %p662_p1 = scmp.lt.s32.totalorder %s17164_s5, 3 }
   0xf   : > { %p663_p2 = pnand %p13155_p0, %p662_p1 }
  0x11   : > { %666 = sbr.rel (%p663_p2) target bundleno = 16229 (0x3f65), region = 116 }
  0x18   : > { %s20971_s6 = sld [smem:[#allocation7_spill]]  ;;  %v17166_v1 = vmov 0.0   ;;  %vm17167_vm0 = vmmov 0   ;;  %p728_p3 = scmp.lt.s32.totalorder %s13151_s26, 1  ;;  %vm796_vm1 = vcmask 1043456   ;;  %vm792_vm2 = vcmask 719872  }
  0x19   : > { %16093 = vmatprep.subr.bf16.mxu0 %v17166_v1  ;;  %16105 = vmatprep.mubr.msk.bf16.mxu0 %vm17167_vm0, %v17166_v1  ;;  %s20973_s4 = sld [smem:[#allocation8_spill]]  ;;  %s20974_s0 = sld [smem:[#allocation4_spill]]  ;;  %v17168_v17 = vmov 0   ;;  %vm902_vm3 = vcmask 523264   ;;  %v852_v27 = vlaneseq  ;;  %vm1006_vm4 = vcmask 130048  }
  0x1a   : > { %s20990_s26 = smov (!%p728_p3, %s13151_s26), 1  ;;  %938 = vmatprep.mubr.bf16.mxu1 %v17168_v17  ;;  %s20975_s8 = sld [smem:[#allocation5_spill]] }
  0x1b   : > { %20972 = sst [smem:[#allocation3_spill]] %s20990_s26  ;;  %s15268_s28 = sshll.u32 %s20990_s26, 3  ;;  %v17382_v28 = vshrl.u32 %v852_v27, 7  ;;  %v16434_v27 = vld [vmem:[%s20929_s10 + $0x10] sm:$0xff]  }
  0x1c   : > { %s20976_s24 = sld [smem:[#allocation9_spill]]  ;;  %s20953_s5 = smov 64  }
  0x1d   : > { %v17385_v29 = vsub.s32 0, %v17382_v28  ;;  %v17391_v31 = vsub.s32 1, %v17382_v28  ;;  %s20977_s30 = sld [smem:[#allocation6_spill]]  ;;  %s20978_s27 = sld [smem:[#allocation10_spill]] }
  0x1e   : > { %v16409_v0 = vld [vmem:[%s20971_s6] sm:$0xff]   ;;  %v16410_v2 = vld [vmem:[%s20971_s6 + $0x8] sm:$0xff]   ;;  %v16411_v3 = vld [vmem:[%s20971_s6 + $0x10] sm:$0xff]   ;;  %s20982_s16 = sld [smem:[#allocation13_spill]]  ;;  %s20986_s29 = sld [smem:[#allocation3_spill]] }
  0x1f   : > { %16094 = vmatpush3.bf16.msra.mxu0 %v16409_v0  ;;  %v16414_v4 = vld [vmem:[%s20971_s6 + $0x28] ss:$0 sps:$4 sm:$0xff]   ;;  %v16416_v5 = vld [vmem:[%s20973_s4 + $0x4] ss:$8 sps:$4 sm:$0xff]   ;;  %s732_s7 = scalar_lea.vmem %s20974_s0, %s15268_s28  ;;  %v16419_v7 = vld [vmem:[%s20973_s4 + $0x14] ss:$8 sps:$4 sm:$0xff]  }
  0x20   : > { %16095 = vmatprep.subr.bf16.mxu0 %v17166_v1  ;;  %v16418_v6 = vld [vmem:[%s20973_s4] ss:$8 sps:$4 sm:$0xff]   ;;  %906 = vmatprep.subr.bf16.mxu1 %v16416_v5  ;;  %v16421_v8 = vld [vmem:[%s20973_s4 + $0x10] ss:$8 sps:$4 sm:$0xff]   ;;  %v16422_v10 = vld [vmem:[%s20973_s4 + $0x24] ss:$8 sps:$4 sm:$0xff]  }
  0x21   : > { %907 = vmatpush1.bf16.msra.mxu1 %v16418_v6  ;;  %v16412_v9 = vld [vmem:[%s20971_s6 + $0x18] sm:$0xff]   ;;  %v798_v11 = vsel %vm796_vm1, %v16414_v4, 0  ;;  %v16413_v12 = vld [vmem:[%s20971_s6 + $0x20] sm:$0xff]   ;;  %v753_v19 = vld [vmem:[%s20975_s8 + $0x8] sm:$0xff]  ;;  %s20979_s28 = sld [smem:[#allocation11_spill]]  ;;  %s20981_s0 = smov 64  }
  0x22   : > { %908 = vmatprep.subr.bf16.mxu1 %v16419_v7  ;;  %v16415_v13 = vld [vmem:[%s732_s7] sm:$0xff]   ;;  %v16425_v15 = vld [vmem:[%s20973_s4 + $0x34] ss:$8 sps:$4 sm:$0xff]   ;;  %v16427_v16 = vld [vmem:[%s20973_s4 + $0x30] ss:$8 sps:$4 sm:$0xff]   ;;  %s20980_s7 = sld [smem:[#allocation12_spill]] }
  0x23   : > { %16096 = vmatpush3.bf16.msra.mxu0 %v16410_v2  ;;  %v16424_v14 = vld [vmem:[%s20973_s4 + $0x20] ss:$8 sps:$4 sm:$0xff]   ;;  %v16430_v7 = vld [vmem:[%s20978_s27 + $0x10] sm:$0xff]   ;;  %s20985_s2 = sld [smem:[#allocation13_spill]] }
  0x24   : > { %16097 = vmatprep.subr.bf16.mxu0 %v17166_v1  ;;  %v752_v18 = vld [vmem:[%s20975_s8] sm:$0xff]  ;;  %v17410_v51 = vld [vmem:[%s20977_s30 + $0x8] sm:$0xff]  ;;  %s15269_s26 = sshll.u32 %s20986_s29, 4 }
  0x25   : > { %909 = vmatpush1.bf16.msra.mxu1 %v16421_v8  ;;  %v850_v30 = vld [vmem:[%s20976_s24] sm:$0x3]  ;;  %v16429_v6 = vld [vmem:[%s20978_s27 + $0x8] sm:$0xff]  }
  0x26   : > { %910 = vmatprep.subr.bf16.mxu1 %v16422_v10  ;;  %v855_v32 = vrot.slane %v850_v30, %v17385_v29  ;;  %v859_v34 = vrot.slane %v850_v30, %v17391_v31  ;;  %v17405_v47 = vld [vmem:[%s20977_s30] sm:$0xff]  ;;  %v16435_v30 = vld [vmem:[%s20929_s10 + $0x18] sm:$0xff]  }
  0x27   : > { %16098 = vmatpush3.bf16.msra.mxu0 %v16411_v3  ;;  %v16428_v5 = vld [vmem:[%s20978_s27] sm:$0xff]  }
  0x28   : > { %16099 = vmatprep.subr.bf16.mxu0 %v17166_v1 }
  0x29   : > { %911 = vmatpush1.bf16.msra.mxu1 %v16424_v14 }
  0x2a   : > { %912 = vmatprep.subr.bf16.mxu1 %v16425_v15  ;;  %v16431_v15 = vld [vmem:[%s20978_s27 + $0x18] sm:$0xff]  }
  0x2b   : > { %16100 = vmatpush3.bf16.msra.mxu0 %v16412_v9 }
  0x2c   : > { %16101 = vmatprep.subr.bf16.mxu0 %v17166_v1 }
  0x2d   : > { %913 = vmatpush1.bf16.msra.mxu1 %v16427_v16 }
  0x2e   : > { %16109 = vmatprep.subr.bf16.mxu1 %v17166_v1 }
  0x2f   : > { %16102 = vmatpush3.bf16.msra.mxu0 %v16413_v12 }
  0x30   : > { %16103 = vmatprep.subr.bf16.mxu0 %v17166_v1 }
  0x33   : > { %16104 = vmatpush3.bf16.msra.mxu0 %v798_v11 }
  0x34   : > { %16115 = vmatprep.subr.bf16.mxu0 %v17166_v1 }
  0x36   : > { %16106 = vmatmul.mubr.msk.bf16.vlgmr.msra.gmra.mrb[0].mxu0 %vm792_vm2, %v16415_v13 }
  0x37   : > { %16117 = vmatprep.mubr.msk.bf16.mxu0 %vm17167_vm0, %v17166_v1 }
 0x109   : > { %v834_v20 = vpop.f32.mrb[0].mxu0 }
 0x10a   : > { %v16107_v21 = vpop.f32.mrb[1].mxu0  ;;  %v17370_v23 = vadd.f32 %v834_v20, %v752_v18  ;;  %v16432_v20 = vld [vmem:[%s20929_s10] sm:$0xff]  }
 0x10b   : > { %v837_v22 = vpop.f32.mrb[2].mxu0 }
 0x10c   : > { %v17372_v24 = vadd.f32 %v837_v22, %v753_v19  ;;  %v16108_v25 = vpop.f32.mrb[3].mxu0 }
 0x10d   : > { %v16433_v25 = vld [vmem:[%s20929_s10 + $0x8] sm:$0xff]  }
 0x10e   : > { %v17376_v26 = vpack.c.bf16 %v17372_v24, %v17370_v23 }
 0x110   : > { %13176 = vmatmul.mubr.msk.bf16.vlgmr.msra.gmra.mrb[0].mxu1 %vm902_vm3, %v17376_v26 }
 0x111   : > { %16111 = vmatprep.mubr.msk.bf16.mxu1 %vm17167_vm0, %v17166_v1 }
 0x1e3   : > { %v940_v33 = vpop.f32.mrb[0].mxu1 }
 0x1e4   : > { %v942_v35 = vpop.f32.mrb[1].mxu1  ;;  %v941_v37 = vadd.f32 %v940_v33, %v855_v32 }
 0x1e5   : > { %v944_v36 = vpop.f32.mrb[2].mxu1  ;;  %v943_v40 = vadd.f32 %v942_v35, %v859_v34 }
 0x1e6   : > { %v945_v38 = vadd.f32 %v944_v36, %v855_v32  ;;  %v946_v39 = vpop.f32.mrb[3].mxu1  ;;  %v13179_v32 = vld [vmem:[%s20979_s28] ss:$0 sm:$0xff] }
 0x1e7   : > { %v947_v41 = vadd.f32 %v946_v39, %v859_v34 }
 0x1e8   : > { %v949_v42 = vpack.c.bf16 %v945_v38, %v941_v37 }
 0x1e9   : > { %v1030_v43 = vpack.c.bf16 %v947_v41, %v943_v40 }
 0x1ea   : > { %951 = vrot.lane.b32.xlu0 %v949_v42, %s20953_s5 }
 0x1eb   : > { %16116 = vmatpush3.bf16.msra.mxu0 %v1030_v43  ;;  %v13193_v43 = vld [vmem:[%s20930_s11] ss:$0 sm:$0xff] }
 0x1ec   : > { %16133 = vmatprep.subr.bf16.mxu0 %v17166_v1 }
 0x25c   : > { %v952_v44 = vpop.permute.xlu0 %951 }
 0x25d   : > { %v957_v45 = vsel %vm902_vm3, %v952_v44, 0 }
 0x25e   : > { %16110 = vmatpush3.bf16.xpose.msra.mxu1 %v957_v45 }
 0x25f   : > { %16121 = vmatprep.subr.bf16.mxu1 %v17166_v1 }
 0x265   : > { %16112 = vmatmul.mubr.msk.bf16.vlgmr.msra.gmra.mrb[4].mxu1 %vm902_vm3, %v949_v42 }
 0x266   : > { %16129 = vmatprep.mubr.msk.bf16.mxu1 %vm17167_vm0, %v17166_v1  ;;  %16122 = vmatpush3.bf16.msra.mxu1 %v16428_v5 }
 0x267   : > { %16123 = vmatprep.subr.bf16.mxu1 %v17166_v1 }
 0x26a   : > { %16124 = vmatpush3.bf16.msra.mxu1 %v16429_v6 }
 0x26b   : > { %16125 = vmatprep.subr.bf16.mxu1 %v17166_v1 }
 0x26e   : > { %16126 = vmatpush3.bf16.msra.mxu1 %v16430_v7 }
 0x26f   : > { %16127 = vmatprep.subr.bf16.mxu1 %v17166_v1 }
 0x272   : > { %16128 = vmatpush3.bf16.msra.mxu1 %v16431_v15 }
 0x273   : > { %16145 = vmatprep.subr.bf16.mxu1 %v17166_v1 }
 0x338   : > { %v993_v46 = vpop.f32.mrb[4].mxu1 }
 0x339   : > { %v1000_v48 = vmul.f32 0.125, %v993_v46  ;;  %v16113_v49 = vpop.f32.mrb[5].mxu1 }
 0x33a   : > { %v996_v50 = vpop.f32.mrb[6].mxu1 }
 0x33b   : > { %v1001_v52 = vmul.f32 0.125, %v996_v50  ;;  %v16114_v53 = vpop.f32.mrb[7].mxu1  ;;  %v1004_v54 = vadd.f32 %v17405_v47, %v1000_v48 }
 0x33d   : > { %v1007_v55 = vsel %vm1006_vm4, %v1004_v54, -inf  ;;  %v1005_v56 = vadd.f32 %v17410_v51, %v1001_v52 }
 0x33e   : > { %1008 = vmax.xlane.f32.xlu0 %v1007_v55 }
 0x33f   : > { %v1010_v57 = vsel %vm1006_vm4, %v1005_v56, -inf }
 0x340   : > { %1011 = vmax.xlane.f32.xlu1 %v1010_v57 }
 0x3cb   : > { %v1009_v58 = vpop.xlane.xlu0 %1008 }
 0x3cc   : > { %v1013_v59 = vsub.f32 %v1004_v54, %v1009_v58 }
 0x3cd   : > { %v1012_v60 = vpop.xlane.xlu1 %1011 }
 0x3ce   : > { %v1015_v61 = vmul.f32 1.442695, %v1013_v59  ;;  %v1014_v62 = vsub.f32 %v1005_v56, %v1012_v60 }
 0x3d0   : > { %17040 = vpow2.f32 %v1015_v61  ;;  %v1017_v63 = vmul.f32 1.442695, %v1014_v62  ;;  %v16436_v61 = vld [vmem:[%s20980_s7] sm:$0xff]   ;;  %v16437_v62 = vld [vmem:[%s20980_s7 + $0x8] sm:$0xff]  }
 0x3d2   : > { %17042 = vpow2.f32 %v1017_v63  ;;  %v16438_v63 = vld [vmem:[%s20980_s7 + $0x10] sm:$0xff]  }
 0x3da   : > { %v17041_v0 = vpop.eup %17040 }
 0x3db   : > { %v1019_v2 = vsel %vm1006_vm4, %v17041_v0, 0.0 }
 0x3dc   : > { %v17043_v3 = vpop.eup %17042  ;;  %1020 = vadd.xlane.f32.xlu1 %v1019_v2 }
 0x3dd   : > { %v1022_v4 = vsel %vm1006_vm4, %v17043_v3, 0.0 }
 0x3e0   : > { %1023 = vadd.xlane.f32.xlu1 %v1022_v4 }
 0x469   : > { %v1021_v8 = vpop.xlane.xlu1 %1020 }
 0x46a   : > { %17044 = vrcp.f32 %v1021_v8 }
 0x46d   : > { %v1024_v9 = vpop.xlane.xlu1 %1023 }
 0x46e   : > { %17046 = vrcp.f32 %v1024_v9 }
 0x474   : > { %v17045_v10 = vpop.eup %17044 }
 0x475   : > { %v1027_v12 = vmul.f32 %v17045_v10, %v17041_v0  ;;  %v16439_v0 = vld [vmem:[%s20980_s7 + $0x18] sm:$0xff]   ;;  %v13185_v10 = vld [vmem:[%s20933_s14] ss:$0 sm:$0xff] }
 0x478   : > { %v17047_v11 = vpop.eup %17046 }
 0x479   : > { %v1028_v13 = vmul.f32 %v17047_v11, %v17043_v3 }
 0x47b   : > { %v1029_v14 = vpack.c.bf16 %v1028_v13, %v1027_v12 }
 0x47d   : > { %16118 = vmatmul.mubr.msk.bf16.vlgmr.msra.gmra.mrb[4].mxu0 %vm1006_vm4, %v1029_v14  ;;  %v13186_v14 = vld [vmem:[%s20934_s15] ss:$0 sm:$0xff] }
 0x47e   : > { %16141 = vmatprep.mubr.msk.bf16.mxu0 %vm17167_vm0, %v17166_v1  ;;  %16134 = vmatpush3.bf16.msra.mxu0 %v16436_v61 }
 0x47f   : > { %16135 = vmatprep.subr.bf16.mxu0 %v17166_v1 }
 0x482   : > { %16136 = vmatpush3.bf16.msra.mxu0 %v16437_v62 }
 0x483   : > { %16137 = vmatprep.subr.bf16.mxu0 %v17166_v1 }
 0x486   : > { %16138 = vmatpush3.bf16.msra.mxu0 %v16438_v63 }
 0x487   : > { %16139 = vmatprep.subr.bf16.mxu0 %v17166_v1 }
 0x48a   : > { %16140 = vmatpush3.bf16.msra.mxu0 %v16439_v0  ;;  %v16443_v0 = vld [vmem:[%s20931_s12 + $0x18] sm:$0xff]  }
 0x48b   : > { %16157 = vmatprep.subr.bf16.mxu0 %v17166_v1 }
 0x550   : > { %v1068_v16 = vpop.f32.mrb[4].mxu0 }
 0x551   : > { %v16119_v18 = vpop.f32.mrb[5].mxu0 }
 0x552   : > { %v1071_v19 = vpop.f32.mrb[6].mxu0 }
 0x553   : > { %v1084_v21 = vpack.c.bf16 %v1071_v19, %v1068_v16  ;;  %v16120_v22 = vpop.f32.mrb[7].mxu0 }
 0x555   : > { %16130 = vmatmul.mubr.msk.bf16.vlgmr.msra.gmra.mrb[8].mxu1 %vm902_vm3, %v1084_v21  ;;  %v13187_v21 = vld [vmem:[%s20928_s9] ss:$0 sm:$0xff] }
 0x556   : > { %16146 = vmatpush3.bf16.msra.mxu1 %v16432_v20  ;;  %16153 = vmatprep.mubr.msk.bf16.mxu1 %vm17167_vm0, %v17166_v1 }
 0x557   : > { %16147 = vmatprep.subr.bf16.mxu1 %v17166_v1 }
 0x55a   : > { %16148 = vmatpush3.bf16.msra.mxu1 %v16433_v25 }
 0x55b   : > { %16149 = vmatprep.subr.bf16.mxu1 %v17166_v1 }
 0x55e   : > { %16150 = vmatpush3.bf16.msra.mxu1 %v16434_v27 }
 0x55f   : > { %16151 = vmatprep.subr.bf16.mxu1 %v17166_v1 }
 0x562   : > { %16152 = vmatpush3.bf16.msra.mxu1 %v16435_v30 }
 0x563   : > { %16169 = vmatprep.subr.bf16.mxu1 %v17166_v1 }
 0x565   : > { %16154 = vmatmul.mubr.msk.bf16.vlgmr.msra.gmra.mrb[12].mxu1 %vm902_vm3, %v17376_v26 }
 0x566   : > { %16177 = vmatprep.mubr.msk.bf16.mxu1 %vm17167_vm0, %v17166_v1 }
 0x628   : > { %v1152_v33 = vpop.f32.mrb[8].mxu1 }
 0x629   : > { %v1153_v34 = vadd.f32 %v13179_v32, %v1152_v33  ;;  %v16131_v35 = vpop.f32.mrb[9].mxu1 }
 0x62a   : > { %v1155_v36 = vpop.f32.mrb[10].mxu1 }
 0x62b   : > { %v1156_v37 = vadd.f32 %v13179_v32, %v1155_v36  ;;  %v16132_v38 = vpop.f32.mrb[11].mxu1  ;;  %v1159_v39 = vadd.f32 %v1153_v34, %v17370_v23 }
 0x62d   : > { %v1163_v40 = vsel %vm902_vm3, %v1159_v39, 0.0  ;;  %v1160_v41 = vadd.f32 %v1156_v37, %v17372_v24 }
 0x62e   : > { %1164 = vadd.xlane.f32.xlu1 %v1163_v40 }
 0x62f   : > { %v1166_v42 = vsel %vm902_vm3, %v1160_v41, 0.0 }
 0x632   : > { %1167 = vadd.xlane.f32.xlu1 %v1166_v42 }
 0x638   : > { %v1363_v44 = vpop.f32.mrb[12].mxu1 }
 0x639   : > { %v16155_v45 = vpop.f32.mrb[13].mxu1  ;;  %v1364_v48 = vadd.f32 %v13193_v43, %v1363_v44 }
 0x63a   : > { %v1366_v46 = vpop.f32.mrb[14].mxu1 }
 0x63b   : > { %v1367_v49 = vadd.f32 %v13193_v43, %v1366_v46  ;;  %v16156_v50 = vpop.f32.mrb[15].mxu1 }
 0x63d   : > { %v17470_v52 = vpack.c.bf16 %v1367_v49, %v1364_v48 }
 0x63f   : > { %v1376_v20 = vsel %vm902_vm3, %v17470_v52, 0 }
 0x6bb   : > { %v1165_v23 = vpop.xlane.xlu1 %1164 }
 0x6bc   : > { %v1170_v53 = vmul.f32 0.015625, %v1165_v23 }
 0x6be   : > { %v1172_v54 = vsub.f32 %v1159_v39, %v1170_v53 }
 0x6bf   : > { %v1168_v24 = vpop.xlane.xlu1 %1167 }
 0x6c0   : > { %v1171_v55 = vmul.f32 0.015625, %v1168_v24  ;;  %v1174_v56 = vmul.f32 %v1172_v54, %v1172_v54 }
 0x6c2   : > { %v1173_v57 = vsub.f32 %v1160_v41, %v1171_v55  ;;  %v1176_v58 = vsel %vm902_vm3, %v1174_v56, 0.0  ;;  %v16441_v55 = vld [vmem:[%s20931_s12 + $0x8] sm:$0xff]   ;;  %v16442_v56 = vld [vmem:[%s20931_s12 + $0x10] sm:$0xff]  }
 0x6c3   : > { %1177 = vadd.xlane.f32.xlu1 %v1176_v58 }
 0x6c4   : > { %v1175_v59 = vmul.f32 %v1173_v57, %v1173_v57 }
 0x6c6   : > { %v1179_v60 = vsel %vm902_vm3, %v1175_v59, 0.0 }
 0x6c7   : > { %1180 = vadd.xlane.f32.xlu1 %v1179_v60 }
 0x750   : > { %v1178_v2 = vpop.xlane.xlu1 %1177 }
 0x751   : > { %v1182_v3 = vmul.f32 0.015625, %v1178_v2 }
 0x753   : > { %v1184_v4 = vadd.f32 1e-05, %v1182_v3 }
 0x754   : > { %v1181_v5 = vpop.xlane.xlu1 %1180 }
 0x755   : > { %17048 = vrsqrt.f32 %v1184_v4  ;;  %v1183_v6 = vmul.f32 0.015625, %v1181_v5 }
 0x757   : > { %v1185_v7 = vadd.f32 1e-05, %v1183_v6 }
 0x759   : > { %17050 = vrsqrt.f32 %v1185_v7  ;;  %v13201_v7 = vld [vmem:[%s20932_s13] ss:$0 sm:$0xff] }
 0x75f   : > { %v17049_v8 = vpop.eup %17048 }
 0x760   : > { %v1188_v9 = vmul.f32 %v17049_v8, %v1172_v54 }
 0x762   : > { %v1196_v12 = vmul.f32 %v13185_v10, %v1188_v9 }
 0x763   : > { %v17051_v11 = vpop.eup %17050 }
 0x764   : > { %v1189_v13 = vmul.f32 %v17051_v11, %v1173_v57  ;;  %v17496_v16 = vadd.f32 %v13186_v14, %v1196_v12 }
 0x766   : > { %v1197_v15 = vmul.f32 %v13185_v10, %v1189_v13 }
 0x768   : > { %v17498_v18 = vadd.f32 %v13186_v14, %v1197_v15 }
 0x76a   : > { %v1215_v19 = vpack.c.bf16 %v17498_v18, %v17496_v16 }
 0x76c   : > { %16142 = vmatmul.mubr.msk.bf16.vlgmr.msra.gmra.mrb[8].mxu0 %vm902_vm3, %v1215_v19 }
 0x76d   : > { %16158 = vmatpush3.bf16.xpose.msra.mxu0 %v1376_v20  ;;  %16159 = vmatprep.mubr.msk.bf16.mxu0 %vm17167_vm0, %v17166_v1 }
 0x76e   : > { %16163 = vmatprep.subr.bf16.mxu0 %v17166_v1 }
 0x83f   : > { %v1283_v22 = vpop.f32.mrb[8].mxu0 }
 0x840   : > { %v16143_v25 = vpop.f32.mrb[9].mxu0  ;;  %v1284_v30 = vadd.f32 %v13187_v21, %v1283_v22 }
 0x841   : > { %v1286_v27 = vpop.f32.mrb[10].mxu0 }
 0x842   : > { %v1287_v32 = vadd.f32 %v13187_v21, %v1286_v27  ;;  %v16144_v33 = vpop.f32.mrb[11].mxu0 }
 0x844   : > { %v1370_v34 = vpack.c.bf16 %v1287_v32, %v1284_v30 }
 0x846   : > { %16160 = vmatmul.mubr.msk.bf16.vlgmr.msra.gmra.mrb[12].mxu0 %vm902_vm3, %v1370_v34 }
 0x847   : > { %16165 = vmatprep.mubr.msk.bf16.mxu0 %vm17167_vm0, %v17166_v1 }
 0x919   : > { %v1412_v35 = vpop.f32.mrb[12].mxu0 }
 0x91a   : > { %v1419_v36 = vmul.f32 0.125, %v1412_v35  ;;  %v16161_v37 = vpop.f32.mrb[13].mxu0  ;;  %v1624_v35 = vld [vmem:[%s20939_s20] sm:$0xff] }
 0x91b   : > { %v1415_v38 = vpop.f32.mrb[14].mxu0  ;;  %v1625_v37 = vld [vmem:[%s20939_s20 + $0x8] sm:$0xff] }
 0x91c   : > { %v1420_v39 = vmul.f32 0.125, %v1415_v38  ;;  %v16162_v40 = vpop.f32.mrb[15].mxu0  ;;  %v1421_v41 = vadd.f32 %v1419_v36, %v17405_v47  ;;  %v1632_v36 = vld [vmem:[%s20939_s20 + $0x40] sm:$0xff] }
 0x91d   : > { %v13210_v38 = vcombine.high %v1624_v35, %v1632_v36  ;;  %v13209_v40 = vcombine.low %v1624_v35, %v1632_v36 }
 0x91e   : > { %v1423_v42 = vsel %vm1006_vm4, %v1421_v41, -inf  ;;  %v1422_v43 = vadd.f32 %v1420_v39, %v17410_v51  ;;  %v16440_v51 = vld [vmem:[%s20931_s12] sm:$0xff]   ;;  %v1633_v39 = vld [vmem:[%s20939_s20 + $0x48] sm:$0xff] }
 0x91f   : > { %1424 = vmax.xlane.f32.xlu1 %v1423_v42  ;;  %16170 = vmatpush3.bf16.msra.mxu1 %v16440_v51  ;;  %v13212_v42 = vcombine.high %v1625_v37, %v1633_v39  ;;  %v1665_v51 = vld [vmem:[%s20939_s20 + $0x148] sm:$0xff] }
 0x920   : > { %v1426_v44 = vsel %vm1006_vm4, %v1422_v43, -inf  ;;  %16171 = vmatprep.subr.bf16.mxu1 %v17166_v1 }
 0x923   : > { %1427 = vmax.xlane.f32.xlu1 %v1426_v44  ;;  %16172 = vmatpush3.bf16.msra.mxu1 %v16441_v55  ;;  %v1648_v44 = vld [vmem:[%s20939_s20 + $0xc0] sm:$0xff] }
 0x924   : > { %16173 = vmatprep.subr.bf16.mxu1 %v17166_v1 }
 0x927   : > { %16174 = vmatpush3.bf16.msra.mxu1 %v16442_v56 }
 0x928   : > { %16175 = vmatprep.subr.bf16.mxu1 %v17166_v1 }
 0x92b   : > { %16176 = vmatpush3.bf16.msra.mxu1 %v16443_v0 }
 0x92c   : > { %2139 = vmatprep.subr.bf16.mxu1 %v13212_v42  ;;  %v1659_v42 = vld [vmem:[%s20939_s20 + $0x118] sm:$0xff] }
 0x9ac   : > { %v1425_v45 = vpop.xlane.xlu1 %1424 }
 0x9ad   : > { %v1429_v46 = vsub.f32 %v1421_v41, %v1425_v45  ;;  %v13211_v41 = vcombine.low %v1625_v37, %v1633_v39  ;;  %v1641_v45 = vld [vmem:[%s20939_s20 + $0x88] sm:$0xff] }
 0x9af   : > { %v1431_v48 = vmul.f32 1.442695, %v1429_v46 }
 0x9b0   : > { %v1428_v49 = vpop.xlane.xlu1 %1427 }
 0x9b1   : > { %17052 = vpow2.f32 %v1431_v48  ;;  %v1430_v50 = vsub.f32 %v1422_v43, %v1428_v49  ;;  %v1640_v43 = vld [vmem:[%s20939_s20 + $0x80] sm:$0xff]  ;;  %v1649_v48 = vld [vmem:[%s20939_s20 + $0xc8] sm:$0xff] }
 0x9b2   : > { %v13226_v46 = vcombine.high %v1640_v43, %v1648_v44  ;;  %v13225_v49 = vcombine.low %v1640_v43, %v1648_v44  ;;  %v1667_v43 = vld [vmem:[%s20939_s20 + $0x158] sm:$0xff] }
 0x9b3   : > { %v1433_v23 = vmul.f32 1.442695, %v1430_v50  ;;  %v13227_v50 = vcombine.low %v1641_v45, %v1649_v48 }
 0x9b5   : > { %17054 = vpow2.f32 %v1433_v23  ;;  %v13228_v23 = vcombine.high %v1641_v45, %v1649_v48  ;;  %v13248_v48 = vcombine.high %v1659_v42, %v1667_v43 }
 0x9bb   : > { %v17053_v53 = vpop.eup %17052 }
 0x9bc   : > { %v1435_v54 = vsel %vm1006_vm4, %v17053_v53, 0.0 }
 0x9bd   : > { %1436 = vadd.xlane.f32.xlu0 %v1435_v54  ;;  %v1664_v54 = vld [vmem:[%s20939_s20 + $0x140] sm:$0xff] }
 0x9bf   : > { %v17055_v47 = vpop.eup %17054 }
 0x9c0   : > { %v1438_v24 = vsel %vm1006_vm4, %v17055_v47, 0.0 }
 0x9c1   : > { %1439 = vadd.xlane.f32.xlu1 %v1438_v24 }
 0x9d3   : > { %1447 = vrot.lane.b32.xlu0 %v17470_v52, %s20981_s0 }
 0xa4a   : > { %v1437_v52 = vpop.xlane.xlu0 %1436 }
 0xa4b   : > { %17056 = vrcp.f32 %v1437_v52 }
 0xa4e   : > { %v1448_v57 = vpop.permute.xlu0 %1447  ;;  %v1440_v58 = vpop.xlane.xlu1 %1439 }
 0xa4f   : > { %17058 = vrcp.f32 %v1440_v58  ;;  %16164 = vmatpush3.bf16.msra.mxu0 %v1448_v57  ;;  %v1672_v57 = vld [vmem:[%s20939_s20 + $0x180] sm:$0xff] }
 0xa50   : > { %2096 = vmatprep.subr.bf16.mxu0 %v13210_v38  ;;  %v1680_v58 = vld [vmem:[%s20939_s20 + $0x1c0] sm:$0xff] }
 0xa55   : > { %v17057_v59 = vpop.eup %17056 }
 0xa56   : > { %v1443_v61 = vmul.f32 %v17057_v59, %v17053_v53  ;;  %v1656_v53 = vld [vmem:[%s20939_s20 + $0x100] sm:$0xff]  ;;  %v1673_v59 = vld [vmem:[%s20939_s20 + $0x188] sm:$0xff] }
 0xa57   : > { %v13242_v24 = vcombine.high %v1656_v53, %v1664_v54  ;;  %v13241_v55 = vcombine.low %v1656_v53, %v1664_v54  ;;  %v1683_v53 = vld [vmem:[%s20939_s20 + $0x1d8] sm:$0xff] }
 0xa59   : > { %v17059_v60 = vpop.eup %17058 }
 0xa5a   : > { %v1444_v62 = vmul.f32 %v17059_v60, %v17055_v47  ;;  %v1657_v47 = vld [vmem:[%s20939_s20 + $0x108] sm:$0xff]  ;;  %v13258_v60 = vcombine.high %v1672_v57, %v1680_v58 }
 0xa5b   : > { %v13243_v56 = vcombine.low %v1657_v47, %v1665_v51  ;;  %v13244_v52 = vcombine.high %v1657_v47, %v1665_v51  ;;  %v13247_v47 = vcombine.low %v1659_v42, %v1667_v43  ;;  %v1654_v42 = vld [vmem:[%s20939_s20 + $0xf0] sm:$0xff]  ;;  %v1647_v43 = vld [vmem:[%s20939_s20 + $0xb8] sm:$0xff] }
 0xa5c   : > { %v1445_v63 = vpack.c.bf16 %v1444_v62, %v1443_v61  ;;  %v1681_v61 = vld [vmem:[%s20939_s20 + $0x1c8] sm:$0xff]  ;;  %v13257_v62 = vcombine.low %v1672_v57, %v1680_v58 }
 0xa5d   : > { %v13260_v0 = vcombine.high %v1673_v59, %v1681_v61  ;;  %v1637_v57 = vld [vmem:[%s20939_s20 + $0x68] sm:$0xff] }
 0xa5e   : > { %16166 = vmatmul.mubr.msk.bf16.vlgmr.msra.gmra.mrb[16].mxu0 %vm1006_vm4, %v1445_v63  ;;  %v13259_v63 = vcombine.low %v1673_v59, %v1681_v61 }
 0xa5f   : > { %2128 = vmatprep.mubr.bf16.mxu0 %v17168_v17  ;;  %2097 = vmatpush1.bf16.msra.mxu0 %v13209_v40  ;;  %v1658_v40 = vld [vmem:[%s20939_s20 + $0x110] sm:$0xff] }
 0xa60   : > { %2098 = vmatprep.subr.bf16.mxu0 %v13226_v46 }
 0xa63   : > { %2099 = vmatpush1.bf16.msra.mxu0 %v13225_v49  ;;  %v1674_v49 = vld [vmem:[%s20939_s20 + $0x190] sm:$0xff] }
 0xa64   : > { %2100 = vmatprep.subr.bf16.mxu0 %v13242_v24 }
 0xa67   : > { %2101 = vmatpush1.bf16.msra.mxu0 %v13241_v55  ;;  %v1628_v55 = vld [vmem:[%s20939_s20 + $0x20] sm:$0xff] }
 0xa68   : > { %2102 = vmatprep.subr.bf16.mxu0 %v13258_v60 }
 0xa6b   : > { %2103 = vmatpush1.bf16.msra.mxu0 %v13257_v62  ;;  %v1644_v62 = vld [vmem:[%s20939_s20 + $0xa0] sm:$0xff] }
 0xb31   : > { %v1487_v2 = vpop.f32.mrb[16].mxu0 }
 0xb32   : > { %v16167_v3 = vpop.f32.mrb[17].mxu0 }
 0xb33   : > { %v1490_v4 = vpop.f32.mrb[18].mxu0  ;;  %v1634_v3 = vld [vmem:[%s20939_s20 + $0x50] sm:$0xff] }
 0xb34   : > { %v1503_v5 = vpack.c.bf16 %v1490_v4, %v1487_v2  ;;  %v16168_v6 = vpop.f32.mrb[19].mxu0  ;;  %v1626_v2 = vld [vmem:[%s20939_s20 + $0x10] sm:$0xff]  ;;  %v1627_v4 = vld [vmem:[%s20939_s20 + $0x18] sm:$0xff] }
 0xb35   : > { %v13214_v6 = vcombine.high %v1626_v2, %v1634_v3 }
 0xb36   : > { %16178 = vmatmul.mubr.msk.bf16.vlgmr.msra.gmra.mrb[16].mxu1 %vm902_vm3, %v1503_v5  ;;  %v13213_v5 = vcombine.low %v1626_v2, %v1634_v3  ;;  %v1653_v2 = vld [vmem:[%s20939_s20 + $0xe8] sm:$0xff] }
 0xb37   : > { %2171 = vmatprep.mubr.bf16.mxu1 %v17168_v17  ;;  %2140 = vmatpush1.bf16.msra.mxu1 %v13211_v41  ;;  %v1666_v41 = vld [vmem:[%s20939_s20 + $0x150] sm:$0xff] }
 0xb38   : > { %2141 = vmatprep.subr.bf16.mxu1 %v13228_v23  ;;  %2182 = vmatprep.subr.bf16.mxu0 %v13214_v6  ;;  %v13246_v46 = vcombine.high %v1658_v40, %v1666_v41  ;;  %v1675_v23 = vld [vmem:[%s20939_s20 + $0x198] sm:$0xff]  ;;  %v13245_v54 = vcombine.low %v1658_v40, %v1666_v41  ;;  %v1646_v41 = vld [vmem:[%s20939_s20 + $0xb0] sm:$0xff] }
 0xb39   : > { %v13264_v51 = vcombine.high %v1675_v23, %v1683_v53  ;;  %v13263_v59 = vcombine.low %v1675_v23, %v1683_v53  ;;  %v1670_v23 = vld [vmem:[%s20939_s20 + $0x170] sm:$0xff]  ;;  %v1663_v53 = vld [vmem:[%s20939_s20 + $0x138] sm:$0xff] }
 0xb3b   : > { %2142 = vmatpush1.bf16.msra.mxu1 %v13227_v50  ;;  %v1682_v50 = vld [vmem:[%s20939_s20 + $0x1d0] sm:$0xff] }
 0xb3c   : > { %2143 = vmatprep.subr.bf16.mxu1 %v13244_v52  ;;  %v13262_v24 = vcombine.high %v1674_v49, %v1682_v50  ;;  %v1629_v52 = vld [vmem:[%s20939_s20 + $0x28] sm:$0xff]  ;;  %v13261_v58 = vcombine.low %v1674_v49, %v1682_v50  ;;  %v1662_v50 = vld [vmem:[%s20939_s20 + $0x130] sm:$0xff] }
 0xb3d   : > { %v13220_v61 = vcombine.high %v1629_v52, %v1637_v57 }
 0xb3f   : > { %2144 = vmatpush1.bf16.msra.mxu1 %v13243_v56  ;;  %v1636_v56 = vld [vmem:[%s20939_s20 + $0x60] sm:$0xff] }
 0xb40   : > { %2145 = vmatprep.subr.bf16.mxu1 %v13260_v0  ;;  %v13218_v60 = vcombine.high %v1628_v55, %v1636_v56  ;;  %v1645_v0 = vld [vmem:[%s20939_s20 + $0xa8] sm:$0xff]  ;;  %v13217_v3 = vcombine.low %v1628_v55, %v1636_v56  ;;  %v1678_v56 = vld [vmem:[%s20939_s20 + $0x1b0] sm:$0xff] }
 0xb41   : > { %v13236_v6 = vcombine.high %v1645_v0, %v1653_v2 }
 0xb43   : > { %2146 = vmatpush1.bf16.msra.mxu1 %v13259_v63  ;;  %v1652_v63 = vld [vmem:[%s20939_s20 + $0xe0] sm:$0xff] }
 0xc09   : > { %v1571_v8 = vpop.f32.mrb[16].mxu1 }
 0xc0a   : > { %v1572_v9 = vadd.f32 %v13201_v7, %v1571_v8  ;;  %v16179_v10 = vpop.f32.mrb[17].mxu1 }
 0xc0b   : > { %v1574_v11 = vpop.f32.mrb[18].mxu1 }
 0xc0c   : > { %v1575_v12 = vadd.f32 %v13201_v7, %v1574_v11  ;;  %v16180_v13 = vpop.f32.mrb[19].mxu1  ;;  %v1578_v14 = vadd.f32 %v1572_v9, %v17496_v16  ;;  %v1635_v7 = vld [vmem:[%s20939_s20 + $0x58] sm:$0xff] }
 0xc0d   : > { %v13215_v8 = vcombine.low %v1627_v4, %v1635_v7  ;;  %v13216_v9 = vcombine.high %v1627_v4, %v1635_v7  ;;  %v13219_v4 = vcombine.low %v1629_v52, %v1637_v57  ;;  %v1660_v7 = vld [vmem:[%s20939_s20 + $0x120] sm:$0xff]  ;;  %v1686_v52 = vld [vmem:[%s20939_s20 + $0x1f0] sm:$0xff]  ;;  %v1679_v57 = vld [vmem:[%s20939_s20 + $0x1b8] sm:$0xff] }
 0xc0e   : > { %v1582_v15 = vsel %vm902_vm3, %v1578_v14, 0.0  ;;  %v1579_v19 = vadd.f32 %v1575_v12, %v17498_v18 }
 0xc0f   : > { %1583 = vadd.xlane.f32.xlu1 %v1582_v15  ;;  %2225 = vmatprep.subr.bf16.mxu1 %v13216_v9  ;;  %v1661_v9 = vld [vmem:[%s20939_s20 + $0x128] sm:$0xff] }
 0xc10   : > { %v1585_v20 = vsel %vm902_vm3, %v1579_v19, 0.0 }
 0xc13   : > { %1586 = vadd.xlane.f32.xlu1 %v1585_v20 }
 0xc9c   : > { %v1584_v21 = vpop.xlane.xlu1 %1583 }
 0xc9d   : > { %v1588_v22 = vmul.f32 0.015625, %v1584_v21  ;;  %v13207_v21 = vld [vmem:[%s20982_s16] ss:$0 sm:$0xff]  ;;  %s20983_s16 = sld [smem:[#allocation13_spill]] }
 0xc9f   : > { %v17548_v25 = vsub.f32 %v1578_v14, %v1588_v22 }
 0xca0   : > { %v1587_v27 = vpop.xlane.xlu1 %1586 }
 0xca1   : > { %v1589_v30 = vmul.f32 0.015625, %v1587_v27  ;;  %v1592_v32 = vmul.f32 %v17548_v25, %v17548_v25 }
 0xca3   : > { %v17552_v33 = vsub.f32 %v1579_v19, %v1589_v30  ;;  %v1594_v16 = vsel %vm902_vm3, %v1592_v32, 0.0  ;;  %v13208_v32 = vld [vmem:[%s20936_s17] ss:$0 sm:$0xff] }
 0xca4   : > { %1595 = vadd.xlane.f32.xlu1 %v1594_v16 }
 0xca5   : > { %v1593_v18 = vmul.f32 %v17552_v33, %v17552_v33 }
 0xca7   : > { %v1597_v34 = vsel %vm902_vm3, %v1593_v18, 0.0  ;;  %v1642_v18 = vld [vmem:[%s20939_s20 + $0x90] sm:$0xff] }
 0xca8   : > { %1598 = vadd.xlane.f32.xlu1 %v1597_v34  ;;  %v1643_v34 = vld [vmem:[%s20939_s20 + $0x98] sm:$0xff] }
 0xd31   : > { %v1596_v10 = vpop.xlane.xlu1 %1595 }
 0xd32   : > { %v1600_v11 = vmul.f32 0.015625, %v1596_v10  ;;  %v1669_v10 = vld [vmem:[%s20939_s20 + $0x168] sm:$0xff] }
 0xd34   : > { %v1602_v12 = vadd.f32 1e-05, %v1600_v11  ;;  %v13233_v11 = vcombine.low %v1644_v62, %v1652_v63 }
 0xd35   : > { %v1599_v13 = vpop.xlane.xlu1 %1598 }
 0xd36   : > { %17060 = vrsqrt.f32 %v1602_v12  ;;  %v1601_v14 = vmul.f32 0.015625, %v1599_v13  ;;  %v13235_v12 = vcombine.low %v1645_v0, %v1653_v2  ;;  %v16444_v2 = vld [vmem:[%s20941_s22 + $0x40] sm:$0xff]  }
 0xd38   : > { %v1603_v15 = vadd.f32 1e-05, %v1601_v14  ;;  %v13252_v14 = vcombine.high %v1661_v9, %v1669_v10 }
 0xd3a   : > { %17062 = vrsqrt.f32 %v1603_v15  ;;  %v1676_v15 = vld [vmem:[%s20939_s20 + $0x1a0] sm:$0xff] }
 0xd40   : > { %v17061_v19 = vpop.eup %17060 }
 0xd41   : > { %v1606_v20 = vmul.f32 %v17061_v19, %v17548_v25  ;;  %v1650_v25 = vld [vmem:[%s20939_s20 + $0xd0] sm:$0xff]  ;;  %v1684_v19 = vld [vmem:[%s20939_s20 + $0x1e0] sm:$0xff] }
 0xd42   : > { %v13230_v38 = vcombine.high %v1642_v18, %v1650_v25  ;;  %v13229_v44 = vcombine.low %v1642_v18, %v1650_v25  ;;  %v1638_v18 = vld [vmem:[%s20939_s20 + $0x70] sm:$0xff]  ;;  %v1631_v25 = vld [vmem:[%s20939_s20 + $0x38] sm:$0xff] }
 0xd43   : > { %v1614_v27 = vmul.f32 %v13207_v21, %v1606_v20  ;;  %v1677_v20 = vld [vmem:[%s20939_s20 + $0x1a8] sm:$0xff] }
 0xd44   : > { %v17063_v22 = vpop.eup %17062 }
 0xd45   : > { %v1607_v30 = vmul.f32 %v17063_v22, %v17552_v33  ;;  %v1651_v33 = vld [vmem:[%s20939_s20 + $0xd8] sm:$0xff]  ;;  %v17638_v35 = vadd.f32 %v13208_v32, %v1614_v27  ;;  %v13251_v27 = vcombine.low %v1661_v9, %v1669_v10  ;;  %v16451_v9 = vld [vmem:[%s20941_s22 + $0x88] sm:$0xff]   ;;  %v16452_v10 = vld [vmem:[%s20941_s22 + $0x50] sm:$0xff]  }
 0xd46   : > { %v13232_v39 = vcombine.high %v1643_v34, %v1651_v33  ;;  %v13231_v45 = vcombine.low %v1643_v34, %v1651_v33  ;;  %v1639_v34 = vld [vmem:[%s20939_s20 + $0x78] sm:$0xff]  ;;  %v13265_v33 = vcombine.low %v1676_v15, %v1684_v19 }
 0xd47   : > { %v1615_v16 = vmul.f32 %v13207_v21, %v1607_v30  ;;  %v1685_v21 = vld [vmem:[%s20939_s20 + $0x1e8] sm:$0xff]  ;;  %v13266_v30 = vcombine.high %v1676_v15, %v1684_v19  ;;  %v13224_v40 = vcombine.high %v1631_v25, %v1639_v34  ;;  %v16458_v15 = vld [vmem:[%s20941_s22 + $0x18] sm:$0xff]  }
 0xd48   : > { %v16459_v19 = vld [vmem:[%s20941_s22 + $0x98] sm:$0xff]  }
 0xd49   : > { %v17640_v36 = vadd.f32 %v13208_v32, %v1615_v16  ;;  %v13268_v32 = vcombine.high %v1677_v20, %v1685_v21  ;;  %v1630_v16 = vld [vmem:[%s20939_s20 + $0x30] sm:$0xff] }
 0xd4b   : > { %v17644_v37 = vpack.c.bf16 %v17640_v36, %v17638_v35 }
 0xd4d   : > { %13273 = vmatmul.mubr.msk.bf16.vlgmr.msra.gmra.mrb[20].mxu0 %vm902_vm3, %v17644_v37  ;;  %13274 = vmatmul.mubr.msk.bf16.vlgmr.msra.gmra.mrb[20].mxu1 %vm902_vm3, %v17644_v37 }
 0xd4e   : > { %2183 = vmatpush1.bf16.msra.mxu0 %v13213_v5  ;;  %2226 = vmatpush1.bf16.msra.mxu1 %v13215_v8  ;;  %v13234_v5 = vcombine.high %v1644_v62, %v1652_v63  ;;  %v1668_v8 = vld [vmem:[%s20939_s20 + $0x160] sm:$0xff]  ;;  %v13269_v63 = vcombine.low %v1678_v56, %v1686_v52 }
 0xd4f   : > { %2184 = vmatprep.subr.bf16.mxu0 %v13230_v38  ;;  %2227 = vmatprep.subr.bf16.mxu1 %v13232_v39  ;;  %v13250_v13 = vcombine.high %v1660_v7, %v1668_v8  ;;  %v13249_v22 = vcombine.low %v1660_v7, %v1668_v8  ;;  %v13267_v38 = vcombine.low %v1677_v20, %v1685_v21  ;;  %v16449_v7 = vld [vmem:[%s20941_s22 + $0xc8] sm:$0xff]   ;;  %v16460_v20 = vld [vmem:[%s20941_s22 + $0x60] sm:$0xff]  }
 0xd50   : > { %2214 = vmatprep.mubr.bf16.mxu0 %v17168_v17  ;;  %2257 = vmatprep.mubr.bf16.mxu1 %v17168_v17  ;;  %v13222_v39 = vcombine.high %v1630_v16, %v1638_v18  ;;  %v16450_v8 = vld [vmem:[%s20941_s22 + $0x8] sm:$0xff]   ;;  %v16461_v21 = vld [vmem:[%s20941_s22 + $0xe0] sm:$0xff]  }
 0xd52   : > { %2185 = vmatpush1.bf16.msra.mxu0 %v13229_v44  ;;  %2228 = vmatpush1.bf16.msra.mxu1 %v13231_v45  ;;  %v1655_v44 = vld [vmem:[%s20939_s20 + $0xf8] sm:$0xff]  ;;  %v13221_v45 = vcombine.low %v1630_v16, %v1638_v18  ;;  %v16466_v16 = vld [vmem:[%s20941_s22 + $0x28] sm:$0xff]  }
 0xd53   : > { %2186 = vmatprep.subr.bf16.mxu0 %v13246_v46  ;;  %2229 = vmatprep.subr.bf16.mxu1 %v13248_v48  ;;  %v13223_v46 = vcombine.low %v1631_v25, %v1639_v34  ;;  %v13238_v48 = vcombine.high %v1646_v41, %v1654_v42  ;;  %v13240_v49 = vcombine.high %v1647_v43, %v1655_v44  ;;  %v16467_v18 = vld [vmem:[%s20941_s22 + $0xa8] sm:$0xff]   ;;  %v16468_v25 = vld [vmem:[%s20941_s22 + $0x70] sm:$0xff]  }
 0xd54   : > { %v16469_v34 = vld [vmem:[%s20941_s22 + $0xf0] sm:$0xff]  }
 0xd56   : > { %2187 = vmatpush1.bf16.msra.mxu0 %v13245_v54  ;;  %2230 = vmatpush1.bf16.msra.mxu1 %v13247_v47  ;;  %v1671_v54 = vld [vmem:[%s20939_s20 + $0x178] sm:$0xff]  ;;  %v13237_v47 = vcombine.low %v1646_v41, %v1654_v42 }
 0xd57   : > { %2188 = vmatprep.subr.bf16.mxu0 %v13262_v24  ;;  %2231 = vmatprep.subr.bf16.mxu1 %v13264_v51  ;;  %v13239_v24 = vcombine.low %v1647_v43, %v1655_v44  ;;  %v13254_v51 = vcombine.high %v1662_v50, %v1670_v23  ;;  %v13256_v55 = vcombine.high %v1663_v53, %v1671_v54  ;;  %v16474_v41 = vld [vmem:[%s20941_s22 + $0x38] sm:$0xff]   ;;  %v16476_v43 = vld [vmem:[%s20941_s22 + $0x140] sm:$0xff]  }
 0xd58   : > { %v16475_v42 = vld [vmem:[%s20941_s22 + $0xb8] sm:$0xff]   ;;  %v16477_v44 = vld [vmem:[%s20941_s22 + $0x1c0] sm:$0xff]  }
 0xd5a   : > { %2189 = vmatpush1.bf16.msra.mxu0 %v13261_v58  ;;  %2232 = vmatpush1.bf16.msra.mxu1 %v13263_v59  ;;  %v1687_v58 = vld [vmem:[%s20939_s20 + $0x1f8] sm:$0xff]  ;;  %v13253_v59 = vcombine.low %v1662_v50, %v1670_v23 }
 0xd5b   : > { %2268 = vmatprep.subr.bf16.mxu0 %v13218_v60  ;;  %2311 = vmatprep.subr.bf16.mxu1 %v13220_v61  ;;  %v13255_v60 = vcombine.low %v1663_v53, %v1671_v54  ;;  %v13270_v61 = vcombine.high %v1678_v56, %v1686_v52  ;;  %v13272_v62 = vcombine.high %v1679_v57, %v1687_v58 }
 0xd5c   : > { %v13271_v0 = vcombine.low %v1679_v57, %v1687_v58 }
 0xd5d   : > { %13275 = vmatmul.mubr.msk.bf16.vlgmr.msra.gmra.mrb[24].mxu0 %vm902_vm3, %v17644_v37  ;;  %13276 = vmatmul.mubr.msk.bf16.vlgmr.msra.gmra.mrb[24].mxu1 %vm902_vm3, %v17644_v37 }
 0xd5e   : > { %2269 = vmatpush1.bf16.msra.mxu0 %v13217_v3  ;;  %2312 = vmatpush1.bf16.msra.mxu1 %v13219_v4  ;;  %v16445_v3 = vld [vmem:[%s20941_s22 + $0xc0] sm:$0xff]  }
 0xd5f   : > { %2270 = vmatprep.subr.bf16.mxu0 %v13234_v5  ;;  %2313 = vmatprep.subr.bf16.mxu1 %v13236_v6  ;;  %v16446_v4 = vld [vmem:[%s20941_s22] sm:$0xff]   ;;  %v16448_v6 = vld [vmem:[%s20941_s22 + $0x48] sm:$0xff]  }
 0xd60   : > { %2300 = vmatprep.mubr.bf16.mxu0 %v17168_v17  ;;  %2343 = vmatprep.mubr.bf16.mxu1 %v17168_v17  ;;  %v16447_v5 = vld [vmem:[%s20941_s22 + $0x80] sm:$0xff]  }
 0xd62   : > { %2271 = vmatpush1.bf16.msra.mxu0 %v13233_v11  ;;  %2314 = vmatpush1.bf16.msra.mxu1 %v13235_v12  ;;  %v16454_v11 = vld [vmem:[%s20941_s22 + $0x10] sm:$0xff]  }
 0xd63   : > { %2272 = vmatprep.subr.bf16.mxu0 %v13250_v13  ;;  %2315 = vmatprep.subr.bf16.mxu1 %v13252_v14  ;;  %v16455_v12 = vld [vmem:[%s20941_s22 + $0x90] sm:$0xff]   ;;  %v16456_v13 = vld [vmem:[%s20941_s22 + $0x58] sm:$0xff]  }
 0xd64   : > { %v16457_v14 = vld [vmem:[%s20941_s22 + $0xd8] sm:$0xff]  }
 0xd66   : > { %2273 = vmatpush1.bf16.msra.mxu0 %v13249_v22  ;;  %2316 = vmatpush1.bf16.msra.mxu1 %v13251_v27  ;;  %v16462_v22 = vld [vmem:[%s20941_s22 + $0x20] sm:$0xff]  }
 0xd67   : > { %2274 = vmatprep.subr.bf16.mxu0 %v13266_v30  ;;  %2317 = vmatprep.subr.bf16.mxu1 %v13268_v32  ;;  %v16463_v27 = vld [vmem:[%s20941_s22 + $0xa0] sm:$0xff]   ;;  %v16464_v30 = vld [vmem:[%s20941_s22 + $0x68] sm:$0xff]  }
 0xd68   : > { %v16465_v32 = vld [vmem:[%s20941_s22 + $0xe8] sm:$0xff]  }
 0xd6a   : > { %2275 = vmatpush1.bf16.msra.mxu0 %v13265_v33  ;;  %2318 = vmatpush1.bf16.msra.mxu1 %v13267_v38  ;;  %v16470_v33 = vld [vmem:[%s20941_s22 + $0x30] sm:$0xff]  }
 0xd6b   : > { %2354 = vmatprep.subr.bf16.mxu0 %v13222_v39  ;;  %2397 = vmatprep.subr.bf16.mxu1 %v13224_v40  ;;  %v16471_v38 = vld [vmem:[%s20941_s22 + $0xb0] sm:$0xff]   ;;  %v16472_v39 = vld [vmem:[%s20941_s22 + $0x78] sm:$0xff]  }
 0xd6c   : > { %v16473_v40 = vld [vmem:[%s20941_s22 + $0xf8] sm:$0xff]  }
 0xd6d   : > { %13277 = vmatmul.mubr.msk.bf16.vlgmr.msra.gmra.mrb[28].mxu0 %vm902_vm3, %v17644_v37  ;;  %13278 = vmatmul.mubr.msk.bf16.vlgmr.msra.gmra.mrb[28].mxu1 %vm902_vm3, %v17644_v37 }
 0xd6e   : > { %2355 = vmatpush1.bf16.msra.mxu0 %v13221_v45  ;;  %2398 = vmatpush1.bf16.msra.mxu1 %v13223_v46  ;;  %v17891_v45 = vsub.s32 2, %v17382_v28  ;;  %v1688_v46 = vld [vmem:[%s20940_s21] sm:$0xff] }
 0xd6f   : > { %2356 = vmatprep.subr.bf16.mxu0 %v13238_v48  ;;  %2399 = vmatprep.subr.bf16.mxu1 %v13240_v49  ;;  %v17897_v48 = vsub.s32 3, %v17382_v28  ;;  %v1696_v49 = vrot.slane %v1688_v46, %v17385_v29  ;;  %v1700_v23 = vrot.slane %v1688_v46, %v17391_v31 }
 0xd70   : > { %2386 = vmatprep.mubr.bf16.mxu0 %v17168_v17  ;;  %2429 = vmatprep.mubr.bf16.mxu1 %v17168_v17  ;;  %v1704_v50 = vrot.slane %v1688_v46, %v17891_v45 }
 0xd71   : > { %v1708_v53 = vrot.slane %v1688_v46, %v17897_v48 }
 0xd72   : > { %2357 = vmatpush1.bf16.msra.mxu0 %v13237_v47  ;;  %2400 = vmatpush1.bf16.msra.mxu1 %v13239_v24 }
 0xd73   : > { %2358 = vmatprep.subr.bf16.mxu0 %v13254_v51  ;;  %2401 = vmatprep.subr.bf16.mxu1 %v13256_v55 }
 0xd76   : > { %2359 = vmatpush1.bf16.msra.mxu0 %v13253_v59  ;;  %2402 = vmatpush1.bf16.msra.mxu1 %v13255_v60 }
 0xd77   : > { %2360 = vmatprep.subr.bf16.mxu0 %v13270_v61  ;;  %2403 = vmatprep.subr.bf16.mxu1 %v13272_v62 }
 0xd7a   : > { %2361 = vmatpush1.bf16.msra.mxu0 %v13269_v63  ;;  %2404 = vmatpush1.bf16.msra.mxu1 %v13271_v0 }
 0xd7b   : > { %15305 = vmatprep.subr.bf16.mxu0 %v16444_v2  ;;  %15327 = vmatprep.subr.bf16.mxu1 %v16445_v3 }
 0xd7d   : > { %13279 = vmatmul.mubr.msk.bf16.vlgmr.msra.gmra.mrb[32].mxu0 %vm902_vm3, %v17644_v37  ;;  %13280 = vmatmul.mubr.msk.bf16.vlgmr.msra.gmra.mrb[32].mxu1 %vm902_vm3, %v17644_v37  ;;  %v16453_v37 = vld [vmem:[%s20941_s22 + $0xd0] sm:$0xff]  }
 0xd7e   : > { %15306 = vmatpush3.bf16.msra.mxu0 %v16446_v4  ;;  %15328 = vmatpush3.bf16.msra.mxu1 %v16447_v5 }
 0xd7f   : > { %15307 = vmatprep.subr.bf16.mxu0 %v16448_v6  ;;  %15329 = vmatprep.subr.bf16.mxu1 %v16449_v7 }
 0xd82   : > { %15308 = vmatpush3.bf16.msra.mxu0 %v16450_v8  ;;  %15330 = vmatpush3.bf16.msra.mxu1 %v16451_v9 }
 0xd83   : > { %15309 = vmatprep.subr.bf16.mxu0 %v16452_v10  ;;  %15331 = vmatprep.subr.bf16.mxu1 %v16453_v37 }
 0xd86   : > { %15310 = vmatpush3.bf16.msra.mxu0 %v16454_v11  ;;  %15332 = vmatpush3.bf16.msra.mxu1 %v16455_v12 }
 0xd87   : > { %15311 = vmatprep.subr.bf16.mxu0 %v16456_v13  ;;  %15333 = vmatprep.subr.bf16.mxu1 %v16457_v14  ;;  %v16478_v14 = vld [vmem:[%s20941_s22 + $0x100] sm:$0xff]  }
 0xd8a   : > { %15312 = vmatpush3.bf16.msra.mxu0 %v16458_v15  ;;  %15334 = vmatpush3.bf16.msra.mxu1 %v16459_v19  ;;  %v16479_v15 = vld [vmem:[%s20941_s22 + $0x180] sm:$0xff]   ;;  %v16480_v19 = vld [vmem:[%s20941_s22 + $0x148] sm:$0xff]  }
 0xd8b   : > { %15313 = vmatprep.subr.bf16.mxu0 %v16460_v20  ;;  %15335 = vmatprep.subr.bf16.mxu1 %v16461_v21  ;;  %v16481_v20 = vld [vmem:[%s20941_s22 + $0x1c8] sm:$0xff]   ;;  %v17916_v21 = vsub.s32 4, %v17382_v28 }
 0xd8e   : > { %15314 = vmatpush3.bf16.msra.mxu0 %v16462_v22  ;;  %15336 = vmatpush3.bf16.msra.mxu1 %v16463_v27  ;;  %v17919_v22 = vsub.s32 6, %v17382_v28  ;;  %v17922_v27 = vsub.s32 5, %v17382_v28 }
 0xd8f   : > { %15315 = vmatprep.subr.bf16.mxu0 %v16464_v30  ;;  %15337 = vmatprep.subr.bf16.mxu1 %v16465_v32  ;;  %v17925_v30 = vsub.s32 7, %v17382_v28  ;;  %v16482_v32 = vld [vmem:[%s20941_s22 + $0x108] sm:$0xff]   ;;  %v16484_v28 = vld [vmem:[%s20941_s22 + $0x150] sm:$0xff]  }
 0xd92   : > { %15316 = vmatpush3.bf16.msra.mxu0 %v16466_v16  ;;  %15338 = vmatpush3.bf16.msra.mxu1 %v16467_v18  ;;  %v16483_v16 = vld [vmem:[%s20941_s22 + $0x188] sm:$0xff]   ;;  %v1712_v18 = vrot.slane %v1688_v46, %v17916_v21 }
 0xd93   : > { %15317 = vmatprep.subr.bf16.mxu0 %v16468_v25  ;;  %15339 = vmatprep.subr.bf16.mxu1 %v16469_v34  ;;  %v1720_v25 = vrot.slane %v1688_v46, %v17919_v22  ;;  %v16485_v34 = vld [vmem:[%s20941_s22 + $0x1d0] sm:$0xff]  }
 0xd96   : > { %15318 = vmatpush3.bf16.msra.mxu0 %v16470_v33  ;;  %15340 = vmatpush3.bf16.msra.mxu1 %v16471_v38  ;;  %v1716_v33 = vrot.slane %v1688_v46, %v17922_v27  ;;  %v1724_v38 = vrot.slane %v1688_v46, %v17925_v30  ;;  %v16488_v46 = vld [vmem:[%s20941_s22 + $0x158] sm:$0xff]  }
 0xd97   : > { %15319 = vmatprep.subr.bf16.mxu0 %v16472_v39  ;;  %15341 = vmatprep.subr.bf16.mxu1 %v16473_v40 }
 0xd9a   : > { %15320 = vmatpush3.bf16.msra.mxu0 %v16474_v41  ;;  %15342 = vmatpush3.bf16.msra.mxu1 %v16475_v42  ;;  %v16486_v41 = vld [vmem:[%s20941_s22 + $0x110] sm:$0xff]  }
 0xd9b   : > { %15349 = vmatprep.subr.bf16.mxu0 %v16476_v43  ;;  %15371 = vmatprep.subr.bf16.mxu1 %v16477_v44  ;;  %v16487_v42 = vld [vmem:[%s20941_s22 + $0x190] sm:$0xff]  }
 0xe20   : > { %v2130_v54 = vpop.f32.mrb[20].mxu0  ;;  %v2173_v47 = vpop.f32.mrb[20].mxu1 }
 0xe21   : > { %v2131_v24 = vadd.f32 %v2130_v54, %v1696_v49  ;;  %v2174_v51 = vadd.f32 %v2173_v47, %v1704_v50  ;;  %v2132_v55 = vpop.f32.mrb[21].mxu0  ;;  %v2175_v56 = vpop.f32.mrb[21].mxu1 }
 0xe22   : > { %v2133_v52 = vadd.f32 %v2132_v55, %v1700_v23  ;;  %v2176_v57 = vadd.f32 %v2175_v56, %v1708_v53  ;;  %v2134_v58 = vpop.f32.mrb[22].mxu0  ;;  %v2177_v59 = vpop.f32.mrb[22].mxu1 }
 0xe23   : > { %v2135_v60 = vadd.f32 %v2134_v58, %v1696_v49  ;;  %v2178_v61 = vadd.f32 %v2177_v59, %v1704_v50  ;;  %v2136_v62 = vpop.f32.mrb[23].mxu0  ;;  %v2179_v63 = vpop.f32.mrb[23].mxu1  ;;  %v2440_v3 = vmax.f32 %v2131_v24, 0.0  ;;  %v2442_v4 = vmax.f32 %v2174_v51, 0.0  ;;  %v16490_v59 = vld [vmem:[%s20941_s22 + $0x118] sm:$0xff]  }
 0xe24   : > { %v2137_v0 = vadd.f32 %v2136_v62, %v1700_v23  ;;  %v2180_v2 = vadd.f32 %v2179_v63, %v1708_v53  ;;  %v2441_v7 = vmax.f32 %v2133_v52, 0.0  ;;  %v2443_v8 = vmax.f32 %v2176_v57, 0.0  ;;  %v16489_v23 = vld [vmem:[%s20941_s22 + $0x1d8] sm:$0xff]  }
 0xe25   : > { %v2456_v5 = vmax.f32 %v2135_v60, 0.0  ;;  %v2458_v6 = vmax.f32 %v2178_v61, 0.0  ;;  %v16491_v60 = vld [vmem:[%s20941_s22 + $0x198] sm:$0xff]  }
 0xe26   : > { %v2457_v9 = vmax.f32 %v2137_v0, 0.0  ;;  %v2459_v10 = vmax.f32 %v2180_v2, 0.0  ;;  %v16492_v2 = vld [vmem:[%s20941_s22 + $0x160] sm:$0xff]  }
 0xe27   : > { %v2472_v37 = vpack.c.bf16 %v2456_v5, %v2440_v3  ;;  %v2474_v11 = vpack.c.bf16 %v2458_v6, %v2442_v4  ;;  %v16493_v3 = vld [vmem:[%s20941_s22 + $0x1e0] sm:$0xff]  }
 0xe28   : > { %v2473_v12 = vpack.c.bf16 %v2457_v9, %v2441_v7  ;;  %v2475_v13 = vpack.c.bf16 %v2459_v10, %v2443_v8 }
 0xe2a   : > { %3551 = vmatprep.mubr.bf16.mxu0 %v2473_v12  ;;  %3592 = vmatprep.mubr.bf16.mxu1 %v2475_v13  ;;  %v16495_v12 = vld [vmem:[%s20941_s22 + $0x1a0] sm:$0xff]   ;;  %v16496_v13 = vld [vmem:[%s20941_s22 + $0x168] sm:$0xff]  }
 0xe2b   : > { %3552 = vmatmul.mubr.bf16.vlgmr.msra.gmra.mrb[36].mxu0 %v2472_v37  ;;  %3593 = vmatmul.mubr.bf16.vlgmr.msra.gmra.mrb[36].mxu1 %v2474_v11  ;;  %v16494_v11 = vld [vmem:[%s20941_s22 + $0x120] sm:$0xff]  }
 0xe2c   : > { %15350 = vmatpush3.bf16.msra.mxu0 %v16478_v14  ;;  %15372 = vmatpush3.bf16.msra.mxu1 %v16479_v15  ;;  %v16497_v14 = vld [vmem:[%s20941_s22 + $0x1e8] sm:$0xff]  }
 0xe2d   : > { %15351 = vmatprep.subr.bf16.mxu0 %v16480_v19  ;;  %15373 = vmatprep.subr.bf16.mxu1 %v16481_v20  ;;  %v17986_v15 = vld [vmem:[%s20940_s21 + $0x8] sm:$0xff] }
 0xe2e   : > { %v16498_v19 = vld [vmem:[%s20941_s22 + $0x128] sm:$0xff]  }
 0xe2f   : > { %v16499_v20 = vld [vmem:[%s20941_s22 + $0x1a8] sm:$0xff]  }
 0xe30   : > { %v2216_v39 = vpop.f32.mrb[24].mxu0  ;;  %v2259_v40 = vpop.f32.mrb[24].mxu1  ;;  %15352 = vmatpush3.bf16.msra.mxu0 %v16482_v32  ;;  %15374 = vmatpush3.bf16.msra.mxu1 %v16483_v16  ;;  %v1728_v32 = vrot.slane %v17986_v15, %v17385_v29  ;;  %v1736_v16 = vrot.slane %v17986_v15, %v17891_v45 }
 0xe31   : > { %v2217_v43 = vadd.f32 %v2216_v39, %v1712_v18  ;;  %v2260_v44 = vadd.f32 %v2259_v40, %v1720_v25  ;;  %v2218_v49 = vpop.f32.mrb[25].mxu0  ;;  %v2261_v50 = vpop.f32.mrb[25].mxu1  ;;  %15353 = vmatprep.subr.bf16.mxu0 %v16484_v28  ;;  %15375 = vmatprep.subr.bf16.mxu1 %v16485_v34  ;;  %v1732_v28 = vrot.slane %v17986_v15, %v17391_v31  ;;  %v16502_v39 = vld [vmem:[%s20941_s22 + $0x130] sm:$0xff]  }
 0xe32   : > { %v2219_v53 = vadd.f32 %v2218_v49, %v1716_v33  ;;  %v2262_v54 = vadd.f32 %v2261_v50, %v1724_v38  ;;  %v2220_v47 = vpop.f32.mrb[26].mxu0  ;;  %v2263_v24 = vpop.f32.mrb[26].mxu1  ;;  %v1740_v34 = vrot.slane %v17986_v15, %v17897_v48  ;;  %v16503_v40 = vld [vmem:[%s20941_s22 + $0x1b0] sm:$0xff]   ;;  %v16504_v49 = vld [vmem:[%s20941_s22 + $0x178] sm:$0xff]  }
 0xe33   : > { %v2221_v51 = vadd.f32 %v2220_v47, %v1712_v18  ;;  %v2264_v55 = vadd.f32 %v2263_v24, %v1720_v25  ;;  %v2222_v56 = vpop.f32.mrb[27].mxu0  ;;  %v2265_v52 = vpop.f32.mrb[27].mxu1  ;;  %v2444_v61 = vmax.f32 %v2217_v43, 0.0  ;;  %v2446_v62 = vmax.f32 %v2260_v44, 0.0  ;;  %v16500_v18 = vld [vmem:[%s20941_s22 + $0x170] sm:$0xff]   ;;  %v16505_v50 = vld [vmem:[%s20941_s22 + $0x1f8] sm:$0xff]  }
 0xe34   : > { %v2223_v57 = vadd.f32 %v2222_v56, %v1716_v33  ;;  %v2266_v58 = vadd.f32 %v2265_v52, %v1724_v38  ;;  %15354 = vmatpush3.bf16.msra.mxu0 %v16486_v41  ;;  %15376 = vmatpush3.bf16.msra.mxu1 %v16487_v42  ;;  %v2445_v4 = vmax.f32 %v2219_v53, 0.0  ;;  %v2447_v5 = vmax.f32 %v2262_v54, 0.0  ;;  %v16501_v25 = vld [vmem:[%s20941_s22 + $0x1f0] sm:$0xff]  }
 0xe35   : > { %v2460_v63 = vmax.f32 %v2221_v51, 0.0  ;;  %v2462_v0 = vmax.f32 %v2264_v55, 0.0  ;;  %15355 = vmatprep.subr.bf16.mxu0 %v16488_v46  ;;  %15377 = vmatprep.subr.bf16.mxu1 %v16489_v23 }
 0xe36   : > { %v2461_v6 = vmax.f32 %v2223_v57, 0.0  ;;  %v2463_v7 = vmax.f32 %v2266_v58, 0.0  ;;  %v16506_v57 = vld [vmem:[%s20941_s22 + $0x138] sm:$0xff]  }
 0xe37   : > { %v17967_v8 = vpack.c.bf16 %v2460_v63, %v2444_v61  ;;  %v17969_v9 = vpack.c.bf16 %v2462_v0, %v2446_v62  ;;  %v16507_v58 = vld [vmem:[%s20941_s22 + $0x1b8] sm:$0xff]   ;;  %v16508_v63 = vld [vmem:[%s20941_s22 + $0x240] sm:$0xff]  }
 0xe38   : > { %v2477_v10 = vpack.c.bf16 %v2461_v6, %v2445_v4  ;;  %v2479_v37 = vpack.c.bf16 %v2463_v7, %v2447_v5  ;;  %15356 = vmatpush3.bf16.msra.mxu0 %v16490_v59  ;;  %15378 = vmatpush3.bf16.msra.mxu1 %v16491_v60  ;;  %v16509_v0 = vld [vmem:[%s20941_s22 + $0x2c0] sm:$0xff]  }
 0xe39   : > { %15357 = vmatprep.subr.bf16.mxu0 %v16492_v2  ;;  %15379 = vmatprep.subr.bf16.mxu1 %v16493_v3 }
 0xe3a   : > { %3633 = vmatprep.mubr.bf16.mxu0 %v2477_v10  ;;  %3674 = vmatprep.mubr.bf16.mxu1 %v2479_v37 }
 0xe3c   : > { %15358 = vmatpush3.bf16.msra.mxu0 %v16494_v11  ;;  %15380 = vmatpush3.bf16.msra.mxu1 %v16495_v12  ;;  %v16510_v11 = vld [vmem:[%s20941_s22 + $0x200] sm:$0xff]  }
 0xe3d   : > { %15359 = vmatprep.subr.bf16.mxu0 %v16496_v13  ;;  %15381 = vmatprep.subr.bf16.mxu1 %v16497_v14  ;;  %v16511_v12 = vld [vmem:[%s20941_s22 + $0x280] sm:$0xff]   ;;  %v16512_v13 = vld [vmem:[%s20941_s22 + $0x248] sm:$0xff]  }
 0xe3e   : > { %v16513_v14 = vld [vmem:[%s20941_s22 + $0x2c8] sm:$0xff]  }
 0xe40   : > { %v2302_v33 = vpop.f32.mrb[28].mxu0  ;;  %v2345_v38 = vpop.f32.mrb[28].mxu1  ;;  %15360 = vmatpush3.bf16.msra.mxu0 %v16498_v19  ;;  %15382 = vmatpush3.bf16.msra.mxu1 %v16499_v20  ;;  %v16514_v19 = vld [vmem:[%s20941_s22 + $0x208] sm:$0xff]   ;;  %v1744_v20 = vrot.slane %v17986_v15, %v17916_v21 }
 0xe41   : > { %v2303_v41 = vadd.f32 %v2302_v33, %v1728_v32  ;;  %v2346_v42 = vadd.f32 %v2345_v38, %v1736_v16  ;;  %v2304_v43 = vpop.f32.mrb[29].mxu0  ;;  %v2347_v44 = vpop.f32.mrb[29].mxu1  ;;  %15361 = vmatprep.subr.bf16.mxu0 %v16500_v18  ;;  %15383 = vmatprep.subr.bf16.mxu1 %v16501_v25  ;;  %v1756_v18 = vrot.slane %v17986_v15, %v17925_v30  ;;  %v16517_v25 = vld [vmem:[%s20941_s22 + $0x2d0] sm:$0xff]  }
 0xe42   : > { %v2305_v46 = vadd.f32 %v2304_v43, %v1732_v28  ;;  %v2348_v23 = vadd.f32 %v2347_v44, %v1740_v34  ;;  %v2306_v53 = vpop.f32.mrb[30].mxu0  ;;  %v2349_v54 = vpop.f32.mrb[30].mxu1  ;;  %v16518_v33 = vld [vmem:[%s20941_s22 + $0x210] sm:$0xff]  }
 0xe43   : > { %v2307_v47 = vadd.f32 %v2306_v53, %v1728_v32  ;;  %v2350_v24 = vadd.f32 %v2349_v54, %v1736_v16  ;;  %v2308_v51 = vpop.f32.mrb[31].mxu0  ;;  %v2351_v55 = vpop.f32.mrb[31].mxu1  ;;  %v2448_v59 = vmax.f32 %v2303_v41, 0.0  ;;  %v2450_v60 = vmax.f32 %v2346_v42, 0.0  ;;  %v16520_v42 = vld [vmem:[%s20941_s22 + $0x258] sm:$0xff]  }
 0xe44   : > { %v2309_v56 = vadd.f32 %v2308_v51, %v1732_v28  ;;  %v2352_v52 = vadd.f32 %v2351_v55, %v1740_v34  ;;  %15362 = vmatpush3.bf16.msra.mxu0 %v16502_v39  ;;  %15384 = vmatpush3.bf16.msra.mxu1 %v16503_v40  ;;  %v2449_v2 = vmax.f32 %v2305_v46, 0.0  ;;  %v2451_v3 = vmax.f32 %v2348_v23, 0.0  ;;  %v16521_v46 = vld [vmem:[%s20941_s22 + $0x2d8] sm:$0xff]  }
 0xe45   : > { %v2464_v61 = vmax.f32 %v2307_v47, 0.0  ;;  %v2466_v62 = vmax.f32 %v2350_v24, 0.0  ;;  %15363 = vmatprep.subr.bf16.mxu0 %v16504_v49  ;;  %15385 = vmatprep.subr.bf16.mxu1 %v16505_v50  ;;  %v1752_v32 = vrot.slane %v17986_v15, %v17919_v22  ;;  %v1748_v16 = vrot.slane %v17986_v15, %v17922_v27  ;;  %v16519_v15 = vld [vmem:[%s20941_s22 + $0x290] sm:$0xff]   ;;  %v16522_v55 = vld [vmem:[%s20941_s22 + $0x218] sm:$0xff]  }
 0xe46   : > { %v2465_v4 = vmax.f32 %v2309_v56, 0.0  ;;  %v2467_v5 = vmax.f32 %v2352_v52, 0.0 }
 0xe47   : > { %v18032_v6 = vpack.c.bf16 %v2464_v61, %v2448_v59  ;;  %v18034_v7 = vpack.c.bf16 %v2466_v62, %v2450_v60  ;;  %v16523_v59 = vld [vmem:[%s20941_s22 + $0x298] sm:$0xff]   ;;  %v16524_v60 = vld [vmem:[%s20941_s22 + $0x260] sm:$0xff]  }
 0xe48   : > { %v2481_v10 = vpack.c.bf16 %v2465_v4, %v2449_v2  ;;  %v2483_v37 = vpack.c.bf16 %v2467_v5, %v2451_v3  ;;  %15364 = vmatpush3.bf16.msra.mxu0 %v16506_v57  ;;  %15386 = vmatpush3.bf16.msra.mxu1 %v16507_v58  ;;  %v16525_v2 = vld [vmem:[%s20941_s22 + $0x2e0] sm:$0xff]  }
 0xe49   : > { %15393 = vmatprep.subr.bf16.mxu0 %v16508_v63  ;;  %15415 = vmatprep.subr.bf16.mxu1 %v16509_v0 }
 0xe4b   : > { %3634 = vmatmul.mubr.bf16.vlgmr.msra.gmra.mrb[40].mxu0 %v17967_v8  ;;  %3675 = vmatmul.mubr.bf16.vlgmr.msra.gmra.mrb[40].mxu1 %v17969_v9  ;;  %v16515_v8 = vld [vmem:[%s20941_s22 + $0x288] sm:$0xff]   ;;  %v16516_v9 = vld [vmem:[%s20941_s22 + $0x250] sm:$0xff]  }
 0xe4c   : > { %15394 = vmatpush3.bf16.msra.mxu0 %v16510_v11  ;;  %3715 = vmatprep.mubr.bf16.mxu0 %v2481_v10  ;;  %v16527_v11 = vld [vmem:[%s20941_s22 + $0x2a0] sm:$0xff]  }
 0xe4d   : > { %15416 = vmatpush3.bf16.msra.mxu1 %v16511_v12  ;;  %3756 = vmatprep.mubr.bf16.mxu1 %v2483_v37  ;;  %v16526_v37 = vld [vmem:[%s20941_s22 + $0x220] sm:$0xff]   ;;  %v16528_v12 = vld [vmem:[%s20941_s22 + $0x268] sm:$0xff]  }
 0xe4e   : > { %15395 = vmatprep.subr.bf16.mxu0 %v16512_v13  ;;  %15417 = vmatprep.subr.bf16.mxu1 %v16513_v14  ;;  %v16529_v13 = vld [vmem:[%s20941_s22 + $0x2e8] sm:$0xff]  }
 0xe4f   : > { %v16530_v14 = vld [vmem:[%s20941_s22 + $0x228] sm:$0xff]  }
 0xe50   : > { %v2388_v28 = vpop.f32.mrb[32].mxu0  ;;  %v2431_v34 = vpop.f32.mrb[32].mxu1  ;;  %15396 = vmatpush3.bf16.msra.mxu0 %v16514_v19  ;;  %v16531_v19 = vld [vmem:[%s20941_s22 + $0x2a8] sm:$0xff]  }
 0xe51   : > { %v2389_v38 = vadd.f32 %v2388_v28, %v1744_v20  ;;  %v2432_v39 = vadd.f32 %v2431_v34, %v1752_v32  ;;  %15418 = vmatpush3.bf16.msra.mxu1 %v16515_v8  ;;  %v2390_v40 = vpop.f32.mrb[33].mxu0  ;;  %v2433_v41 = vpop.f32.mrb[33].mxu1  ;;  %15397 = vmatprep.subr.bf16.mxu0 %v16516_v9  ;;  %v16534_v8 = vld [vmem:[%s20941_s22 + $0x230] sm:$0xff]   ;;  %v16539_v28 = vld [vmem:[%s20941_s22 + $0x2b8] sm:$0xff]   ;;  %v16540_v34 = vld [vmem:[%s20941_s22 + $0x340] sm:$0xff]  }
 0xe52   : > { %v2391_v43 = vadd.f32 %v2390_v40, %v1748_v16  ;;  %v2434_v44 = vadd.f32 %v2433_v41, %v1756_v18  ;;  %v2392_v49 = vpop.f32.mrb[34].mxu0  ;;  %v2435_v50 = vpop.f32.mrb[34].mxu1  ;;  %15419 = vmatprep.subr.bf16.mxu1 %v16517_v25  ;;  %v16535_v9 = vld [vmem:[%s20941_s22 + $0x2b0] sm:$0xff]   ;;  %v16538_v25 = vld [vmem:[%s20941_s22 + $0x238] sm:$0xff]   ;;  %v16544_v40 = vld [vmem:[%s20941_s22 + $0x348] sm:$0xff]  }
 0xe53   : > { %v2393_v23 = vadd.f32 %v2392_v49, %v1744_v20  ;;  %v2436_v53 = vadd.f32 %v2435_v50, %v1752_v32  ;;  %v2394_v54 = vpop.f32.mrb[35].mxu0  ;;  %v2437_v47 = vpop.f32.mrb[35].mxu1  ;;  %v2452_v56 = vmax.f32 %v2389_v38, 0.0  ;;  %v2454_v52 = vmax.f32 %v2432_v39, 0.0  ;;  %v16532_v20 = vld [vmem:[%s20941_s22 + $0x270] sm:$0xff]   ;;  %v16542_v38 = vld [vmem:[%s20941_s22 + $0x300] sm:$0xff]  }
 0xe54   : > { %v2395_v24 = vadd.f32 %v2394_v54, %v1748_v16  ;;  %v2438_v51 = vadd.f32 %v2437_v47, %v1756_v18  ;;  %15398 = vmatpush3.bf16.msra.mxu0 %v16518_v33  ;;  %v2453_v61 = vmax.f32 %v2391_v43, 0.0  ;;  %v2455_v62 = vmax.f32 %v2434_v44, 0.0  ;;  %v16533_v32 = vld [vmem:[%s20941_s22 + $0x2f0] sm:$0xff]   ;;  %v16536_v16 = vld [vmem:[%s20941_s22 + $0x278] sm:$0xff]   ;;  %v16541_v33 = vld [vmem:[%s20941_s22 + $0x3c0] sm:$0xff]  }
 0xe55   : > { %v2468_v57 = vmax.f32 %v2393_v23, 0.0  ;;  %v2470_v58 = vmax.f32 %v2436_v53, 0.0  ;;  %15420 = vmatpush3.bf16.msra.mxu1 %v16519_v15  ;;  %15399 = vmatprep.subr.bf16.mxu0 %v16520_v42  ;;  %v16537_v18 = vld [vmem:[%s20941_s22 + $0x2f8] sm:$0xff]   ;;  %v16543_v39 = vld [vmem:[%s20941_s22 + $0x380] sm:$0xff]   ;;  %v16545_v41 = vld [vmem:[%s20941_s22 + $0x3c8] sm:$0xff]  }
 0xe56   : > { %v2469_v63 = vmax.f32 %v2395_v24, 0.0  ;;  %v2471_v0 = vmax.f32 %v2438_v51, 0.0  ;;  %15421 = vmatprep.subr.bf16.mxu1 %v16521_v46  ;;  %v16546_v15 = vld [vmem:[%s20941_s22 + $0x308] sm:$0xff]   ;;  %v16550_v43 = vld [vmem:[%s20941_s22 + $0x310] sm:$0xff]   ;;  %v16552_v49 = vld [vmem:[%s20941_s22 + $0x358] sm:$0xff]  }
 0xe57   : > { %v18094_v3 = vpack.c.bf16 %v2468_v57, %v2452_v56  ;;  %v18096_v4 = vpack.c.bf16 %v2470_v58, %v2454_v52  ;;  %v16547_v42 = vld [vmem:[%s20941_s22 + $0x388] sm:$0xff]   ;;  %v16551_v44 = vld [vmem:[%s20941_s22 + $0x390] sm:$0xff]   ;;  %v16553_v50 = vld [vmem:[%s20941_s22 + $0x3d8] sm:$0xff]  }
 0xe58   : > { %v2485_v5 = vpack.c.bf16 %v2469_v63, %v2453_v61  ;;  %v2487_v10 = vpack.c.bf16 %v2471_v0, %v2455_v62  ;;  %15400 = vmatpush3.bf16.msra.mxu0 %v16522_v55  ;;  %v16554_v46 = vld [vmem:[%s20941_s22 + $0x318] sm:$0xff]   ;;  %v16556_v53 = vld [vmem:[%s20941_s22 + $0x360] sm:$0xff]   ;;  %v16560_v51 = vld [vmem:[%s20941_s22 + $0x368] sm:$0xff]  }
 0xe59   : > { %15422 = vmatpush3.bf16.msra.mxu1 %v16523_v59  ;;  %15401 = vmatprep.subr.bf16.mxu0 %v16524_v60  ;;  %v16555_v23 = vld [vmem:[%s20941_s22 + $0x398] sm:$0xff]   ;;  %v16557_v54 = vld [vmem:[%s20941_s22 + $0x3e0] sm:$0xff]   ;;  %v16561_v55 = vld [vmem:[%s20941_s22 + $0x3e8] sm:$0xff]  }
 0xe5a   : > { %15423 = vmatprep.subr.bf16.mxu1 %v16525_v2  ;;  %v16558_v47 = vld [vmem:[%s20941_s22 + $0x320] sm:$0xff]   ;;  %v16562_v56 = vld [vmem:[%s20941_s22 + $0x328] sm:$0xff]   ;;  %v16564_v57 = vld [vmem:[%s20941_s22 + $0x370] sm:$0xff]  }
 0xe5b   : > { %v16559_v24 = vld [vmem:[%s20941_s22 + $0x3a0] sm:$0xff]   ;;  %v16563_v52 = vld [vmem:[%s20941_s22 + $0x3a8] sm:$0xff]   ;;  %v16565_v58 = vld [vmem:[%s20941_s22 + $0x3f0] sm:$0xff]  }
 0xe5c   : > { %15402 = vmatpush3.bf16.msra.mxu0 %v16526_v37  ;;  %v16566_v59 = vld [vmem:[%s20941_s22 + $0x330] sm:$0xff]   ;;  %v16568_v61 = vld [vmem:[%s20941_s22 + $0x378] sm:$0xff]  }
 0xe5d   : > { %15424 = vmatpush3.bf16.msra.mxu1 %v16527_v11  ;;  %15403 = vmatprep.subr.bf16.mxu0 %v16528_v12  ;;  %v16567_v60 = vld [vmem:[%s20941_s22 + $0x3b0] sm:$0xff]   ;;  %v16569_v62 = vld [vmem:[%s20941_s22 + $0x3f8] sm:$0xff]  }
 0xe5e   : > { %15425 = vmatprep.subr.bf16.mxu1 %v16529_v13  ;;  %v16570_v63 = vld [vmem:[%s20941_s22 + $0x338] sm:$0xff]  }
 0xe5f   : > { %v16571_v0 = vld [vmem:[%s20941_s22 + $0x3b8] sm:$0xff]  }
 0xe60   : > { %15404 = vmatpush3.bf16.msra.mxu0 %v16530_v14 }
 0xe61   : > { %15426 = vmatpush3.bf16.msra.mxu1 %v16531_v19  ;;  %15405 = vmatprep.subr.bf16.mxu0 %v16532_v20 }
 0xe62   : > { %15427 = vmatprep.subr.bf16.mxu1 %v16533_v32 }
 0xe64   : > { %15406 = vmatpush3.bf16.msra.mxu0 %v16534_v8 }
 0xe65   : > { %15428 = vmatpush3.bf16.msra.mxu1 %v16535_v9  ;;  %15407 = vmatprep.subr.bf16.mxu0 %v16536_v16 }
 0xe66   : > { %15429 = vmatprep.subr.bf16.mxu1 %v16537_v18 }
 0xe68   : > { %15408 = vmatpush3.bf16.msra.mxu0 %v16538_v25 }
 0xe69   : > { %15430 = vmatpush3.bf16.msra.mxu1 %v16539_v28  ;;  %15437 = vmatprep.subr.bf16.mxu0 %v16540_v34 }
 0xe6a   : > { %15459 = vmatprep.subr.bf16.mxu1 %v16541_v33 }
 0xe6b   : > { %3716 = vmatmul.mubr.bf16.vlgmr.msra.gmra.mrb[44].mxu0 %v18032_v6  ;;  %v16548_v6 = vld [vmem:[%s20941_s22 + $0x350] sm:$0xff]  }
 0xe6c   : > { %3757 = vmatmul.mubr.bf16.vlgmr.msra.gmra.mrb[44].mxu1 %v18034_v7  ;;  %15438 = vmatpush3.bf16.msra.mxu0 %v16542_v38  ;;  %v16549_v7 = vld [vmem:[%s20941_s22 + $0x3d0] sm:$0xff]  }
 0xe6d   : > { %3797 = vmatprep.mubr.bf16.mxu0 %v2485_v5  ;;  %15460 = vmatpush3.bf16.msra.mxu1 %v16543_v39 }
 0xe6e   : > { %3838 = vmatprep.mubr.bf16.mxu1 %v2487_v10  ;;  %15439 = vmatprep.subr.bf16.mxu0 %v16544_v40  ;;  %v13281_v10 = vld [vmem:[%s20942_s23] ss:$0 sm:$0xff] }
 0xe6f   : > { %15461 = vmatprep.subr.bf16.mxu1 %v16545_v41 }
 0xe70   : > { %15440 = vmatpush3.bf16.msra.mxu0 %v16546_v15 }
 0xe71   : > { %15462 = vmatpush3.bf16.msra.mxu1 %v16547_v42  ;;  %15441 = vmatprep.subr.bf16.mxu0 %v16548_v6 }
 0xe72   : > { %15463 = vmatprep.subr.bf16.mxu1 %v16549_v7 }
 0xe74   : > { %15442 = vmatpush3.bf16.msra.mxu0 %v16550_v43 }
 0xe75   : > { %15464 = vmatpush3.bf16.msra.mxu1 %v16551_v44  ;;  %15443 = vmatprep.subr.bf16.mxu0 %v16552_v49 }
 0xe76   : > { %15465 = vmatprep.subr.bf16.mxu1 %v16553_v50 }
 0xe78   : > { %15444 = vmatpush3.bf16.msra.mxu0 %v16554_v46 }
 0xe79   : > { %15466 = vmatpush3.bf16.msra.mxu1 %v16555_v23  ;;  %15445 = vmatprep.subr.bf16.mxu0 %v16556_v53 }
 0xe7a   : > { %15467 = vmatprep.subr.bf16.mxu1 %v16557_v54 }
 0xe7c   : > { %15446 = vmatpush3.bf16.msra.mxu0 %v16558_v47 }
 0xe7d   : > { %15468 = vmatpush3.bf16.msra.mxu1 %v16559_v24  ;;  %15447 = vmatprep.subr.bf16.mxu0 %v16560_v51 }
 0xe7e   : > { %15469 = vmatprep.subr.bf16.mxu1 %v16561_v55 }
 0xe80   : > { %15448 = vmatpush3.bf16.msra.mxu0 %v16562_v56 }
 0xe81   : > { %15470 = vmatpush3.bf16.msra.mxu1 %v16563_v52  ;;  %15449 = vmatprep.subr.bf16.mxu0 %v16564_v57 }
 0xe82   : > { %15471 = vmatprep.subr.bf16.mxu1 %v16565_v58 }
 0xe84   : > { %15450 = vmatpush3.bf16.msra.mxu0 %v16566_v59 }
 0xe85   : > { %15472 = vmatpush3.bf16.msra.mxu1 %v16567_v60  ;;  %15451 = vmatprep.subr.bf16.mxu0 %v16568_v61 }
 0xe86   : > { %15473 = vmatprep.subr.bf16.mxu1 %v16569_v62 }
 0xe88   : > { %15452 = vmatpush3.bf16.msra.mxu0 %v16570_v63 }
 0xe89   : > { %15474 = vmatpush3.bf16.msra.mxu1 %v16571_v0 }
 0xe8a   : > { %16181 = vmatprep.subr.bf16.mxu1 %v17166_v1 }
 0xe8b   : > { %3798 = vmatmul.mubr.bf16.vlgmr.msra.gmra.mrb[48].mxu0 %v18094_v3 }
 0xe8c   : > { %3839 = vmatmul.mubr.bf16.vlgmr.msra.gmra.mrb[48].mxu1 %v18096_v4  ;;  %3991 = vmatprep.mubr.bf16.mxu0 %v17168_v17 }
 0xe8d   : > { %16183 = vmatprep.mubr.msk.bf16.mxu1 %vm17167_vm0, %v17166_v1 }
 0xefe   : > { %v15321_v2 = vpop.f32.mrb[36].mxu0  ;;  %v15343_v5 = vpop.f32.mrb[36].mxu1 }
 0xeff   : > { %v15322_v37 = vpop.f32.mrb[37].mxu0  ;;  %v15344_v11 = vpop.f32.mrb[37].mxu1 }
 0xf00   : > { %v15323_v12 = vadd.f32 %v15322_v37, %v15321_v2  ;;  %v15345_v13 = vadd.f32 %v15344_v11, %v15343_v5  ;;  %v15324_v14 = vpop.f32.mrb[38].mxu0  ;;  %v15346_v19 = vpop.f32.mrb[38].mxu1 }
 0xf01   : > { %v15325_v3 = vpop.f32.mrb[39].mxu0  ;;  %v15347_v20 = vpop.f32.mrb[39].mxu1 }
 0xf02   : > { %v3554_v4 = vadd.f32 %v15323_v12, %v13281_v10  ;;  %v15326_v32 = vadd.f32 %v15325_v3, %v15324_v14  ;;  %v15348_v8 = vadd.f32 %v15347_v20, %v15346_v19 }
 0xf04   : > { %v3595_v9 = vadd.f32 %v15345_v13, %v3554_v4  ;;  %v3557_v16 = vadd.f32 %v15326_v32, %v13281_v10 }
 0xf06   : > { %v3598_v18 = vadd.f32 %v15348_v8, %v3557_v16 }
 0xf1e   : > { %v15365_v25 = vpop.f32.mrb[40].mxu0  ;;  %v15387_v28 = vpop.f32.mrb[40].mxu1 }
 0xf1f   : > { %v15366_v34 = vpop.f32.mrb[41].mxu0  ;;  %v15388_v33 = vpop.f32.mrb[41].mxu1 }
 0xf20   : > { %v15367_v38 = vadd.f32 %v15366_v34, %v15365_v25  ;;  %v15389_v39 = vadd.f32 %v15388_v33, %v15387_v28  ;;  %v15368_v40 = vpop.f32.mrb[42].mxu0  ;;  %v15390_v41 = vpop.f32.mrb[42].mxu1 }
 0xf21   : > { %v15369_v15 = vpop.f32.mrb[43].mxu0  ;;  %v15391_v42 = vpop.f32.mrb[43].mxu1 }
 0xf22   : > { %v3636_v6 = vadd.f32 %v15367_v38, %v3595_v9  ;;  %v15370_v7 = vadd.f32 %v15369_v15, %v15368_v40  ;;  %v15392_v43 = vadd.f32 %v15391_v42, %v15390_v41 }
 0xf24   : > { %v3677_v44 = vadd.f32 %v15389_v39, %v3636_v6  ;;  %v3639_v49 = vadd.f32 %v15370_v7, %v3598_v18  ;;  %v16572_v6 = vld [vmem:[%s20973_s4 + $0x40] ss:$8 sps:$4 sm:$0xff]   ;;  %v16577_v7 = vld [vmem:[%s20973_s4 + $0x54] ss:$8 sps:$4 sm:$0xff]  }
 0xf26   : > { %v3680_v50 = vadd.f32 %v15392_v43, %v3639_v49  ;;  %v16575_v43 = vld [vmem:[%s20973_s4 + $0x50] ss:$8 sps:$4 sm:$0xff]   ;;  %v16578_v49 = vld [vmem:[%s20973_s4 + $0x60] ss:$8 sps:$4 sm:$0xff]  }
 0xf3e   : > { %v15409_v46 = vpop.f32.mrb[44].mxu0 }
 0xf3f   : > { %v15431_v23 = vpop.f32.mrb[44].mxu1  ;;  %v15410_v53 = vpop.f32.mrb[45].mxu0 }
 0xf40   : > { %v15411_v54 = vadd.f32 %v15410_v53, %v15409_v46  ;;  %v15432_v47 = vpop.f32.mrb[45].mxu1  ;;  %v15412_v24 = vpop.f32.mrb[46].mxu0  ;;  %v16581_v46 = vld [vmem:[%s20973_s4 + $0x70] ss:$8 sps:$4 sm:$0xff]  }
 0xf41   : > { %v15433_v51 = vadd.f32 %v15432_v47, %v15431_v23  ;;  %v15434_v55 = vpop.f32.mrb[46].mxu1  ;;  %v15413_v56 = vpop.f32.mrb[47].mxu0 }
 0xf42   : > { %v3718_v52 = vadd.f32 %v15411_v54, %v3677_v44  ;;  %v15414_v57 = vadd.f32 %v15413_v56, %v15412_v24  ;;  %v15435_v58 = vpop.f32.mrb[47].mxu1  ;;  %v16580_v44 = vld [vmem:[%s20973_s4 + $0x64] ss:$8 sps:$4 sm:$0xff]  }
 0xf43   : > { %v15436_v59 = vadd.f32 %v15435_v58, %v15434_v55 }
 0xf44   : > { %v3759_v60 = vadd.f32 %v15433_v51, %v3718_v52  ;;  %v3721_v61 = vadd.f32 %v15414_v57, %v3680_v50  ;;  %v16583_v50 = vld [vmem:[%s20973_s4 + $0x74] ss:$8 sps:$4 sm:$0xff]   ;;  %v13410_v52 = vld [vmem:[%s20937_s18] ss:$0 sm:$0xff] }
 0xf46   : > { %v3762_v62 = vadd.f32 %v15436_v59, %v3721_v61 }
 0xf5e   : > { %v15453_v63 = vpop.f32.mrb[48].mxu0 }
 0xf5f   : > { %v15475_v0 = vpop.f32.mrb[48].mxu1  ;;  %v15454_v2 = vpop.f32.mrb[49].mxu0 }
 0xf60   : > { %v15455_v5 = vadd.f32 %v15454_v2, %v15453_v63  ;;  %v15476_v10 = vpop.f32.mrb[49].mxu1  ;;  %v15456_v37 = vpop.f32.mrb[50].mxu0  ;;  %v13420_v2 = vld [vmem:[%s20976_s24 + $0x2] sm:$0x3] }
 0xf61   : > { %v15477_v11 = vadd.f32 %v15476_v10, %v15475_v0  ;;  %v15478_v12 = vpop.f32.mrb[50].mxu1  ;;  %v15457_v13 = vpop.f32.mrb[51].mxu0 }
 0xf62   : > { %v3800_v14 = vadd.f32 %v15455_v5, %v3759_v60  ;;  %v15458_v19 = vadd.f32 %v15457_v13, %v15456_v37  ;;  %v15479_v3 = vpop.f32.mrb[51].mxu1  ;;  %v13411_v60 = vld [vmem:[%s20938_s19] ss:$0 sm:$0xff]  ;;  %v3909_v5 = vrot.slane %v13420_v2, %v17385_v29  ;;  %v3913_v37 = vrot.slane %v13420_v2, %v17391_v31 }
 0xf63   : > { %v15480_v20 = vadd.f32 %v15479_v3, %v15478_v12  ;;  %v16588_v2 = vld [vmem:[%s20929_s10 + $0x20] sm:$0xff]  }
 0xf64   : > { %v3841_v4 = vadd.f32 %v15477_v11, %v3800_v14  ;;  %v3803_v32 = vadd.f32 %v15458_v19, %v3762_v62 }
 0xf66   : > { %v3844_v8 = vadd.f32 %v15480_v20, %v3803_v32  ;;  %v3847_v9 = vadd.f32 %v3841_v4, %v17638_v35 }
 0xf68   : > { %v3851_v16 = vsel %vm902_vm3, %v3847_v9, 0.0  ;;  %v3848_v18 = vadd.f32 %v3844_v8, %v17640_v36  ;;  %v16574_v36 = vld [vmem:[%s20973_s4 + $0x44] ss:$8 sps:$4 sm:$0xff]  }
 0xf69   : > { %3852 = vadd.xlane.f32.xlu1 %v3851_v16  ;;  %3959 = vmatprep.subr.bf16.mxu0 %v16574_v36 }
 0xf6a   : > { %v3854_v25 = vsel %vm902_vm3, %v3848_v18, 0.0  ;;  %3960 = vmatpush1.bf16.msra.mxu0 %v16572_v6 }
 0xf6b   : > { %3961 = vmatprep.subr.bf16.mxu0 %v16577_v7 }
 0xf6d   : > { %3855 = vadd.xlane.f32.xlu1 %v3854_v25 }
 0xf6e   : > { %3962 = vmatpush1.bf16.msra.mxu0 %v16575_v43 }
 0xf6f   : > { %3963 = vmatprep.subr.bf16.mxu0 %v16580_v44 }
 0xf72   : > { %3964 = vmatpush1.bf16.msra.mxu0 %v16578_v49 }
 0xf73   : > { %3965 = vmatprep.subr.bf16.mxu0 %v16583_v50 }
 0xf76   : > { %3966 = vmatpush1.bf16.msra.mxu0 %v16581_v46 }
 0xf77   : > { %16187 = vmatprep.subr.bf16.mxu0 %v17166_v1 }
 0xff6   : > { %v3853_v28 = vpop.xlane.xlu1 %3852 }
 0xff7   : > { %v3857_v34 = vmul.f32 0.015625, %v3853_v28 }
 0xff9   : > { %v3859_v33 = vsub.f32 %v3847_v9, %v3857_v34 }
 0xffa   : > { %v3856_v38 = vpop.xlane.xlu1 %3855 }
 0xffb   : > { %v3858_v39 = vmul.f32 0.015625, %v3856_v38  ;;  %v3861_v40 = vmul.f32 %v3859_v33, %v3859_v33  ;;  %v18308_v38 = vld [vmem:[%s20977_s30] sm:$0xff] }
 0xffd   : > { %v3860_v41 = vsub.f32 %v3848_v18, %v3858_v39  ;;  %v3863_v15 = vsel %vm902_vm3, %v3861_v40, 0.0 }
 0xffe   : > { %3864 = vadd.xlane.f32.xlu0 %v3863_v15 }
 0xfff   : > { %v3862_v42 = vmul.f32 %v3860_v41, %v3860_v41 }
0x1001   : > { %v3866_v35 = vsel %vm902_vm3, %v3862_v42, 0.0 }
0x1002   : > { %3867 = vadd.xlane.f32.xlu1 %v3866_v35 }
0x108b   : > { %v3865_v23 = vpop.xlane.xlu0 %3864 }
0x108c   : > { %v3869_v53 = vmul.f32 0.015625, %v3865_v23 }
0x108e   : > { %v3871_v54 = vadd.f32 1e-05, %v3869_v53  ;;  %v16584_v53 = vld [vmem:[%s20978_s27 + $0x20] sm:$0xff]  }
0x108f   : > { %v3868_v47 = vpop.xlane.xlu1 %3867 }
0x1090   : > { %17064 = vrsqrt.f32 %v3871_v54  ;;  %v3870_v24 = vmul.f32 0.015625, %v3868_v47  ;;  %v16585_v54 = vld [vmem:[%s20978_s27 + $0x28] sm:$0xff]   ;;  %v16586_v47 = vld [vmem:[%s20978_s27 + $0x30] sm:$0xff]  }
0x1092   : > { %v3872_v51 = vadd.f32 1e-05, %v3870_v24 }
0x1094   : > { %17066 = vrsqrt.f32 %v3872_v51 }
0x109a   : > { %v17065_v55 = vpop.eup %17064 }
0x109b   : > { %v3875_v56 = vmul.f32 %v17065_v55, %v3859_v33 }
0x109d   : > { %v3883_v58 = vmul.f32 %v13410_v52, %v3875_v56 }
0x109e   : > { %v17067_v57 = vpop.eup %17066 }
0x109f   : > { %v3876_v59 = vmul.f32 %v17067_v57, %v3860_v41  ;;  %v18284_v62 = vadd.f32 %v13411_v60, %v3883_v58  ;;  %v18315_v41 = vld [vmem:[%s20977_s30 + $0x8] sm:$0xff] }
0x10a1   : > { %v3884_v61 = vmul.f32 %v13410_v52, %v3876_v59  ;;  %v16587_v59 = vld [vmem:[%s20978_s27 + $0x38] sm:$0xff]  }
0x10a3   : > { %v18286_v63 = vadd.f32 %v13411_v60, %v3884_v61 }
0x10a5   : > { %v3904_v0 = vpack.c.bf16 %v18286_v63, %v18284_v62 }
0x10a7   : > { %13429 = vmatmul.mubr.msk.bf16.vlgmr.msra.gmra.mrb[52].mxu0 %vm902_vm3, %v3904_v0 }
0x10a8   : > { %16189 = vmatprep.mubr.msk.bf16.mxu0 %vm17167_vm0, %v17166_v1 }
0x117a   : > { %v3993_v10 = vpop.f32.mrb[52].mxu0 }
0x117b   : > { %v3995_v11 = vpop.f32.mrb[53].mxu0  ;;  %v3994_v13 = vadd.f32 %v3993_v10, %v3909_v5 }
0x117c   : > { %v3997_v12 = vpop.f32.mrb[54].mxu0  ;;  %v3996_v3 = vadd.f32 %v3995_v11, %v3913_v37  ;;  %v16590_v11 = vld [vmem:[%s20929_s10 + $0x30] sm:$0xff]  }
0x117d   : > { %v3998_v14 = vadd.f32 %v3997_v12, %v3909_v5  ;;  %v3999_v19 = vpop.f32.mrb[55].mxu0  ;;  %v16591_v12 = vld [vmem:[%s20929_s10 + $0x38] sm:$0xff]  }
0x117e   : > { %v4000_v20 = vadd.f32 %v3999_v19, %v3913_v37  ;;  %v16589_v37 = vld [vmem:[%s20929_s10 + $0x28] sm:$0xff]  }
0x117f   : > { %v4002_v4 = vpack.c.bf16 %v3998_v14, %v3994_v13  ;;  %v13441_v13 = vld [vmem:[%s20979_s28 + $0x1] ss:$0 sm:$0xff] }
0x1180   : > { %v4080_v32 = vpack.c.bf16 %v4000_v20, %v3996_v3 }
0x1181   : > { %4004 = vrot.lane.b32.xlu1 %v4002_v4, %s20981_s0 }
0x1182   : > { %16188 = vmatpush3.bf16.msra.mxu0 %v4080_v32 }
0x1183   : > { %16205 = vmatprep.subr.bf16.mxu0 %v17166_v1 }
0x11f3   : > { %v4005_v8 = vpop.permute.xlu1 %4004 }
0x11f4   : > { %v4010_v9 = vsel %vm902_vm3, %v4005_v8, 0 }
0x11f5   : > { %16182 = vmatpush3.bf16.xpose.msra.mxu1 %v4010_v9 }
0x11f6   : > { %16193 = vmatprep.subr.bf16.mxu1 %v17166_v1 }
0x11fc   : > { %16184 = vmatmul.mubr.msk.bf16.vlgmr.msra.gmra.mrb[52].mxu1 %vm902_vm3, %v4002_v4 }
0x11fd   : > { %16201 = vmatprep.mubr.msk.bf16.mxu1 %vm17167_vm0, %v17166_v1  ;;  %16194 = vmatpush3.bf16.msra.mxu1 %v16584_v53  ;;  %v16594_v53 = vld [vmem:[%s20980_s7 + $0x30] sm:$0xff]  }
0x11fe   : > { %16195 = vmatprep.subr.bf16.mxu1 %v17166_v1 }
0x1201   : > { %16196 = vmatpush3.bf16.msra.mxu1 %v16585_v54  ;;  %v16595_v54 = vld [vmem:[%s20980_s7 + $0x38] sm:$0xff]  }
0x1202   : > { %16197 = vmatprep.subr.bf16.mxu1 %v17166_v1 }
0x1205   : > { %16198 = vmatpush3.bf16.msra.mxu1 %v16586_v47 }
0x1206   : > { %16199 = vmatprep.subr.bf16.mxu1 %v17166_v1 }
0x1209   : > { %16200 = vmatpush3.bf16.msra.mxu1 %v16587_v59  ;;  %v13449_v59 = vld [vmem:[%s20933_s14 + $0x1] ss:$0 sm:$0xff] }
0x120a   : > { %16217 = vmatprep.subr.bf16.mxu1 %v17166_v1 }
0x12cf   : > { %v4046_v16 = vpop.f32.mrb[52].mxu1 }
0x12d0   : > { %v4053_v18 = vmul.f32 0.125, %v4046_v16  ;;  %v16185_v25 = vpop.f32.mrb[53].mxu1 }
0x12d1   : > { %v4049_v28 = vpop.f32.mrb[54].mxu1  ;;  %v13475_v25 = vld [vmem:[%s20930_s11 + $0x1] ss:$0 sm:$0xff] }
0x12d2   : > { %v4054_v34 = vmul.f32 0.125, %v4049_v28  ;;  %v16186_v33 = vpop.f32.mrb[55].mxu1  ;;  %v4055_v39 = vadd.f32 %v18308_v38, %v4053_v18 }
0x12d4   : > { %v4057_v40 = vsel %vm1006_vm4, %v4055_v39, -inf  ;;  %v4056_v15 = vadd.f32 %v18315_v41, %v4054_v34 }
0x12d5   : > { %4058 = vmax.xlane.f32.xlu1 %v4057_v40 }
0x12d6   : > { %v4060_v42 = vsel %vm1006_vm4, %v4056_v15, -inf }
0x12d7   : > { %4061 = vmax.xlane.f32.xlu0 %v4060_v42 }
0x1362   : > { %v4059_v35 = vpop.xlane.xlu1 %4058 }
0x1363   : > { %v4063_v36 = vsub.f32 %v4055_v39, %v4059_v35 }
0x1364   : > { %v4062_v6 = vpop.xlane.xlu0 %4061 }
0x1365   : > { %v4065_v7 = vmul.f32 1.442695, %v4063_v36  ;;  %v4064_v43 = vsub.f32 %v4056_v15, %v4062_v6 }
0x1367   : > { %17068 = vpow2.f32 %v4065_v7  ;;  %v4067_v44 = vmul.f32 1.442695, %v4064_v43 }
0x1369   : > { %17070 = vpow2.f32 %v4067_v44 }
0x1371   : > { %v17069_v49 = vpop.eup %17068 }
0x1372   : > { %v4069_v50 = vsel %vm1006_vm4, %v17069_v49, 0.0 }
0x1373   : > { %v17071_v46 = vpop.eup %17070  ;;  %4070 = vadd.xlane.f32.xlu0 %v4069_v50 }
0x1374   : > { %v4072_v23 = vsel %vm1006_vm4, %v17071_v46, 0.0 }
0x1377   : > { %4073 = vadd.xlane.f32.xlu0 %v4072_v23  ;;  %v16593_v23 = vld [vmem:[%s20980_s7 + $0x28] sm:$0xff]  }
0x1400   : > { %v4071_v24 = vpop.xlane.xlu0 %4070 }
0x1401   : > { %17072 = vrcp.f32 %v4071_v24 }
0x1404   : > { %v4074_v51 = vpop.xlane.xlu0 %4073 }
0x1405   : > { %17074 = vrcp.f32 %v4074_v51 }
0x140b   : > { %v17073_v55 = vpop.eup %17072 }
0x140c   : > { %v4077_v52 = vmul.f32 %v17073_v55, %v17069_v49 }
0x140f   : > { %v17075_v56 = vpop.eup %17074 }
0x1410   : > { %v4078_v57 = vmul.f32 %v17075_v56, %v17071_v46  ;;  %v16592_v46 = vld [vmem:[%s20980_s7 + $0x20] sm:$0xff]  }
0x1412   : > { %v4079_v58 = vpack.c.bf16 %v4078_v57, %v4077_v52 }
0x1414   : > { %16190 = vmatmul.mubr.msk.bf16.vlgmr.msra.gmra.mrb[56].mxu0 %vm1006_vm4, %v4079_v58 }
0x1415   : > { %16213 = vmatprep.mubr.msk.bf16.mxu0 %vm17167_vm0, %v17166_v1  ;;  %16206 = vmatpush3.bf16.msra.mxu0 %v16592_v46  ;;  %v16598_v46 = vld [vmem:[%s20931_s12 + $0x30] sm:$0xff]  }
0x1416   : > { %16207 = vmatprep.subr.bf16.mxu0 %v17166_v1 }
0x1419   : > { %16208 = vmatpush3.bf16.msra.mxu0 %v16593_v23 }
0x141a   : > { %16209 = vmatprep.subr.bf16.mxu0 %v17166_v1 }
0x141d   : > { %16210 = vmatpush3.bf16.msra.mxu0 %v16594_v53 }
0x141e   : > { %16211 = vmatprep.subr.bf16.mxu0 %v17166_v1 }
0x1421   : > { %16212 = vmatpush3.bf16.msra.mxu0 %v16595_v54 }
0x1422   : > { %16229 = vmatprep.subr.bf16.mxu0 %v17166_v1 }
0x14e7   : > { %v4118_v60 = vpop.f32.mrb[56].mxu0 }
0x14e8   : > { %v16191_v61 = vpop.f32.mrb[57].mxu0 }
0x14e9   : > { %v4121_v0 = vpop.f32.mrb[58].mxu0 }
0x14ea   : > { %v4136_v5 = vpack.c.bf16 %v4121_v0, %v4118_v60  ;;  %v16192_v10 = vpop.f32.mrb[59].mxu0 }
0x14ec   : > { %16202 = vmatmul.mubr.msk.bf16.vlgmr.msra.gmra.mrb[56].mxu1 %vm902_vm3, %v4136_v5 }
0x14ed   : > { %16218 = vmatpush3.bf16.msra.mxu1 %v16588_v2  ;;  %16225 = vmatprep.mubr.msk.bf16.mxu1 %vm17167_vm0, %v17166_v1  ;;  %v13450_v2 = vld [vmem:[%s20934_s15 + $0x1] ss:$0 sm:$0xff] }
0x14ee   : > { %16219 = vmatprep.subr.bf16.mxu1 %v17166_v1 }
0x14f1   : > { %16220 = vmatpush3.bf16.msra.mxu1 %v16589_v37 }
0x14f2   : > { %16221 = vmatprep.subr.bf16.mxu1 %v17166_v1 }
0x14f5   : > { %16222 = vmatpush3.bf16.msra.mxu1 %v16590_v11 }
0x14f6   : > { %16223 = vmatprep.subr.bf16.mxu1 %v17166_v1 }
0x14f9   : > { %16224 = vmatpush3.bf16.msra.mxu1 %v16591_v12 }
0x14fa   : > { %16241 = vmatprep.subr.bf16.mxu1 %v17166_v1 }
0x14fc   : > { %16226 = vmatmul.mubr.msk.bf16.vlgmr.msra.gmra.mrb[60].mxu1 %vm902_vm3, %v17376_v26 }
0x14fd   : > { %16249 = vmatprep.mubr.msk.bf16.mxu1 %vm17167_vm0, %v17166_v1 }
0x15bf   : > { %v4204_v14 = vpop.f32.mrb[56].mxu1 }
0x15c0   : > { %v4205_v19 = vadd.f32 %v13441_v13, %v4204_v14  ;;  %v16203_v3 = vpop.f32.mrb[57].mxu1 }
0x15c1   : > { %v4207_v20 = vpop.f32.mrb[58].mxu1 }
0x15c2   : > { %v4208_v4 = vadd.f32 %v13441_v13, %v4207_v20  ;;  %v16204_v32 = vpop.f32.mrb[59].mxu1  ;;  %v4211_v8 = vadd.f32 %v4205_v19, %v18284_v62  ;;  %v13460_v13 = vld [vmem:[%s20928_s9 + $0x1] ss:$0 sm:$0xff] }
0x15c4   : > { %v4217_v9 = vsel %vm902_vm3, %v4211_v8, 0.0  ;;  %v4212_v16 = vadd.f32 %v4208_v4, %v18286_v63 }
0x15c5   : > { %4218 = vadd.xlane.f32.xlu0 %v4217_v9 }
0x15c6   : > { %v4220_v18 = vsel %vm902_vm3, %v4212_v16, 0.0 }
0x15c9   : > { %4221 = vadd.xlane.f32.xlu0 %v4220_v18 }
0x15cf   : > { %v4420_v28 = vpop.f32.mrb[60].mxu1 }
0x15d0   : > { %v16227_v34 = vpop.f32.mrb[61].mxu1  ;;  %v4421_v39 = vadd.f32 %v13475_v25, %v4420_v28 }
0x15d1   : > { %v4423_v33 = vpop.f32.mrb[62].mxu1 }
0x15d2   : > { %v4424_v40 = vadd.f32 %v13475_v25, %v4423_v33  ;;  %v16228_v15 = vpop.f32.mrb[63].mxu1 }
0x15d4   : > { %v18373_v42 = vpack.c.bf16 %v4424_v40, %v4421_v39 }
0x15d6   : > { %v4433_v12 = vsel %vm902_vm3, %v18373_v42, 0 }
0x1652   : > { %v4219_v62 = vpop.xlane.xlu0 %4218 }
0x1653   : > { %v4223_v35 = vmul.f32 0.015625, %v4219_v62 }
0x1655   : > { %v4225_v36 = vsub.f32 %v4211_v8, %v4223_v35 }
0x1656   : > { %v4222_v63 = vpop.xlane.xlu0 %4221 }
0x1657   : > { %v4224_v6 = vmul.f32 0.015625, %v4222_v63  ;;  %v4227_v7 = vmul.f32 %v4225_v36, %v4225_v36 }
0x1659   : > { %v4226_v43 = vsub.f32 %v4212_v16, %v4224_v6  ;;  %v4229_v44 = vsel %vm902_vm3, %v4227_v7, 0.0 }
0x165a   : > { %4230 = vadd.xlane.f32.xlu0 %v4229_v44 }
0x165b   : > { %v4228_v49 = vmul.f32 %v4226_v43, %v4226_v43 }
0x165d   : > { %v4232_v50 = vsel %vm902_vm3, %v4228_v49, 0.0 }
0x165e   : > { %4233 = vadd.xlane.f32.xlu0 %v4232_v50  ;;  %v16597_v50 = vld [vmem:[%s20931_s12 + $0x28] sm:$0xff]  }
0x16e7   : > { %v4231_v47 = vpop.xlane.xlu0 %4230 }
0x16e8   : > { %v4235_v24 = vmul.f32 0.015625, %v4231_v47 }
0x16ea   : > { %v4237_v51 = vadd.f32 1e-05, %v4235_v24 }
0x16eb   : > { %v4234_v55 = vpop.xlane.xlu0 %4233 }
0x16ec   : > { %17076 = vrsqrt.f32 %v4237_v51  ;;  %v4236_v56 = vmul.f32 0.015625, %v4234_v55 }
0x16ee   : > { %v4238_v52 = vadd.f32 1e-05, %v4236_v56  ;;  %v16599_v56 = vld [vmem:[%s20931_s12 + $0x38] sm:$0xff]  }
0x16f0   : > { %17078 = vrsqrt.f32 %v4238_v52 }
0x16f6   : > { %v17077_v57 = vpop.eup %17076 }
0x16f7   : > { %v4241_v58 = vmul.f32 %v17077_v57, %v4225_v36 }
0x16f9   : > { %v4249_v61 = vmul.f32 %v13449_v59, %v4241_v58 }
0x16fa   : > { %v17079_v60 = vpop.eup %17078 }
0x16fb   : > { %v4242_v0 = vmul.f32 %v17079_v60, %v4226_v43  ;;  %v18399_v10 = vadd.f32 %v13450_v2, %v4249_v61  ;;  %v13492_v61 = vld [vmem:[%s20932_s13 + $0x1] ss:$0 sm:$0xff] }
0x16fd   : > { %v4250_v5 = vmul.f32 %v13449_v59, %v4242_v0 }
0x16ff   : > { %v18401_v37 = vadd.f32 %v13450_v2, %v4250_v5 }
0x1701   : > { %v4270_v11 = vpack.c.bf16 %v18401_v37, %v18399_v10 }
0x1703   : > { %16214 = vmatmul.mubr.msk.bf16.vlgmr.msra.gmra.mrb[60].mxu0 %vm902_vm3, %v4270_v11 }
0x1704   : > { %16230 = vmatpush3.bf16.xpose.msra.mxu0 %v4433_v12  ;;  %16231 = vmatprep.mubr.msk.bf16.mxu0 %vm17167_vm0, %v17166_v1 }
0x1705   : > { %16235 = vmatprep.subr.bf16.mxu0 %v17166_v1 }
0x17d6   : > { %v4338_v14 = vpop.f32.mrb[60].mxu0 }
0x17d7   : > { %v16215_v19 = vpop.f32.mrb[61].mxu0  ;;  %v4339_v20 = vadd.f32 %v13460_v13, %v4338_v14 }
0x17d8   : > { %v4341_v3 = vpop.f32.mrb[62].mxu0 }
0x17d9   : > { %v4342_v4 = vadd.f32 %v13460_v13, %v4341_v3  ;;  %v16216_v32 = vpop.f32.mrb[63].mxu0 }
0x17db   : > { %v4427_v8 = vpack.c.bf16 %v4342_v4, %v4339_v20 }
0x17dd   : > { %16232 = vmatmul.mubr.msk.bf16.vlgmr.msra.gmra.mrb[64].mxu0 %vm902_vm3, %v4427_v8 }
0x17de   : > { %16237 = vmatprep.mubr.msk.bf16.mxu0 %vm17167_vm0, %v17166_v1 }
0x18b0   : > { %v4469_v9 = vpop.f32.mrb[64].mxu0 }
0x18b1   : > { %v4476_v16 = vmul.f32 0.125, %v4469_v9  ;;  %v16233_v18 = vpop.f32.mrb[65].mxu0 }
0x18b2   : > { %v4472_v25 = vpop.f32.mrb[66].mxu0 }
0x18b3   : > { %v4477_v28 = vmul.f32 0.125, %v4472_v25  ;;  %v16234_v34 = vpop.f32.mrb[67].mxu0  ;;  %v4478_v33 = vadd.f32 %v18308_v38, %v4476_v16 }
0x18b4   : > { %v13502_v34 = vld [vmem:[%s20939_s20 + $0x200] sm:$0xff] }
0x18b5   : > { %v4480_v39 = vsel %vm1006_vm4, %v4478_v33, -inf  ;;  %v4479_v40 = vadd.f32 %v18315_v41, %v4477_v28  ;;  %v16596_v41 = vld [vmem:[%s20931_s12 + $0x20] sm:$0xff]  }
0x18b6   : > { %4481 = vmax.xlane.f32.xlu0 %v4480_v39  ;;  %16242 = vmatpush3.bf16.msra.mxu1 %v16596_v41  ;;  %v13503_v39 = vld [vmem:[%s20939_s20 + $0x208] sm:$0xff] }
0x18b7   : > { %v4483_v15 = vsel %vm1006_vm4, %v4479_v40, -inf  ;;  %16243 = vmatprep.subr.bf16.mxu1 %v17166_v1 }
0x18b8   : > { %4484 = vmax.xlane.f32.xlu1 %v4483_v15  ;;  %v13511_v15 = vld [vmem:[%s20939_s20 + $0x248] sm:$0xff] }
0x18ba   : > { %16244 = vmatpush3.bf16.msra.mxu1 %v16597_v50  ;;  %v13534_v50 = vld [vmem:[%s20939_s20 + $0x300] sm:$0xff] }
0x18bb   : > { %16245 = vmatprep.subr.bf16.mxu1 %v17166_v1 }
0x18be   : > { %16246 = vmatpush3.bf16.msra.mxu1 %v16598_v46  ;;  %v13542_v46 = vld [vmem:[%s20939_s20 + $0x340] sm:$0xff] }
0x18bf   : > { %16247 = vmatprep.subr.bf16.mxu1 %v17166_v1 }
0x18c2   : > { %16248 = vmatpush3.bf16.msra.mxu1 %v16599_v56  ;;  %v13551_v56 = vld [vmem:[%s20939_s20 + $0x388] sm:$0xff] }
0x1943   : > { %v4482_v62 = vpop.xlane.xlu0 %4481 }
0x1944   : > { %v4486_v35 = vsub.f32 %v4478_v33, %v4482_v62  ;;  %v13510_v33 = vld [vmem:[%s20939_s20 + $0x240] sm:$0xff] }
0x1945   : > { %v4485_v36 = vpop.xlane.xlu1 %4484  ;;  %v13568_v62 = vcombine.low %v13502_v34, %v13510_v33 }
0x1946   : > { %v4488_v63 = vmul.f32 1.442695, %v4486_v35  ;;  %v4487_v6 = vsub.f32 %v4479_v40, %v4485_v36  ;;  %v13569_v40 = vcombine.high %v13502_v34, %v13510_v33  ;;  %v13570_v35 = vcombine.low %v13503_v39, %v13511_v15  ;;  %v13501_v33 = vld [vmem:[%s20936_s17 + $0x1] ss:$0 sm:$0xff] }
0x1947   : > { %v13571_v36 = vcombine.high %v13503_v39, %v13511_v15  ;;  %v13521_v15 = vld [vmem:[%s20939_s20 + $0x298] sm:$0xff] }
0x1948   : > { %17080 = vpow2.f32 %v4488_v63  ;;  %v4490_v7 = vmul.f32 1.442695, %v4487_v6  ;;  %v13518_v63 = vld [vmem:[%s20939_s20 + $0x280] sm:$0xff] }
0x1949   : > { %5202 = vmatprep.subr.bf16.mxu1 %v13571_v36  ;;  %v13526_v6 = vld [vmem:[%s20939_s20 + $0x2c0] sm:$0xff] }
0x194a   : > { %17082 = vpow2.f32 %v4490_v7  ;;  %v13519_v7 = vld [vmem:[%s20939_s20 + $0x288] sm:$0xff] }
0x1952   : > { %v17081_v43 = vpop.eup %17080 }
0x1953   : > { %v4492_v44 = vsel %vm1006_vm4, %v17081_v43, 0.0 }
0x1954   : > { %v17083_v38 = vpop.eup %17082  ;;  %4493 = vadd.xlane.f32.xlu0 %v4492_v44  ;;  %v13527_v44 = vld [vmem:[%s20939_s20 + $0x2c8] sm:$0xff] }
0x1955   : > { %v4495_v49 = vsel %vm1006_vm4, %v17083_v38, 0.0  ;;  %v13587_v41 = vcombine.high %v13519_v7, %v13527_v44 }
0x1956   : > { %4496 = vadd.xlane.f32.xlu1 %v4495_v49  ;;  %v13586_v49 = vcombine.low %v13519_v7, %v13527_v44  ;;  %v13536_v7 = vld [vmem:[%s20939_s20 + $0x310] sm:$0xff]  ;;  %v13537_v44 = vld [vmem:[%s20939_s20 + $0x318] sm:$0xff] }
0x196a   : > { %4504 = vrot.lane.b32.xlu0 %v18373_v42, %s20981_s0 }
0x19e1   : > { %v4494_v42 = vpop.xlane.xlu0 %4493 }
0x19e2   : > { %17084 = vrcp.f32 %v4494_v42  ;;  %v13535_v42 = vld [vmem:[%s20939_s20 + $0x308] sm:$0xff] }
0x19e3   : > { %v4497_v23 = vpop.xlane.xlu1 %4496 }
0x19e4   : > { %17086 = vrcp.f32 %v4497_v23  ;;  %v13601_v23 = vcombine.high %v13534_v50, %v13542_v46 }
0x19e5   : > { %v4505_v53 = vpop.permute.xlu0 %4504 }
0x19e6   : > { %16236 = vmatpush3.bf16.msra.mxu0 %v4505_v53  ;;  %v13543_v53 = vld [vmem:[%s20939_s20 + $0x348] sm:$0xff] }
0x19e7   : > { %5159 = vmatprep.subr.bf16.mxu0 %v13569_v40  ;;  %v13520_v40 = vld [vmem:[%s20939_s20 + $0x290] sm:$0xff] }
0x19ec   : > { %v17085_v54 = vpop.eup %17084 }
0x19ed   : > { %v4500_v24 = vmul.f32 %v17085_v54, %v17081_v43  ;;  %v13585_v43 = vcombine.high %v13518_v63, %v13526_v6  ;;  %v13600_v54 = vcombine.low %v13534_v50, %v13542_v46 }
0x19ee   : > { %v17087_v47 = vpop.eup %17086 }
0x19ef   : > { %v4501_v51 = vmul.f32 %v17087_v47, %v17083_v38  ;;  %v13584_v38 = vcombine.low %v13518_v63, %v13526_v6  ;;  %v13602_v47 = vcombine.low %v13535_v42, %v13543_v53 }
0x19f1   : > { %v4502_v55 = vpack.c.bf16 %v4501_v51, %v4500_v24  ;;  %v13603_v24 = vcombine.high %v13535_v42, %v13543_v53  ;;  %v13550_v51 = vld [vmem:[%s20939_s20 + $0x380] sm:$0xff]  ;;  %v13552_v42 = vld [vmem:[%s20939_s20 + $0x390] sm:$0xff]  ;;  %v13553_v53 = vld [vmem:[%s20939_s20 + $0x398] sm:$0xff] }
0x19f3   : > { %16238 = vmatmul.mubr.msk.bf16.vlgmr.msra.gmra.mrb[68].mxu0 %vm1006_vm4, %v4502_v55  ;;  %v13558_v55 = vld [vmem:[%s20939_s20 + $0x3c0] sm:$0xff] }
0x19f4   : > { %5191 = vmatprep.mubr.bf16.mxu0 %v17168_v17  ;;  %5160 = vmatpush1.bf16.msra.mxu0 %v13568_v62 }
0x19f5   : > { %5161 = vmatprep.subr.bf16.mxu0 %v13585_v43  ;;  %v13544_v43 = vld [vmem:[%s20939_s20 + $0x350] sm:$0xff] }
0x19f6   : > { %v13605_v50 = vcombine.high %v13536_v7, %v13544_v43 }
0x19f8   : > { %5162 = vmatpush1.bf16.msra.mxu0 %v13584_v38  ;;  %v13545_v38 = vld [vmem:[%s20939_s20 + $0x358] sm:$0xff] }
0x19f9   : > { %5163 = vmatprep.subr.bf16.mxu0 %v13601_v23  ;;  %v13607_v46 = vcombine.high %v13537_v44, %v13545_v38  ;;  %v13560_v23 = vld [vmem:[%s20939_s20 + $0x3d0] sm:$0xff] }
0x19fc   : > { %5164 = vmatpush1.bf16.msra.mxu0 %v13600_v54  ;;  %v13561_v54 = vld [vmem:[%s20939_s20 + $0x3d8] sm:$0xff] }
0x1ac6   : > { %v4544_v52 = vpop.f32.mrb[68].mxu0 }
0x1ac7   : > { %v16239_v57 = vpop.f32.mrb[69].mxu0 }
0x1ac8   : > { %v4547_v58 = vpop.f32.mrb[70].mxu0  ;;  %v13559_v57 = vld [vmem:[%s20939_s20 + $0x3c8] sm:$0xff] }
0x1ac9   : > { %v4562_v59 = vpack.c.bf16 %v4547_v58, %v4544_v52  ;;  %v16240_v60 = vpop.f32.mrb[71].mxu0  ;;  %v13617_v52 = vcombine.high %v13550_v51, %v13558_v55  ;;  %v13616_v58 = vcombine.low %v13550_v51, %v13558_v55  ;;  %v13621_v51 = vcombine.high %v13552_v42, %v13560_v23 }
0x1aca   : > { %v13619_v60 = vcombine.high %v13551_v56, %v13559_v57  ;;  %v13623_v55 = vcombine.high %v13553_v53, %v13561_v54 }
0x1acb   : > { %16250 = vmatmul.mubr.msk.bf16.vlgmr.msra.gmra.mrb[64].mxu1 %vm902_vm3, %v4562_v59  ;;  %v13618_v59 = vcombine.low %v13551_v56, %v13559_v57  ;;  %5165 = vmatprep.subr.bf16.mxu0 %v13617_v52  ;;  %v13506_v56 = vld [vmem:[%s20939_s20 + $0x220] sm:$0xff]  ;;  %v13507_v57 = vld [vmem:[%s20939_s20 + $0x228] sm:$0xff] }
0x1acc   : > { %5234 = vmatprep.mubr.bf16.mxu1 %v17168_v17  ;;  %5203 = vmatpush1.bf16.msra.mxu1 %v13570_v35  ;;  %v13514_v52 = vld [vmem:[%s20939_s20 + $0x260] sm:$0xff] }
0x1acd   : > { %5204 = vmatprep.subr.bf16.mxu1 %v13587_v41  ;;  %5166 = vmatpush1.bf16.msra.mxu0 %v13616_v58  ;;  %v13515_v58 = vld [vmem:[%s20939_s20 + $0x268] sm:$0xff] }
0x1ad0   : > { %5205 = vmatpush1.bf16.msra.mxu1 %v13586_v49 }
0x1ad1   : > { %5206 = vmatprep.subr.bf16.mxu1 %v13603_v24  ;;  %v13606_v24 = vcombine.low %v13537_v44, %v13545_v38 }
0x1ad4   : > { %5207 = vmatpush1.bf16.msra.mxu1 %v13602_v47  ;;  %v13604_v47 = vcombine.low %v13536_v7, %v13544_v43  ;;  %v13509_v7 = vld [vmem:[%s20939_s20 + $0x238] sm:$0xff] }
0x1ad5   : > { %5208 = vmatprep.subr.bf16.mxu1 %v13619_v60  ;;  %v13622_v60 = vcombine.low %v13553_v53, %v13561_v54  ;;  %v13517_v43 = vld [vmem:[%s20939_s20 + $0x278] sm:$0xff] }
0x1ad6   : > { %v13582_v54 = vcombine.low %v13509_v7, %v13517_v43 }
0x1ad8   : > { %5209 = vmatpush1.bf16.msra.mxu1 %v13618_v59  ;;  %v13620_v59 = vcombine.low %v13552_v42, %v13560_v23  ;;  %v13525_v42 = vld [vmem:[%s20939_s20 + $0x2b8] sm:$0xff] }
0x1ad9   : > { %v13533_v23 = vld [vmem:[%s20939_s20 + $0x2f8] sm:$0xff] }
0x1b9e   : > { %v4630_v0 = vpop.f32.mrb[64].mxu1 }
0x1b9f   : > { %v4631_v2 = vadd.f32 %v13492_v61, %v4630_v0  ;;  %v16251_v5 = vpop.f32.mrb[65].mxu1  ;;  %v13512_v0 = vld [vmem:[%s20939_s20 + $0x250] sm:$0xff] }
0x1ba0   : > { %v4633_v11 = vpop.f32.mrb[66].mxu1 }
0x1ba1   : > { %v4634_v12 = vadd.f32 %v13492_v61, %v4633_v11  ;;  %v16252_v13 = vpop.f32.mrb[67].mxu1  ;;  %v4637_v14 = vadd.f32 %v4631_v2, %v18399_v10  ;;  %v13504_v61 = vld [vmem:[%s20939_s20 + $0x210] sm:$0xff]  ;;  %v13505_v2 = vld [vmem:[%s20939_s20 + $0x218] sm:$0xff] }
0x1ba2   : > { %v13572_v5 = vcombine.low %v13504_v61, %v13512_v0  ;;  %v13573_v11 = vcombine.high %v13504_v61, %v13512_v0  ;;  %v13577_v61 = vcombine.high %v13506_v56, %v13514_v52  ;;  %v13579_v0 = vcombine.high %v13507_v57, %v13515_v58 }
0x1ba3   : > { %v4643_v19 = vsel %vm902_vm3, %v4637_v14, 0.0  ;;  %v4638_v3 = vadd.f32 %v4634_v12, %v18401_v37  ;;  %v13513_v12 = vld [vmem:[%s20939_s20 + $0x258] sm:$0xff] }
0x1ba4   : > { %4644 = vadd.xlane.f32.xlu1 %v4643_v19  ;;  %v13574_v13 = vcombine.low %v13505_v2, %v13513_v12  ;;  %5245 = vmatprep.subr.bf16.mxu0 %v13573_v11  ;;  %v13523_v11 = vld [vmem:[%s20939_s20 + $0x2a8] sm:$0xff] }
0x1ba5   : > { %v4646_v20 = vsel %vm902_vm3, %v4638_v3, 0.0 }
0x1ba8   : > { %4647 = vadd.xlane.f32.xlu1 %v4646_v20 }
0x1c31   : > { %v4645_v4 = vpop.xlane.xlu1 %4644 }
0x1c32   : > { %v4649_v32 = vmul.f32 0.015625, %v4645_v4 }
0x1c34   : > { %v18451_v8 = vsub.f32 %v4637_v14, %v4649_v32  ;;  %v13575_v14 = vcombine.high %v13505_v2, %v13513_v12  ;;  %v13522_v2 = vld [vmem:[%s20939_s20 + $0x2a0] sm:$0xff]  ;;  %v13531_v12 = vld [vmem:[%s20939_s20 + $0x2e8] sm:$0xff] }
0x1c35   : > { %v4648_v9 = vpop.xlane.xlu1 %4647 }
0x1c36   : > { %v4650_v16 = vmul.f32 0.015625, %v4648_v9  ;;  %v4653_v18 = vmul.f32 %v18451_v8, %v18451_v8  ;;  %5288 = vmatprep.subr.bf16.mxu1 %v13575_v14  ;;  %v13578_v14 = vcombine.low %v13507_v57, %v13515_v58  ;;  %v13598_v58 = vcombine.low %v13525_v42, %v13533_v23 }
0x1c38   : > { %v18455_v25 = vsub.f32 %v4638_v3, %v4650_v16  ;;  %v4655_v10 = vsel %vm902_vm3, %v4653_v18, 0.0 }
0x1c39   : > { %4656 = vadd.xlane.f32.xlu1 %v4655_v10  ;;  %v13500_v10 = vld [vmem:[%s20983_s16 + $0x1] ss:$0 sm:$0xff]  ;;  %s20984_s16 = sld [smem:[#allocation13_spill]] }
0x1c3a   : > { %v4654_v37 = vmul.f32 %v18455_v25, %v18455_v25 }
0x1c3c   : > { %v4658_v28 = vsel %vm902_vm3, %v4654_v37, 0.0 }
0x1c3d   : > { %4659 = vadd.xlane.f32.xlu1 %v4658_v28 }
0x1cc6   : > { %v4657_v19 = vpop.xlane.xlu1 %4656 }
0x1cc7   : > { %v4661_v3 = vmul.f32 0.015625, %v4657_v19 }
0x1cc9   : > { %v4663_v20 = vadd.f32 1e-05, %v4661_v3  ;;  %v13595_v3 = vcombine.high %v13523_v11, %v13531_v12 }
0x1cca   : > { %v4660_v4 = vpop.xlane.xlu1 %4659 }
0x1ccb   : > { %17088 = vrsqrt.f32 %v4663_v20  ;;  %v4662_v32 = vmul.f32 0.015625, %v4660_v4  ;;  %v13538_v20 = vld [vmem:[%s20939_s20 + $0x320] sm:$0xff] }
0x1ccc   : > { %v13546_v4 = vld [vmem:[%s20939_s20 + $0x360] sm:$0xff] }
0x1ccd   : > { %v4664_v9 = vadd.f32 1e-05, %v4662_v32  ;;  %v13539_v32 = vld [vmem:[%s20939_s20 + $0x328] sm:$0xff] }
0x1ccf   : > { %17090 = vrsqrt.f32 %v4664_v9  ;;  %v13547_v9 = vld [vmem:[%s20939_s20 + $0x368] sm:$0xff] }
0x1cd5   : > { %v17089_v16 = vpop.eup %17088 }
0x1cd6   : > { %v4667_v18 = vmul.f32 %v17089_v16, %v18451_v8  ;;  %v13528_v8 = vld [vmem:[%s20939_s20 + $0x2d0] sm:$0xff] }
0x1cd7   : > { %v13589_v63 = vcombine.high %v13520_v40, %v13528_v8  ;;  %v13588_v49 = vcombine.low %v13520_v40, %v13528_v8  ;;  %v13608_v40 = vcombine.low %v13538_v20, %v13546_v4  ;;  %v13610_v8 = vcombine.low %v13539_v32, %v13547_v9 }
0x1cd8   : > { %v4675_v28 = vmul.f32 %v13500_v10, %v4667_v18  ;;  %v13594_v18 = vcombine.low %v13523_v11, %v13531_v12 }
0x1cd9   : > { %v17091_v37 = vpop.eup %17090 }
0x1cda   : > { %v4668_v34 = vmul.f32 %v17091_v37, %v18455_v25  ;;  %v13529_v25 = vld [vmem:[%s20939_s20 + $0x2d8] sm:$0xff]  ;;  %v18541_v62 = vadd.f32 %v13501_v33, %v4675_v28  ;;  %v13611_v37 = vcombine.high %v13539_v32, %v13547_v9  ;;  %v13554_v28 = vld [vmem:[%s20939_s20 + $0x3a0] sm:$0xff] }
0x1cdb   : > { %v13591_v6 = vcombine.high %v13521_v15, %v13529_v25  ;;  %v13590_v41 = vcombine.low %v13521_v15, %v13529_v25  ;;  %v16602_v32 = vld [vmem:[%s20941_s22 + $0x400] sm:$0xff]  }
0x1cdc   : > { %v4676_v39 = vmul.f32 %v13500_v10, %v4668_v34  ;;  %v13609_v10 = vcombine.high %v13538_v20, %v13546_v4  ;;  %v13562_v34 = vld [vmem:[%s20939_s20 + $0x3e0] sm:$0xff] }
0x1cdd   : > { %v13625_v15 = vcombine.high %v13554_v28, %v13562_v34  ;;  %v13624_v44 = vcombine.low %v13554_v28, %v13562_v34  ;;  %v16600_v20 = vld [vmem:[%s20941_s22 + $0x440] sm:$0xff]   ;;  %v16608_v28 = vld [vmem:[%s20941_s22 + $0x450] sm:$0xff]  }
0x1cde   : > { %v18543_v35 = vadd.f32 %v13501_v33, %v4676_v39  ;;  %v13555_v33 = vld [vmem:[%s20939_s20 + $0x3a8] sm:$0xff]  ;;  %v16601_v4 = vld [vmem:[%s20941_s22 + $0x4c0] sm:$0xff]   ;;  %v16610_v34 = vld [vmem:[%s20941_s22 + $0x410] sm:$0xff]  }
0x1cdf   : > { %v13563_v39 = vld [vmem:[%s20939_s20 + $0x3e8] sm:$0xff]  ;;  %v16603_v9 = vld [vmem:[%s20941_s22 + $0x480] sm:$0xff]  }
0x1ce0   : > { %v18547_v36 = vpack.c.bf16 %v18543_v35, %v18541_v62  ;;  %v13627_v25 = vcombine.high %v13555_v33, %v13563_v39  ;;  %v13626_v38 = vcombine.low %v13555_v33, %v13563_v39  ;;  %v16611_v33 = vld [vmem:[%s20941_s22 + $0x490] sm:$0xff]   ;;  %v16612_v39 = vld [vmem:[%s20941_s22 + $0x458] sm:$0xff]  }
0x1ce2   : > { %13632 = vmatmul.mubr.msk.bf16.vlgmr.msra.gmra.mrb[72].mxu0 %vm902_vm3, %v18547_v36  ;;  %13633 = vmatmul.mubr.msk.bf16.vlgmr.msra.gmra.mrb[68].mxu1 %vm902_vm3, %v18547_v36 }
0x1ce3   : > { %5246 = vmatpush1.bf16.msra.mxu0 %v13572_v5  ;;  %5289 = vmatpush1.bf16.msra.mxu1 %v13574_v13  ;;  %v13530_v5 = vld [vmem:[%s20939_s20 + $0x2e0] sm:$0xff]  ;;  %v13576_v13 = vcombine.low %v13506_v56, %v13514_v52  ;;  %v13541_v56 = vld [vmem:[%s20939_s20 + $0x338] sm:$0xff] }
0x1ce4   : > { %5247 = vmatprep.subr.bf16.mxu0 %v13589_v63  ;;  %5290 = vmatprep.subr.bf16.mxu1 %v13591_v6  ;;  %v13593_v19 = vcombine.high %v13522_v2, %v13530_v5  ;;  %v13592_v16 = vcombine.low %v13522_v2, %v13530_v5  ;;  %v13508_v63 = vld [vmem:[%s20939_s20 + $0x230] sm:$0xff]  ;;  %v13549_v52 = vld [vmem:[%s20939_s20 + $0x378] sm:$0xff] }
0x1ce5   : > { %5277 = vmatprep.mubr.bf16.mxu0 %v17168_v17  ;;  %5320 = vmatprep.mubr.bf16.mxu1 %v17168_v17  ;;  %v13516_v6 = vld [vmem:[%s20939_s20 + $0x270] sm:$0xff]  ;;  %v13557_v2 = vld [vmem:[%s20939_s20 + $0x3b8] sm:$0xff]  ;;  %v13614_v12 = vcombine.low %v13541_v56, %v13549_v52 }
0x1ce6   : > { %v13580_v53 = vcombine.low %v13508_v63, %v13516_v6  ;;  %v13565_v5 = vld [vmem:[%s20939_s20 + $0x3f8] sm:$0xff] }
0x1ce7   : > { %5248 = vmatpush1.bf16.msra.mxu0 %v13588_v49  ;;  %5291 = vmatpush1.bf16.msra.mxu1 %v13590_v41  ;;  %v13581_v49 = vcombine.high %v13508_v63, %v13516_v6  ;;  %v13583_v41 = vcombine.high %v13509_v7, %v13517_v43  ;;  %v16617_v63 = vld [vmem:[%s20941_s22 + $0x4e0] sm:$0xff]   ;;  %v16620_v43 = vld [vmem:[%s20941_s22 + $0x468] sm:$0xff]  }
0x1ce8   : > { %5249 = vmatprep.subr.bf16.mxu0 %v13605_v50  ;;  %5292 = vmatprep.subr.bf16.mxu1 %v13607_v46  ;;  %v13524_v50 = vld [vmem:[%s20939_s20 + $0x2b0] sm:$0xff]  ;;  %v16618_v6 = vld [vmem:[%s20941_s22 + $0x420] sm:$0xff]  }
0x1ce9   : > { %v13532_v46 = vld [vmem:[%s20939_s20 + $0x2f0] sm:$0xff]  ;;  %v16619_v7 = vld [vmem:[%s20941_s22 + $0x4a0] sm:$0xff]  }
0x1cea   : > { %v13596_v57 = vcombine.low %v13524_v50, %v13532_v46 }
0x1ceb   : > { %5250 = vmatpush1.bf16.msra.mxu0 %v13604_v47  ;;  %5293 = vmatpush1.bf16.msra.mxu1 %v13606_v24  ;;  %v13597_v47 = vcombine.high %v13524_v50, %v13532_v46  ;;  %v13599_v24 = vcombine.high %v13525_v42, %v13533_v23  ;;  %v16625_v50 = vld [vmem:[%s20941_s22 + $0x4f0] sm:$0xff]   ;;  %v16628_v23 = vld [vmem:[%s20941_s22 + $0x478] sm:$0xff]  }
0x1cec   : > { %5251 = vmatprep.subr.bf16.mxu0 %v13621_v51  ;;  %5294 = vmatprep.subr.bf16.mxu1 %v13623_v55  ;;  %v13540_v51 = vld [vmem:[%s20939_s20 + $0x330] sm:$0xff] }
0x1ced   : > { %v13548_v55 = vld [vmem:[%s20939_s20 + $0x370] sm:$0xff] }
0x1cee   : > { %v13612_v11 = vcombine.low %v13540_v51, %v13548_v55  ;;  %v16626_v46 = vld [vmem:[%s20941_s22 + $0x430] sm:$0xff]  }
0x1cef   : > { %5252 = vmatpush1.bf16.msra.mxu0 %v13620_v59  ;;  %5295 = vmatpush1.bf16.msra.mxu1 %v13622_v60  ;;  %v13613_v59 = vcombine.high %v13540_v51, %v13548_v55  ;;  %v13615_v60 = vcombine.high %v13541_v56, %v13549_v52  ;;  %v16627_v42 = vld [vmem:[%s20941_s22 + $0x4b0] sm:$0xff]   ;;  %v16633_v51 = vld [vmem:[%s20941_s22 + $0x5c0] sm:$0xff]  }
0x1cf0   : > { %5331 = vmatprep.subr.bf16.mxu0 %v13577_v61  ;;  %5374 = vmatprep.subr.bf16.mxu1 %v13579_v0  ;;  %v13556_v61 = vld [vmem:[%s20939_s20 + $0x3b0] sm:$0xff] }
0x1cf1   : > { %v13564_v0 = vld [vmem:[%s20939_s20 + $0x3f0] sm:$0xff] }
0x1cf2   : > { %13634 = vmatmul.mubr.msk.bf16.vlgmr.msra.gmra.mrb[76].mxu0 %vm902_vm3, %v18547_v36  ;;  %13635 = vmatmul.mubr.msk.bf16.vlgmr.msra.gmra.mrb[72].mxu1 %vm902_vm3, %v18547_v36  ;;  %v13566_v55 = vld [vmem:[%s20940_s21 + $0x10] sm:$0xff] }
0x1cf3   : > { %5332 = vmatpush1.bf16.msra.mxu0 %v13576_v13  ;;  %5375 = vmatpush1.bf16.msra.mxu1 %v13578_v14  ;;  %v13629_v13 = vcombine.high %v13556_v61, %v13564_v0  ;;  %v13631_v14 = vcombine.high %v13557_v2, %v13565_v5  ;;  %v4759_v56 = vrot.slane %v13566_v55, %v17385_v29 }
0x1cf4   : > { %5333 = vmatprep.subr.bf16.mxu0 %v13593_v19  ;;  %5376 = vmatprep.subr.bf16.mxu1 %v13595_v3  ;;  %v13628_v19 = vcombine.low %v13556_v61, %v13564_v0  ;;  %v13630_v3 = vcombine.low %v13557_v2, %v13565_v5  ;;  %v4767_v52 = vrot.slane %v13566_v55, %v17891_v45 }
0x1cf5   : > { %5363 = vmatprep.mubr.bf16.mxu0 %v17168_v17  ;;  %5406 = vmatprep.mubr.bf16.mxu1 %v17168_v17 }
0x1cf7   : > { %5334 = vmatpush1.bf16.msra.mxu0 %v13592_v16  ;;  %5377 = vmatpush1.bf16.msra.mxu1 %v13594_v18  ;;  %v16604_v16 = vld [vmem:[%s20941_s22 + $0x448] sm:$0xff]  }
0x1cf8   : > { %5335 = vmatprep.subr.bf16.mxu0 %v13609_v10  ;;  %5378 = vmatprep.subr.bf16.mxu1 %v13611_v37  ;;  %v16605_v18 = vld [vmem:[%s20941_s22 + $0x4c8] sm:$0xff]  }
0x1cf9   : > { %v16606_v10 = vld [vmem:[%s20941_s22 + $0x408] sm:$0xff]  }
0x1cfa   : > { %v16607_v37 = vld [vmem:[%s20941_s22 + $0x488] sm:$0xff]  }
0x1cfb   : > { %5336 = vmatpush1.bf16.msra.mxu0 %v13608_v40  ;;  %5379 = vmatpush1.bf16.msra.mxu1 %v13610_v8  ;;  %v16613_v40 = vld [vmem:[%s20941_s22 + $0x4d8] sm:$0xff]  }
0x1cfc   : > { %5337 = vmatprep.subr.bf16.mxu0 %v13625_v15  ;;  %5380 = vmatprep.subr.bf16.mxu1 %v13627_v25  ;;  %v16614_v8 = vld [vmem:[%s20941_s22 + $0x418] sm:$0xff]   ;;  %v16616_v25 = vld [vmem:[%s20941_s22 + $0x460] sm:$0xff]  }
0x1cfd   : > { %v16615_v15 = vld [vmem:[%s20941_s22 + $0x498] sm:$0xff]  }
0x1cff   : > { %5338 = vmatpush1.bf16.msra.mxu0 %v13624_v44  ;;  %5381 = vmatpush1.bf16.msra.mxu1 %v13626_v38  ;;  %v16621_v44 = vld [vmem:[%s20941_s22 + $0x4e8] sm:$0xff]  }
0x1d00   : > { %5417 = vmatprep.subr.bf16.mxu0 %v13581_v49  ;;  %5460 = vmatprep.subr.bf16.mxu1 %v13583_v41  ;;  %v16622_v38 = vld [vmem:[%s20941_s22 + $0x428] sm:$0xff]   ;;  %v16624_v41 = vld [vmem:[%s20941_s22 + $0x470] sm:$0xff]  }
0x1d01   : > { %v16623_v49 = vld [vmem:[%s20941_s22 + $0x4a8] sm:$0xff]  }
0x1d02   : > { %13636 = vmatmul.mubr.msk.bf16.vlgmr.msra.gmra.mrb[80].mxu0 %vm902_vm3, %v18547_v36  ;;  %13637 = vmatmul.mubr.msk.bf16.vlgmr.msra.gmra.mrb[76].mxu1 %vm902_vm3, %v18547_v36 }
0x1d03   : > { %5418 = vmatpush1.bf16.msra.mxu0 %v13580_v53  ;;  %5461 = vmatpush1.bf16.msra.mxu1 %v13582_v54  ;;  %v16629_v53 = vld [vmem:[%s20941_s22 + $0x4f8] sm:$0xff]  }
0x1d04   : > { %5419 = vmatprep.subr.bf16.mxu0 %v13597_v47  ;;  %5462 = vmatprep.subr.bf16.mxu1 %v13599_v24  ;;  %v16630_v54 = vld [vmem:[%s20941_s22 + $0x438] sm:$0xff]   ;;  %v16632_v24 = vld [vmem:[%s20941_s22 + $0x540] sm:$0xff]  }
0x1d05   : > { %5449 = vmatprep.mubr.bf16.mxu0 %v17168_v17  ;;  %5492 = vmatprep.mubr.bf16.mxu1 %v17168_v17  ;;  %v16631_v47 = vld [vmem:[%s20941_s22 + $0x4b8] sm:$0xff]  }
0x1d07   : > { %5420 = vmatpush1.bf16.msra.mxu0 %v13596_v57  ;;  %5463 = vmatpush1.bf16.msra.mxu1 %v13598_v58  ;;  %v4763_v57 = vrot.slane %v13566_v55, %v17391_v31  ;;  %v4771_v58 = vrot.slane %v13566_v55, %v17897_v48 }
0x1d08   : > { %5421 = vmatprep.subr.bf16.mxu0 %v13613_v59  ;;  %5464 = vmatprep.subr.bf16.mxu1 %v13615_v60 }
0x1d0b   : > { %5422 = vmatpush1.bf16.msra.mxu0 %v13612_v11  ;;  %5465 = vmatpush1.bf16.msra.mxu1 %v13614_v12 }
0x1d0c   : > { %5423 = vmatprep.subr.bf16.mxu0 %v13629_v13  ;;  %5466 = vmatprep.subr.bf16.mxu1 %v13631_v14 }
0x1d0f   : > { %5424 = vmatpush1.bf16.msra.mxu0 %v13628_v19  ;;  %5467 = vmatpush1.bf16.msra.mxu1 %v13630_v3 }
0x1d10   : > { %15509 = vmatprep.subr.bf16.mxu0 %v16600_v20  ;;  %15531 = vmatprep.subr.bf16.mxu1 %v16601_v4 }
0x1d12   : > { %13638 = vmatmul.mubr.msk.bf16.vlgmr.msra.gmra.mrb[84].mxu0 %vm902_vm3, %v18547_v36  ;;  %13639 = vmatmul.mubr.msk.bf16.vlgmr.msra.gmra.mrb[80].mxu1 %vm902_vm3, %v18547_v36  ;;  %v16609_v36 = vld [vmem:[%s20941_s22 + $0x4d0] sm:$0xff]  }
0x1d13   : > { %15510 = vmatpush3.bf16.msra.mxu0 %v16602_v32  ;;  %15532 = vmatpush3.bf16.msra.mxu1 %v16603_v9 }
0x1d14   : > { %15511 = vmatprep.subr.bf16.mxu0 %v16604_v16  ;;  %15533 = vmatprep.subr.bf16.mxu1 %v16605_v18 }
0x1d17   : > { %15512 = vmatpush3.bf16.msra.mxu0 %v16606_v10  ;;  %15534 = vmatpush3.bf16.msra.mxu1 %v16607_v37 }
0x1d18   : > { %15513 = vmatprep.subr.bf16.mxu0 %v16608_v28  ;;  %15535 = vmatprep.subr.bf16.mxu1 %v16609_v36 }
0x1d1b   : > { %15514 = vmatpush3.bf16.msra.mxu0 %v16610_v34  ;;  %15536 = vmatpush3.bf16.msra.mxu1 %v16611_v33 }
0x1d1c   : > { %15515 = vmatprep.subr.bf16.mxu0 %v16612_v39  ;;  %15537 = vmatprep.subr.bf16.mxu1 %v16613_v40 }
0x1d1f   : > { %15516 = vmatpush3.bf16.msra.mxu0 %v16614_v8  ;;  %15538 = vmatpush3.bf16.msra.mxu1 %v16615_v15 }
0x1d20   : > { %15517 = vmatprep.subr.bf16.mxu0 %v16616_v25  ;;  %15539 = vmatprep.subr.bf16.mxu1 %v16617_v63  ;;  %v16634_v25 = vld [vmem:[%s20941_s22 + $0x500] sm:$0xff]  }
0x1d21   : > { %v16635_v63 = vld [vmem:[%s20941_s22 + $0x580] sm:$0xff]  }
0x1d23   : > { %15518 = vmatpush3.bf16.msra.mxu0 %v16618_v6  ;;  %15540 = vmatpush3.bf16.msra.mxu1 %v16619_v7  ;;  %v16636_v6 = vld [vmem:[%s20941_s22 + $0x548] sm:$0xff]  }
0x1d24   : > { %15519 = vmatprep.subr.bf16.mxu0 %v16620_v43  ;;  %15541 = vmatprep.subr.bf16.mxu1 %v16621_v44  ;;  %v16637_v7 = vld [vmem:[%s20941_s22 + $0x5c8] sm:$0xff]  }
0x1d25   : > { %v16638_v43 = vld [vmem:[%s20941_s22 + $0x508] sm:$0xff]  }
0x1d26   : > { %v16639_v44 = vld [vmem:[%s20941_s22 + $0x588] sm:$0xff]  }
0x1d27   : > { %15520 = vmatpush3.bf16.msra.mxu0 %v16622_v38  ;;  %15542 = vmatpush3.bf16.msra.mxu1 %v16623_v49  ;;  %v4775_v38 = vrot.slane %v13566_v55, %v17916_v21  ;;  %v4783_v49 = vrot.slane %v13566_v55, %v17919_v22 }
0x1d28   : > { %15521 = vmatprep.subr.bf16.mxu0 %v16624_v41  ;;  %15543 = vmatprep.subr.bf16.mxu1 %v16625_v50  ;;  %v16640_v41 = vld [vmem:[%s20941_s22 + $0x550] sm:$0xff]  }
0x1d29   : > { %v16641_v50 = vld [vmem:[%s20941_s22 + $0x5d0] sm:$0xff]  }
0x1d2b   : > { %15522 = vmatpush3.bf16.msra.mxu0 %v16626_v46  ;;  %15544 = vmatpush3.bf16.msra.mxu1 %v16627_v42  ;;  %v4779_v46 = vrot.slane %v13566_v55, %v17922_v27  ;;  %v4787_v42 = vrot.slane %v13566_v55, %v17925_v30  ;;  %v16644_v55 = vld [vmem:[%s20941_s22 + $0x558] sm:$0xff]  }
0x1d2c   : > { %15523 = vmatprep.subr.bf16.mxu0 %v16628_v23  ;;  %15545 = vmatprep.subr.bf16.mxu1 %v16629_v53 }
0x1d2f   : > { %15524 = vmatpush3.bf16.msra.mxu0 %v16630_v54  ;;  %15546 = vmatpush3.bf16.msra.mxu1 %v16631_v47  ;;  %v16642_v54 = vld [vmem:[%s20941_s22 + $0x510] sm:$0xff]  }
0x1d30   : > { %15553 = vmatprep.subr.bf16.mxu0 %v16632_v24  ;;  %15575 = vmatprep.subr.bf16.mxu1 %v16633_v51  ;;  %v16643_v47 = vld [vmem:[%s20941_s22 + $0x590] sm:$0xff]  }
0x1db5   : > { %v5193_v59 = vpop.f32.mrb[72].mxu0  ;;  %v5236_v60 = vpop.f32.mrb[68].mxu1 }
0x1db6   : > { %v5194_v61 = vadd.f32 %v5193_v59, %v4759_v56  ;;  %v5237_v0 = vadd.f32 %v5236_v60, %v4767_v52  ;;  %v5195_v2 = vpop.f32.mrb[73].mxu0  ;;  %v5238_v5 = vpop.f32.mrb[69].mxu1 }
0x1db7   : > { %v5196_v11 = vadd.f32 %v5195_v2, %v4763_v57  ;;  %v5239_v12 = vadd.f32 %v5238_v5, %v4771_v58  ;;  %v5197_v13 = vpop.f32.mrb[74].mxu0  ;;  %v5240_v14 = vpop.f32.mrb[70].mxu1 }
0x1db8   : > { %v5198_v19 = vadd.f32 %v5197_v13, %v4759_v56  ;;  %v5241_v3 = vadd.f32 %v5240_v14, %v4767_v52  ;;  %v5199_v20 = vpop.f32.mrb[75].mxu0  ;;  %v5242_v4 = vpop.f32.mrb[71].mxu1  ;;  %v5503_v16 = vmax.f32 %v5194_v61, 0.0  ;;  %v5505_v18 = vmax.f32 %v5237_v0, 0.0  ;;  %v16646_v14 = vld [vmem:[%s20941_s22 + $0x518] sm:$0xff]  }
0x1db9   : > { %v5200_v32 = vadd.f32 %v5199_v20, %v4763_v57  ;;  %v5243_v9 = vadd.f32 %v5242_v4, %v4771_v58  ;;  %v5504_v28 = vmax.f32 %v5196_v11, 0.0  ;;  %v5506_v36 = vmax.f32 %v5239_v12, 0.0  ;;  %v16645_v57 = vld [vmem:[%s20941_s22 + $0x5d8] sm:$0xff]  }
0x1dba   : > { %v5519_v10 = vmax.f32 %v5198_v19, 0.0  ;;  %v5521_v37 = vmax.f32 %v5241_v3, 0.0  ;;  %v16647_v19 = vld [vmem:[%s20941_s22 + $0x598] sm:$0xff]  }
0x1dbb   : > { %v5520_v34 = vmax.f32 %v5200_v32, 0.0  ;;  %v5522_v33 = vmax.f32 %v5243_v9, 0.0  ;;  %v16648_v9 = vld [vmem:[%s20941_s22 + $0x560] sm:$0xff]  }
0x1dbc   : > { %v5535_v39 = vpack.c.bf16 %v5519_v10, %v5503_v16  ;;  %v5537_v40 = vpack.c.bf16 %v5521_v37, %v5505_v18  ;;  %v16649_v16 = vld [vmem:[%s20941_s22 + $0x5e0] sm:$0xff]  }
0x1dbd   : > { %v5536_v8 = vpack.c.bf16 %v5520_v34, %v5504_v28  ;;  %v5538_v15 = vpack.c.bf16 %v5522_v33, %v5506_v36 }
0x1dbf   : > { %6616 = vmatprep.mubr.bf16.mxu0 %v5536_v8  ;;  %6657 = vmatprep.mubr.bf16.mxu1 %v5538_v15  ;;  %v16651_v8 = vld [vmem:[%s20941_s22 + $0x5a0] sm:$0xff]   ;;  %v16652_v15 = vld [vmem:[%s20941_s22 + $0x568] sm:$0xff]  }
0x1dc0   : > { %6617 = vmatmul.mubr.bf16.vlgmr.msra.gmra.mrb[88].mxu0 %v5535_v39  ;;  %6658 = vmatmul.mubr.bf16.vlgmr.msra.gmra.mrb[84].mxu1 %v5537_v40  ;;  %v16650_v40 = vld [vmem:[%s20941_s22 + $0x520] sm:$0xff]  }
0x1dc1   : > { %15554 = vmatpush3.bf16.msra.mxu0 %v16634_v25  ;;  %15576 = vmatpush3.bf16.msra.mxu1 %v16635_v63  ;;  %v16653_v25 = vld [vmem:[%s20941_s22 + $0x5e8] sm:$0xff]   ;;  %v18871_v63 = vld [vmem:[%s20940_s21 + $0x18] sm:$0xff] }
0x1dc2   : > { %15555 = vmatprep.subr.bf16.mxu0 %v16636_v6  ;;  %15577 = vmatprep.subr.bf16.mxu1 %v16637_v7  ;;  %v16654_v6 = vld [vmem:[%s20941_s22 + $0x528] sm:$0xff]  }
0x1dc3   : > { %v16655_v7 = vld [vmem:[%s20941_s22 + $0x5a8] sm:$0xff]  }
0x1dc5   : > { %v5279_v23 = vpop.f32.mrb[76].mxu0  ;;  %v5322_v53 = vpop.f32.mrb[72].mxu1  ;;  %15556 = vmatpush3.bf16.msra.mxu0 %v16638_v43  ;;  %15578 = vmatpush3.bf16.msra.mxu1 %v16639_v44  ;;  %v4791_v43 = vrot.slane %v18871_v63, %v17385_v29  ;;  %v4799_v44 = vrot.slane %v18871_v63, %v17891_v45 }
0x1dc6   : > { %v5280_v24 = vadd.f32 %v5279_v23, %v4775_v38  ;;  %v5323_v51 = vadd.f32 %v5322_v53, %v4783_v49  ;;  %v5281_v56 = vpop.f32.mrb[77].mxu0  ;;  %v5324_v52 = vpop.f32.mrb[73].mxu1  ;;  %15557 = vmatprep.subr.bf16.mxu0 %v16640_v41  ;;  %15579 = vmatprep.subr.bf16.mxu1 %v16641_v50  ;;  %v4795_v41 = vrot.slane %v18871_v63, %v17391_v31  ;;  %v16658_v23 = vld [vmem:[%s20941_s22 + $0x530] sm:$0xff]  }
0x1dc7   : > { %v5282_v58 = vadd.f32 %v5281_v56, %v4779_v46  ;;  %v5325_v59 = vadd.f32 %v5324_v52, %v4787_v42  ;;  %v5283_v60 = vpop.f32.mrb[78].mxu0  ;;  %v5326_v61 = vpop.f32.mrb[74].mxu1  ;;  %v4803_v50 = vrot.slane %v18871_v63, %v17897_v48  ;;  %v16659_v53 = vld [vmem:[%s20941_s22 + $0x5b0] sm:$0xff]   ;;  %v16660_v56 = vld [vmem:[%s20941_s22 + $0x578] sm:$0xff]  }
0x1dc8   : > { %v5284_v0 = vadd.f32 %v5283_v60, %v4775_v38  ;;  %v5327_v2 = vadd.f32 %v5326_v61, %v4783_v49  ;;  %v5285_v5 = vpop.f32.mrb[79].mxu0  ;;  %v5328_v11 = vpop.f32.mrb[75].mxu1  ;;  %v5507_v3 = vmax.f32 %v5280_v24, 0.0  ;;  %v5509_v20 = vmax.f32 %v5323_v51, 0.0  ;;  %v16656_v38 = vld [vmem:[%s20941_s22 + $0x570] sm:$0xff]   ;;  %v16661_v52 = vld [vmem:[%s20941_s22 + $0x5f8] sm:$0xff]  }
0x1dc9   : > { %v5286_v12 = vadd.f32 %v5285_v5, %v4779_v46  ;;  %v5329_v13 = vadd.f32 %v5328_v11, %v4787_v42  ;;  %15558 = vmatpush3.bf16.msra.mxu0 %v16642_v54  ;;  %15580 = vmatpush3.bf16.msra.mxu1 %v16643_v47  ;;  %v5508_v18 = vmax.f32 %v5282_v58, 0.0  ;;  %v5510_v10 = vmax.f32 %v5325_v59, 0.0  ;;  %v16657_v49 = vld [vmem:[%s20941_s22 + $0x5f0] sm:$0xff]  }
0x1dca   : > { %v5523_v4 = vmax.f32 %v5284_v0, 0.0  ;;  %v5525_v32 = vmax.f32 %v5327_v2, 0.0  ;;  %15559 = vmatprep.subr.bf16.mxu0 %v16644_v55  ;;  %15581 = vmatprep.subr.bf16.mxu1 %v16645_v57 }
0x1dcb   : > { %v5524_v37 = vmax.f32 %v5286_v12, 0.0  ;;  %v5526_v28 = vmax.f32 %v5329_v13, 0.0  ;;  %v16662_v12 = vld [vmem:[%s20941_s22 + $0x538] sm:$0xff]  }
0x1dcc   : > { %v18852_v36 = vpack.c.bf16 %v5523_v4, %v5507_v3  ;;  %v18854_v34 = vpack.c.bf16 %v5525_v32, %v5509_v20  ;;  %v16663_v13 = vld [vmem:[%s20941_s22 + $0x5b8] sm:$0xff]   ;;  %v16664_v4 = vld [vmem:[%s20941_s22 + $0x640] sm:$0xff]  }
0x1dcd   : > { %v5540_v33 = vpack.c.bf16 %v5524_v37, %v5508_v18  ;;  %v5542_v39 = vpack.c.bf16 %v5526_v28, %v5510_v10  ;;  %15560 = vmatpush3.bf16.msra.mxu0 %v16646_v14  ;;  %15582 = vmatpush3.bf16.msra.mxu1 %v16647_v19  ;;  %v16665_v32 = vld [vmem:[%s20941_s22 + $0x6c0] sm:$0xff]  }
0x1dce   : > { %15561 = vmatprep.subr.bf16.mxu0 %v16648_v9  ;;  %15583 = vmatprep.subr.bf16.mxu1 %v16649_v16 }
0x1dcf   : > { %6698 = vmatprep.mubr.bf16.mxu0 %v5540_v33  ;;  %6739 = vmatprep.mubr.bf16.mxu1 %v5542_v39 }
0x1dd1   : > { %15562 = vmatpush3.bf16.msra.mxu0 %v16650_v40  ;;  %15584 = vmatpush3.bf16.msra.mxu1 %v16651_v8  ;;  %v16666_v40 = vld [vmem:[%s20941_s22 + $0x600] sm:$0xff]  }
0x1dd2   : > { %15563 = vmatprep.subr.bf16.mxu0 %v16652_v15  ;;  %15585 = vmatprep.subr.bf16.mxu1 %v16653_v25  ;;  %v16667_v8 = vld [vmem:[%s20941_s22 + $0x680] sm:$0xff]   ;;  %v16668_v15 = vld [vmem:[%s20941_s22 + $0x648] sm:$0xff]  }
0x1dd3   : > { %v16669_v25 = vld [vmem:[%s20941_s22 + $0x6c8] sm:$0xff]  }
0x1dd5   : > { %v5365_v46 = vpop.f32.mrb[80].mxu0  ;;  %v5408_v42 = vpop.f32.mrb[76].mxu1  ;;  %15564 = vmatpush3.bf16.msra.mxu0 %v16654_v6  ;;  %15586 = vmatpush3.bf16.msra.mxu1 %v16655_v7  ;;  %v16670_v6 = vld [vmem:[%s20941_s22 + $0x608] sm:$0xff]   ;;  %v4807_v7 = vrot.slane %v18871_v63, %v17916_v21 }
0x1dd6   : > { %v5366_v54 = vadd.f32 %v5365_v46, %v4791_v43  ;;  %v5409_v47 = vadd.f32 %v5408_v42, %v4799_v44  ;;  %v5367_v24 = vpop.f32.mrb[81].mxu0  ;;  %v5410_v51 = vpop.f32.mrb[77].mxu1  ;;  %15565 = vmatprep.subr.bf16.mxu0 %v16656_v38  ;;  %15587 = vmatprep.subr.bf16.mxu1 %v16657_v49  ;;  %v4819_v38 = vrot.slane %v18871_v63, %v17925_v30  ;;  %v16673_v49 = vld [vmem:[%s20941_s22 + $0x6d0] sm:$0xff]  }
0x1dd7   : > { %v5368_v55 = vadd.f32 %v5367_v24, %v4795_v41  ;;  %v5411_v57 = vadd.f32 %v5410_v51, %v4803_v50  ;;  %v5369_v58 = vpop.f32.mrb[82].mxu0  ;;  %v5412_v59 = vpop.f32.mrb[78].mxu1  ;;  %v16674_v46 = vld [vmem:[%s20941_s22 + $0x610] sm:$0xff]  }
0x1dd8   : > { %v5370_v60 = vadd.f32 %v5369_v58, %v4791_v43  ;;  %v5413_v61 = vadd.f32 %v5412_v59, %v4799_v44  ;;  %v5371_v0 = vpop.f32.mrb[83].mxu0  ;;  %v5414_v2 = vpop.f32.mrb[79].mxu1  ;;  %v5511_v14 = vmax.f32 %v5366_v54, 0.0  ;;  %v5513_v19 = vmax.f32 %v5409_v47, 0.0  ;;  %v16676_v47 = vld [vmem:[%s20941_s22 + $0x658] sm:$0xff]  }
0x1dd9   : > { %v5372_v5 = vadd.f32 %v5371_v0, %v4795_v41  ;;  %v5415_v11 = vadd.f32 %v5414_v2, %v4803_v50  ;;  %15566 = vmatpush3.bf16.msra.mxu0 %v16658_v23  ;;  %15588 = vmatpush3.bf16.msra.mxu1 %v16659_v53  ;;  %v5512_v9 = vmax.f32 %v5368_v55, 0.0  ;;  %v5514_v16 = vmax.f32 %v5411_v57, 0.0  ;;  %v16677_v55 = vld [vmem:[%s20941_s22 + $0x6d8] sm:$0xff]  }
0x1dda   : > { %v5527_v3 = vmax.f32 %v5370_v60, 0.0  ;;  %v5529_v20 = vmax.f32 %v5413_v61, 0.0  ;;  %15567 = vmatprep.subr.bf16.mxu0 %v16660_v56  ;;  %15589 = vmatprep.subr.bf16.mxu1 %v16661_v52  ;;  %v4815_v43 = vrot.slane %v18871_v63, %v17919_v22  ;;  %v4811_v44 = vrot.slane %v18871_v63, %v17922_v27  ;;  %v16675_v63 = vld [vmem:[%s20941_s22 + $0x690] sm:$0xff]   ;;  %v16678_v2 = vld [vmem:[%s20941_s22 + $0x618] sm:$0xff]  }
0x1ddb   : > { %v5528_v18 = vmax.f32 %v5372_v5, 0.0  ;;  %v5530_v10 = vmax.f32 %v5415_v11, 0.0 }
0x1ddc   : > { %v18917_v37 = vpack.c.bf16 %v5527_v3, %v5511_v14  ;;  %v18919_v28 = vpack.c.bf16 %v5529_v20, %v5513_v19  ;;  %v16679_v14 = vld [vmem:[%s20941_s22 + $0x698] sm:$0xff]   ;;  %v16680_v19 = vld [vmem:[%s20941_s22 + $0x660] sm:$0xff]  }
0x1ddd   : > { %v5544_v33 = vpack.c.bf16 %v5528_v18, %v5512_v9  ;;  %v5546_v39 = vpack.c.bf16 %v5530_v10, %v5514_v16  ;;  %15568 = vmatpush3.bf16.msra.mxu0 %v16662_v12  ;;  %15590 = vmatpush3.bf16.msra.mxu1 %v16663_v13  ;;  %v16681_v9 = vld [vmem:[%s20941_s22 + $0x6e0] sm:$0xff]  }
0x1dde   : > { %15597 = vmatprep.subr.bf16.mxu0 %v16664_v4  ;;  %15619 = vmatprep.subr.bf16.mxu1 %v16665_v32 }
0x1de0   : > { %6699 = vmatmul.mubr.bf16.vlgmr.msra.gmra.mrb[92].mxu0 %v18852_v36  ;;  %6740 = vmatmul.mubr.bf16.vlgmr.msra.gmra.mrb[88].mxu1 %v18854_v34  ;;  %v16671_v36 = vld [vmem:[%s20941_s22 + $0x688] sm:$0xff]   ;;  %v16672_v34 = vld [vmem:[%s20941_s22 + $0x650] sm:$0xff]  }
0x1de1   : > { %15598 = vmatpush3.bf16.msra.mxu0 %v16666_v40  ;;  %6780 = vmatprep.mubr.bf16.mxu0 %v5544_v33  ;;  %v16683_v40 = vld [vmem:[%s20941_s22 + $0x6a0] sm:$0xff]  }
0x1de2   : > { %15620 = vmatpush3.bf16.msra.mxu1 %v16667_v8  ;;  %6821 = vmatprep.mubr.bf16.mxu1 %v5546_v39  ;;  %v16682_v39 = vld [vmem:[%s20941_s22 + $0x620] sm:$0xff]   ;;  %v16684_v8 = vld [vmem:[%s20941_s22 + $0x668] sm:$0xff]  }
0x1de3   : > { %15599 = vmatprep.subr.bf16.mxu0 %v16668_v15  ;;  %15621 = vmatprep.subr.bf16.mxu1 %v16669_v25  ;;  %v16685_v15 = vld [vmem:[%s20941_s22 + $0x6e8] sm:$0xff]  }
0x1de4   : > { %v16686_v25 = vld [vmem:[%s20941_s22 + $0x628] sm:$0xff]  }
0x1de5   : > { %v5451_v41 = vpop.f32.mrb[84].mxu0  ;;  %v5494_v50 = vpop.f32.mrb[80].mxu1  ;;  %15600 = vmatpush3.bf16.msra.mxu0 %v16670_v6  ;;  %v16687_v6 = vld [vmem:[%s20941_s22 + $0x6a8] sm:$0xff]  }
0x1de6   : > { %v5452_v42 = vadd.f32 %v5451_v41, %v4807_v7  ;;  %v5495_v23 = vadd.f32 %v5494_v50, %v4815_v43  ;;  %15622 = vmatpush3.bf16.msra.mxu1 %v16671_v36  ;;  %v5453_v53 = vpop.f32.mrb[85].mxu0  ;;  %v5496_v54 = vpop.f32.mrb[81].mxu1  ;;  %15601 = vmatprep.subr.bf16.mxu0 %v16672_v34  ;;  %v16690_v36 = vld [vmem:[%s20941_s22 + $0x630] sm:$0xff]   ;;  %v16695_v41 = vld [vmem:[%s20941_s22 + $0x6b8] sm:$0xff]   ;;  %v16696_v50 = vld [vmem:[%s20941_s22 + $0x740] sm:$0xff]  }
0x1de7   : > { %v5454_v24 = vadd.f32 %v5453_v53, %v4811_v44  ;;  %v5497_v51 = vadd.f32 %v5496_v54, %v4819_v38  ;;  %v5455_v56 = vpop.f32.mrb[86].mxu0  ;;  %v5498_v52 = vpop.f32.mrb[82].mxu1  ;;  %15623 = vmatprep.subr.bf16.mxu1 %v16673_v49  ;;  %v16691_v34 = vld [vmem:[%s20941_s22 + $0x6b0] sm:$0xff]   ;;  %v16694_v49 = vld [vmem:[%s20941_s22 + $0x638] sm:$0xff]   ;;  %v16700_v53 = vld [vmem:[%s20941_s22 + $0x748] sm:$0xff]  }
0x1de8   : > { %v5456_v57 = vadd.f32 %v5455_v56, %v4807_v7  ;;  %v5499_v58 = vadd.f32 %v5498_v52, %v4815_v43  ;;  %v5457_v59 = vpop.f32.mrb[87].mxu0  ;;  %v5500_v60 = vpop.f32.mrb[83].mxu1  ;;  %v5515_v5 = vmax.f32 %v5452_v42, 0.0  ;;  %v5517_v11 = vmax.f32 %v5495_v23, 0.0  ;;  %v16688_v7 = vld [vmem:[%s20941_s22 + $0x670] sm:$0xff]   ;;  %v16698_v42 = vld [vmem:[%s20941_s22 + $0x700] sm:$0xff]  }
0x1de9   : > { %v5458_v61 = vadd.f32 %v5457_v59, %v4811_v44  ;;  %v5501_v0 = vadd.f32 %v5500_v60, %v4819_v38  ;;  %15602 = vmatpush3.bf16.msra.mxu0 %v16674_v46  ;;  %v5516_v3 = vmax.f32 %v5454_v24, 0.0  ;;  %v5518_v20 = vmax.f32 %v5497_v51, 0.0  ;;  %v16689_v43 = vld [vmem:[%s20941_s22 + $0x6f0] sm:$0xff]   ;;  %v16692_v44 = vld [vmem:[%s20941_s22 + $0x678] sm:$0xff]   ;;  %v16697_v46 = vld [vmem:[%s20941_s22 + $0x7c0] sm:$0xff]  }
0x1dea   : > { %v5531_v12 = vmax.f32 %v5456_v57, 0.0  ;;  %v5533_v13 = vmax.f32 %v5499_v58, 0.0  ;;  %15624 = vmatpush3.bf16.msra.mxu1 %v16675_v63  ;;  %15603 = vmatprep.subr.bf16.mxu0 %v16676_v47  ;;  %v16693_v38 = vld [vmem:[%s20941_s22 + $0x6f8] sm:$0xff]   ;;  %v16699_v23 = vld [vmem:[%s20941_s22 + $0x780] sm:$0xff]   ;;  %v16701_v54 = vld [vmem:[%s20941_s22 + $0x7c8] sm:$0xff]  }
0x1deb   : > { %v5532_v4 = vmax.f32 %v5458_v61, 0.0  ;;  %v5534_v32 = vmax.f32 %v5501_v0, 0.0  ;;  %15625 = vmatprep.subr.bf16.mxu1 %v16677_v55  ;;  %v16702_v63 = vld [vmem:[%s20941_s22 + $0x708] sm:$0xff]   ;;  %v16706_v24 = vld [vmem:[%s20941_s22 + $0x710] sm:$0xff]   ;;  %v16708_v56 = vld [vmem:[%s20941_s22 + $0x758] sm:$0xff]  }
0x1dec   : > { %v18979_v16 = vpack.c.bf16 %v5531_v12, %v5515_v5  ;;  %v18981_v18 = vpack.c.bf16 %v5533_v13, %v5517_v11  ;;  %v16703_v47 = vld [vmem:[%s20941_s22 + $0x788] sm:$0xff]   ;;  %v16707_v51 = vld [vmem:[%s20941_s22 + $0x790] sm:$0xff]   ;;  %v16709_v52 = vld [vmem:[%s20941_s22 + $0x7d8] sm:$0xff]  }
0x1ded   : > { %v5548_v10 = vpack.c.bf16 %v5532_v4, %v5516_v3  ;;  %v5550_v33 = vpack.c.bf16 %v5534_v32, %v5518_v20  ;;  %15604 = vmatpush3.bf16.msra.mxu0 %v16678_v2  ;;  %v16710_v55 = vld [vmem:[%s20941_s22 + $0x718] sm:$0xff]   ;;  %v16712_v58 = vld [vmem:[%s20941_s22 + $0x760] sm:$0xff]   ;;  %v16716_v0 = vld [vmem:[%s20941_s22 + $0x768] sm:$0xff]  }
0x1dee   : > { %15626 = vmatpush3.bf16.msra.mxu1 %v16679_v14  ;;  %15605 = vmatprep.subr.bf16.mxu0 %v16680_v19  ;;  %v16711_v57 = vld [vmem:[%s20941_s22 + $0x798] sm:$0xff]   ;;  %v16713_v59 = vld [vmem:[%s20941_s22 + $0x7e0] sm:$0xff]   ;;  %v16717_v2 = vld [vmem:[%s20941_s22 + $0x7e8] sm:$0xff]  }
0x1def   : > { %15627 = vmatprep.subr.bf16.mxu1 %v16681_v9  ;;  %v16714_v60 = vld [vmem:[%s20941_s22 + $0x720] sm:$0xff]   ;;  %v16718_v5 = vld [vmem:[%s20941_s22 + $0x728] sm:$0xff]   ;;  %v16720_v12 = vld [vmem:[%s20941_s22 + $0x770] sm:$0xff]  }
0x1df0   : > { %v16715_v61 = vld [vmem:[%s20941_s22 + $0x7a0] sm:$0xff]   ;;  %v16719_v11 = vld [vmem:[%s20941_s22 + $0x7a8] sm:$0xff]   ;;  %v16721_v13 = vld [vmem:[%s20941_s22 + $0x7f0] sm:$0xff]  }
0x1df1   : > { %15606 = vmatpush3.bf16.msra.mxu0 %v16682_v39  ;;  %v16722_v14 = vld [vmem:[%s20941_s22 + $0x730] sm:$0xff]   ;;  %v16724_v3 = vld [vmem:[%s20941_s22 + $0x778] sm:$0xff]  }
0x1df2   : > { %15628 = vmatpush3.bf16.msra.mxu1 %v16683_v40  ;;  %15607 = vmatprep.subr.bf16.mxu0 %v16684_v8  ;;  %v16723_v19 = vld [vmem:[%s20941_s22 + $0x7b0] sm:$0xff]   ;;  %v16725_v20 = vld [vmem:[%s20941_s22 + $0x7f8] sm:$0xff]  }
0x1df3   : > { %15629 = vmatprep.subr.bf16.mxu1 %v16685_v15  ;;  %v16726_v4 = vld [vmem:[%s20941_s22 + $0x738] sm:$0xff]  }
0x1df4   : > { %v16727_v32 = vld [vmem:[%s20941_s22 + $0x7b8] sm:$0xff]  }
0x1df5   : > { %15608 = vmatpush3.bf16.msra.mxu0 %v16686_v25 }
0x1df6   : > { %15630 = vmatpush3.bf16.msra.mxu1 %v16687_v6  ;;  %15609 = vmatprep.subr.bf16.mxu0 %v16688_v7 }
0x1df7   : > { %15631 = vmatprep.subr.bf16.mxu1 %v16689_v43 }
0x1df9   : > { %15610 = vmatpush3.bf16.msra.mxu0 %v16690_v36 }
0x1dfa   : > { %15632 = vmatpush3.bf16.msra.mxu1 %v16691_v34  ;;  %15611 = vmatprep.subr.bf16.mxu0 %v16692_v44 }
0x1dfb   : > { %15633 = vmatprep.subr.bf16.mxu1 %v16693_v38 }
0x1dfd   : > { %15612 = vmatpush3.bf16.msra.mxu0 %v16694_v49 }
0x1dfe   : > { %15634 = vmatpush3.bf16.msra.mxu1 %v16695_v41  ;;  %15641 = vmatprep.subr.bf16.mxu0 %v16696_v50 }
0x1dff   : > { %15663 = vmatprep.subr.bf16.mxu1 %v16697_v46 }
0x1e00   : > { %6781 = vmatmul.mubr.bf16.vlgmr.msra.gmra.mrb[96].mxu0 %v18917_v37  ;;  %v16704_v37 = vld [vmem:[%s20941_s22 + $0x750] sm:$0xff]  }
0x1e01   : > { %6822 = vmatmul.mubr.bf16.vlgmr.msra.gmra.mrb[92].mxu1 %v18919_v28  ;;  %15642 = vmatpush3.bf16.msra.mxu0 %v16698_v42  ;;  %v16705_v28 = vld [vmem:[%s20941_s22 + $0x7d0] sm:$0xff]  }
0x1e02   : > { %6862 = vmatprep.mubr.bf16.mxu0 %v5548_v10  ;;  %15664 = vmatpush3.bf16.msra.mxu1 %v16699_v23 }
0x1e03   : > { %6903 = vmatprep.mubr.bf16.mxu1 %v5550_v33  ;;  %15643 = vmatprep.subr.bf16.mxu0 %v16700_v53  ;;  %v13897_v33 = vld [vmem:[%s20942_s23 + $0x1] ss:$0 sm:$0xff] }
0x1e04   : > { %15665 = vmatprep.subr.bf16.mxu1 %v16701_v54 }
0x1e05   : > { %15644 = vmatpush3.bf16.msra.mxu0 %v16702_v63 }
0x1e06   : > { %15666 = vmatpush3.bf16.msra.mxu1 %v16703_v47  ;;  %15645 = vmatprep.subr.bf16.mxu0 %v16704_v37 }
0x1e07   : > { %15667 = vmatprep.subr.bf16.mxu1 %v16705_v28 }
0x1e09   : > { %15646 = vmatpush3.bf16.msra.mxu0 %v16706_v24 }
0x1e0a   : > { %15668 = vmatpush3.bf16.msra.mxu1 %v16707_v51  ;;  %15647 = vmatprep.subr.bf16.mxu0 %v16708_v56 }
0x1e0b   : > { %15669 = vmatprep.subr.bf16.mxu1 %v16709_v52 }
0x1e0d   : > { %15648 = vmatpush3.bf16.msra.mxu0 %v16710_v55 }
0x1e0e   : > { %15670 = vmatpush3.bf16.msra.mxu1 %v16711_v57  ;;  %15649 = vmatprep.subr.bf16.mxu0 %v16712_v58 }
0x1e0f   : > { %15671 = vmatprep.subr.bf16.mxu1 %v16713_v59 }
0x1e11   : > { %15650 = vmatpush3.bf16.msra.mxu0 %v16714_v60 }
0x1e12   : > { %15672 = vmatpush3.bf16.msra.mxu1 %v16715_v61  ;;  %15651 = vmatprep.subr.bf16.mxu0 %v16716_v0 }
0x1e13   : > { %15673 = vmatprep.subr.bf16.mxu1 %v16717_v2 }
0x1e15   : > { %15652 = vmatpush3.bf16.msra.mxu0 %v16718_v5 }
0x1e16   : > { %15674 = vmatpush3.bf16.msra.mxu1 %v16719_v11  ;;  %15653 = vmatprep.subr.bf16.mxu0 %v16720_v12 }
0x1e17   : > { %15675 = vmatprep.subr.bf16.mxu1 %v16721_v13 }
0x1e19   : > { %15654 = vmatpush3.bf16.msra.mxu0 %v16722_v14 }
0x1e1a   : > { %15676 = vmatpush3.bf16.msra.mxu1 %v16723_v19  ;;  %15655 = vmatprep.subr.bf16.mxu0 %v16724_v3 }
0x1e1b   : > { %15677 = vmatprep.subr.bf16.mxu1 %v16725_v20 }
0x1e1d   : > { %15656 = vmatpush3.bf16.msra.mxu0 %v16726_v4 }
0x1e1e   : > { %15678 = vmatpush3.bf16.msra.mxu1 %v16727_v32 }
0x1e1f   : > { %16253 = vmatprep.subr.bf16.mxu1 %v17166_v1 }
0x1e20   : > { %6863 = vmatmul.mubr.bf16.vlgmr.msra.gmra.mrb[100].mxu0 %v18979_v16 }
0x1e21   : > { %6904 = vmatmul.mubr.bf16.vlgmr.msra.gmra.mrb[96].mxu1 %v18981_v18  ;;  %7058 = vmatprep.mubr.bf16.mxu0 %v17168_v17 }
0x1e22   : > { %16255 = vmatprep.mubr.msk.bf16.mxu1 %vm17167_vm0, %v17166_v1 }
0x1e93   : > { %v15525_v9 = vpop.f32.mrb[88].mxu0  ;;  %v15547_v10 = vpop.f32.mrb[84].mxu1 }
0x1e94   : > { %v15526_v39 = vpop.f32.mrb[89].mxu0  ;;  %v15548_v40 = vpop.f32.mrb[85].mxu1 }
0x1e95   : > { %v15527_v8 = vadd.f32 %v15526_v39, %v15525_v9  ;;  %v15549_v15 = vadd.f32 %v15548_v40, %v15547_v10  ;;  %v15528_v25 = vpop.f32.mrb[90].mxu0  ;;  %v15550_v6 = vpop.f32.mrb[86].mxu1 }
0x1e96   : > { %v15529_v16 = vpop.f32.mrb[91].mxu0  ;;  %v15551_v7 = vpop.f32.mrb[87].mxu1 }
0x1e97   : > { %v6619_v18 = vadd.f32 %v15527_v8, %v13897_v33  ;;  %v15530_v43 = vadd.f32 %v15529_v16, %v15528_v25  ;;  %v15552_v36 = vadd.f32 %v15551_v7, %v15550_v6 }
0x1e99   : > { %v6660_v34 = vadd.f32 %v15549_v15, %v6619_v18  ;;  %v6622_v44 = vadd.f32 %v15530_v43, %v13897_v33 }
0x1e9b   : > { %v6663_v38 = vadd.f32 %v15552_v36, %v6622_v44 }
0x1eb3   : > { %v15569_v49 = vpop.f32.mrb[92].mxu0  ;;  %v15591_v41 = vpop.f32.mrb[88].mxu1 }
0x1eb4   : > { %v15570_v50 = vpop.f32.mrb[93].mxu0  ;;  %v15592_v46 = vpop.f32.mrb[89].mxu1 }
0x1eb5   : > { %v15571_v42 = vadd.f32 %v15570_v50, %v15569_v49  ;;  %v15593_v23 = vadd.f32 %v15592_v46, %v15591_v41  ;;  %v15572_v53 = vpop.f32.mrb[94].mxu0  ;;  %v15594_v54 = vpop.f32.mrb[90].mxu1 }
0x1eb6   : > { %v15573_v63 = vpop.f32.mrb[95].mxu0  ;;  %v15595_v47 = vpop.f32.mrb[91].mxu1 }
0x1eb7   : > { %v6701_v37 = vadd.f32 %v15571_v42, %v6660_v34  ;;  %v15574_v28 = vadd.f32 %v15573_v63, %v15572_v53  ;;  %v15596_v24 = vadd.f32 %v15595_v47, %v15594_v54 }
0x1eb9   : > { %v6742_v51 = vadd.f32 %v15593_v23, %v6701_v37  ;;  %v6704_v56 = vadd.f32 %v15574_v28, %v6663_v38  ;;  %v16728_v37 = vld [vmem:[%s20973_s4 + $0x80] ss:$8 sps:$4 sm:$0xff]   ;;  %v16733_v28 = vld [vmem:[%s20973_s4 + $0x94] ss:$8 sps:$4 sm:$0xff]  }
0x1ebb   : > { %v6745_v52 = vadd.f32 %v15596_v24, %v6704_v56  ;;  %v16731_v24 = vld [vmem:[%s20973_s4 + $0x90] ss:$8 sps:$4 sm:$0xff]   ;;  %v16734_v56 = vld [vmem:[%s20973_s4 + $0xa0] ss:$8 sps:$4 sm:$0xff]  }
0x1ed3   : > { %v15613_v55 = vpop.f32.mrb[96].mxu0 }
0x1ed4   : > { %v15635_v57 = vpop.f32.mrb[92].mxu1  ;;  %v15614_v58 = vpop.f32.mrb[97].mxu0 }
0x1ed5   : > { %v15615_v59 = vadd.f32 %v15614_v58, %v15613_v55  ;;  %v15636_v60 = vpop.f32.mrb[93].mxu1  ;;  %v15616_v61 = vpop.f32.mrb[98].mxu0  ;;  %v16737_v55 = vld [vmem:[%s20973_s4 + $0xb0] ss:$8 sps:$4 sm:$0xff]  }
0x1ed6   : > { %v15637_v0 = vadd.f32 %v15636_v60, %v15635_v57  ;;  %v15638_v2 = vpop.f32.mrb[94].mxu1  ;;  %v15617_v5 = vpop.f32.mrb[99].mxu0 }
0x1ed7   : > { %v6783_v11 = vadd.f32 %v15615_v59, %v6742_v51  ;;  %v15618_v12 = vadd.f32 %v15617_v5, %v15616_v61  ;;  %v15639_v13 = vpop.f32.mrb[95].mxu1  ;;  %v16736_v51 = vld [vmem:[%s20973_s4 + $0xa4] ss:$8 sps:$4 sm:$0xff]  }
0x1ed8   : > { %v15640_v14 = vadd.f32 %v15639_v13, %v15638_v2 }
0x1ed9   : > { %v6824_v19 = vadd.f32 %v15637_v0, %v6783_v11  ;;  %v6786_v3 = vadd.f32 %v15618_v12, %v6745_v52  ;;  %v16739_v52 = vld [vmem:[%s20973_s4 + $0xb4] ss:$8 sps:$4 sm:$0xff]   ;;  %v14028_v11 = vld [vmem:[%s20937_s18 + $0x1] ss:$0 sm:$0xff] }
0x1edb   : > { %v6827_v20 = vadd.f32 %v15640_v14, %v6786_v3 }
0x1ef3   : > { %v15657_v4 = vpop.f32.mrb[100].mxu0 }
0x1ef4   : > { %v15679_v32 = vpop.f32.mrb[96].mxu1  ;;  %v15658_v9 = vpop.f32.mrb[101].mxu0 }
0x1ef5   : > { %v15659_v10 = vadd.f32 %v15658_v9, %v15657_v4  ;;  %v15680_v33 = vpop.f32.mrb[97].mxu1  ;;  %v15660_v39 = vpop.f32.mrb[102].mxu0  ;;  %v14038_v9 = vld [vmem:[%s20976_s24 + $0x4] sm:$0x3] }
0x1ef6   : > { %v15681_v40 = vadd.f32 %v15680_v33, %v15679_v32  ;;  %v15682_v8 = vpop.f32.mrb[98].mxu1  ;;  %v15661_v15 = vpop.f32.mrb[103].mxu0 }
0x1ef7   : > { %v6865_v25 = vadd.f32 %v15659_v10, %v6824_v19  ;;  %v15662_v6 = vadd.f32 %v15661_v15, %v15660_v39  ;;  %v15683_v16 = vpop.f32.mrb[99].mxu1  ;;  %v14029_v19 = vld [vmem:[%s20938_s19 + $0x1] ss:$0 sm:$0xff]  ;;  %v6976_v10 = vrot.slane %v14038_v9, %v17385_v29  ;;  %v6980_v39 = vrot.slane %v14038_v9, %v17391_v31 }
0x1ef8   : > { %v15684_v7 = vadd.f32 %v15683_v16, %v15682_v8  ;;  %v16744_v9 = vld [vmem:[%s20929_s10 + $0x40] sm:$0xff]  }
0x1ef9   : > { %v6906_v18 = vadd.f32 %v15681_v40, %v6865_v25  ;;  %v6868_v43 = vadd.f32 %v15662_v6, %v6827_v20 }
0x1efb   : > { %v6909_v36 = vadd.f32 %v15684_v7, %v6868_v43  ;;  %v6912_v34 = vadd.f32 %v6906_v18, %v18541_v62 }
0x1efd   : > { %v6918_v44 = vsel %vm902_vm3, %v6912_v34, 0.0  ;;  %v6913_v38 = vadd.f32 %v6909_v36, %v18543_v35  ;;  %v16730_v35 = vld [vmem:[%s20973_s4 + $0x84] ss:$8 sps:$4 sm:$0xff]  }
0x1efe   : > { %6919 = vadd.xlane.f32.xlu1 %v6918_v44  ;;  %7026 = vmatprep.subr.bf16.mxu0 %v16730_v35 }
0x1eff   : > { %v6921_v49 = vsel %vm902_vm3, %v6913_v38, 0.0  ;;  %7027 = vmatpush1.bf16.msra.mxu0 %v16728_v37 }
0x1f00   : > { %7028 = vmatprep.subr.bf16.mxu0 %v16733_v28 }
0x1f02   : > { %6922 = vadd.xlane.f32.xlu1 %v6921_v49 }
0x1f03   : > { %7029 = vmatpush1.bf16.msra.mxu0 %v16731_v24 }
0x1f04   : > { %7030 = vmatprep.subr.bf16.mxu0 %v16736_v51 }
0x1f07   : > { %7031 = vmatpush1.bf16.msra.mxu0 %v16734_v56 }
0x1f08   : > { %7032 = vmatprep.subr.bf16.mxu0 %v16739_v52 }
0x1f0b   : > { %7033 = vmatpush1.bf16.msra.mxu0 %v16737_v55 }
0x1f0c   : > { %16259 = vmatprep.subr.bf16.mxu0 %v17166_v1 }
0x1f8b   : > { %v6920_v41 = vpop.xlane.xlu1 %6919 }
0x1f8c   : > { %v6924_v50 = vmul.f32 0.015625, %v6920_v41 }
0x1f8e   : > { %v6926_v46 = vsub.f32 %v6912_v34, %v6924_v50 }
0x1f8f   : > { %v6923_v42 = vpop.xlane.xlu1 %6922 }
0x1f90   : > { %v6925_v23 = vmul.f32 0.015625, %v6923_v42  ;;  %v6928_v53 = vmul.f32 %v6926_v46, %v6926_v46  ;;  %v19193_v42 = vld [vmem:[%s20977_s30] sm:$0xff] }
0x1f92   : > { %v6927_v54 = vsub.f32 %v6913_v38, %v6925_v23  ;;  %v6930_v63 = vsel %vm902_vm3, %v6928_v53, 0.0 }
0x1f93   : > { %6931 = vadd.xlane.f32.xlu0 %v6930_v63 }
0x1f94   : > { %v6929_v47 = vmul.f32 %v6927_v54, %v6927_v54 }
0x1f96   : > { %v6933_v62 = vsel %vm902_vm3, %v6929_v47, 0.0 }
0x1f97   : > { %6934 = vadd.xlane.f32.xlu1 %v6933_v62 }
0x2020   : > { %v6932_v57 = vpop.xlane.xlu0 %6931 }
0x2021   : > { %v6936_v58 = vmul.f32 0.015625, %v6932_v57 }
0x2023   : > { %v6938_v59 = vadd.f32 1e-05, %v6936_v58  ;;  %v16740_v58 = vld [vmem:[%s20978_s27 + $0x40] sm:$0xff]  }
0x2024   : > { %v6935_v60 = vpop.xlane.xlu1 %6934 }
0x2025   : > { %17092 = vrsqrt.f32 %v6938_v59  ;;  %v6937_v61 = vmul.f32 0.015625, %v6935_v60  ;;  %v16741_v59 = vld [vmem:[%s20978_s27 + $0x48] sm:$0xff]   ;;  %v16742_v60 = vld [vmem:[%s20978_s27 + $0x50] sm:$0xff]  }
0x2027   : > { %v6939_v0 = vadd.f32 1e-05, %v6937_v61 }
0x2029   : > { %17094 = vrsqrt.f32 %v6939_v0 }
0x202f   : > { %v17093_v2 = vpop.eup %17092 }
0x2030   : > { %v6942_v5 = vmul.f32 %v17093_v2, %v6926_v46 }
0x2032   : > { %v6950_v13 = vmul.f32 %v14028_v11, %v6942_v5 }
0x2033   : > { %v17095_v12 = vpop.eup %17094 }
0x2034   : > { %v6943_v14 = vmul.f32 %v17095_v12, %v6927_v54  ;;  %v19169_v20 = vadd.f32 %v14029_v19, %v6950_v13  ;;  %v19200_v54 = vld [vmem:[%s20977_s30 + $0x8] sm:$0xff] }
0x2036   : > { %v6951_v3 = vmul.f32 %v14028_v11, %v6943_v14  ;;  %v16743_v14 = vld [vmem:[%s20978_s27 + $0x58] sm:$0xff]  }
0x2038   : > { %v19171_v4 = vadd.f32 %v14029_v19, %v6951_v3 }
0x203a   : > { %v6971_v32 = vpack.c.bf16 %v19171_v4, %v19169_v20 }
0x203c   : > { %14047 = vmatmul.mubr.msk.bf16.vlgmr.msra.gmra.mrb[104].mxu0 %vm902_vm3, %v6971_v32 }
0x203d   : > { %16261 = vmatprep.mubr.msk.bf16.mxu0 %vm17167_vm0, %v17166_v1 }
0x210f   : > { %v7060_v33 = vpop.f32.mrb[104].mxu0 }
0x2110   : > { %v7062_v40 = vpop.f32.mrb[105].mxu0  ;;  %v7061_v15 = vadd.f32 %v7060_v33, %v6976_v10 }
0x2111   : > { %v7064_v8 = vpop.f32.mrb[106].mxu0  ;;  %v7063_v16 = vadd.f32 %v7062_v40, %v6980_v39  ;;  %v16746_v40 = vld [vmem:[%s20929_s10 + $0x50] sm:$0xff]  }
0x2112   : > { %v7065_v25 = vadd.f32 %v7064_v8, %v6976_v10  ;;  %v7066_v6 = vpop.f32.mrb[107].mxu0  ;;  %v16747_v8 = vld [vmem:[%s20929_s10 + $0x58] sm:$0xff]  }
0x2113   : > { %v7067_v7 = vadd.f32 %v7066_v6, %v6980_v39  ;;  %v16745_v39 = vld [vmem:[%s20929_s10 + $0x48] sm:$0xff]  }
0x2114   : > { %v7069_v18 = vpack.c.bf16 %v7065_v25, %v7061_v15  ;;  %v14059_v15 = vld [vmem:[%s20979_s28 + $0x2] ss:$0 sm:$0xff] }
0x2115   : > { %v7147_v43 = vpack.c.bf16 %v7067_v7, %v7063_v16 }
0x2116   : > { %7071 = vrot.lane.b32.xlu1 %v7069_v18, %s20981_s0 }
0x2117   : > { %16260 = vmatpush3.bf16.msra.mxu0 %v7147_v43 }
0x2118   : > { %16277 = vmatprep.subr.bf16.mxu0 %v17166_v1 }
0x2188   : > { %v7072_v36 = vpop.permute.xlu1 %7071 }
0x2189   : > { %v7077_v34 = vsel %vm902_vm3, %v7072_v36, 0 }
0x218a   : > { %16254 = vmatpush3.bf16.xpose.msra.mxu1 %v7077_v34 }
0x218b   : > { %16265 = vmatprep.subr.bf16.mxu1 %v17166_v1 }
0x2191   : > { %16256 = vmatmul.mubr.msk.bf16.vlgmr.msra.gmra.mrb[100].mxu1 %vm902_vm3, %v7069_v18 }
0x2192   : > { %16273 = vmatprep.mubr.msk.bf16.mxu1 %vm17167_vm0, %v17166_v1  ;;  %16266 = vmatpush3.bf16.msra.mxu1 %v16740_v58  ;;  %v16750_v58 = vld [vmem:[%s20980_s7 + $0x50] sm:$0xff]  }
0x2193   : > { %16267 = vmatprep.subr.bf16.mxu1 %v17166_v1 }
0x2196   : > { %16268 = vmatpush3.bf16.msra.mxu1 %v16741_v59  ;;  %v16751_v59 = vld [vmem:[%s20980_s7 + $0x58] sm:$0xff]  }
0x2197   : > { %16269 = vmatprep.subr.bf16.mxu1 %v17166_v1 }
0x219a   : > { %16270 = vmatpush3.bf16.msra.mxu1 %v16742_v60 }
0x219b   : > { %16271 = vmatprep.subr.bf16.mxu1 %v17166_v1 }
0x219e   : > { %16272 = vmatpush3.bf16.msra.mxu1 %v16743_v14  ;;  %v14067_v14 = vld [vmem:[%s20933_s14 + $0x2] ss:$0 sm:$0xff] }
0x219f   : > { %16289 = vmatprep.subr.bf16.mxu1 %v17166_v1 }
0x2264   : > { %v7113_v44 = vpop.f32.mrb[100].mxu1 }
0x2265   : > { %v7120_v38 = vmul.f32 0.125, %v7113_v44  ;;  %v16257_v49 = vpop.f32.mrb[101].mxu1 }
0x2266   : > { %v7116_v41 = vpop.f32.mrb[102].mxu1  ;;  %v14093_v49 = vld [vmem:[%s20930_s11 + $0x2] ss:$0 sm:$0xff] }
0x2267   : > { %v7121_v50 = vmul.f32 0.125, %v7116_v41  ;;  %v16258_v46 = vpop.f32.mrb[103].mxu1  ;;  %v7122_v23 = vadd.f32 %v19193_v42, %v7120_v38 }
0x2269   : > { %v7124_v53 = vsel %vm1006_vm4, %v7122_v23, -inf  ;;  %v7123_v63 = vadd.f32 %v19200_v54, %v7121_v50 }
0x226a   : > { %7125 = vmax.xlane.f32.xlu1 %v7124_v53 }
0x226b   : > { %v7127_v47 = vsel %vm1006_vm4, %v7123_v63, -inf }
0x226c   : > { %7128 = vmax.xlane.f32.xlu0 %v7127_v47 }
0x22f7   : > { %v7126_v62 = vpop.xlane.xlu1 %7125 }
0x22f8   : > { %v7130_v35 = vsub.f32 %v7122_v23, %v7126_v62 }
0x22f9   : > { %v7129_v37 = vpop.xlane.xlu0 %7128 }
0x22fa   : > { %v7132_v28 = vmul.f32 1.442695, %v7130_v35  ;;  %v7131_v24 = vsub.f32 %v7123_v63, %v7129_v37 }
0x22fc   : > { %17096 = vpow2.f32 %v7132_v28  ;;  %v7134_v51 = vmul.f32 1.442695, %v7131_v24 }
0x22fe   : > { %17098 = vpow2.f32 %v7134_v51 }
0x2306   : > { %v17097_v56 = vpop.eup %17096 }
0x2307   : > { %v7136_v52 = vsel %vm1006_vm4, %v17097_v56, 0.0 }
0x2308   : > { %v17099_v55 = vpop.eup %17098  ;;  %7137 = vadd.xlane.f32.xlu0 %v7136_v52 }
0x2309   : > { %v7139_v57 = vsel %vm1006_vm4, %v17099_v55, 0.0 }
0x230c   : > { %7140 = vadd.xlane.f32.xlu0 %v7139_v57  ;;  %v16749_v57 = vld [vmem:[%s20980_s7 + $0x48] sm:$0xff]  }
0x2395   : > { %v7138_v61 = vpop.xlane.xlu0 %7137 }
0x2396   : > { %17100 = vrcp.f32 %v7138_v61 }
0x2399   : > { %v7141_v0 = vpop.xlane.xlu0 %7140 }
0x239a   : > { %17102 = vrcp.f32 %v7141_v0 }
0x23a0   : > { %v17101_v2 = vpop.eup %17100 }
0x23a1   : > { %v7144_v11 = vmul.f32 %v17101_v2, %v17097_v56 }
0x23a4   : > { %v17103_v5 = vpop.eup %17102 }
0x23a5   : > { %v7145_v12 = vmul.f32 %v17103_v5, %v17099_v55  ;;  %v16748_v55 = vld [vmem:[%s20980_s7 + $0x40] sm:$0xff]  }
0x23a7   : > { %v7146_v13 = vpack.c.bf16 %v7145_v12, %v7144_v11 }
0x23a9   : > { %16262 = vmatmul.mubr.msk.bf16.vlgmr.msra.gmra.mrb[108].mxu0 %vm1006_vm4, %v7146_v13 }
0x23aa   : > { %16285 = vmatprep.mubr.msk.bf16.mxu0 %vm17167_vm0, %v17166_v1  ;;  %16278 = vmatpush3.bf16.msra.mxu0 %v16748_v55  ;;  %v16754_v55 = vld [vmem:[%s20931_s12 + $0x50] sm:$0xff]  }
0x23ab   : > { %16279 = vmatprep.subr.bf16.mxu0 %v17166_v1 }
0x23ae   : > { %16280 = vmatpush3.bf16.msra.mxu0 %v16749_v57 }
0x23af   : > { %16281 = vmatprep.subr.bf16.mxu0 %v17166_v1 }
0x23b2   : > { %16282 = vmatpush3.bf16.msra.mxu0 %v16750_v58 }
0x23b3   : > { %16283 = vmatprep.subr.bf16.mxu0 %v17166_v1 }
0x23b6   : > { %16284 = vmatpush3.bf16.msra.mxu0 %v16751_v59 }
0x23b7   : > { %16301 = vmatprep.subr.bf16.mxu0 %v17166_v1 }
0x247c   : > { %v7185_v19 = vpop.f32.mrb[108].mxu0 }
0x247d   : > { %v16263_v3 = vpop.f32.mrb[109].mxu0 }
0x247e   : > { %v7188_v32 = vpop.f32.mrb[110].mxu0 }
0x247f   : > { %v7203_v10 = vpack.c.bf16 %v7188_v32, %v7185_v19  ;;  %v16264_v33 = vpop.f32.mrb[111].mxu0 }
0x2481   : > { %16274 = vmatmul.mubr.msk.bf16.vlgmr.msra.gmra.mrb[104].mxu1 %vm902_vm3, %v7203_v10 }
0x2482   : > { %16290 = vmatpush3.bf16.msra.mxu1 %v16744_v9  ;;  %16297 = vmatprep.mubr.msk.bf16.mxu1 %vm17167_vm0, %v17166_v1  ;;  %v14068_v9 = vld [vmem:[%s20934_s15 + $0x2] ss:$0 sm:$0xff] }
0x2483   : > { %16291 = vmatprep.subr.bf16.mxu1 %v17166_v1 }
0x2486   : > { %16292 = vmatpush3.bf16.msra.mxu1 %v16745_v39 }
0x2487   : > { %16293 = vmatprep.subr.bf16.mxu1 %v17166_v1 }
0x248a   : > { %16294 = vmatpush3.bf16.msra.mxu1 %v16746_v40 }
0x248b   : > { %16295 = vmatprep.subr.bf16.mxu1 %v17166_v1 }
0x248e   : > { %16296 = vmatpush3.bf16.msra.mxu1 %v16747_v8 }
0x248f   : > { %16313 = vmatprep.subr.bf16.mxu1 %v17166_v1 }
0x2491   : > { %16298 = vmatmul.mubr.msk.bf16.vlgmr.msra.gmra.mrb[108].mxu1 %vm902_vm3, %v17376_v26 }
0x2492   : > { %16321 = vmatprep.mubr.msk.bf16.mxu1 %vm17167_vm0, %v17166_v1 }
0x2554   : > { %v7271_v25 = vpop.f32.mrb[104].mxu1 }
0x2555   : > { %v7272_v6 = vadd.f32 %v14059_v15, %v7271_v25  ;;  %v16275_v16 = vpop.f32.mrb[105].mxu1 }
0x2556   : > { %v7274_v7 = vpop.f32.mrb[106].mxu1 }
0x2557   : > { %v7275_v18 = vadd.f32 %v14059_v15, %v7274_v7  ;;  %v16276_v43 = vpop.f32.mrb[107].mxu1  ;;  %v7278_v36 = vadd.f32 %v7272_v6, %v19169_v20  ;;  %v14078_v15 = vld [vmem:[%s20928_s9 + $0x2] ss:$0 sm:$0xff] }
0x2559   : > { %v7284_v34 = vsel %vm902_vm3, %v7278_v36, 0.0  ;;  %v7279_v44 = vadd.f32 %v7275_v18, %v19171_v4 }
0x255a   : > { %7285 = vadd.xlane.f32.xlu0 %v7284_v34 }
0x255b   : > { %v7287_v38 = vsel %vm902_vm3, %v7279_v44, 0.0 }
0x255e   : > { %7288 = vadd.xlane.f32.xlu0 %v7287_v38 }
0x2564   : > { %v7487_v41 = vpop.f32.mrb[108].mxu1 }
0x2565   : > { %v16299_v50 = vpop.f32.mrb[109].mxu1  ;;  %v7488_v23 = vadd.f32 %v14093_v49, %v7487_v41 }
0x2566   : > { %v7490_v46 = vpop.f32.mrb[110].mxu1 }
0x2567   : > { %v7491_v53 = vadd.f32 %v14093_v49, %v7490_v46  ;;  %v16300_v63 = vpop.f32.mrb[111].mxu1 }
0x2569   : > { %v19258_v47 = vpack.c.bf16 %v7491_v53, %v7488_v23 }
0x256b   : > { %v7500_v8 = vsel %vm902_vm3, %v19258_v47, 0 }
0x25e7   : > { %v7286_v20 = vpop.xlane.xlu0 %7285 }
0x25e8   : > { %v7290_v62 = vmul.f32 0.015625, %v7286_v20 }
0x25ea   : > { %v7292_v35 = vsub.f32 %v7278_v36, %v7290_v62 }
0x25eb   : > { %v7289_v4 = vpop.xlane.xlu0 %7288 }
0x25ec   : > { %v7291_v37 = vmul.f32 0.015625, %v7289_v4  ;;  %v7294_v28 = vmul.f32 %v7292_v35, %v7292_v35 }
0x25ee   : > { %v7293_v24 = vsub.f32 %v7279_v44, %v7291_v37  ;;  %v7296_v51 = vsel %vm902_vm3, %v7294_v28, 0.0 }
0x25ef   : > { %7297 = vadd.xlane.f32.xlu0 %v7296_v51 }
0x25f0   : > { %v7295_v56 = vmul.f32 %v7293_v24, %v7293_v24 }
0x25f2   : > { %v7299_v52 = vsel %vm902_vm3, %v7295_v56, 0.0 }
0x25f3   : > { %7300 = vadd.xlane.f32.xlu0 %v7299_v52  ;;  %v16753_v52 = vld [vmem:[%s20931_s12 + $0x48] sm:$0xff]  }
0x267c   : > { %v7298_v60 = vpop.xlane.xlu0 %7297 }
0x267d   : > { %v7302_v61 = vmul.f32 0.015625, %v7298_v60 }
0x267f   : > { %v7304_v0 = vadd.f32 1e-05, %v7302_v61 }
0x2680   : > { %v7301_v2 = vpop.xlane.xlu0 %7300 }
0x2681   : > { %17104 = vrsqrt.f32 %v7304_v0  ;;  %v7303_v5 = vmul.f32 0.015625, %v7301_v2 }
0x2683   : > { %v7305_v11 = vadd.f32 1e-05, %v7303_v5  ;;  %v16755_v5 = vld [vmem:[%s20931_s12 + $0x58] sm:$0xff]  }
0x2685   : > { %17106 = vrsqrt.f32 %v7305_v11 }
0x268b   : > { %v17105_v12 = vpop.eup %17104 }
0x268c   : > { %v7308_v13 = vmul.f32 %v17105_v12, %v7292_v35 }
0x268e   : > { %v7316_v3 = vmul.f32 %v14067_v14, %v7308_v13 }
0x268f   : > { %v17107_v19 = vpop.eup %17106 }
0x2690   : > { %v7309_v32 = vmul.f32 %v17107_v19, %v7293_v24  ;;  %v19284_v33 = vadd.f32 %v14068_v9, %v7316_v3  ;;  %v14110_v3 = vld [vmem:[%s20932_s13 + $0x2] ss:$0 sm:$0xff] }
0x2692   : > { %v7317_v10 = vmul.f32 %v14067_v14, %v7309_v32 }
0x2694   : > { %v19286_v39 = vadd.f32 %v14068_v9, %v7317_v10 }
0x2696   : > { %v7337_v40 = vpack.c.bf16 %v19286_v39, %v19284_v33 }
0x2698   : > { %16286 = vmatmul.mubr.msk.bf16.vlgmr.msra.gmra.mrb[112].mxu0 %vm902_vm3, %v7337_v40 }
0x2699   : > { %16302 = vmatpush3.bf16.xpose.msra.mxu0 %v7500_v8  ;;  %16303 = vmatprep.mubr.msk.bf16.mxu0 %vm17167_vm0, %v17166_v1 }
0x269a   : > { %16307 = vmatprep.subr.bf16.mxu0 %v17166_v1 }
0x276b   : > { %v7405_v25 = vpop.f32.mrb[112].mxu0 }
0x276c   : > { %v16287_v6 = vpop.f32.mrb[113].mxu0  ;;  %v7406_v7 = vadd.f32 %v14078_v15, %v7405_v25 }
0x276d   : > { %v7408_v16 = vpop.f32.mrb[114].mxu0 }
0x276e   : > { %v7409_v18 = vadd.f32 %v14078_v15, %v7408_v16  ;;  %v16288_v43 = vpop.f32.mrb[115].mxu0 }
0x2770   : > { %v7494_v36 = vpack.c.bf16 %v7409_v18, %v7406_v7 }
0x2772   : > { %16304 = vmatmul.mubr.msk.bf16.vlgmr.msra.gmra.mrb[116].mxu0 %vm902_vm3, %v7494_v36 }
0x2773   : > { %16309 = vmatprep.mubr.msk.bf16.mxu0 %vm17167_vm0, %v17166_v1 }
0x2845   : > { %v7536_v34 = vpop.f32.mrb[116].mxu0 }
0x2846   : > { %v7543_v44 = vmul.f32 0.125, %v7536_v34  ;;  %v16305_v38 = vpop.f32.mrb[117].mxu0 }
0x2847   : > { %v7539_v49 = vpop.f32.mrb[118].mxu0 }
0x2848   : > { %v7544_v41 = vmul.f32 0.125, %v7539_v49  ;;  %v16306_v50 = vpop.f32.mrb[119].mxu0  ;;  %v7545_v46 = vadd.f32 %v19193_v42, %v7543_v44 }
0x2849   : > { %v14120_v50 = vld [vmem:[%s20939_s20 + $0x400] sm:$0xff] }
0x284a   : > { %v7547_v23 = vsel %vm1006_vm4, %v7545_v46, -inf  ;;  %v7546_v53 = vadd.f32 %v19200_v54, %v7544_v41  ;;  %v16752_v54 = vld [vmem:[%s20931_s12 + $0x40] sm:$0xff]  }
0x284b   : > { %7548 = vmax.xlane.f32.xlu0 %v7547_v23  ;;  %16314 = vmatpush3.bf16.msra.mxu1 %v16752_v54  ;;  %v14121_v23 = vld [vmem:[%s20939_s20 + $0x408] sm:$0xff] }
0x284c   : > { %v7550_v63 = vsel %vm1006_vm4, %v7546_v53, -inf  ;;  %16315 = vmatprep.subr.bf16.mxu1 %v17166_v1 }
0x284d   : > { %7551 = vmax.xlane.f32.xlu1 %v7550_v63  ;;  %v14129_v63 = vld [vmem:[%s20939_s20 + $0x448] sm:$0xff] }
0x284f   : > { %16316 = vmatpush3.bf16.msra.mxu1 %v16753_v52  ;;  %v14152_v52 = vld [vmem:[%s20939_s20 + $0x500] sm:$0xff] }
0x2850   : > { %16317 = vmatprep.subr.bf16.mxu1 %v17166_v1 }
0x2853   : > { %16318 = vmatpush3.bf16.msra.mxu1 %v16754_v55  ;;  %v14160_v55 = vld [vmem:[%s20939_s20 + $0x540] sm:$0xff] }
0x2854   : > { %16319 = vmatprep.subr.bf16.mxu1 %v17166_v1 }
0x2857   : > { %16320 = vmatpush3.bf16.msra.mxu1 %v16755_v5  ;;  %v14169_v5 = vld [vmem:[%s20939_s20 + $0x588] sm:$0xff] }
0x28d8   : > { %v7549_v20 = vpop.xlane.xlu0 %7548 }
0x28d9   : > { %v7553_v62 = vsub.f32 %v7545_v46, %v7549_v20  ;;  %v14128_v46 = vld [vmem:[%s20939_s20 + $0x440] sm:$0xff] }
0x28da   : > { %v7552_v35 = vpop.xlane.xlu1 %7551  ;;  %v14186_v20 = vcombine.low %v14120_v50, %v14128_v46 }
0x28db   : > { %v7555_v4 = vmul.f32 1.442695, %v7553_v62  ;;  %v7554_v37 = vsub.f32 %v7546_v53, %v7552_v35  ;;  %v14187_v53 = vcombine.high %v14120_v50, %v14128_v46  ;;  %v14188_v62 = vcombine.low %v14121_v23, %v14129_v63  ;;  %v14119_v46 = vld [vmem:[%s20936_s17 + $0x2] ss:$0 sm:$0xff] }
0x28dc   : > { %v14189_v35 = vcombine.high %v14121_v23, %v14129_v63  ;;  %v14139_v63 = vld [vmem:[%s20939_s20 + $0x498] sm:$0xff] }
0x28dd   : > { %17108 = vpow2.f32 %v7555_v4  ;;  %v7557_v28 = vmul.f32 1.442695, %v7554_v37  ;;  %v14136_v4 = vld [vmem:[%s20939_s20 + $0x480] sm:$0xff] }
0x28de   : > { %8269 = vmatprep.subr.bf16.mxu1 %v14189_v35  ;;  %v14144_v37 = vld [vmem:[%s20939_s20 + $0x4c0] sm:$0xff] }
0x28df   : > { %17110 = vpow2.f32 %v7557_v28  ;;  %v14137_v28 = vld [vmem:[%s20939_s20 + $0x488] sm:$0xff] }
0x28e7   : > { %v17109_v24 = vpop.eup %17108 }
0x28e8   : > { %v7559_v51 = vsel %vm1006_vm4, %v17109_v24, 0.0 }
0x28e9   : > { %v17111_v42 = vpop.eup %17110  ;;  %7560 = vadd.xlane.f32.xlu0 %v7559_v51  ;;  %v14145_v51 = vld [vmem:[%s20939_s20 + $0x4c8] sm:$0xff] }
0x28ea   : > { %v7562_v56 = vsel %vm1006_vm4, %v17111_v42, 0.0  ;;  %v14205_v54 = vcombine.high %v14137_v28, %v14145_v51 }
0x28eb   : > { %7563 = vadd.xlane.f32.xlu1 %v7562_v56  ;;  %v14204_v56 = vcombine.low %v14137_v28, %v14145_v51  ;;  %v14154_v28 = vld [vmem:[%s20939_s20 + $0x510] sm:$0xff]  ;;  %v14155_v51 = vld [vmem:[%s20939_s20 + $0x518] sm:$0xff] }
0x28ff   : > { %7571 = vrot.lane.b32.xlu0 %v19258_v47, %s20981_s0 }
0x2976   : > { %v7561_v47 = vpop.xlane.xlu0 %7560 }
0x2977   : > { %17112 = vrcp.f32 %v7561_v47  ;;  %v14153_v47 = vld [vmem:[%s20939_s20 + $0x508] sm:$0xff] }
0x2978   : > { %v7564_v57 = vpop.xlane.xlu1 %7563 }
0x2979   : > { %17114 = vrcp.f32 %v7564_v57  ;;  %v14219_v57 = vcombine.high %v14152_v52, %v14160_v55 }
0x297a   : > { %v7572_v58 = vpop.permute.xlu0 %7571 }
0x297b   : > { %16308 = vmatpush3.bf16.msra.mxu0 %v7572_v58  ;;  %v14161_v58 = vld [vmem:[%s20939_s20 + $0x548] sm:$0xff] }
0x297c   : > { %8226 = vmatprep.subr.bf16.mxu0 %v14187_v53  ;;  %v14138_v53 = vld [vmem:[%s20939_s20 + $0x490] sm:$0xff] }
0x2981   : > { %v17113_v59 = vpop.eup %17112 }
0x2982   : > { %v7567_v61 = vmul.f32 %v17113_v59, %v17109_v24  ;;  %v14203_v24 = vcombine.high %v14136_v4, %v14144_v37  ;;  %v14218_v59 = vcombine.low %v14152_v52, %v14160_v55 }
0x2983   : > { %v17115_v60 = vpop.eup %17114 }
0x2984   : > { %v7568_v0 = vmul.f32 %v17115_v60, %v17111_v42  ;;  %v14202_v42 = vcombine.low %v14136_v4, %v14144_v37  ;;  %v14220_v60 = vcombine.low %v14153_v47, %v14161_v58 }
0x2986   : > { %v7569_v2 = vpack.c.bf16 %v7568_v0, %v7567_v61  ;;  %v14221_v61 = vcombine.high %v14153_v47, %v14161_v58  ;;  %v14168_v0 = vld [vmem:[%s20939_s20 + $0x580] sm:$0xff]  ;;  %v14170_v47 = vld [vmem:[%s20939_s20 + $0x590] sm:$0xff]  ;;  %v14171_v58 = vld [vmem:[%s20939_s20 + $0x598] sm:$0xff] }
0x2988   : > { %16310 = vmatmul.mubr.msk.bf16.vlgmr.msra.gmra.mrb[120].mxu0 %vm1006_vm4, %v7569_v2  ;;  %v14176_v2 = vld [vmem:[%s20939_s20 + $0x5c0] sm:$0xff] }
0x2989   : > { %8258 = vmatprep.mubr.bf16.mxu0 %v17168_v17  ;;  %8227 = vmatpush1.bf16.msra.mxu0 %v14186_v20 }
0x298a   : > { %8228 = vmatprep.subr.bf16.mxu0 %v14203_v24  ;;  %v14162_v24 = vld [vmem:[%s20939_s20 + $0x550] sm:$0xff] }
0x298b   : > { %v14223_v52 = vcombine.high %v14154_v28, %v14162_v24 }
0x298d   : > { %8229 = vmatpush1.bf16.msra.mxu0 %v14202_v42  ;;  %v14163_v42 = vld [vmem:[%s20939_s20 + $0x558] sm:$0xff] }
0x298e   : > { %8230 = vmatprep.subr.bf16.mxu0 %v14219_v57  ;;  %v14225_v55 = vcombine.high %v14155_v51, %v14163_v42  ;;  %v14178_v57 = vld [vmem:[%s20939_s20 + $0x5d0] sm:$0xff] }
0x2991   : > { %8231 = vmatpush1.bf16.msra.mxu0 %v14218_v59  ;;  %v14179_v59 = vld [vmem:[%s20939_s20 + $0x5d8] sm:$0xff] }
0x2a5b   : > { %v7611_v11 = vpop.f32.mrb[120].mxu0 }
0x2a5c   : > { %v16311_v12 = vpop.f32.mrb[121].mxu0 }
0x2a5d   : > { %v7614_v13 = vpop.f32.mrb[122].mxu0  ;;  %v14177_v12 = vld [vmem:[%s20939_s20 + $0x5c8] sm:$0xff] }
0x2a5e   : > { %v7629_v14 = vpack.c.bf16 %v7614_v13, %v7611_v11  ;;  %v16312_v19 = vpop.f32.mrb[123].mxu0  ;;  %v14235_v11 = vcombine.high %v14168_v0, %v14176_v2  ;;  %v14234_v13 = vcombine.low %v14168_v0, %v14176_v2  ;;  %v14239_v0 = vcombine.high %v14170_v47, %v14178_v57 }
0x2a5f   : > { %v14237_v19 = vcombine.high %v14169_v5, %v14177_v12  ;;  %v14241_v2 = vcombine.high %v14171_v58, %v14179_v59 }
0x2a60   : > { %16322 = vmatmul.mubr.msk.bf16.vlgmr.msra.gmra.mrb[112].mxu1 %vm902_vm3, %v7629_v14  ;;  %v14236_v14 = vcombine.low %v14169_v5, %v14177_v12  ;;  %8232 = vmatprep.subr.bf16.mxu0 %v14235_v11  ;;  %v14124_v5 = vld [vmem:[%s20939_s20 + $0x420] sm:$0xff]  ;;  %v14125_v12 = vld [vmem:[%s20939_s20 + $0x428] sm:$0xff] }
0x2a61   : > { %8301 = vmatprep.mubr.bf16.mxu1 %v17168_v17  ;;  %8270 = vmatpush1.bf16.msra.mxu1 %v14188_v62  ;;  %v14132_v11 = vld [vmem:[%s20939_s20 + $0x460] sm:$0xff] }
0x2a62   : > { %8271 = vmatprep.subr.bf16.mxu1 %v14205_v54  ;;  %8233 = vmatpush1.bf16.msra.mxu0 %v14234_v13  ;;  %v14133_v13 = vld [vmem:[%s20939_s20 + $0x468] sm:$0xff] }
0x2a65   : > { %8272 = vmatpush1.bf16.msra.mxu1 %v14204_v56 }
0x2a66   : > { %8273 = vmatprep.subr.bf16.mxu1 %v14221_v61  ;;  %v14224_v61 = vcombine.low %v14155_v51, %v14163_v42 }
0x2a69   : > { %8274 = vmatpush1.bf16.msra.mxu1 %v14220_v60  ;;  %v14222_v60 = vcombine.low %v14154_v28, %v14162_v24  ;;  %v14127_v28 = vld [vmem:[%s20939_s20 + $0x438] sm:$0xff] }
0x2a6a   : > { %8275 = vmatprep.subr.bf16.mxu1 %v14237_v19  ;;  %v14240_v19 = vcombine.low %v14171_v58, %v14179_v59  ;;  %v14135_v24 = vld [vmem:[%s20939_s20 + $0x478] sm:$0xff] }
0x2a6b   : > { %v14200_v59 = vcombine.low %v14127_v28, %v14135_v24 }
0x2a6d   : > { %8276 = vmatpush1.bf16.msra.mxu1 %v14236_v14  ;;  %v14238_v14 = vcombine.low %v14170_v47, %v14178_v57  ;;  %v14143_v47 = vld [vmem:[%s20939_s20 + $0x4b8] sm:$0xff] }
0x2a6e   : > { %v14151_v57 = vld [vmem:[%s20939_s20 + $0x4f8] sm:$0xff] }
0x2b33   : > { %v7697_v32 = vpop.f32.mrb[112].mxu1 }
0x2b34   : > { %v7698_v9 = vadd.f32 %v14110_v3, %v7697_v32  ;;  %v16323_v10 = vpop.f32.mrb[113].mxu1  ;;  %v14130_v32 = vld [vmem:[%s20939_s20 + $0x450] sm:$0xff] }
0x2b35   : > { %v7700_v40 = vpop.f32.mrb[114].mxu1 }
0x2b36   : > { %v7701_v8 = vadd.f32 %v14110_v3, %v7700_v40  ;;  %v16324_v15 = vpop.f32.mrb[115].mxu1  ;;  %v7704_v25 = vadd.f32 %v7698_v9, %v19284_v33  ;;  %v14122_v3 = vld [vmem:[%s20939_s20 + $0x410] sm:$0xff]  ;;  %v14123_v9 = vld [vmem:[%s20939_s20 + $0x418] sm:$0xff] }
0x2b37   : > { %v14190_v10 = vcombine.low %v14122_v3, %v14130_v32  ;;  %v14191_v40 = vcombine.high %v14122_v3, %v14130_v32  ;;  %v14195_v3 = vcombine.high %v14124_v5, %v14132_v11  ;;  %v14197_v32 = vcombine.high %v14125_v12, %v14133_v13 }
0x2b38   : > { %v7710_v6 = vsel %vm902_vm3, %v7704_v25, 0.0  ;;  %v7705_v16 = vadd.f32 %v7701_v8, %v19286_v39  ;;  %v14131_v8 = vld [vmem:[%s20939_s20 + $0x458] sm:$0xff] }
0x2b39   : > { %7711 = vadd.xlane.f32.xlu1 %v7710_v6  ;;  %v14192_v15 = vcombine.low %v14123_v9, %v14131_v8  ;;  %8312 = vmatprep.subr.bf16.mxu0 %v14191_v40  ;;  %v14141_v40 = vld [vmem:[%s20939_s20 + $0x4a8] sm:$0xff] }
0x2b3a   : > { %v7713_v7 = vsel %vm902_vm3, %v7705_v16, 0.0 }
0x2b3d   : > { %7714 = vadd.xlane.f32.xlu1 %v7713_v7 }
0x2bc6   : > { %v7712_v18 = vpop.xlane.xlu1 %7711 }
0x2bc7   : > { %v7716_v43 = vmul.f32 0.015625, %v7712_v18 }
0x2bc9   : > { %v19336_v36 = vsub.f32 %v7704_v25, %v7716_v43  ;;  %v14193_v25 = vcombine.high %v14123_v9, %v14131_v8  ;;  %v14140_v9 = vld [vmem:[%s20939_s20 + $0x4a0] sm:$0xff]  ;;  %v14149_v8 = vld [vmem:[%s20939_s20 + $0x4e8] sm:$0xff] }
0x2bca   : > { %v7715_v34 = vpop.xlane.xlu1 %7714 }
0x2bcb   : > { %v7717_v44 = vmul.f32 0.015625, %v7715_v34  ;;  %v7720_v38 = vmul.f32 %v19336_v36, %v19336_v36  ;;  %8355 = vmatprep.subr.bf16.mxu1 %v14193_v25  ;;  %v14196_v25 = vcombine.low %v14125_v12, %v14133_v13  ;;  %v14216_v13 = vcombine.low %v14143_v47, %v14151_v57 }
0x2bcd   : > { %v19340_v49 = vsub.f32 %v7705_v16, %v7717_v44  ;;  %v7722_v33 = vsel %vm902_vm3, %v7720_v38, 0.0 }
0x2bce   : > { %7723 = vadd.xlane.f32.xlu1 %v7722_v33  ;;  %v14118_v33 = vld [vmem:[%s20984_s16 + $0x2] ss:$0 sm:$0xff] }
0x2bcf   : > { %v7721_v39 = vmul.f32 %v19340_v49, %v19340_v49 }
0x2bd1   : > { %v7725_v41 = vsel %vm902_vm3, %v7721_v39, 0.0 }
0x2bd2   : > { %7726 = vadd.xlane.f32.xlu1 %v7725_v41 }
0x2c5b   : > { %v7724_v6 = vpop.xlane.xlu1 %7723 }
0x2c5c   : > { %v7728_v16 = vmul.f32 0.015625, %v7724_v6 }
0x2c5e   : > { %v7730_v7 = vadd.f32 1e-05, %v7728_v16  ;;  %v14213_v16 = vcombine.high %v14141_v40, %v14149_v8 }
0x2c5f   : > { %v7727_v18 = vpop.xlane.xlu1 %7726 }
0x2c60   : > { %17116 = vrsqrt.f32 %v7730_v7  ;;  %v7729_v43 = vmul.f32 0.015625, %v7727_v18  ;;  %v14156_v7 = vld [vmem:[%s20939_s20 + $0x520] sm:$0xff] }
0x2c61   : > { %v14164_v18 = vld [vmem:[%s20939_s20 + $0x560] sm:$0xff] }
0x2c62   : > { %v7731_v34 = vadd.f32 1e-05, %v7729_v43  ;;  %v14157_v43 = vld [vmem:[%s20939_s20 + $0x528] sm:$0xff] }
0x2c64   : > { %17118 = vrsqrt.f32 %v7731_v34  ;;  %v14165_v34 = vld [vmem:[%s20939_s20 + $0x568] sm:$0xff] }
0x2c6a   : > { %v17117_v44 = vpop.eup %17116 }
0x2c6b   : > { %v7734_v38 = vmul.f32 %v17117_v44, %v19336_v36  ;;  %v14146_v36 = vld [vmem:[%s20939_s20 + $0x4d0] sm:$0xff] }
0x2c6c   : > { %v14207_v4 = vcombine.high %v14138_v53, %v14146_v36  ;;  %v14206_v56 = vcombine.low %v14138_v53, %v14146_v36  ;;  %v14226_v53 = vcombine.low %v14156_v7, %v14164_v18  ;;  %v14228_v36 = vcombine.low %v14157_v43, %v14165_v34 }
0x2c6d   : > { %v7742_v41 = vmul.f32 %v14118_v33, %v7734_v38  ;;  %v14212_v38 = vcombine.low %v14141_v40, %v14149_v8 }
0x2c6e   : > { %v17119_v39 = vpop.eup %17118 }
0x2c6f   : > { %v7735_v50 = vmul.f32 %v17119_v39, %v19340_v49  ;;  %v14147_v49 = vld [vmem:[%s20939_s20 + $0x4d8] sm:$0xff]  ;;  %v19426_v20 = vadd.f32 %v14119_v46, %v7742_v41  ;;  %v14229_v39 = vcombine.high %v14157_v43, %v14165_v34  ;;  %v14172_v41 = vld [vmem:[%s20939_s20 + $0x5a0] sm:$0xff] }
0x2c70   : > { %v14209_v37 = vcombine.high %v14139_v63, %v14147_v49  ;;  %v14208_v54 = vcombine.low %v14139_v63, %v14147_v49  ;;  %v16758_v43 = vld [vmem:[%s20941_s22 + $0x800] sm:$0xff]  }
0x2c71   : > { %v7743_v23 = vmul.f32 %v14118_v33, %v7735_v50  ;;  %v14227_v33 = vcombine.high %v14156_v7, %v14164_v18  ;;  %v14180_v50 = vld [vmem:[%s20939_s20 + $0x5e0] sm:$0xff] }
0x2c72   : > { %v14243_v63 = vcombine.high %v14172_v41, %v14180_v50  ;;  %v14242_v51 = vcombine.low %v14172_v41, %v14180_v50  ;;  %v16756_v7 = vld [vmem:[%s20941_s22 + $0x840] sm:$0xff]   ;;  %v16764_v41 = vld [vmem:[%s20941_s22 + $0x850] sm:$0xff]  }
0x2c73   : > { %v19428_v62 = vadd.f32 %v14119_v46, %v7743_v23  ;;  %v14173_v46 = vld [vmem:[%s20939_s20 + $0x5a8] sm:$0xff]  ;;  %v16757_v18 = vld [vmem:[%s20941_s22 + $0x8c0] sm:$0xff]   ;;  %v16766_v50 = vld [vmem:[%s20941_s22 + $0x810] sm:$0xff]  }
0x2c74   : > { %v14181_v23 = vld [vmem:[%s20939_s20 + $0x5e8] sm:$0xff]  ;;  %v16759_v34 = vld [vmem:[%s20941_s22 + $0x880] sm:$0xff]  }
0x2c75   : > { %v19432_v35 = vpack.c.bf16 %v19428_v62, %v19426_v20  ;;  %v14245_v49 = vcombine.high %v14173_v46, %v14181_v23  ;;  %v14244_v42 = vcombine.low %v14173_v46, %v14181_v23  ;;  %v16767_v46 = vld [vmem:[%s20941_s22 + $0x890] sm:$0xff]   ;;  %v16768_v23 = vld [vmem:[%s20941_s22 + $0x858] sm:$0xff]  }
0x2c77   : > { %14250 = vmatmul.mubr.msk.bf16.vlgmr.msra.gmra.mrb[124].mxu0 %vm902_vm3, %v19432_v35  ;;  %14251 = vmatmul.mubr.msk.bf16.vlgmr.msra.gmra.mrb[116].mxu1 %vm902_vm3, %v19432_v35 }
0x2c78   : > { %8313 = vmatpush1.bf16.msra.mxu0 %v14190_v10  ;;  %8356 = vmatpush1.bf16.msra.mxu1 %v14192_v15  ;;  %v14148_v10 = vld [vmem:[%s20939_s20 + $0x4e0] sm:$0xff]  ;;  %v14194_v15 = vcombine.low %v14124_v5, %v14132_v11  ;;  %v14159_v5 = vld [vmem:[%s20939_s20 + $0x538] sm:$0xff] }
0x2c79   : > { %8314 = vmatprep.subr.bf16.mxu0 %v14207_v4  ;;  %8357 = vmatprep.subr.bf16.mxu1 %v14209_v37  ;;  %v14211_v6 = vcombine.high %v14140_v9, %v14148_v10  ;;  %v14210_v44 = vcombine.low %v14140_v9, %v14148_v10  ;;  %v14126_v4 = vld [vmem:[%s20939_s20 + $0x430] sm:$0xff]  ;;  %v14167_v11 = vld [vmem:[%s20939_s20 + $0x578] sm:$0xff] }
0x2c7a   : > { %8344 = vmatprep.mubr.bf16.mxu0 %v17168_v17  ;;  %8387 = vmatprep.mubr.bf16.mxu1 %v17168_v17  ;;  %v14134_v37 = vld [vmem:[%s20939_s20 + $0x470] sm:$0xff]  ;;  %v14175_v9 = vld [vmem:[%s20939_s20 + $0x5b8] sm:$0xff]  ;;  %v14232_v8 = vcombine.low %v14159_v5, %v14167_v11 }
0x2c7b   : > { %v14198_v58 = vcombine.low %v14126_v4, %v14134_v37  ;;  %v14183_v10 = vld [vmem:[%s20939_s20 + $0x5f8] sm:$0xff] }
0x2c7c   : > { %8315 = vmatpush1.bf16.msra.mxu0 %v14206_v56  ;;  %8358 = vmatpush1.bf16.msra.mxu1 %v14208_v54  ;;  %v14199_v56 = vcombine.high %v14126_v4, %v14134_v37  ;;  %v14201_v54 = vcombine.high %v14127_v28, %v14135_v24  ;;  %v16773_v4 = vld [vmem:[%s20941_s22 + $0x8e0] sm:$0xff]   ;;  %v16776_v24 = vld [vmem:[%s20941_s22 + $0x868] sm:$0xff]  }
0x2c7d   : > { %8316 = vmatprep.subr.bf16.mxu0 %v14223_v52  ;;  %8359 = vmatprep.subr.bf16.mxu1 %v14225_v55  ;;  %v14142_v52 = vld [vmem:[%s20939_s20 + $0x4b0] sm:$0xff]  ;;  %v16774_v37 = vld [vmem:[%s20941_s22 + $0x820] sm:$0xff]  }
0x2c7e   : > { %v14150_v55 = vld [vmem:[%s20939_s20 + $0x4f0] sm:$0xff]  ;;  %v16775_v28 = vld [vmem:[%s20941_s22 + $0x8a0] sm:$0xff]  }
0x2c7f   : > { %v14214_v12 = vcombine.low %v14142_v52, %v14150_v55 }
0x2c80   : > { %8317 = vmatpush1.bf16.msra.mxu0 %v14222_v60  ;;  %8360 = vmatpush1.bf16.msra.mxu1 %v14224_v61  ;;  %v14215_v60 = vcombine.high %v14142_v52, %v14150_v55  ;;  %v14217_v61 = vcombine.high %v14143_v47, %v14151_v57  ;;  %v16781_v52 = vld [vmem:[%s20941_s22 + $0x8f0] sm:$0xff]   ;;  %v16784_v57 = vld [vmem:[%s20941_s22 + $0x878] sm:$0xff]  }
0x2c81   : > { %8318 = vmatprep.subr.bf16.mxu0 %v14239_v0  ;;  %8361 = vmatprep.subr.bf16.mxu1 %v14241_v2  ;;  %v14158_v0 = vld [vmem:[%s20939_s20 + $0x530] sm:$0xff] }
0x2c82   : > { %v14166_v2 = vld [vmem:[%s20939_s20 + $0x570] sm:$0xff] }
0x2c83   : > { %v14230_v40 = vcombine.low %v14158_v0, %v14166_v2  ;;  %v16782_v55 = vld [vmem:[%s20941_s22 + $0x830] sm:$0xff]  }
0x2c84   : > { %8319 = vmatpush1.bf16.msra.mxu0 %v14238_v14  ;;  %8362 = vmatpush1.bf16.msra.mxu1 %v14240_v19  ;;  %v14231_v14 = vcombine.high %v14158_v0, %v14166_v2  ;;  %v14233_v19 = vcombine.high %v14159_v5, %v14167_v11  ;;  %v16783_v47 = vld [vmem:[%s20941_s22 + $0x8b0] sm:$0xff]   ;;  %v16789_v0 = vld [vmem:[%s20941_s22 + $0x9c0] sm:$0xff]  }
0x2c85   : > { %8398 = vmatprep.subr.bf16.mxu0 %v14195_v3  ;;  %8441 = vmatprep.subr.bf16.mxu1 %v14197_v32  ;;  %v14174_v3 = vld [vmem:[%s20939_s20 + $0x5b0] sm:$0xff]  ;;  %v14184_v2 = vld [vmem:[%s20940_s21 + $0x20] sm:$0xff] }
0x2c86   : > { %v14182_v32 = vld [vmem:[%s20939_s20 + $0x5f0] sm:$0xff]  ;;  %v7826_v5 = vrot.slane %v14184_v2, %v17385_v29  ;;  %v7834_v11 = vrot.slane %v14184_v2, %v17891_v45 }
0x2c87   : > { %14252 = vmatmul.mubr.msk.bf16.vlgmr.msra.gmra.mrb[128].mxu0 %vm902_vm3, %v19432_v35  ;;  %14253 = vmatmul.mubr.msk.bf16.vlgmr.msra.gmra.mrb[120].mxu1 %vm902_vm3, %v19432_v35 }
0x2c88   : > { %8399 = vmatpush1.bf16.msra.mxu0 %v14194_v15  ;;  %8442 = vmatpush1.bf16.msra.mxu1 %v14196_v25  ;;  %v14247_v15 = vcombine.high %v14174_v3, %v14182_v32  ;;  %v14249_v25 = vcombine.high %v14175_v9, %v14183_v10 }
0x2c89   : > { %8400 = vmatprep.subr.bf16.mxu0 %v14211_v6  ;;  %8443 = vmatprep.subr.bf16.mxu1 %v14213_v16  ;;  %v14246_v6 = vcombine.low %v14174_v3, %v14182_v32  ;;  %v14248_v16 = vcombine.low %v14175_v9, %v14183_v10 }
0x2c8a   : > { %8430 = vmatprep.mubr.bf16.mxu0 %v17168_v17  ;;  %8473 = vmatprep.mubr.bf16.mxu1 %v17168_v17 }
0x2c8c   : > { %8401 = vmatpush1.bf16.msra.mxu0 %v14210_v44  ;;  %8444 = vmatpush1.bf16.msra.mxu1 %v14212_v38  ;;  %v16760_v44 = vld [vmem:[%s20941_s22 + $0x848] sm:$0xff]  }
0x2c8d   : > { %8402 = vmatprep.subr.bf16.mxu0 %v14227_v33  ;;  %8445 = vmatprep.subr.bf16.mxu1 %v14229_v39  ;;  %v16761_v38 = vld [vmem:[%s20941_s22 + $0x8c8] sm:$0xff]  }
0x2c8e   : > { %v16762_v33 = vld [vmem:[%s20941_s22 + $0x808] sm:$0xff]  }
0x2c8f   : > { %v16763_v39 = vld [vmem:[%s20941_s22 + $0x888] sm:$0xff]  }
0x2c90   : > { %8403 = vmatpush1.bf16.msra.mxu0 %v14226_v53  ;;  %8446 = vmatpush1.bf16.msra.mxu1 %v14228_v36  ;;  %v16769_v53 = vld [vmem:[%s20941_s22 + $0x8d8] sm:$0xff]  }
0x2c91   : > { %8404 = vmatprep.subr.bf16.mxu0 %v14243_v63  ;;  %8447 = vmatprep.subr.bf16.mxu1 %v14245_v49  ;;  %v16770_v36 = vld [vmem:[%s20941_s22 + $0x818] sm:$0xff]   ;;  %v16772_v49 = vld [vmem:[%s20941_s22 + $0x860] sm:$0xff]  }
0x2c92   : > { %v16771_v63 = vld [vmem:[%s20941_s22 + $0x898] sm:$0xff]  }
0x2c94   : > { %8405 = vmatpush1.bf16.msra.mxu0 %v14242_v51  ;;  %8448 = vmatpush1.bf16.msra.mxu1 %v14244_v42  ;;  %v16777_v51 = vld [vmem:[%s20941_s22 + $0x8e8] sm:$0xff]  }
0x2c95   : > { %8484 = vmatprep.subr.bf16.mxu0 %v14199_v56  ;;  %8527 = vmatprep.subr.bf16.mxu1 %v14201_v54  ;;  %v16778_v42 = vld [vmem:[%s20941_s22 + $0x828] sm:$0xff]   ;;  %v16780_v54 = vld [vmem:[%s20941_s22 + $0x870] sm:$0xff]  }
0x2c96   : > { %v16779_v56 = vld [vmem:[%s20941_s22 + $0x8a8] sm:$0xff]  }
0x2c97   : > { %14254 = vmatmul.mubr.msk.bf16.vlgmr.msra.gmra.mrb[132].mxu0 %vm902_vm3, %v19432_v35  ;;  %14255 = vmatmul.mubr.msk.bf16.vlgmr.msra.gmra.mrb[124].mxu1 %vm902_vm3, %v19432_v35 }
0x2c98   : > { %8485 = vmatpush1.bf16.msra.mxu0 %v14198_v58  ;;  %8528 = vmatpush1.bf16.msra.mxu1 %v14200_v59  ;;  %v16785_v58 = vld [vmem:[%s20941_s22 + $0x8f8] sm:$0xff]  }
0x2c99   : > { %8486 = vmatprep.subr.bf16.mxu0 %v14215_v60  ;;  %8529 = vmatprep.subr.bf16.mxu1 %v14217_v61  ;;  %v16786_v59 = vld [vmem:[%s20941_s22 + $0x838] sm:$0xff]   ;;  %v16788_v61 = vld [vmem:[%s20941_s22 + $0x940] sm:$0xff]  }
0x2c9a   : > { %8516 = vmatprep.mubr.bf16.mxu0 %v17168_v17  ;;  %8559 = vmatprep.mubr.bf16.mxu1 %v17168_v17  ;;  %v16787_v60 = vld [vmem:[%s20941_s22 + $0x8b8] sm:$0xff]  }
0x2c9c   : > { %8487 = vmatpush1.bf16.msra.mxu0 %v14214_v12  ;;  %8530 = vmatpush1.bf16.msra.mxu1 %v14216_v13  ;;  %v7830_v12 = vrot.slane %v14184_v2, %v17391_v31  ;;  %v7838_v13 = vrot.slane %v14184_v2, %v17897_v48 }
0x2c9d   : > { %8488 = vmatprep.subr.bf16.mxu0 %v14231_v14  ;;  %8531 = vmatprep.subr.bf16.mxu1 %v14233_v19 }
0x2ca0   : > { %8489 = vmatpush1.bf16.msra.mxu0 %v14230_v40  ;;  %8532 = vmatpush1.bf16.msra.mxu1 %v14232_v8 }
0x2ca1   : > { %8490 = vmatprep.subr.bf16.mxu0 %v14247_v15  ;;  %8533 = vmatprep.subr.bf16.mxu1 %v14249_v25 }
0x2ca4   : > { %8491 = vmatpush1.bf16.msra.mxu0 %v14246_v6  ;;  %8534 = vmatpush1.bf16.msra.mxu1 %v14248_v16 }
0x2ca5   : > { %15713 = vmatprep.subr.bf16.mxu0 %v16756_v7  ;;  %15735 = vmatprep.subr.bf16.mxu1 %v16757_v18 }
0x2ca7   : > { %14256 = vmatmul.mubr.msk.bf16.vlgmr.msra.gmra.mrb[136].mxu0 %vm902_vm3, %v19432_v35  ;;  %14257 = vmatmul.mubr.msk.bf16.vlgmr.msra.gmra.mrb[128].mxu1 %vm902_vm3, %v19432_v35  ;;  %v16765_v35 = vld [vmem:[%s20941_s22 + $0x8d0] sm:$0xff]  }
0x2ca8   : > { %15714 = vmatpush3.bf16.msra.mxu0 %v16758_v43  ;;  %15736 = vmatpush3.bf16.msra.mxu1 %v16759_v34 }
0x2ca9   : > { %15715 = vmatprep.subr.bf16.mxu0 %v16760_v44  ;;  %15737 = vmatprep.subr.bf16.mxu1 %v16761_v38 }
0x2cac   : > { %15716 = vmatpush3.bf16.msra.mxu0 %v16762_v33  ;;  %15738 = vmatpush3.bf16.msra.mxu1 %v16763_v39 }
0x2cad   : > { %15717 = vmatprep.subr.bf16.mxu0 %v16764_v41  ;;  %15739 = vmatprep.subr.bf16.mxu1 %v16765_v35 }
0x2cb0   : > { %15718 = vmatpush3.bf16.msra.mxu0 %v16766_v50  ;;  %15740 = vmatpush3.bf16.msra.mxu1 %v16767_v46 }
0x2cb1   : > { %15719 = vmatprep.subr.bf16.mxu0 %v16768_v23  ;;  %15741 = vmatprep.subr.bf16.mxu1 %v16769_v53 }
0x2cb4   : > { %15720 = vmatpush3.bf16.msra.mxu0 %v16770_v36  ;;  %15742 = vmatpush3.bf16.msra.mxu1 %v16771_v63 }
0x2cb5   : > { %15721 = vmatprep.subr.bf16.mxu0 %v16772_v49  ;;  %15743 = vmatprep.subr.bf16.mxu1 %v16773_v4  ;;  %v16790_v49 = vld [vmem:[%s20941_s22 + $0x900] sm:$0xff]  }
0x2cb6   : > { %v16791_v4 = vld [vmem:[%s20941_s22 + $0x980] sm:$0xff]  }
0x2cb8   : > { %15722 = vmatpush3.bf16.msra.mxu0 %v16774_v37  ;;  %15744 = vmatpush3.bf16.msra.mxu1 %v16775_v28  ;;  %v16792_v37 = vld [vmem:[%s20941_s22 + $0x948] sm:$0xff]  }
0x2cb9   : > { %15723 = vmatprep.subr.bf16.mxu0 %v16776_v24  ;;  %15745 = vmatprep.subr.bf16.mxu1 %v16777_v51  ;;  %v16793_v28 = vld [vmem:[%s20941_s22 + $0x9c8] sm:$0xff]  }
0x2cba   : > { %v16794_v24 = vld [vmem:[%s20941_s22 + $0x908] sm:$0xff]  }
0x2cbb   : > { %v16795_v51 = vld [vmem:[%s20941_s22 + $0x988] sm:$0xff]  }
0x2cbc   : > { %15724 = vmatpush3.bf16.msra.mxu0 %v16778_v42  ;;  %15746 = vmatpush3.bf16.msra.mxu1 %v16779_v56  ;;  %v7842_v42 = vrot.slane %v14184_v2, %v17916_v21  ;;  %v7850_v56 = vrot.slane %v14184_v2, %v17919_v22 }
0x2cbd   : > { %15725 = vmatprep.subr.bf16.mxu0 %v16780_v54  ;;  %15747 = vmatprep.subr.bf16.mxu1 %v16781_v52  ;;  %v16796_v54 = vld [vmem:[%s20941_s22 + $0x950] sm:$0xff]  }
0x2cbe   : > { %v16797_v52 = vld [vmem:[%s20941_s22 + $0x9d0] sm:$0xff]  }
0x2cc0   : > { %15726 = vmatpush3.bf16.msra.mxu0 %v16782_v55  ;;  %15748 = vmatpush3.bf16.msra.mxu1 %v16783_v47  ;;  %v7846_v55 = vrot.slane %v14184_v2, %v17922_v27  ;;  %v7854_v47 = vrot.slane %v14184_v2, %v17925_v30  ;;  %v16800_v2 = vld [vmem:[%s20941_s22 + $0x958] sm:$0xff]  }
0x2cc1   : > { %15727 = vmatprep.subr.bf16.mxu0 %v16784_v57  ;;  %15749 = vmatprep.subr.bf16.mxu1 %v16785_v58 }
0x2cc4   : > { %15728 = vmatpush3.bf16.msra.mxu0 %v16786_v59  ;;  %15750 = vmatpush3.bf16.msra.mxu1 %v16787_v60  ;;  %v16798_v59 = vld [vmem:[%s20941_s22 + $0x910] sm:$0xff]  }
0x2cc5   : > { %15757 = vmatprep.subr.bf16.mxu0 %v16788_v61  ;;  %15779 = vmatprep.subr.bf16.mxu1 %v16789_v0  ;;  %v16799_v60 = vld [vmem:[%s20941_s22 + $0x990] sm:$0xff]  }
0x2d4a   : > { %v8260_v14 = vpop.f32.mrb[124].mxu0  ;;  %v8303_v19 = vpop.f32.mrb[116].mxu1 }
0x2d4b   : > { %v8261_v3 = vadd.f32 %v8260_v14, %v7826_v5  ;;  %v8304_v32 = vadd.f32 %v8303_v19, %v7834_v11  ;;  %v8262_v9 = vpop.f32.mrb[125].mxu0  ;;  %v8305_v10 = vpop.f32.mrb[117].mxu1 }
0x2d4c   : > { %v8263_v40 = vadd.f32 %v8262_v9, %v7830_v12  ;;  %v8306_v8 = vadd.f32 %v8305_v10, %v7838_v13  ;;  %v8264_v15 = vpop.f32.mrb[126].mxu0  ;;  %v8307_v25 = vpop.f32.mrb[118].mxu1 }
0x2d4d   : > { %v8265_v6 = vadd.f32 %v8264_v15, %v7826_v5  ;;  %v8308_v16 = vadd.f32 %v8307_v25, %v7834_v11  ;;  %v8266_v7 = vpop.f32.mrb[127].mxu0  ;;  %v8309_v18 = vpop.f32.mrb[119].mxu1  ;;  %v8570_v44 = vmax.f32 %v8261_v3, 0.0  ;;  %v8572_v38 = vmax.f32 %v8304_v32, 0.0  ;;  %v16802_v25 = vld [vmem:[%s20941_s22 + $0x918] sm:$0xff]  }
0x2d4e   : > { %v8267_v43 = vadd.f32 %v8266_v7, %v7830_v12  ;;  %v8310_v34 = vadd.f32 %v8309_v18, %v7838_v13  ;;  %v8571_v41 = vmax.f32 %v8263_v40, 0.0  ;;  %v8573_v35 = vmax.f32 %v8306_v8, 0.0  ;;  %v16801_v12 = vld [vmem:[%s20941_s22 + $0x9d8] sm:$0xff]  }
0x2d4f   : > { %v8586_v33 = vmax.f32 %v8265_v6, 0.0  ;;  %v8588_v39 = vmax.f32 %v8308_v16, 0.0  ;;  %v16803_v6 = vld [vmem:[%s20941_s22 + $0x998] sm:$0xff]  }
0x2d50   : > { %v8587_v50 = vmax.f32 %v8267_v43, 0.0  ;;  %v8589_v46 = vmax.f32 %v8310_v34, 0.0  ;;  %v16804_v34 = vld [vmem:[%s20941_s22 + $0x960] sm:$0xff]  }
0x2d51   : > { %v8602_v23 = vpack.c.bf16 %v8586_v33, %v8570_v44  ;;  %v8604_v53 = vpack.c.bf16 %v8588_v39, %v8572_v38  ;;  %v16805_v44 = vld [vmem:[%s20941_s22 + $0x9e0] sm:$0xff]  }
0x2d52   : > { %v8603_v36 = vpack.c.bf16 %v8587_v50, %v8571_v41  ;;  %v8605_v63 = vpack.c.bf16 %v8589_v46, %v8573_v35 }
0x2d54   : > { %9683 = vmatprep.mubr.bf16.mxu0 %v8603_v36  ;;  %9724 = vmatprep.mubr.bf16.mxu1 %v8605_v63  ;;  %v16807_v36 = vld [vmem:[%s20941_s22 + $0x9a0] sm:$0xff]   ;;  %v16808_v63 = vld [vmem:[%s20941_s22 + $0x968] sm:$0xff]  }
0x2d55   : > { %9684 = vmatmul.mubr.bf16.vlgmr.msra.gmra.mrb[140].mxu0 %v8602_v23  ;;  %9725 = vmatmul.mubr.bf16.vlgmr.msra.gmra.mrb[132].mxu1 %v8604_v53  ;;  %v16806_v53 = vld [vmem:[%s20941_s22 + $0x920] sm:$0xff]  }
0x2d56   : > { %15758 = vmatpush3.bf16.msra.mxu0 %v16790_v49  ;;  %15780 = vmatpush3.bf16.msra.mxu1 %v16791_v4  ;;  %v16809_v49 = vld [vmem:[%s20941_s22 + $0x9e8] sm:$0xff]  }
0x2d57   : > { %15759 = vmatprep.subr.bf16.mxu0 %v16792_v37  ;;  %15781 = vmatprep.subr.bf16.mxu1 %v16793_v28  ;;  %v19756_v4 = vld [vmem:[%s20940_s21 + $0x28] sm:$0xff] }
0x2d58   : > { %v16810_v37 = vld [vmem:[%s20941_s22 + $0x928] sm:$0xff]  }
0x2d59   : > { %v16811_v28 = vld [vmem:[%s20941_s22 + $0x9a8] sm:$0xff]  }
0x2d5a   : > { %v8346_v57 = vpop.f32.mrb[128].mxu0  ;;  %v8389_v58 = vpop.f32.mrb[120].mxu1  ;;  %15760 = vmatpush3.bf16.msra.mxu0 %v16794_v24  ;;  %15782 = vmatpush3.bf16.msra.mxu1 %v16795_v51  ;;  %v7858_v24 = vrot.slane %v19756_v4, %v17385_v29  ;;  %v7866_v51 = vrot.slane %v19756_v4, %v17891_v45 }
0x2d5b   : > { %v8347_v61 = vadd.f32 %v8346_v57, %v7842_v42  ;;  %v8390_v0 = vadd.f32 %v8389_v58, %v7850_v56  ;;  %v8348_v5 = vpop.f32.mrb[129].mxu0  ;;  %v8391_v11 = vpop.f32.mrb[121].mxu1  ;;  %15761 = vmatprep.subr.bf16.mxu0 %v16796_v54  ;;  %15783 = vmatprep.subr.bf16.mxu1 %v16797_v52  ;;  %v7862_v54 = vrot.slane %v19756_v4, %v17391_v31  ;;  %v16814_v57 = vld [vmem:[%s20941_s22 + $0x930] sm:$0xff]  }
0x2d5c   : > { %v8349_v13 = vadd.f32 %v8348_v5, %v7846_v55  ;;  %v8392_v14 = vadd.f32 %v8391_v11, %v7854_v47  ;;  %v8350_v19 = vpop.f32.mrb[130].mxu0  ;;  %v8393_v3 = vpop.f32.mrb[122].mxu1  ;;  %v7870_v52 = vrot.slane %v19756_v4, %v17897_v48  ;;  %v16815_v58 = vld [vmem:[%s20941_s22 + $0x9b0] sm:$0xff]   ;;  %v16816_v5 = vld [vmem:[%s20941_s22 + $0x978] sm:$0xff]  }
0x2d5d   : > { %v8351_v32 = vadd.f32 %v8350_v19, %v7842_v42  ;;  %v8394_v9 = vadd.f32 %v8393_v3, %v7850_v56  ;;  %v8352_v10 = vpop.f32.mrb[131].mxu0  ;;  %v8395_v40 = vpop.f32.mrb[123].mxu1  ;;  %v8574_v16 = vmax.f32 %v8347_v61, 0.0  ;;  %v8576_v7 = vmax.f32 %v8390_v0, 0.0  ;;  %v16812_v42 = vld [vmem:[%s20941_s22 + $0x970] sm:$0xff]   ;;  %v16817_v11 = vld [vmem:[%s20941_s22 + $0x9f8] sm:$0xff]  }
0x2d5e   : > { %v8353_v8 = vadd.f32 %v8352_v10, %v7846_v55  ;;  %v8396_v15 = vadd.f32 %v8395_v40, %v7854_v47  ;;  %15762 = vmatpush3.bf16.msra.mxu0 %v16798_v59  ;;  %15784 = vmatpush3.bf16.msra.mxu1 %v16799_v60  ;;  %v8575_v38 = vmax.f32 %v8349_v13, 0.0  ;;  %v8577_v33 = vmax.f32 %v8392_v14, 0.0  ;;  %v16813_v56 = vld [vmem:[%s20941_s22 + $0x9f0] sm:$0xff]  }
0x2d5f   : > { %v8590_v18 = vmax.f32 %v8351_v32, 0.0  ;;  %v8592_v43 = vmax.f32 %v8394_v9, 0.0  ;;  %15763 = vmatprep.subr.bf16.mxu0 %v16800_v2  ;;  %15785 = vmatprep.subr.bf16.mxu1 %v16801_v12 }
0x2d60   : > { %v8591_v39 = vmax.f32 %v8353_v8, 0.0  ;;  %v8593_v41 = vmax.f32 %v8396_v15, 0.0  ;;  %v16818_v8 = vld [vmem:[%s20941_s22 + $0x938] sm:$0xff]  }
0x2d61   : > { %v19737_v35 = vpack.c.bf16 %v8590_v18, %v8574_v16  ;;  %v19739_v50 = vpack.c.bf16 %v8592_v43, %v8576_v7  ;;  %v16819_v15 = vld [vmem:[%s20941_s22 + $0x9b8] sm:$0xff]   ;;  %v16820_v18 = vld [vmem:[%s20941_s22 + $0xa40] sm:$0xff]  }
0x2d62   : > { %v8607_v46 = vpack.c.bf16 %v8591_v39, %v8575_v38  ;;  %v8609_v23 = vpack.c.bf16 %v8593_v41, %v8577_v33  ;;  %15764 = vmatpush3.bf16.msra.mxu0 %v16802_v25  ;;  %15786 = vmatpush3.bf16.msra.mxu1 %v16803_v6  ;;  %v16821_v43 = vld [vmem:[%s20941_s22 + $0xac0] sm:$0xff]  }
0x2d63   : > { %15765 = vmatprep.subr.bf16.mxu0 %v16804_v34  ;;  %15787 = vmatprep.subr.bf16.mxu1 %v16805_v44 }
0x2d64   : > { %9765 = vmatprep.mubr.bf16.mxu0 %v8607_v46  ;;  %9806 = vmatprep.mubr.bf16.mxu1 %v8609_v23 }
0x2d66   : > { %15766 = vmatpush3.bf16.msra.mxu0 %v16806_v53  ;;  %15788 = vmatpush3.bf16.msra.mxu1 %v16807_v36  ;;  %v16822_v53 = vld [vmem:[%s20941_s22 + $0xa00] sm:$0xff]  }
0x2d67   : > { %15767 = vmatprep.subr.bf16.mxu0 %v16808_v63  ;;  %15789 = vmatprep.subr.bf16.mxu1 %v16809_v49  ;;  %v16823_v36 = vld [vmem:[%s20941_s22 + $0xa80] sm:$0xff]   ;;  %v16824_v63 = vld [vmem:[%s20941_s22 + $0xa48] sm:$0xff]  }
0x2d68   : > { %v16825_v49 = vld [vmem:[%s20941_s22 + $0xac8] sm:$0xff]  }
0x2d6a   : > { %v8432_v55 = vpop.f32.mrb[132].mxu0  ;;  %v8475_v47 = vpop.f32.mrb[124].mxu1  ;;  %15768 = vmatpush3.bf16.msra.mxu0 %v16810_v37  ;;  %15790 = vmatpush3.bf16.msra.mxu1 %v16811_v28  ;;  %v16826_v37 = vld [vmem:[%s20941_s22 + $0xa08] sm:$0xff]   ;;  %v7874_v28 = vrot.slane %v19756_v4, %v17916_v21 }
0x2d6b   : > { %v8433_v59 = vadd.f32 %v8432_v55, %v7858_v24  ;;  %v8476_v60 = vadd.f32 %v8475_v47, %v7866_v51  ;;  %v8434_v61 = vpop.f32.mrb[133].mxu0  ;;  %v8477_v0 = vpop.f32.mrb[125].mxu1  ;;  %15769 = vmatprep.subr.bf16.mxu0 %v16812_v42  ;;  %15791 = vmatprep.subr.bf16.mxu1 %v16813_v56  ;;  %v7886_v42 = vrot.slane %v19756_v4, %v17925_v30  ;;  %v16829_v56 = vld [vmem:[%s20941_s22 + $0xad0] sm:$0xff]  }
0x2d6c   : > { %v8435_v2 = vadd.f32 %v8434_v61, %v7862_v54  ;;  %v8478_v12 = vadd.f32 %v8477_v0, %v7870_v52  ;;  %v8436_v13 = vpop.f32.mrb[134].mxu0  ;;  %v8479_v14 = vpop.f32.mrb[126].mxu1  ;;  %v16830_v55 = vld [vmem:[%s20941_s22 + $0xa10] sm:$0xff]  }
0x2d6d   : > { %v8437_v19 = vadd.f32 %v8436_v13, %v7858_v24  ;;  %v8480_v3 = vadd.f32 %v8479_v14, %v7866_v51  ;;  %v8438_v32 = vpop.f32.mrb[135].mxu0  ;;  %v8481_v9 = vpop.f32.mrb[127].mxu1  ;;  %v8578_v25 = vmax.f32 %v8433_v59, 0.0  ;;  %v8580_v6 = vmax.f32 %v8476_v60, 0.0  ;;  %v16832_v60 = vld [vmem:[%s20941_s22 + $0xa58] sm:$0xff]  }
0x2d6e   : > { %v8439_v10 = vadd.f32 %v8438_v32, %v7862_v54  ;;  %v8482_v40 = vadd.f32 %v8481_v9, %v7870_v52  ;;  %15770 = vmatpush3.bf16.msra.mxu0 %v16814_v57  ;;  %15792 = vmatpush3.bf16.msra.mxu1 %v16815_v58  ;;  %v8579_v34 = vmax.f32 %v8435_v2, 0.0  ;;  %v8581_v44 = vmax.f32 %v8478_v12, 0.0  ;;  %v16833_v2 = vld [vmem:[%s20941_s22 + $0xad8] sm:$0xff]  }
0x2d6f   : > { %v8594_v16 = vmax.f32 %v8437_v19, 0.0  ;;  %v8596_v7 = vmax.f32 %v8480_v3, 0.0  ;;  %15771 = vmatprep.subr.bf16.mxu0 %v16816_v5  ;;  %15793 = vmatprep.subr.bf16.mxu1 %v16817_v11  ;;  %v7882_v24 = vrot.slane %v19756_v4, %v17919_v22  ;;  %v7878_v51 = vrot.slane %v19756_v4, %v17922_v27  ;;  %v16831_v4 = vld [vmem:[%s20941_s22 + $0xa90] sm:$0xff]   ;;  %v16834_v9 = vld [vmem:[%s20941_s22 + $0xa18] sm:$0xff]  }
0x2d70   : > { %v8595_v38 = vmax.f32 %v8439_v10, 0.0  ;;  %v8597_v33 = vmax.f32 %v8482_v40, 0.0 }
0x2d71   : > { %v19802_v39 = vpack.c.bf16 %v8594_v16, %v8578_v25  ;;  %v19804_v41 = vpack.c.bf16 %v8596_v7, %v8580_v6  ;;  %v16835_v25 = vld [vmem:[%s20941_s22 + $0xa98] sm:$0xff]   ;;  %v16836_v6 = vld [vmem:[%s20941_s22 + $0xa60] sm:$0xff]  }
0x2d72   : > { %v8611_v46 = vpack.c.bf16 %v8595_v38, %v8579_v34  ;;  %v8613_v23 = vpack.c.bf16 %v8597_v33, %v8581_v44  ;;  %15772 = vmatpush3.bf16.msra.mxu0 %v16818_v8  ;;  %15794 = vmatpush3.bf16.msra.mxu1 %v16819_v15  ;;  %v16837_v34 = vld [vmem:[%s20941_s22 + $0xae0] sm:$0xff]  }
0x2d73   : > { %15801 = vmatprep.subr.bf16.mxu0 %v16820_v18  ;;  %15823 = vmatprep.subr.bf16.mxu1 %v16821_v43 }
0x2d75   : > { %9766 = vmatmul.mubr.bf16.vlgmr.msra.gmra.mrb[144].mxu0 %v19737_v35  ;;  %9807 = vmatmul.mubr.bf16.vlgmr.msra.gmra.mrb[136].mxu1 %v19739_v50  ;;  %v16827_v35 = vld [vmem:[%s20941_s22 + $0xa88] sm:$0xff]   ;;  %v16828_v50 = vld [vmem:[%s20941_s22 + $0xa50] sm:$0xff]  }
0x2d76   : > { %15802 = vmatpush3.bf16.msra.mxu0 %v16822_v53  ;;  %9847 = vmatprep.mubr.bf16.mxu0 %v8611_v46  ;;  %v16839_v53 = vld [vmem:[%s20941_s22 + $0xaa0] sm:$0xff]  }
0x2d77   : > { %15824 = vmatpush3.bf16.msra.mxu1 %v16823_v36  ;;  %9888 = vmatprep.mubr.bf16.mxu1 %v8613_v23  ;;  %v16838_v23 = vld [vmem:[%s20941_s22 + $0xa20] sm:$0xff]   ;;  %v16840_v36 = vld [vmem:[%s20941_s22 + $0xa68] sm:$0xff]  }
0x2d78   : > { %15803 = vmatprep.subr.bf16.mxu0 %v16824_v63  ;;  %15825 = vmatprep.subr.bf16.mxu1 %v16825_v49  ;;  %v16841_v63 = vld [vmem:[%s20941_s22 + $0xae8] sm:$0xff]  }
0x2d79   : > { %v16842_v49 = vld [vmem:[%s20941_s22 + $0xa28] sm:$0xff]  }
0x2d7a   : > { %v8518_v54 = vpop.f32.mrb[136].mxu0  ;;  %v8561_v52 = vpop.f32.mrb[128].mxu1  ;;  %15804 = vmatpush3.bf16.msra.mxu0 %v16826_v37  ;;  %v16843_v37 = vld [vmem:[%s20941_s22 + $0xaa8] sm:$0xff]  }
0x2d7b   : > { %v8519_v47 = vadd.f32 %v8518_v54, %v7874_v28  ;;  %v8562_v57 = vadd.f32 %v8561_v52, %v7882_v24  ;;  %15826 = vmatpush3.bf16.msra.mxu1 %v16827_v35  ;;  %v8520_v58 = vpop.f32.mrb[137].mxu0  ;;  %v8563_v59 = vpop.f32.mrb[129].mxu1  ;;  %15805 = vmatprep.subr.bf16.mxu0 %v16828_v50  ;;  %v16846_v35 = vld [vmem:[%s20941_s22 + $0xa30] sm:$0xff]   ;;  %v16851_v54 = vld [vmem:[%s20941_s22 + $0xab8] sm:$0xff]   ;;  %v16852_v52 = vld [vmem:[%s20941_s22 + $0xb40] sm:$0xff]  }
0x2d7c   : > { %v8521_v61 = vadd.f32 %v8520_v58, %v7878_v51  ;;  %v8564_v0 = vadd.f32 %v8563_v59, %v7886_v42  ;;  %v8522_v5 = vpop.f32.mrb[138].mxu0  ;;  %v8565_v11 = vpop.f32.mrb[130].mxu1  ;;  %15827 = vmatprep.subr.bf16.mxu1 %v16829_v56  ;;  %v16847_v50 = vld [vmem:[%s20941_s22 + $0xab0] sm:$0xff]   ;;  %v16850_v56 = vld [vmem:[%s20941_s22 + $0xa38] sm:$0xff]   ;;  %v16856_v58 = vld [vmem:[%s20941_s22 + $0xb48] sm:$0xff]  }
0x2d7d   : > { %v8523_v12 = vadd.f32 %v8522_v5, %v7874_v28  ;;  %v8566_v13 = vadd.f32 %v8565_v11, %v7882_v24  ;;  %v8524_v14 = vpop.f32.mrb[139].mxu0  ;;  %v8567_v19 = vpop.f32.mrb[131].mxu1  ;;  %v8582_v10 = vmax.f32 %v8519_v47, 0.0  ;;  %v8584_v40 = vmax.f32 %v8562_v57, 0.0  ;;  %v16844_v28 = vld [vmem:[%s20941_s22 + $0xa70] sm:$0xff]   ;;  %v16854_v47 = vld [vmem:[%s20941_s22 + $0xb00] sm:$0xff]  }
0x2d7e   : > { %v8525_v3 = vadd.f32 %v8524_v14, %v7878_v51  ;;  %v8568_v32 = vadd.f32 %v8567_v19, %v7886_v42  ;;  %15806 = vmatpush3.bf16.msra.mxu0 %v16830_v55  ;;  %v8583_v16 = vmax.f32 %v8521_v61, 0.0  ;;  %v8585_v7 = vmax.f32 %v8564_v0, 0.0  ;;  %v16845_v24 = vld [vmem:[%s20941_s22 + $0xaf0] sm:$0xff]   ;;  %v16848_v51 = vld [vmem:[%s20941_s22 + $0xa78] sm:$0xff]   ;;  %v16853_v55 = vld [vmem:[%s20941_s22 + $0xbc0] sm:$0xff]  }
0x2d7f   : > { %v8598_v8 = vmax.f32 %v8523_v12, 0.0  ;;  %v8600_v15 = vmax.f32 %v8566_v13, 0.0  ;;  %15828 = vmatpush3.bf16.msra.mxu1 %v16831_v4  ;;  %15807 = vmatprep.subr.bf16.mxu0 %v16832_v60  ;;  %v16849_v42 = vld [vmem:[%s20941_s22 + $0xaf8] sm:$0xff]   ;;  %v16855_v57 = vld [vmem:[%s20941_s22 + $0xb80] sm:$0xff]   ;;  %v16857_v59 = vld [vmem:[%s20941_s22 + $0xbc8] sm:$0xff]  }
0x2d80   : > { %v8599_v18 = vmax.f32 %v8525_v3, 0.0  ;;  %v8601_v43 = vmax.f32 %v8568_v32, 0.0  ;;  %15829 = vmatprep.subr.bf16.mxu1 %v16833_v2  ;;  %v16858_v4 = vld [vmem:[%s20941_s22 + $0xb08] sm:$0xff]   ;;  %v16862_v61 = vld [vmem:[%s20941_s22 + $0xb10] sm:$0xff]   ;;  %v16864_v5 = vld [vmem:[%s20941_s22 + $0xb58] sm:$0xff]  }
0x2d81   : > { %v19864_v44 = vpack.c.bf16 %v8598_v8, %v8582_v10  ;;  %v19866_v38 = vpack.c.bf16 %v8600_v15, %v8584_v40  ;;  %v16859_v60 = vld [vmem:[%s20941_s22 + $0xb88] sm:$0xff]   ;;  %v16863_v0 = vld [vmem:[%s20941_s22 + $0xb90] sm:$0xff]   ;;  %v16865_v11 = vld [vmem:[%s20941_s22 + $0xbd8] sm:$0xff]  }
0x2d82   : > { %v8615_v33 = vpack.c.bf16 %v8599_v18, %v8583_v16  ;;  %v8617_v46 = vpack.c.bf16 %v8601_v43, %v8585_v7  ;;  %15808 = vmatpush3.bf16.msra.mxu0 %v16834_v9  ;;  %v16866_v2 = vld [vmem:[%s20941_s22 + $0xb18] sm:$0xff]   ;;  %v16868_v13 = vld [vmem:[%s20941_s22 + $0xb60] sm:$0xff]   ;;  %v16872_v32 = vld [vmem:[%s20941_s22 + $0xb68] sm:$0xff]  }
0x2d83   : > { %15830 = vmatpush3.bf16.msra.mxu1 %v16835_v25  ;;  %15809 = vmatprep.subr.bf16.mxu0 %v16836_v6  ;;  %v16867_v12 = vld [vmem:[%s20941_s22 + $0xb98] sm:$0xff]   ;;  %v16869_v14 = vld [vmem:[%s20941_s22 + $0xbe0] sm:$0xff]   ;;  %v16873_v9 = vld [vmem:[%s20941_s22 + $0xbe8] sm:$0xff]  }
0x2d84   : > { %15831 = vmatprep.subr.bf16.mxu1 %v16837_v34  ;;  %v16870_v19 = vld [vmem:[%s20941_s22 + $0xb20] sm:$0xff]   ;;  %v16874_v10 = vld [vmem:[%s20941_s22 + $0xb28] sm:$0xff]   ;;  %v16876_v8 = vld [vmem:[%s20941_s22 + $0xb70] sm:$0xff]  }
0x2d85   : > { %v16871_v3 = vld [vmem:[%s20941_s22 + $0xba0] sm:$0xff]   ;;  %v16875_v40 = vld [vmem:[%s20941_s22 + $0xba8] sm:$0xff]   ;;  %v16877_v15 = vld [vmem:[%s20941_s22 + $0xbf0] sm:$0xff]  }
0x2d86   : > { %15810 = vmatpush3.bf16.msra.mxu0 %v16838_v23  ;;  %v16878_v25 = vld [vmem:[%s20941_s22 + $0xb30] sm:$0xff]   ;;  %v16880_v16 = vld [vmem:[%s20941_s22 + $0xb78] sm:$0xff]  }
0x2d87   : > { %15832 = vmatpush3.bf16.msra.mxu1 %v16839_v53  ;;  %15811 = vmatprep.subr.bf16.mxu0 %v16840_v36  ;;  %v16879_v6 = vld [vmem:[%s20941_s22 + $0xbb0] sm:$0xff]   ;;  %v16881_v7 = vld [vmem:[%s20941_s22 + $0xbf8] sm:$0xff]  }
0x2d88   : > { %15833 = vmatprep.subr.bf16.mxu1 %v16841_v63  ;;  %v16882_v18 = vld [vmem:[%s20941_s22 + $0xb38] sm:$0xff]  }
0x2d89   : > { %v16883_v43 = vld [vmem:[%s20941_s22 + $0xbb8] sm:$0xff]  }
0x2d8a   : > { %15812 = vmatpush3.bf16.msra.mxu0 %v16842_v49 }
0x2d8b   : > { %15834 = vmatpush3.bf16.msra.mxu1 %v16843_v37  ;;  %15813 = vmatprep.subr.bf16.mxu0 %v16844_v28 }
0x2d8c   : > { %15835 = vmatprep.subr.bf16.mxu1 %v16845_v24 }
0x2d8e   : > { %15814 = vmatpush3.bf16.msra.mxu0 %v16846_v35 }
0x2d8f   : > { %15836 = vmatpush3.bf16.msra.mxu1 %v16847_v50  ;;  %15815 = vmatprep.subr.bf16.mxu0 %v16848_v51 }
0x2d90   : > { %15837 = vmatprep.subr.bf16.mxu1 %v16849_v42 }
0x2d92   : > { %15816 = vmatpush3.bf16.msra.mxu0 %v16850_v56 }
0x2d93   : > { %15838 = vmatpush3.bf16.msra.mxu1 %v16851_v54  ;;  %15845 = vmatprep.subr.bf16.mxu0 %v16852_v52 }
0x2d94   : > { %15867 = vmatprep.subr.bf16.mxu1 %v16853_v55 }
0x2d95   : > { %9848 = vmatmul.mubr.bf16.vlgmr.msra.gmra.mrb[148].mxu0 %v19802_v39  ;;  %v16860_v39 = vld [vmem:[%s20941_s22 + $0xb50] sm:$0xff]  }
0x2d96   : > { %9889 = vmatmul.mubr.bf16.vlgmr.msra.gmra.mrb[140].mxu1 %v19804_v41  ;;  %15846 = vmatpush3.bf16.msra.mxu0 %v16854_v47  ;;  %v16861_v41 = vld [vmem:[%s20941_s22 + $0xbd0] sm:$0xff]  }
0x2d97   : > { %9929 = vmatprep.mubr.bf16.mxu0 %v8615_v33  ;;  %15868 = vmatpush3.bf16.msra.mxu1 %v16855_v57 }
0x2d98   : > { %9970 = vmatprep.mubr.bf16.mxu1 %v8617_v46  ;;  %15847 = vmatprep.subr.bf16.mxu0 %v16856_v58  ;;  %v14515_v46 = vld [vmem:[%s20942_s23 + $0x2] ss:$0 sm:$0xff] }
0x2d99   : > { %15869 = vmatprep.subr.bf16.mxu1 %v16857_v59 }
0x2d9a   : > { %15848 = vmatpush3.bf16.msra.mxu0 %v16858_v4 }
0x2d9b   : > { %15870 = vmatpush3.bf16.msra.mxu1 %v16859_v60  ;;  %15849 = vmatprep.subr.bf16.mxu0 %v16860_v39 }
0x2d9c   : > { %15871 = vmatprep.subr.bf16.mxu1 %v16861_v41 }
0x2d9e   : > { %15850 = vmatpush3.bf16.msra.mxu0 %v16862_v61 }
0x2d9f   : > { %15872 = vmatpush3.bf16.msra.mxu1 %v16863_v0  ;;  %15851 = vmatprep.subr.bf16.mxu0 %v16864_v5 }
0x2da0   : > { %15873 = vmatprep.subr.bf16.mxu1 %v16865_v11 }
0x2da2   : > { %15852 = vmatpush3.bf16.msra.mxu0 %v16866_v2 }
0x2da3   : > { %15874 = vmatpush3.bf16.msra.mxu1 %v16867_v12  ;;  %15853 = vmatprep.subr.bf16.mxu0 %v16868_v13 }
0x2da4   : > { %15875 = vmatprep.subr.bf16.mxu1 %v16869_v14 }
0x2da6   : > { %15854 = vmatpush3.bf16.msra.mxu0 %v16870_v19 }
0x2da7   : > { %15876 = vmatpush3.bf16.msra.mxu1 %v16871_v3  ;;  %15855 = vmatprep.subr.bf16.mxu0 %v16872_v32 }
0x2da8   : > { %15877 = vmatprep.subr.bf16.mxu1 %v16873_v9 }
0x2daa   : > { %15856 = vmatpush3.bf16.msra.mxu0 %v16874_v10 }
0x2dab   : > { %15878 = vmatpush3.bf16.msra.mxu1 %v16875_v40  ;;  %15857 = vmatprep.subr.bf16.mxu0 %v16876_v8 }
0x2dac   : > { %15879 = vmatprep.subr.bf16.mxu1 %v16877_v15 }
0x2dae   : > { %15858 = vmatpush3.bf16.msra.mxu0 %v16878_v25 }
0x2daf   : > { %15880 = vmatpush3.bf16.msra.mxu1 %v16879_v6  ;;  %15859 = vmatprep.subr.bf16.mxu0 %v16880_v16 }
0x2db0   : > { %15881 = vmatprep.subr.bf16.mxu1 %v16881_v7 }
0x2db2   : > { %15860 = vmatpush3.bf16.msra.mxu0 %v16882_v18 }
0x2db3   : > { %15882 = vmatpush3.bf16.msra.mxu1 %v16883_v43 }
0x2db4   : > { %16325 = vmatprep.subr.bf16.mxu1 %v17166_v1 }
0x2db5   : > { %9930 = vmatmul.mubr.bf16.vlgmr.msra.gmra.mrb[152].mxu0 %v19864_v44 }
0x2db6   : > { %9971 = vmatmul.mubr.bf16.vlgmr.msra.gmra.mrb[144].mxu1 %v19866_v38  ;;  %10125 = vmatprep.mubr.bf16.mxu0 %v17168_v17 }
0x2db7   : > { %16327 = vmatprep.mubr.msk.bf16.mxu1 %vm17167_vm0, %v17166_v1 }
0x2e28   : > { %v15729_v34 = vpop.f32.mrb[140].mxu0  ;;  %v15751_v33 = vpop.f32.mrb[132].mxu1 }
0x2e29   : > { %v15730_v23 = vpop.f32.mrb[141].mxu0  ;;  %v15752_v53 = vpop.f32.mrb[133].mxu1 }
0x2e2a   : > { %v15731_v36 = vadd.f32 %v15730_v23, %v15729_v34  ;;  %v15753_v63 = vadd.f32 %v15752_v53, %v15751_v33  ;;  %v15732_v49 = vpop.f32.mrb[142].mxu0  ;;  %v15754_v37 = vpop.f32.mrb[134].mxu1 }
0x2e2b   : > { %v15733_v44 = vpop.f32.mrb[143].mxu0  ;;  %v15755_v28 = vpop.f32.mrb[135].mxu1 }
0x2e2c   : > { %v9686_v38 = vadd.f32 %v15731_v36, %v14515_v46  ;;  %v15734_v24 = vadd.f32 %v15733_v44, %v15732_v49  ;;  %v15756_v35 = vadd.f32 %v15755_v28, %v15754_v37 }
0x2e2e   : > { %v9727_v50 = vadd.f32 %v15753_v63, %v9686_v38  ;;  %v9689_v51 = vadd.f32 %v15734_v24, %v14515_v46 }
0x2e30   : > { %v9730_v42 = vadd.f32 %v15756_v35, %v9689_v51 }
0x2e48   : > { %v15773_v56 = vpop.f32.mrb[144].mxu0  ;;  %v15795_v54 = vpop.f32.mrb[136].mxu1 }
0x2e49   : > { %v15774_v52 = vpop.f32.mrb[145].mxu0  ;;  %v15796_v55 = vpop.f32.mrb[137].mxu1 }
0x2e4a   : > { %v15775_v47 = vadd.f32 %v15774_v52, %v15773_v56  ;;  %v15797_v57 = vadd.f32 %v15796_v55, %v15795_v54  ;;  %v15776_v58 = vpop.f32.mrb[146].mxu0  ;;  %v15798_v59 = vpop.f32.mrb[138].mxu1 }
0x2e4b   : > { %v15777_v4 = vpop.f32.mrb[147].mxu0  ;;  %v15799_v60 = vpop.f32.mrb[139].mxu1 }
0x2e4c   : > { %v9768_v39 = vadd.f32 %v15775_v47, %v9727_v50  ;;  %v15778_v41 = vadd.f32 %v15777_v4, %v15776_v58  ;;  %v15800_v61 = vadd.f32 %v15799_v60, %v15798_v59 }
0x2e4e   : > { %v9809_v0 = vadd.f32 %v15797_v57, %v9768_v39  ;;  %v9771_v5 = vadd.f32 %v15778_v41, %v9730_v42  ;;  %v16884_v39 = vld [vmem:[%s20973_s4 + $0xc0] ss:$8 sps:$4 sm:$0xff]   ;;  %v16889_v41 = vld [vmem:[%s20973_s4 + $0xd4] ss:$8 sps:$4 sm:$0xff]  }
0x2e50   : > { %v9812_v11 = vadd.f32 %v15800_v61, %v9771_v5  ;;  %v16887_v61 = vld [vmem:[%s20973_s4 + $0xd0] ss:$8 sps:$4 sm:$0xff]   ;;  %v16890_v5 = vld [vmem:[%s20973_s4 + $0xe0] ss:$8 sps:$4 sm:$0xff]  }
0x2e68   : > { %v15817_v2 = vpop.f32.mrb[148].mxu0 }
0x2e69   : > { %v15839_v12 = vpop.f32.mrb[140].mxu1  ;;  %v15818_v13 = vpop.f32.mrb[149].mxu0 }
0x2e6a   : > { %v15819_v14 = vadd.f32 %v15818_v13, %v15817_v2  ;;  %v15840_v19 = vpop.f32.mrb[141].mxu1  ;;  %v15820_v3 = vpop.f32.mrb[150].mxu0  ;;  %v16893_v2 = vld [vmem:[%s20973_s4 + $0xf0] ss:$8 sps:$4 sm:$0xff]  }
0x2e6b   : > { %v15841_v32 = vadd.f32 %v15840_v19, %v15839_v12  ;;  %v15842_v9 = vpop.f32.mrb[142].mxu1  ;;  %v15821_v10 = vpop.f32.mrb[151].mxu0 }
0x2e6c   : > { %v9850_v40 = vadd.f32 %v15819_v14, %v9809_v0  ;;  %v15822_v8 = vadd.f32 %v15821_v10, %v15820_v3  ;;  %v15843_v15 = vpop.f32.mrb[143].mxu1  ;;  %v16892_v0 = vld [vmem:[%s20973_s4 + $0xe4] ss:$8 sps:$4 sm:$0xff]  }
0x2e6d   : > { %v15844_v25 = vadd.f32 %v15843_v15, %v15842_v9 }
0x2e6e   : > { %v9891_v6 = vadd.f32 %v15841_v32, %v9850_v40  ;;  %v9853_v16 = vadd.f32 %v15822_v8, %v9812_v11  ;;  %v16895_v11 = vld [vmem:[%s20973_s4 + $0xf4] ss:$8 sps:$4 sm:$0xff]   ;;  %v14646_v40 = vld [vmem:[%s20937_s18 + $0x2] ss:$0 sm:$0xff] }
0x2e70   : > { %v9894_v7 = vadd.f32 %v15844_v25, %v9853_v16 }
0x2e88   : > { %v15861_v18 = vpop.f32.mrb[152].mxu0 }
0x2e89   : > { %v15883_v43 = vpop.f32.mrb[144].mxu1  ;;  %v15862_v34 = vpop.f32.mrb[153].mxu0 }
0x2e8a   : > { %v15863_v33 = vadd.f32 %v15862_v34, %v15861_v18  ;;  %v15884_v46 = vpop.f32.mrb[145].mxu1  ;;  %v15864_v23 = vpop.f32.mrb[154].mxu0  ;;  %v14656_v34 = vld [vmem:[%s20976_s24 + $0x6] sm:$0x3] }
0x2e8b   : > { %v15885_v53 = vadd.f32 %v15884_v46, %v15883_v43  ;;  %v15886_v36 = vpop.f32.mrb[146].mxu1  ;;  %v15865_v63 = vpop.f32.mrb[155].mxu0 }
0x2e8c   : > { %v9932_v49 = vadd.f32 %v15863_v33, %v9891_v6  ;;  %v15866_v37 = vadd.f32 %v15865_v63, %v15864_v23  ;;  %v15887_v44 = vpop.f32.mrb[147].mxu1  ;;  %v14647_v6 = vld [vmem:[%s20938_s19 + $0x2] ss:$0 sm:$0xff]  ;;  %v10043_v33 = vrot.slane %v14656_v34, %v17385_v29  ;;  %v10047_v23 = vrot.slane %v14656_v34, %v17391_v31 }
0x2e8d   : > { %v15888_v28 = vadd.f32 %v15887_v44, %v15886_v36  ;;  %v16900_v34 = vld [vmem:[%s20929_s10 + $0x60] sm:$0xff]  }
0x2e8e   : > { %v9973_v38 = vadd.f32 %v15885_v53, %v9932_v49  ;;  %v9935_v24 = vadd.f32 %v15866_v37, %v9894_v7 }
0x2e90   : > { %v9976_v35 = vadd.f32 %v15888_v28, %v9935_v24  ;;  %v9979_v50 = vadd.f32 %v9973_v38, %v19426_v20 }
0x2e92   : > { %v9985_v51 = vsel %vm902_vm3, %v9979_v50, 0.0  ;;  %v9980_v42 = vadd.f32 %v9976_v35, %v19428_v62  ;;  %v16886_v62 = vld [vmem:[%s20973_s4 + $0xc4] ss:$8 sps:$4 sm:$0xff]  }
0x2e93   : > { %9986 = vadd.xlane.f32.xlu1 %v9985_v51  ;;  %10093 = vmatprep.subr.bf16.mxu0 %v16886_v62 }
0x2e94   : > { %v9988_v56 = vsel %vm902_vm3, %v9980_v42, 0.0  ;;  %10094 = vmatpush1.bf16.msra.mxu0 %v16884_v39 }
0x2e95   : > { %10095 = vmatprep.subr.bf16.mxu0 %v16889_v41 }
0x2e97   : > { %9989 = vadd.xlane.f32.xlu1 %v9988_v56 }
0x2e98   : > { %10096 = vmatpush1.bf16.msra.mxu0 %v16887_v61 }
0x2e99   : > { %10097 = vmatprep.subr.bf16.mxu0 %v16892_v0 }
0x2e9c   : > { %10098 = vmatpush1.bf16.msra.mxu0 %v16890_v5 }
0x2e9d   : > { %10099 = vmatprep.subr.bf16.mxu0 %v16895_v11 }
0x2ea0   : > { %10100 = vmatpush1.bf16.msra.mxu0 %v16893_v2 }
0x2ea1   : > { %16331 = vmatprep.subr.bf16.mxu0 %v17166_v1 }
0x2f20   : > { %v9987_v54 = vpop.xlane.xlu1 %9986 }
0x2f21   : > { %v9991_v52 = vmul.f32 0.015625, %v9987_v54 }
0x2f23   : > { %v9993_v55 = vsub.f32 %v9979_v50, %v9991_v52 }
0x2f24   : > { %v9990_v47 = vpop.xlane.xlu1 %9989 }
0x2f25   : > { %v9992_v57 = vmul.f32 0.015625, %v9990_v47  ;;  %v9995_v58 = vmul.f32 %v9993_v55, %v9993_v55  ;;  %v20078_v47 = vld [vmem:[%s20977_s30] sm:$0xff] }
0x2f27   : > { %v9994_v59 = vsub.f32 %v9980_v42, %v9992_v57  ;;  %v9997_v4 = vsel %vm902_vm3, %v9995_v58, 0.0 }
0x2f28   : > { %9998 = vadd.xlane.f32.xlu0 %v9997_v4 }
0x2f29   : > { %v9996_v60 = vmul.f32 %v9994_v59, %v9994_v59 }
0x2f2b   : > { %v10000_v20 = vsel %vm902_vm3, %v9996_v60, 0.0 }
0x2f2c   : > { %10001 = vadd.xlane.f32.xlu1 %v10000_v20 }
0x2fb5   : > { %v9999_v12 = vpop.xlane.xlu0 %9998 }
0x2fb6   : > { %v10003_v13 = vmul.f32 0.015625, %v9999_v12 }
0x2fb8   : > { %v10005_v14 = vadd.f32 1e-05, %v10003_v13  ;;  %v16896_v13 = vld [vmem:[%s20978_s27 + $0x60] sm:$0xff]  }
0x2fb9   : > { %v10002_v19 = vpop.xlane.xlu1 %10001 }
0x2fba   : > { %17120 = vrsqrt.f32 %v10005_v14  ;;  %v10004_v3 = vmul.f32 0.015625, %v10002_v19  ;;  %v16897_v14 = vld [vmem:[%s20978_s27 + $0x68] sm:$0xff]   ;;  %v16898_v19 = vld [vmem:[%s20978_s27 + $0x70] sm:$0xff]  }
0x2fbc   : > { %v10006_v32 = vadd.f32 1e-05, %v10004_v3 }
0x2fbe   : > { %17122 = vrsqrt.f32 %v10006_v32 }
0x2fc4   : > { %v17121_v9 = vpop.eup %17120 }
0x2fc5   : > { %v10009_v10 = vmul.f32 %v17121_v9, %v9993_v55 }
0x2fc7   : > { %v10017_v15 = vmul.f32 %v14646_v40, %v10009_v10 }
0x2fc8   : > { %v17123_v8 = vpop.eup %17122 }
0x2fc9   : > { %v10010_v25 = vmul.f32 %v17123_v8, %v9994_v59  ;;  %v20054_v7 = vadd.f32 %v14647_v6, %v10017_v15  ;;  %v20085_v59 = vld [vmem:[%s20977_s30 + $0x8] sm:$0xff] }
0x2fcb   : > { %v10018_v16 = vmul.f32 %v14646_v40, %v10010_v25  ;;  %v16899_v25 = vld [vmem:[%s20978_s27 + $0x78] sm:$0xff]  }
0x2fcd   : > { %v20056_v18 = vadd.f32 %v14647_v6, %v10018_v16 }
0x2fcf   : > { %v10038_v43 = vpack.c.bf16 %v20056_v18, %v20054_v7 }
0x2fd1   : > { %14665 = vmatmul.mubr.msk.bf16.vlgmr.msra.gmra.mrb[156].mxu0 %vm902_vm3, %v10038_v43 }
0x2fd2   : > { %16333 = vmatprep.mubr.msk.bf16.mxu0 %vm17167_vm0, %v17166_v1 }
0x30a4   : > { %v10127_v46 = vpop.f32.mrb[156].mxu0 }
0x30a5   : > { %v10129_v53 = vpop.f32.mrb[157].mxu0  ;;  %v10128_v63 = vadd.f32 %v10127_v46, %v10043_v33 }
0x30a6   : > { %v10131_v36 = vpop.f32.mrb[158].mxu0  ;;  %v10130_v44 = vadd.f32 %v10129_v53, %v10047_v23  ;;  %v16902_v53 = vld [vmem:[%s20929_s10 + $0x70] sm:$0xff]  }
0x30a7   : > { %v10132_v49 = vadd.f32 %v10131_v36, %v10043_v33  ;;  %v10133_v37 = vpop.f32.mrb[159].mxu0  ;;  %v16903_v36 = vld [vmem:[%s20929_s10 + $0x78] sm:$0xff]  }
0x30a8   : > { %v10134_v28 = vadd.f32 %v10133_v37, %v10047_v23  ;;  %v16901_v23 = vld [vmem:[%s20929_s10 + $0x68] sm:$0xff]  }
0x30a9   : > { %v10136_v38 = vpack.c.bf16 %v10132_v49, %v10128_v63  ;;  %v14677_v63 = vld [vmem:[%s20979_s28 + $0x3] ss:$0 sm:$0xff] }
0x30aa   : > { %v10214_v24 = vpack.c.bf16 %v10134_v28, %v10130_v44 }
0x30ab   : > { %10138 = vrot.lane.b32.xlu1 %v10136_v38, %s20981_s0 }
0x30ac   : > { %16332 = vmatpush3.bf16.msra.mxu0 %v10214_v24 }
0x30ad   : > { %16349 = vmatprep.subr.bf16.mxu0 %v17166_v1 }
0x311d   : > { %v10139_v35 = vpop.permute.xlu1 %10138 }
0x311e   : > { %v10144_v50 = vsel %vm902_vm3, %v10139_v35, 0 }
0x311f   : > { %16326 = vmatpush3.bf16.xpose.msra.mxu1 %v10144_v50 }
0x3120   : > { %16337 = vmatprep.subr.bf16.mxu1 %v17166_v1 }
0x3126   : > { %16328 = vmatmul.mubr.msk.bf16.vlgmr.msra.gmra.mrb[148].mxu1 %vm902_vm3, %v10136_v38 }
0x3127   : > { %16345 = vmatprep.mubr.msk.bf16.mxu1 %vm17167_vm0, %v17166_v1  ;;  %16338 = vmatpush3.bf16.msra.mxu1 %v16896_v13  ;;  %v16907_v13 = vld [vmem:[%s20980_s7 + $0x78] sm:$0xff]  }
0x3128   : > { %16339 = vmatprep.subr.bf16.mxu1 %v17166_v1 }
0x312b   : > { %16340 = vmatpush3.bf16.msra.mxu1 %v16897_v14 }
0x312c   : > { %16341 = vmatprep.subr.bf16.mxu1 %v17166_v1 }
0x312f   : > { %16342 = vmatpush3.bf16.msra.mxu1 %v16898_v19 }
0x3130   : > { %16343 = vmatprep.subr.bf16.mxu1 %v17166_v1 }
0x3133   : > { %16344 = vmatpush3.bf16.msra.mxu1 %v16899_v25 }
0x3134   : > { %16361 = vmatprep.subr.bf16.mxu1 %v17166_v1 }
0x31f9   : > { %v10180_v51 = vpop.f32.mrb[148].mxu1 }
0x31fa   : > { %v10187_v42 = vmul.f32 0.125, %v10180_v51  ;;  %v16329_v56 = vpop.f32.mrb[149].mxu1 }
0x31fb   : > { %v10183_v54 = vpop.f32.mrb[150].mxu1 }
0x31fc   : > { %v10188_v52 = vmul.f32 0.125, %v10183_v54  ;;  %v16330_v55 = vpop.f32.mrb[151].mxu1  ;;  %v10189_v57 = vadd.f32 %v20078_v47, %v10187_v42  ;;  %v14711_v42 = vld [vmem:[%s20930_s11 + $0x3] ss:$0 sm:$0xff] }
0x31fe   : > { %v10191_v58 = vsel %vm1006_vm4, %v10189_v57, -inf  ;;  %v10190_v4 = vadd.f32 %v20085_v59, %v10188_v52 }
0x31ff   : > { %10192 = vmax.xlane.f32.xlu1 %v10191_v58 }
0x3200   : > { %v10194_v60 = vsel %vm1006_vm4, %v10190_v4, -inf }
0x3201   : > { %10195 = vmax.xlane.f32.xlu0 %v10194_v60 }
0x328c   : > { %v10193_v20 = vpop.xlane.xlu1 %10192 }
0x328d   : > { %v10197_v62 = vsub.f32 %v10189_v57, %v10193_v20 }
0x328e   : > { %v10196_v39 = vpop.xlane.xlu0 %10195 }
0x328f   : > { %v10199_v41 = vmul.f32 1.442695, %v10197_v62  ;;  %v10198_v61 = vsub.f32 %v10190_v4, %v10196_v39 }
0x3291   : > { %17124 = vpow2.f32 %v10199_v41  ;;  %v10201_v0 = vmul.f32 1.442695, %v10198_v61 }
0x3293   : > { %17126 = vpow2.f32 %v10201_v0 }
0x329b   : > { %v17125_v5 = vpop.eup %17124 }
0x329c   : > { %v10203_v11 = vsel %vm1006_vm4, %v17125_v5, 0.0 }
0x329d   : > { %v17127_v2 = vpop.eup %17126  ;;  %10204 = vadd.xlane.f32.xlu0 %v10203_v11  ;;  %v16904_v11 = vld [vmem:[%s20980_s7 + $0x60] sm:$0xff]  }
0x329e   : > { %v10206_v12 = vsel %vm1006_vm4, %v17127_v2, 0.0 }
0x32a1   : > { %10207 = vadd.xlane.f32.xlu0 %v10206_v12  ;;  %v16906_v12 = vld [vmem:[%s20980_s7 + $0x70] sm:$0xff]  }
0x332a   : > { %v10205_v3 = vpop.xlane.xlu0 %10204 }
0x332b   : > { %17128 = vrcp.f32 %v10205_v3 }
0x332e   : > { %v10208_v32 = vpop.xlane.xlu0 %10207 }
0x332f   : > { %17130 = vrcp.f32 %v10208_v32 }
0x3335   : > { %v17129_v9 = vpop.eup %17128 }
0x3336   : > { %v10211_v40 = vmul.f32 %v17129_v9, %v17125_v5 }
0x3339   : > { %v17131_v10 = vpop.eup %17130 }
0x333a   : > { %v10212_v8 = vmul.f32 %v17131_v10, %v17127_v2  ;;  %v16905_v2 = vld [vmem:[%s20980_s7 + $0x68] sm:$0xff]  }
0x333c   : > { %v10213_v15 = vpack.c.bf16 %v10212_v8, %v10211_v40 }
0x333e   : > { %16334 = vmatmul.mubr.msk.bf16.vlgmr.msra.gmra.mrb[160].mxu0 %vm1006_vm4, %v10213_v15  ;;  %v14685_v15 = vld [vmem:[%s20933_s14 + $0x3] ss:$0 sm:$0xff] }
0x333f   : > { %16357 = vmatprep.mubr.msk.bf16.mxu0 %vm17167_vm0, %v17166_v1  ;;  %16350 = vmatpush3.bf16.msra.mxu0 %v16904_v11 }
0x3340   : > { %16351 = vmatprep.subr.bf16.mxu0 %v17166_v1 }
0x3343   : > { %16352 = vmatpush3.bf16.msra.mxu0 %v16905_v2 }
0x3344   : > { %16353 = vmatprep.subr.bf16.mxu0 %v17166_v1 }
0x3347   : > { %16354 = vmatpush3.bf16.msra.mxu0 %v16906_v12 }
0x3348   : > { %16355 = vmatprep.subr.bf16.mxu0 %v17166_v1 }
0x334b   : > { %16356 = vmatpush3.bf16.msra.mxu0 %v16907_v13 }
0x334c   : > { %16373 = vmatprep.subr.bf16.mxu0 %v17166_v1 }
0x3411   : > { %v10252_v6 = vpop.f32.mrb[160].mxu0 }
0x3412   : > { %v16335_v16 = vpop.f32.mrb[161].mxu0 }
0x3413   : > { %v10255_v43 = vpop.f32.mrb[162].mxu0 }
0x3414   : > { %v10270_v33 = vpack.c.bf16 %v10255_v43, %v10252_v6  ;;  %v16336_v46 = vpop.f32.mrb[163].mxu0  ;;  %v14686_v43 = vld [vmem:[%s20934_s15 + $0x3] ss:$0 sm:$0xff] }
0x3416   : > { %16346 = vmatmul.mubr.msk.bf16.vlgmr.msra.gmra.mrb[152].mxu1 %vm902_vm3, %v10270_v33 }
0x3417   : > { %16362 = vmatpush3.bf16.msra.mxu1 %v16900_v34  ;;  %16369 = vmatprep.mubr.msk.bf16.mxu1 %vm17167_vm0, %v17166_v1 }
0x3418   : > { %16363 = vmatprep.subr.bf16.mxu1 %v17166_v1 }
0x341b   : > { %16364 = vmatpush3.bf16.msra.mxu1 %v16901_v23 }
0x341c   : > { %16365 = vmatprep.subr.bf16.mxu1 %v17166_v1 }
0x341f   : > { %16366 = vmatpush3.bf16.msra.mxu1 %v16902_v53 }
0x3420   : > { %16367 = vmatprep.subr.bf16.mxu1 %v17166_v1 }
0x3423   : > { %16368 = vmatpush3.bf16.msra.mxu1 %v16903_v36  ;;  %v14696_v36 = vld [vmem:[%s20928_s9 + $0x3] ss:$0 sm:$0xff] }
0x3424   : > { %16385 = vmatprep.subr.bf16.mxu1 %v17166_v1 }
0x3426   : > { %16370 = vmatmul.mubr.msk.bf16.vlgmr.msra.gmra.mrb[156].mxu1 %vm902_vm3, %v17376_v26 }
0x3427   : > { %16393 = vmatprep.mubr.msk.bf16.mxu1 %vm17167_vm0, %v17166_v1 }
0x34e9   : > { %v10338_v49 = vpop.f32.mrb[152].mxu1 }
0x34ea   : > { %v10339_v37 = vadd.f32 %v14677_v63, %v10338_v49  ;;  %v16347_v44 = vpop.f32.mrb[153].mxu1 }
0x34eb   : > { %v10341_v28 = vpop.f32.mrb[154].mxu1 }
0x34ec   : > { %v10342_v38 = vadd.f32 %v14677_v63, %v10341_v28  ;;  %v16348_v24 = vpop.f32.mrb[155].mxu1  ;;  %v10345_v35 = vadd.f32 %v10339_v37, %v20054_v7 }
0x34ee   : > { %v10351_v50 = vsel %vm902_vm3, %v10345_v35, 0.0  ;;  %v10346_v51 = vadd.f32 %v10342_v38, %v20056_v18 }
0x34ef   : > { %10352 = vadd.xlane.f32.xlu0 %v10351_v50 }
0x34f0   : > { %v10354_v26 = vsel %vm902_vm3, %v10346_v51, 0.0 }
0x34f3   : > { %10355 = vadd.xlane.f32.xlu0 %v10354_v26 }
0x34f9   : > { %v10554_v56 = vpop.f32.mrb[156].mxu1 }
0x34fa   : > { %v16371_v54 = vpop.f32.mrb[157].mxu1  ;;  %v10555_v55 = vadd.f32 %v14711_v42, %v10554_v56 }
0x34fb   : > { %v10557_v52 = vpop.f32.mrb[158].mxu1 }
0x34fc   : > { %v10558_v57 = vadd.f32 %v14711_v42, %v10557_v52  ;;  %v16372_v58 = vpop.f32.mrb[159].mxu1 }
0x34fe   : > { %v20143_v4 = vpack.c.bf16 %v10558_v57, %v10555_v55 }
0x3500   : > { %v10567_v53 = vsel %vm902_vm3, %v20143_v4, 0 }
0x357c   : > { %v10353_v7 = vpop.xlane.xlu0 %10352 }
0x357d   : > { %v10357_v60 = vmul.f32 0.015625, %v10353_v7 }
0x357f   : > { %v10359_v20 = vsub.f32 %v10345_v35, %v10357_v60 }
0x3580   : > { %v10356_v18 = vpop.xlane.xlu0 %10355 }
0x3581   : > { %v10358_v62 = vmul.f32 0.015625, %v10356_v18  ;;  %v10361_v39 = vmul.f32 %v10359_v20, %v10359_v20 }
0x3583   : > { %v10360_v41 = vsub.f32 %v10346_v51, %v10358_v62  ;;  %v10363_v61 = vsel %vm902_vm3, %v10361_v39, 0.0 }
0x3584   : > { %10364 = vadd.xlane.f32.xlu0 %v10363_v61 }
0x3585   : > { %v10362_v0 = vmul.f32 %v10360_v41, %v10360_v41 }
0x3587   : > { %v10366_v5 = vsel %vm902_vm3, %v10362_v0, 0.0  ;;  %v16909_v0 = vld [vmem:[%s20931_s12 + $0x68] sm:$0xff]  }
0x3588   : > { %10367 = vadd.xlane.f32.xlu0 %v10366_v5  ;;  %v16910_v5 = vld [vmem:[%s20931_s12 + $0x70] sm:$0xff]  }
0x3611   : > { %v10365_v14 = vpop.xlane.xlu0 %10364 }
0x3612   : > { %v10369_v19 = vmul.f32 0.015625, %v10365_v14 }
0x3614   : > { %v10371_v3 = vadd.f32 1e-05, %v10369_v19 }
0x3615   : > { %v10368_v32 = vpop.xlane.xlu0 %10367 }
0x3616   : > { %17132 = vrsqrt.f32 %v10371_v3  ;;  %v10370_v9 = vmul.f32 0.015625, %v10368_v32  ;;  %v16911_v32 = vld [vmem:[%s20931_s12 + $0x78] sm:$0xff]  }
0x3618   : > { %v10372_v10 = vadd.f32 1e-05, %v10370_v9 }
0x361a   : > { %17134 = vrsqrt.f32 %v10372_v10 }
0x3620   : > { %v17133_v40 = vpop.eup %17132 }
0x3621   : > { %v10375_v8 = vmul.f32 %v17133_v40, %v10359_v20 }
0x3623   : > { %v10383_v6 = vmul.f32 %v14685_v15, %v10375_v8 }
0x3624   : > { %v17135_v25 = vpop.eup %17134 }
0x3625   : > { %v10376_v16 = vmul.f32 %v17135_v25, %v10360_v41  ;;  %v20169_v33 = vadd.f32 %v14686_v43, %v10383_v6 }
0x3627   : > { %v10384_v34 = vmul.f32 %v14685_v15, %v10376_v16  ;;  %v14728_v15 = vld [vmem:[%s20932_s13 + $0x3] ss:$0 sm:$0xff] }
0x3629   : > { %v20171_v46 = vadd.f32 %v14686_v43, %v10384_v34 }
0x362b   : > { %v10404_v23 = vpack.c.bf16 %v20171_v46, %v20169_v33 }
0x362d   : > { %16358 = vmatmul.mubr.msk.bf16.vlgmr.msra.gmra.mrb[164].mxu0 %vm902_vm3, %v10404_v23 }
0x362e   : > { %16374 = vmatpush3.bf16.xpose.msra.mxu0 %v10567_v53  ;;  %16375 = vmatprep.mubr.msk.bf16.mxu0 %vm17167_vm0, %v17166_v1 }
0x362f   : > { %16379 = vmatprep.subr.bf16.mxu0 %v17166_v1 }
0x3700   : > { %v10472_v63 = vpop.f32.mrb[164].mxu0 }
0x3701   : > { %v16359_v49 = vpop.f32.mrb[165].mxu0  ;;  %v10473_v44 = vadd.f32 %v14696_v36, %v10472_v63 }
0x3702   : > { %v10475_v37 = vpop.f32.mrb[166].mxu0 }
0x3703   : > { %v10476_v28 = vadd.f32 %v14696_v36, %v10475_v37  ;;  %v16360_v38 = vpop.f32.mrb[167].mxu0 }
0x3705   : > { %v10561_v24 = vpack.c.bf16 %v10476_v28, %v10473_v44 }
0x3707   : > { %16376 = vmatmul.mubr.msk.bf16.vlgmr.msra.gmra.mrb[168].mxu0 %vm902_vm3, %v10561_v24 }
0x3708   : > { %16381 = vmatprep.mubr.msk.bf16.mxu0 %vm17167_vm0, %v17166_v1 }
0x37da   : > { %v10603_v35 = vpop.f32.mrb[168].mxu0 }
0x37db   : > { %v10610_v50 = vmul.f32 0.125, %v10603_v35  ;;  %v16377_v51 = vpop.f32.mrb[169].mxu0 }
0x37dc   : > { %v10606_v26 = vpop.f32.mrb[170].mxu0 }
0x37dd   : > { %v10611_v42 = vmul.f32 0.125, %v10606_v26  ;;  %v16378_v56 = vpop.f32.mrb[171].mxu0  ;;  %v10612_v54 = vadd.f32 %v20078_v47, %v10610_v50  ;;  %v14738_v26 = vld [vmem:[%s20939_s20 + $0x600] sm:$0xff] }
0x37de   : > { %v14739_v56 = vld [vmem:[%s20939_s20 + $0x608] sm:$0xff] }
0x37df   : > { %v10614_v52 = vsel %vm1006_vm4, %v10612_v54, -inf  ;;  %v10613_v55 = vadd.f32 %v20085_v59, %v10611_v42  ;;  %v16908_v59 = vld [vmem:[%s20931_s12 + $0x60] sm:$0xff]  }
0x37e0   : > { %10615 = vmax.xlane.f32.xlu0 %v10614_v52  ;;  %16386 = vmatpush3.bf16.msra.mxu1 %v16908_v59  ;;  %v14746_v42 = vld [vmem:[%s20939_s20 + $0x640] sm:$0xff]  ;;  %v14747_v52 = vld [vmem:[%s20939_s20 + $0x648] sm:$0xff] }
0x37e1   : > { %v10617_v57 = vsel %vm1006_vm4, %v10613_v55, -inf  ;;  %16387 = vmatprep.subr.bf16.mxu1 %v17166_v1  ;;  %v14778_v59 = vld [vmem:[%s20939_s20 + $0x740] sm:$0xff] }
0x37e2   : > { %10618 = vmax.xlane.f32.xlu1 %v10617_v57  ;;  %v14806_v57 = vcombine.low %v14739_v56, %v14747_v52 }
0x37e4   : > { %16388 = vmatpush3.bf16.msra.mxu1 %v16909_v0  ;;  %v14771_v0 = vld [vmem:[%s20939_s20 + $0x708] sm:$0xff] }
0x37e5   : > { %16389 = vmatprep.subr.bf16.mxu1 %v17166_v1 }
0x37e8   : > { %16390 = vmatpush3.bf16.msra.mxu1 %v16910_v5 }
0x37e9   : > { %16391 = vmatprep.subr.bf16.mxu1 %v17166_v1 }
0x37ec   : > { %16392 = vmatpush3.bf16.msra.mxu1 %v16911_v32  ;;  %v14795_v32 = vld [vmem:[%s20939_s20 + $0x7c8] sm:$0xff] }
0x386d   : > { %v10616_v58 = vpop.xlane.xlu0 %10615 }
0x386e   : > { %v10620_v7 = vsub.f32 %v10612_v54, %v10616_v58  ;;  %v14805_v54 = vcombine.high %v14738_v26, %v14746_v42  ;;  %v14807_v58 = vcombine.high %v14739_v56, %v14747_v52  ;;  %v14757_v56 = vld [vmem:[%s20939_s20 + $0x698] sm:$0xff] }
0x386f   : > { %v10619_v60 = vpop.xlane.xlu1 %10618 }
0x3870   : > { %v10622_v20 = vmul.f32 1.442695, %v10620_v7  ;;  %v10621_v18 = vsub.f32 %v10613_v55, %v10619_v60  ;;  %v14804_v55 = vcombine.low %v14738_v26, %v14746_v42  ;;  %11336 = vmatprep.subr.bf16.mxu1 %v14807_v58  ;;  %v14754_v7 = vld [vmem:[%s20939_s20 + $0x680] sm:$0xff]  ;;  %v14756_v42 = vld [vmem:[%s20939_s20 + $0x690] sm:$0xff] }
0x3871   : > { %v14762_v60 = vld [vmem:[%s20939_s20 + $0x6c0] sm:$0xff] }
0x3872   : > { %17136 = vpow2.f32 %v10622_v20  ;;  %v10624_v62 = vmul.f32 1.442695, %v10621_v18  ;;  %v14755_v20 = vld [vmem:[%s20939_s20 + $0x688] sm:$0xff]  ;;  %v14821_v18 = vcombine.high %v14754_v7, %v14762_v60 }
0x3874   : > { %17138 = vpow2.f32 %v10624_v62  ;;  %v14763_v62 = vld [vmem:[%s20939_s20 + $0x6c8] sm:$0xff] }
0x387c   : > { %v17137_v39 = vpop.eup %17136 }
0x387d   : > { %v10626_v41 = vsel %vm1006_vm4, %v17137_v39, 0.0 }
0x387e   : > { %v17139_v47 = vpop.eup %17138  ;;  %10627 = vadd.xlane.f32.xlu0 %v10626_v41  ;;  %v14822_v41 = vcombine.low %v14755_v20, %v14763_v62 }
0x387f   : > { %v10629_v61 = vsel %vm1006_vm4, %v17139_v47, 0.0 }
0x3880   : > { %10630 = vadd.xlane.f32.xlu1 %v10629_v61  ;;  %v14770_v61 = vld [vmem:[%s20939_s20 + $0x700] sm:$0xff] }
0x3881   : > { %v14837_v5 = vcombine.high %v14770_v61, %v14778_v59 }
0x3894   : > { %10638 = vrot.lane.b32.xlu0 %v20143_v4, %s20981_s0  ;;  %s20987_s0 = sld [smem:[#allocation14_spill]] }
0x389a   : > { %s737_s8 = scalar_lea.vmem %s20987_s0, %s15269_s26 }
0x390b   : > { %v10628_v4 = vpop.xlane.xlu0 %10627 }
0x390c   : > { %17140 = vrcp.f32 %v10628_v4  ;;  %v14779_v4 = vld [vmem:[%s20939_s20 + $0x748] sm:$0xff] }
0x390d   : > { %v10631_v11 = vpop.xlane.xlu1 %10630 }
0x390e   : > { %17142 = vrcp.f32 %v10631_v11  ;;  %v14836_v11 = vcombine.low %v14770_v61, %v14778_v59  ;;  %v14788_v61 = vld [vmem:[%s20939_s20 + $0x790] sm:$0xff] }
0x390f   : > { %v10639_v2 = vpop.permute.xlu0 %10638  ;;  %v14796_v59 = vld [vmem:[%s20939_s20 + $0x7d0] sm:$0xff] }
0x3910   : > { %16380 = vmatpush3.bf16.msra.mxu0 %v10639_v2  ;;  %v14838_v2 = vcombine.low %v14771_v0, %v14779_v4 }
0x3911   : > { %11293 = vmatprep.subr.bf16.mxu0 %v14805_v54 }
0x3916   : > { %v17141_v12 = vpop.eup %17140 }
0x3917   : > { %v10634_v14 = vmul.f32 %v17141_v12, %v17137_v39  ;;  %v14820_v39 = vcombine.low %v14754_v7, %v14762_v60  ;;  %v14839_v12 = vcombine.high %v14771_v0, %v14779_v4  ;;  %v14772_v7 = vld [vmem:[%s20939_s20 + $0x710] sm:$0xff]  ;;  %v14789_v0 = vld [vmem:[%s20939_s20 + $0x798] sm:$0xff] }
0x3918   : > { %v17143_v13 = vpop.eup %17142  ;;  %v14780_v60 = vld [vmem:[%s20939_s20 + $0x750] sm:$0xff] }
0x3919   : > { %v10635_v19 = vmul.f32 %v17143_v13, %v17139_v47  ;;  %v14823_v47 = vcombine.high %v14755_v20, %v14763_v62  ;;  %v14786_v13 = vld [vmem:[%s20939_s20 + $0x780] sm:$0xff]  ;;  %v14773_v20 = vld [vmem:[%s20939_s20 + $0x718] sm:$0xff]  ;;  %v14840_v4 = vcombine.low %v14772_v7, %v14780_v60 }
0x391b   : > { %v10636_v3 = vpack.c.bf16 %v10635_v19, %v10634_v14  ;;  %v14794_v14 = vld [vmem:[%s20939_s20 + $0x7c0] sm:$0xff]  ;;  %v14787_v19 = vld [vmem:[%s20939_s20 + $0x788] sm:$0xff] }
0x391d   : > { %16382 = vmatmul.mubr.msk.bf16.vlgmr.msra.gmra.mrb[172].mxu0 %vm1006_vm4, %v10636_v3  ;;  %v14853_v3 = vcombine.high %v14786_v13, %v14794_v14 }
0x391e   : > { %11325 = vmatprep.mubr.bf16.mxu0 %v17168_v17  ;;  %11294 = vmatpush1.bf16.msra.mxu0 %v14804_v55 }
0x391f   : > { %11295 = vmatprep.subr.bf16.mxu0 %v14821_v18  ;;  %v14781_v18 = vld [vmem:[%s20939_s20 + $0x758] sm:$0xff] }
0x3922   : > { %11296 = vmatpush1.bf16.msra.mxu0 %v14820_v39 }
0x3923   : > { %11297 = vmatprep.subr.bf16.mxu0 %v14837_v5  ;;  %v14797_v5 = vld [vmem:[%s20939_s20 + $0x7d8] sm:$0xff] }
0x3926   : > { %11298 = vmatpush1.bf16.msra.mxu0 %v14836_v11  ;;  %v14842_v11 = vcombine.low %v14773_v20, %v14781_v18 }
0x3927   : > { %11299 = vmatprep.subr.bf16.mxu0 %v14853_v3  ;;  %v14751_v3 = vld [vmem:[%s20939_s20 + $0x668] sm:$0xff] }
0x39f0   : > { %v10678_v1 = vpop.f32.mrb[172].mxu0 }
0x39f1   : > { %v16383_v9 = vpop.f32.mrb[173].mxu0 }
0x39f2   : > { %v10681_v10 = vpop.f32.mrb[174].mxu0  ;;  %v14854_v9 = vcombine.low %v14787_v19, %v14795_v32 }
0x39f3   : > { %v10696_v40 = vpack.c.bf16 %v10681_v10, %v10678_v1  ;;  %v16384_v8 = vpop.f32.mrb[175].mxu0  ;;  %v14852_v1 = vcombine.low %v14786_v13, %v14794_v14  ;;  %v14855_v10 = vcombine.high %v14787_v19, %v14795_v32  ;;  %v14742_v13 = vld [vmem:[%s20939_s20 + $0x620] sm:$0xff]  ;;  %v14743_v19 = vld [vmem:[%s20939_s20 + $0x628] sm:$0xff]  ;;  %v14856_v32 = vcombine.low %v14788_v61, %v14796_v59 }
0x39f4   : > { %v14748_v8 = vld [vmem:[%s20939_s20 + $0x650] sm:$0xff]  ;;  %v14750_v14 = vld [vmem:[%s20939_s20 + $0x660] sm:$0xff] }
0x39f5   : > { %16394 = vmatmul.mubr.msk.bf16.vlgmr.msra.gmra.mrb[160].mxu1 %vm902_vm3, %v10696_v40  ;;  %11300 = vmatpush1.bf16.msra.mxu0 %v14852_v1  ;;  %v14740_v40 = vld [vmem:[%s20939_s20 + $0x610] sm:$0xff]  ;;  %v14858_v1 = vcombine.low %v14789_v0, %v14797_v5 }
0x39f6   : > { %11368 = vmatprep.mubr.bf16.mxu1 %v17168_v17  ;;  %11337 = vmatpush1.bf16.msra.mxu1 %v14806_v57 }
0x39f7   : > { %11338 = vmatprep.subr.bf16.mxu1 %v14823_v47  ;;  %v14843_v47 = vcombine.high %v14773_v20, %v14781_v18 }
0x39fa   : > { %11339 = vmatpush1.bf16.msra.mxu1 %v14822_v41  ;;  %v14841_v41 = vcombine.high %v14772_v7, %v14780_v60 }
0x39fb   : > { %11340 = vmatprep.subr.bf16.mxu1 %v14839_v12  ;;  %v14859_v12 = vcombine.high %v14789_v0, %v14797_v5 }
0x39fe   : > { %11341 = vmatpush1.bf16.msra.mxu1 %v14838_v2  ;;  %v14857_v2 = vcombine.high %v14788_v61, %v14796_v59 }
0x39ff   : > { %11342 = vmatprep.subr.bf16.mxu1 %v14855_v10  ;;  %v14815_v10 = vcombine.high %v14743_v19, %v14751_v3 }
0x3a02   : > { %11343 = vmatpush1.bf16.msra.mxu1 %v14854_v9  ;;  %v14813_v9 = vcombine.high %v14742_v13, %v14750_v14 }
0x3ac8   : > { %v10764_v25 = vpop.f32.mrb[160].mxu1 }
0x3ac9   : > { %v10765_v6 = vadd.f32 %v14728_v15, %v10764_v25  ;;  %v16395_v16 = vpop.f32.mrb[161].mxu1  ;;  %v14808_v25 = vcombine.low %v14740_v40, %v14748_v8 }
0x3aca   : > { %v10767_v43 = vpop.f32.mrb[162].mxu1  ;;  %v14749_v16 = vld [vmem:[%s20939_s20 + $0x658] sm:$0xff] }
0x3acb   : > { %v10768_v34 = vadd.f32 %v14728_v15, %v10767_v43  ;;  %v16396_v23 = vpop.f32.mrb[163].mxu1  ;;  %v10771_v53 = vadd.f32 %v10765_v6, %v20169_v33  ;;  %v14741_v15 = vld [vmem:[%s20939_s20 + $0x618] sm:$0xff]  ;;  %v14809_v6 = vcombine.high %v14740_v40, %v14748_v8  ;;  %v14758_v40 = vld [vmem:[%s20939_s20 + $0x6a0] sm:$0xff] }
0x3acc   : > { %v14810_v43 = vcombine.low %v14741_v15, %v14749_v16  ;;  %v14766_v8 = vld [vmem:[%s20939_s20 + $0x6e0] sm:$0xff] }
0x3acd   : > { %v10777_v36 = vsel %vm902_vm3, %v10771_v53, 0.0  ;;  %v10772_v63 = vadd.f32 %v10768_v34, %v20171_v46  ;;  %v14811_v34 = vcombine.high %v14741_v15, %v14749_v16  ;;  %11379 = vmatprep.subr.bf16.mxu0 %v14809_v6  ;;  %v14759_v15 = vld [vmem:[%s20939_s20 + $0x6a8] sm:$0xff]  ;;  %v14812_v6 = vcombine.low %v14742_v13, %v14750_v14 }
0x3ace   : > { %10778 = vadd.xlane.f32.xlu1 %v10777_v36  ;;  %v14814_v16 = vcombine.low %v14743_v19, %v14751_v3 }
0x3acf   : > { %v10780_v49 = vsel %vm902_vm3, %v10772_v63, 0.0  ;;  %11422 = vmatprep.subr.bf16.mxu1 %v14811_v34 }
0x3ad2   : > { %10781 = vadd.xlane.f32.xlu1 %v10780_v49 }
0x3b5b   : > { %v10779_v37 = vpop.xlane.xlu1 %10778 }
0x3b5c   : > { %v10783_v44 = vmul.f32 0.015625, %v10779_v37 }
0x3b5e   : > { %v20221_v28 = vsub.f32 %v10771_v53, %v10783_v44 }
0x3b5f   : > { %v10782_v38 = vpop.xlane.xlu1 %10781 }
0x3b60   : > { %v10784_v24 = vmul.f32 0.015625, %v10782_v38  ;;  %v10787_v35 = vmul.f32 %v20221_v28, %v20221_v28 }
0x3b62   : > { %v20225_v50 = vsub.f32 %v10772_v63, %v10784_v24  ;;  %v10789_v33 = vsel %vm902_vm3, %v10787_v35, 0.0  ;;  %v14736_v24 = vld [vmem:[%s20985_s2 + $0x3] ss:$0 sm:$0xff] }
0x3b63   : > { %10790 = vadd.xlane.f32.xlu1 %v10789_v33 }
0x3b64   : > { %v10788_v46 = vmul.f32 %v20225_v50, %v20225_v50 }
0x3b66   : > { %v10792_v51 = vsel %vm902_vm3, %v10788_v46, 0.0 }
0x3b67   : > { %10793 = vadd.xlane.f32.xlu1 %v10792_v51  ;;  %v14737_v51 = vld [vmem:[%s20936_s17 + $0x3] ss:$0 sm:$0xff] }
0x3bf0   : > { %v10791_v23 = vpop.xlane.xlu1 %10790 }
0x3bf1   : > { %v10795_v53 = vmul.f32 0.015625, %v10791_v23  ;;  %v14774_v23 = vld [vmem:[%s20939_s20 + $0x720] sm:$0xff] }
0x3bf3   : > { %v10797_v36 = vadd.f32 1e-05, %v10795_v53  ;;  %v14782_v53 = vld [vmem:[%s20939_s20 + $0x760] sm:$0xff] }
0x3bf4   : > { %v10794_v63 = vpop.xlane.xlu1 %10793 }
0x3bf5   : > { %17144 = vrsqrt.f32 %v10797_v36  ;;  %v10796_v49 = vmul.f32 0.015625, %v10794_v63  ;;  %v14775_v36 = vld [vmem:[%s20939_s20 + $0x728] sm:$0xff] }
0x3bf6   : > { %v14783_v63 = vld [vmem:[%s20939_s20 + $0x768] sm:$0xff] }
0x3bf7   : > { %v10798_v37 = vadd.f32 1e-05, %v10796_v49  ;;  %v14828_v49 = vcombine.low %v14758_v40, %v14766_v8 }
0x3bf9   : > { %17146 = vrsqrt.f32 %v10798_v37 }
0x3bff   : > { %v17145_v44 = vpop.eup %17144 }
0x3c00   : > { %v10801_v38 = vmul.f32 %v17145_v44, %v20221_v28  ;;  %v14764_v28 = vld [vmem:[%s20939_s20 + $0x6d0] sm:$0xff]  ;;  %v14845_v44 = vcombine.high %v14774_v23, %v14782_v53 }
0x3c01   : > { %v14825_v57 = vcombine.high %v14756_v42, %v14764_v28  ;;  %v14824_v62 = vcombine.low %v14756_v42, %v14764_v28 }
0x3c02   : > { %v10809_v33 = vmul.f32 %v14736_v24, %v10801_v38  ;;  %v14847_v38 = vcombine.high %v14775_v36, %v14783_v63 }
0x3c03   : > { %v17147_v35 = vpop.eup %17146 }
0x3c04   : > { %v10802_v46 = vmul.f32 %v17147_v35, %v20225_v50  ;;  %v14765_v50 = vld [vmem:[%s20939_s20 + $0x6d8] sm:$0xff]  ;;  %v20311_v54 = vadd.f32 %v14737_v51, %v10809_v33  ;;  %v14798_v35 = vld [vmem:[%s20939_s20 + $0x7e0] sm:$0xff]  ;;  %v14791_v33 = vld [vmem:[%s20939_s20 + $0x7a8] sm:$0xff] }
0x3c05   : > { %v14827_v58 = vcombine.high %v14757_v56, %v14765_v50  ;;  %v14826_v39 = vcombine.low %v14757_v56, %v14765_v50  ;;  %v14744_v56 = vld [vmem:[%s20939_s20 + $0x630] sm:$0xff] }
0x3c06   : > { %v10810_v26 = vmul.f32 %v14736_v24, %v10802_v46  ;;  %v14790_v24 = vld [vmem:[%s20939_s20 + $0x7a0] sm:$0xff]  ;;  %v14799_v46 = vld [vmem:[%s20939_s20 + $0x7e8] sm:$0xff]  ;;  %v14752_v50 = vld [vmem:[%s20939_s20 + $0x670] sm:$0xff] }
0x3c07   : > { %v14861_v42 = vcombine.high %v14790_v24, %v14798_v35  ;;  %v14863_v28 = vcombine.high %v14791_v33, %v14799_v46  ;;  %v14860_v7 = vcombine.low %v14790_v24, %v14798_v35  ;;  %v14862_v60 = vcombine.low %v14791_v33, %v14799_v46  ;;  %v16924_v24 = vld [vmem:[%s20941_s22 + $0xc58] sm:$0xff]  }
0x3c08   : > { %v20313_v52 = vadd.f32 %v14737_v51, %v10810_v26  ;;  %v14844_v51 = vcombine.low %v14774_v23, %v14782_v53  ;;  %v14846_v26 = vcombine.low %v14775_v36, %v14783_v63  ;;  %v14817_v20 = vcombine.high %v14744_v56, %v14752_v50  ;;  %v16915_v23 = vld [vmem:[%s20941_s22 + $0xc80] sm:$0xff]   ;;  %v16916_v53 = vld [vmem:[%s20941_s22 + $0xc48] sm:$0xff]   ;;  %v16925_v35 = vld [vmem:[%s20941_s22 + $0xcd8] sm:$0xff]  }
0x3c09   : > { %v14816_v61 = vcombine.low %v14744_v56, %v14752_v50  ;;  %v16917_v36 = vld [vmem:[%s20941_s22 + $0xcc8] sm:$0xff]   ;;  %v16926_v33 = vld [vmem:[%s20941_s22 + $0xc18] sm:$0xff]  }
0x3c0a   : > { %v20317_v55 = vpack.c.bf16 %v20313_v52, %v20311_v54  ;;  %v16918_v63 = vld [vmem:[%s20941_s22 + $0xc08] sm:$0xff]   ;;  %v16927_v46 = vld [vmem:[%s20941_s22 + $0xc98] sm:$0xff]  }
0x3c0b   : > { %v16932_v56 = vld [vmem:[%s20941_s22 + $0xc68] sm:$0xff]  }
0x3c0c   : > { %14868 = vmatmul.mubr.msk.bf16.vlgmr.msra.gmra.mrb[176].mxu0 %vm902_vm3, %v20317_v55  ;;  %14869 = vmatmul.mubr.msk.bf16.vlgmr.msra.gmra.mrb[164].mxu1 %vm902_vm3, %v20317_v55  ;;  %v16933_v50 = vld [vmem:[%s20941_s22 + $0xce8] sm:$0xff]  }
0x3c0d   : > { %11380 = vmatpush1.bf16.msra.mxu0 %v14808_v25  ;;  %11423 = vmatpush1.bf16.msra.mxu1 %v14810_v43  ;;  %v14767_v25 = vld [vmem:[%s20939_s20 + $0x6e8] sm:$0xff]  ;;  %v14829_v43 = vcombine.high %v14758_v40, %v14766_v8 }
0x3c0e   : > { %11381 = vmatprep.subr.bf16.mxu0 %v14825_v57  ;;  %11424 = vmatprep.subr.bf16.mxu1 %v14827_v58  ;;  %v14831_v34 = vcombine.high %v14759_v15, %v14767_v25  ;;  %v14830_v37 = vcombine.low %v14759_v15, %v14767_v25  ;;  %v14745_v57 = vld [vmem:[%s20939_s20 + $0x638] sm:$0xff] }
0x3c0f   : > { %11411 = vmatprep.mubr.bf16.mxu0 %v17168_v17  ;;  %11454 = vmatprep.mubr.bf16.mxu1 %v17168_v17  ;;  %v14753_v58 = vld [vmem:[%s20939_s20 + $0x678] sm:$0xff] }
0x3c10   : > { %v14819_v18 = vcombine.high %v14745_v57, %v14753_v58  ;;  %v14818_v59 = vcombine.low %v14745_v57, %v14753_v58  ;;  %v16934_v57 = vld [vmem:[%s20941_s22 + $0xc28] sm:$0xff]  }
0x3c11   : > { %11382 = vmatpush1.bf16.msra.mxu0 %v14824_v62  ;;  %11425 = vmatpush1.bf16.msra.mxu1 %v14826_v39  ;;  %v14760_v62 = vld [vmem:[%s20939_s20 + $0x6b0] sm:$0xff]  ;;  %v16935_v58 = vld [vmem:[%s20941_s22 + $0xca8] sm:$0xff]  }
0x3c12   : > { %11383 = vmatprep.subr.bf16.mxu0 %v14841_v41  ;;  %11426 = vmatprep.subr.bf16.mxu1 %v14843_v47  ;;  %v14768_v39 = vld [vmem:[%s20939_s20 + $0x6f0] sm:$0xff]  ;;  %v14761_v41 = vld [vmem:[%s20939_s20 + $0x6b8] sm:$0xff] }
0x3c13   : > { %v14769_v47 = vld [vmem:[%s20939_s20 + $0x6f8] sm:$0xff]  ;;  %v14833_v0 = vcombine.high %v14760_v62, %v14768_v39  ;;  %v14832_v13 = vcombine.low %v14760_v62, %v14768_v39 }
0x3c14   : > { %v14835_v5 = vcombine.high %v14761_v41, %v14769_v47  ;;  %v14834_v14 = vcombine.low %v14761_v41, %v14769_v47  ;;  %v16940_v62 = vld [vmem:[%s20941_s22 + $0xc78] sm:$0xff]  }
0x3c15   : > { %11384 = vmatpush1.bf16.msra.mxu0 %v14840_v4  ;;  %11427 = vmatpush1.bf16.msra.mxu1 %v14842_v11  ;;  %v14776_v4 = vld [vmem:[%s20939_s20 + $0x730] sm:$0xff]  ;;  %v16941_v39 = vld [vmem:[%s20941_s22 + $0xcf8] sm:$0xff]  }
0x3c16   : > { %11385 = vmatprep.subr.bf16.mxu0 %v14857_v2  ;;  %11428 = vmatprep.subr.bf16.mxu1 %v14859_v12  ;;  %v14784_v11 = vld [vmem:[%s20939_s20 + $0x770] sm:$0xff]  ;;  %v14777_v2 = vld [vmem:[%s20939_s20 + $0x738] sm:$0xff] }
0x3c17   : > { %v14785_v12 = vld [vmem:[%s20939_s20 + $0x778] sm:$0xff]  ;;  %v14849_v19 = vcombine.high %v14776_v4, %v14784_v11  ;;  %v14848_v40 = vcombine.low %v14776_v4, %v14784_v11 }
0x3c18   : > { %v14851_v3 = vcombine.high %v14777_v2, %v14785_v12  ;;  %v14850_v8 = vcombine.low %v14777_v2, %v14785_v12  ;;  %v16942_v41 = vld [vmem:[%s20941_s22 + $0xc38] sm:$0xff]  }
0x3c19   : > { %11386 = vmatpush1.bf16.msra.mxu0 %v14856_v32  ;;  %11429 = vmatpush1.bf16.msra.mxu1 %v14858_v1  ;;  %v14792_v32 = vld [vmem:[%s20939_s20 + $0x7b0] sm:$0xff]  ;;  %v16943_v47 = vld [vmem:[%s20941_s22 + $0xcb8] sm:$0xff]  }
0x3c1a   : > { %11465 = vmatprep.subr.bf16.mxu0 %v14813_v9  ;;  %11508 = vmatprep.subr.bf16.mxu1 %v14815_v10  ;;  %v14800_v1 = vld [vmem:[%s20939_s20 + $0x7f0] sm:$0xff]  ;;  %v14793_v9 = vld [vmem:[%s20939_s20 + $0x7b8] sm:$0xff] }
0x3c1b   : > { %v14801_v10 = vld [vmem:[%s20939_s20 + $0x7f8] sm:$0xff]  ;;  %v14865_v15 = vcombine.high %v14792_v32, %v14800_v1 }
0x3c1c   : > { %14870 = vmatmul.mubr.msk.bf16.vlgmr.msra.gmra.mrb[180].mxu0 %vm902_vm3, %v20317_v55  ;;  %14871 = vmatmul.mubr.msk.bf16.vlgmr.msra.gmra.mrb[168].mxu1 %vm902_vm3, %v20317_v55  ;;  %v14867_v25 = vcombine.high %v14793_v9, %v14801_v10 }
0x3c1d   : > { %11466 = vmatpush1.bf16.msra.mxu0 %v14812_v6  ;;  %11509 = vmatpush1.bf16.msra.mxu1 %v14814_v16  ;;  %v14864_v6 = vcombine.low %v14792_v32, %v14800_v1  ;;  %v14866_v16 = vcombine.low %v14793_v9, %v14801_v10 }
0x3c1e   : > { %11467 = vmatprep.subr.bf16.mxu0 %v14829_v43  ;;  %11510 = vmatprep.subr.bf16.mxu1 %v14831_v34  ;;  %v16912_v43 = vld [vmem:[%s20941_s22 + $0xc40] sm:$0xff]  }
0x3c1f   : > { %11497 = vmatprep.mubr.bf16.mxu0 %v17168_v17  ;;  %11540 = vmatprep.mubr.bf16.mxu1 %v17168_v17  ;;  %v16914_v34 = vld [vmem:[%s20941_s22 + $0xc00] sm:$0xff]  }
0x3c21   : > { %11468 = vmatpush1.bf16.msra.mxu0 %v14828_v49  ;;  %11511 = vmatpush1.bf16.msra.mxu1 %v14830_v37  ;;  %v16919_v49 = vld [vmem:[%s20941_s22 + $0xc88] sm:$0xff]   ;;  %v16920_v37 = vld [vmem:[%s20941_s22 + $0xc50] sm:$0xff]  }
0x3c22   : > { %11469 = vmatprep.subr.bf16.mxu0 %v14845_v44  ;;  %11512 = vmatprep.subr.bf16.mxu1 %v14847_v38  ;;  %v16922_v44 = vld [vmem:[%s20941_s22 + $0xc10] sm:$0xff]  }
0x3c23   : > { %v16923_v38 = vld [vmem:[%s20941_s22 + $0xc90] sm:$0xff]  }
0x3c25   : > { %11470 = vmatpush1.bf16.msra.mxu0 %v14844_v51  ;;  %11513 = vmatpush1.bf16.msra.mxu1 %v14846_v26  ;;  %v16928_v51 = vld [vmem:[%s20941_s22 + $0xc60] sm:$0xff]  }
0x3c26   : > { %11471 = vmatprep.subr.bf16.mxu0 %v14861_v42  ;;  %11514 = vmatprep.subr.bf16.mxu1 %v14863_v28  ;;  %v16929_v26 = vld [vmem:[%s20941_s22 + $0xce0] sm:$0xff]  }
0x3c27   : > { %v16930_v42 = vld [vmem:[%s20941_s22 + $0xc20] sm:$0xff]  }
0x3c28   : > { %v16931_v28 = vld [vmem:[%s20941_s22 + $0xca0] sm:$0xff]  }
0x3c29   : > { %11472 = vmatpush1.bf16.msra.mxu0 %v14860_v7  ;;  %11515 = vmatpush1.bf16.msra.mxu1 %v14862_v60  ;;  %v16936_v7 = vld [vmem:[%s20941_s22 + $0xc70] sm:$0xff]  }
0x3c2a   : > { %11551 = vmatprep.subr.bf16.mxu0 %v14817_v20  ;;  %11594 = vmatprep.subr.bf16.mxu1 %v14819_v18  ;;  %v16937_v60 = vld [vmem:[%s20941_s22 + $0xcf0] sm:$0xff]  }
0x3c2b   : > { %v16938_v20 = vld [vmem:[%s20941_s22 + $0xc30] sm:$0xff]  }
0x3c2c   : > { %14872 = vmatmul.mubr.msk.bf16.vlgmr.msra.gmra.mrb[184].mxu0 %vm902_vm3, %v20317_v55  ;;  %14873 = vmatmul.mubr.msk.bf16.vlgmr.msra.gmra.mrb[172].mxu1 %vm902_vm3, %v20317_v55  ;;  %v16939_v18 = vld [vmem:[%s20941_s22 + $0xcb0] sm:$0xff]  }
0x3c2d   : > { %11552 = vmatpush1.bf16.msra.mxu0 %v14816_v61  ;;  %11595 = vmatpush1.bf16.msra.mxu1 %v14818_v59  ;;  %v16944_v61 = vld [vmem:[%s20941_s22 + $0xd40] sm:$0xff]  }
0x3c2e   : > { %11553 = vmatprep.subr.bf16.mxu0 %v14833_v0  ;;  %11596 = vmatprep.subr.bf16.mxu1 %v14835_v5  ;;  %v16945_v59 = vld [vmem:[%s20941_s22 + $0xdc0] sm:$0xff]   ;;  %v14802_v0 = vld [vmem:[%s20940_s21 + $0x30] sm:$0xff] }
0x3c2f   : > { %11583 = vmatprep.mubr.bf16.mxu0 %v17168_v17  ;;  %11626 = vmatprep.mubr.bf16.mxu1 %v17168_v17  ;;  %v16913_v17 = vld [vmem:[%s20941_s22 + $0xcc0] sm:$0xff]   ;;  %v10893_v5 = vrot.slane %v14802_v0, %v17385_v29  ;;  %v10901_v4 = vrot.slane %v14802_v0, %v17891_v45  ;;  %v10897_v11 = vrot.slane %v14802_v0, %v17391_v31 }
0x3c30   : > { %v10905_v2 = vrot.slane %v14802_v0, %v17897_v48 }
0x3c31   : > { %11554 = vmatpush1.bf16.msra.mxu0 %v14832_v13  ;;  %11597 = vmatpush1.bf16.msra.mxu1 %v14834_v14 }
0x3c32   : > { %11555 = vmatprep.subr.bf16.mxu0 %v14849_v19  ;;  %11598 = vmatprep.subr.bf16.mxu1 %v14851_v3 }
0x3c35   : > { %11556 = vmatpush1.bf16.msra.mxu0 %v14848_v40  ;;  %11599 = vmatpush1.bf16.msra.mxu1 %v14850_v8 }
0x3c36   : > { %11557 = vmatprep.subr.bf16.mxu0 %v14865_v15  ;;  %11600 = vmatprep.subr.bf16.mxu1 %v14867_v25 }
0x3c39   : > { %11558 = vmatpush1.bf16.msra.mxu0 %v14864_v6  ;;  %11601 = vmatpush1.bf16.msra.mxu1 %v14866_v16 }
0x3c3a   : > { %15917 = vmatprep.subr.bf16.mxu0 %v16912_v43  ;;  %15939 = vmatprep.subr.bf16.mxu1 %v16913_v17 }
0x3c3c   : > { %14874 = vmatmul.mubr.msk.bf16.vlgmr.msra.gmra.mrb[188].mxu0 %vm902_vm3, %v20317_v55  ;;  %14875 = vmatmul.mubr.msk.bf16.vlgmr.msra.gmra.mrb[176].mxu1 %vm902_vm3, %v20317_v55  ;;  %v16921_v55 = vld [vmem:[%s20941_s22 + $0xcd0] sm:$0xff]  }
0x3c3d   : > { %15918 = vmatpush3.bf16.msra.mxu0 %v16914_v34  ;;  %15940 = vmatpush3.bf16.msra.mxu1 %v16915_v23 }
0x3c3e   : > { %15919 = vmatprep.subr.bf16.mxu0 %v16916_v53  ;;  %15941 = vmatprep.subr.bf16.mxu1 %v16917_v36 }
0x3c41   : > { %15920 = vmatpush3.bf16.msra.mxu0 %v16918_v63  ;;  %15942 = vmatpush3.bf16.msra.mxu1 %v16919_v49 }
0x3c42   : > { %15921 = vmatprep.subr.bf16.mxu0 %v16920_v37  ;;  %15943 = vmatprep.subr.bf16.mxu1 %v16921_v55 }
0x3c45   : > { %15922 = vmatpush3.bf16.msra.mxu0 %v16922_v44  ;;  %15944 = vmatpush3.bf16.msra.mxu1 %v16923_v38 }
0x3c46   : > { %15923 = vmatprep.subr.bf16.mxu0 %v16924_v24  ;;  %15945 = vmatprep.subr.bf16.mxu1 %v16925_v35  ;;  %v16946_v35 = vld [vmem:[%s20941_s22 + $0xd00] sm:$0xff]  }
0x3c49   : > { %15924 = vmatpush3.bf16.msra.mxu0 %v16926_v33  ;;  %15946 = vmatpush3.bf16.msra.mxu1 %v16927_v46  ;;  %v16947_v33 = vld [vmem:[%s20941_s22 + $0xd80] sm:$0xff]   ;;  %v16948_v46 = vld [vmem:[%s20941_s22 + $0xd48] sm:$0xff]  }
0x3c4a   : > { %15925 = vmatprep.subr.bf16.mxu0 %v16928_v51  ;;  %15947 = vmatprep.subr.bf16.mxu1 %v16929_v26  ;;  %v16949_v51 = vld [vmem:[%s20941_s22 + $0xdc8] sm:$0xff]  }
0x3c4b   : > { %v16950_v26 = vld [vmem:[%s20941_s22 + $0xd08] sm:$0xff]  }
0x3c4d   : > { %15926 = vmatpush3.bf16.msra.mxu0 %v16930_v42  ;;  %15948 = vmatpush3.bf16.msra.mxu1 %v16931_v28  ;;  %v16951_v42 = vld [vmem:[%s20941_s22 + $0xd88] sm:$0xff]   ;;  %v10909_v28 = vrot.slane %v14802_v0, %v17916_v21 }
0x3c4e   : > { %15927 = vmatprep.subr.bf16.mxu0 %v16932_v56  ;;  %15949 = vmatprep.subr.bf16.mxu1 %v16933_v50  ;;  %v10917_v56 = vrot.slane %v14802_v0, %v17919_v22  ;;  %v16952_v50 = vld [vmem:[%s20941_s22 + $0xd50] sm:$0xff]  }
0x3c51   : > { %15928 = vmatpush3.bf16.msra.mxu0 %v16934_v57  ;;  %15950 = vmatpush3.bf16.msra.mxu1 %v16935_v58  ;;  %v16953_v57 = vld [vmem:[%s20941_s22 + $0xdd0] sm:$0xff]   ;;  %v10913_v58 = vrot.slane %v14802_v0, %v17922_v27 }
0x3c52   : > { %15929 = vmatprep.subr.bf16.mxu0 %v16936_v7  ;;  %15951 = vmatprep.subr.bf16.mxu1 %v16937_v60  ;;  %v10921_v7 = vrot.slane %v14802_v0, %v17925_v30  ;;  %v16957_v0 = vld [vmem:[%s20941_s22 + $0xdd8] sm:$0xff]  }
0x3c55   : > { %15930 = vmatpush3.bf16.msra.mxu0 %v16938_v20  ;;  %15952 = vmatpush3.bf16.msra.mxu1 %v16939_v18  ;;  %v16954_v18 = vld [vmem:[%s20941_s22 + $0xd10] sm:$0xff]  }
0x3c56   : > { %15931 = vmatprep.subr.bf16.mxu0 %v16940_v62  ;;  %15953 = vmatprep.subr.bf16.mxu1 %v16941_v39  ;;  %v16955_v62 = vld [vmem:[%s20941_s22 + $0xd90] sm:$0xff]  }
0x3c59   : > { %15932 = vmatpush3.bf16.msra.mxu0 %v16942_v41  ;;  %15954 = vmatpush3.bf16.msra.mxu1 %v16943_v47 }
0x3c5a   : > { %15961 = vmatprep.subr.bf16.mxu0 %v16944_v61  ;;  %15983 = vmatprep.subr.bf16.mxu1 %v16945_v59  ;;  %v16956_v59 = vld [vmem:[%s20941_s22 + $0xd58] sm:$0xff]  }
0x3cdf   : > { %v11327_v12 = vpop.f32.mrb[176].mxu0  ;;  %v11370_v13 = vpop.f32.mrb[164].mxu1 }
0x3ce0   : > { %v11328_v14 = vadd.f32 %v11327_v12, %v10893_v5  ;;  %v11371_v19 = vadd.f32 %v11370_v13, %v10901_v4  ;;  %v11329_v3 = vpop.f32.mrb[177].mxu0  ;;  %v11372_v32 = vpop.f32.mrb[165].mxu1 }
0x3ce1   : > { %v11330_v1 = vadd.f32 %v11329_v3, %v10897_v11  ;;  %v11373_v9 = vadd.f32 %v11372_v32, %v10905_v2  ;;  %v11331_v10 = vpop.f32.mrb[178].mxu0  ;;  %v11374_v40 = vpop.f32.mrb[166].mxu1 }
0x3ce2   : > { %v11332_v8 = vadd.f32 %v11331_v10, %v10893_v5  ;;  %v11375_v15 = vadd.f32 %v11374_v40, %v10901_v4  ;;  %v11333_v25 = vpop.f32.mrb[179].mxu0  ;;  %v11376_v6 = vpop.f32.mrb[167].mxu1  ;;  %v11637_v17 = vmax.f32 %v11328_v14, 0.0  ;;  %v11639_v34 = vmax.f32 %v11371_v19, 0.0 }
0x3ce3   : > { %v11334_v16 = vadd.f32 %v11333_v25, %v10897_v11  ;;  %v11377_v43 = vadd.f32 %v11376_v6, %v10905_v2  ;;  %v11638_v36 = vmax.f32 %v11330_v1, 0.0  ;;  %v11640_v63 = vmax.f32 %v11373_v9, 0.0  ;;  %v16958_v1 = vld [vmem:[%s20941_s22 + $0xd18] sm:$0xff]   ;;  %v16960_v25 = vld [vmem:[%s20941_s22 + $0xd60] sm:$0xff]  }
0x3ce4   : > { %v11653_v23 = vmax.f32 %v11332_v8, 0.0  ;;  %v11655_v53 = vmax.f32 %v11375_v15, 0.0  ;;  %v16959_v9 = vld [vmem:[%s20941_s22 + $0xd98] sm:$0xff]   ;;  %v16961_v6 = vld [vmem:[%s20941_s22 + $0xde0] sm:$0xff]  }
0x3ce5   : > { %v11654_v49 = vmax.f32 %v11334_v16, 0.0  ;;  %v11656_v37 = vmax.f32 %v11377_v43, 0.0 }
0x3ce6   : > { %v11669_v55 = vpack.c.bf16 %v11653_v23, %v11637_v17  ;;  %v11671_v44 = vpack.c.bf16 %v11655_v53, %v11639_v34 }
0x3ce7   : > { %v11670_v38 = vpack.c.bf16 %v11654_v49, %v11638_v36  ;;  %v11672_v24 = vpack.c.bf16 %v11656_v37, %v11640_v63  ;;  %v16962_v49 = vld [vmem:[%s20941_s22 + $0xd20] sm:$0xff]  }
0x3ce8   : > { %v16963_v37 = vld [vmem:[%s20941_s22 + $0xda0] sm:$0xff]  }
0x3ce9   : > { %12750 = vmatprep.mubr.bf16.mxu0 %v11670_v38  ;;  %12791 = vmatprep.mubr.bf16.mxu1 %v11672_v24  ;;  %v20641_v38 = vld [vmem:[%s20940_s21 + $0x38] sm:$0xff]  ;;  %v16966_v24 = vld [vmem:[%s20941_s22 + $0xd28] sm:$0xff]  }
0x3cea   : > { %12751 = vmatmul.mubr.bf16.vlgmr.msra.gmra.mrb[192].mxu0 %v11669_v55  ;;  %12792 = vmatmul.mubr.bf16.vlgmr.msra.gmra.mrb[180].mxu1 %v11671_v44  ;;  %v16964_v55 = vld [vmem:[%s20941_s22 + $0xd68] sm:$0xff]  }
0x3ceb   : > { %15962 = vmatpush3.bf16.msra.mxu0 %v16946_v35  ;;  %15984 = vmatpush3.bf16.msra.mxu1 %v16947_v33  ;;  %v16965_v44 = vld [vmem:[%s20941_s22 + $0xde8] sm:$0xff]   ;;  %v10925_v33 = vrot.slane %v20641_v38, %v17385_v29  ;;  %v16970_v29 = vld [vmem:[%s20941_s22 + $0xd30] sm:$0xff]  }
0x3cec   : > { %15963 = vmatprep.subr.bf16.mxu0 %v16948_v46  ;;  %15985 = vmatprep.subr.bf16.mxu1 %v16949_v51  ;;  %v16967_v35 = vld [vmem:[%s20941_s22 + $0xda8] sm:$0xff]   ;;  %v10933_v46 = vrot.slane %v20641_v38, %v17891_v45  ;;  %v16968_v51 = vld [vmem:[%s20941_s22 + $0xd70] sm:$0xff]  }
0x3ced   : > { %v16971_v45 = vld [vmem:[%s20941_s22 + $0xdb0] sm:$0xff]  }
0x3cef   : > { %v11413_v60 = vpop.f32.mrb[180].mxu0  ;;  %v11456_v20 = vpop.f32.mrb[168].mxu1  ;;  %15964 = vmatpush3.bf16.msra.mxu0 %v16950_v26  ;;  %15986 = vmatpush3.bf16.msra.mxu1 %v16951_v42  ;;  %v16969_v26 = vld [vmem:[%s20941_s22 + $0xdf0] sm:$0xff]   ;;  %v10929_v42 = vrot.slane %v20641_v38, %v17391_v31  ;;  %v16972_v31 = vld [vmem:[%s20941_s22 + $0xd78] sm:$0xff]  }
0x3cf0   : > { %v11414_v39 = vadd.f32 %v11413_v60, %v10909_v28  ;;  %v11457_v41 = vadd.f32 %v11456_v20, %v10917_v56  ;;  %v11415_v47 = vpop.f32.mrb[181].mxu0  ;;  %v11458_v61 = vpop.f32.mrb[169].mxu1  ;;  %15965 = vmatprep.subr.bf16.mxu0 %v16952_v50  ;;  %15987 = vmatprep.subr.bf16.mxu1 %v16953_v57 }
0x3cf1   : > { %v11416_v5 = vadd.f32 %v11415_v47, %v10913_v58  ;;  %v11459_v4 = vadd.f32 %v11458_v61, %v10921_v7  ;;  %v11417_v11 = vpop.f32.mrb[182].mxu0  ;;  %v11460_v2 = vpop.f32.mrb[170].mxu1 }
0x3cf2   : > { %v11418_v12 = vadd.f32 %v11417_v11, %v10909_v28  ;;  %v11461_v13 = vadd.f32 %v11460_v2, %v10917_v56  ;;  %v11419_v14 = vpop.f32.mrb[183].mxu0  ;;  %v11462_v19 = vpop.f32.mrb[171].mxu1  ;;  %v11641_v10 = vmax.f32 %v11414_v39, 0.0  ;;  %v11643_v40 = vmax.f32 %v11457_v41, 0.0  ;;  %v16975_v11 = vld [vmem:[%s20941_s22 + $0xdb8] sm:$0xff]  }
0x3cf3   : > { %v11420_v3 = vadd.f32 %v11419_v14, %v10913_v58  ;;  %v11463_v32 = vadd.f32 %v11462_v19, %v10921_v7  ;;  %15966 = vmatpush3.bf16.msra.mxu0 %v16954_v18  ;;  %15988 = vmatpush3.bf16.msra.mxu1 %v16955_v62  ;;  %v11642_v16 = vmax.f32 %v11416_v5, 0.0  ;;  %v11644_v43 = vmax.f32 %v11459_v4, 0.0  ;;  %v16974_v4 = vld [vmem:[%s20941_s22 + $0xd38] sm:$0xff]   ;;  %v16976_v19 = vld [vmem:[%s20941_s22 + $0xe40] sm:$0xff]  }
0x3cf4   : > { %v11657_v8 = vmax.f32 %v11418_v12, 0.0  ;;  %v11659_v15 = vmax.f32 %v11461_v13, 0.0  ;;  %15967 = vmatprep.subr.bf16.mxu0 %v16956_v59  ;;  %15989 = vmatprep.subr.bf16.mxu1 %v16957_v0  ;;  %v10937_v28 = vrot.slane %v20641_v38, %v17897_v48  ;;  %v16973_v48 = vld [vmem:[%s20941_s22 + $0xdf8] sm:$0xff]  }
0x3cf5   : > { %v11658_v17 = vmax.f32 %v11420_v3, 0.0  ;;  %v11660_v34 = vmax.f32 %v11463_v32, 0.0  ;;  %v16977_v3 = vld [vmem:[%s20941_s22 + $0xec0] sm:$0xff]  }
0x3cf6   : > { %v20622_v23 = vpack.c.bf16 %v11657_v8, %v11641_v10  ;;  %v20624_v53 = vpack.c.bf16 %v11659_v15, %v11643_v40 }
0x3cf7   : > { %v11674_v36 = vpack.c.bf16 %v11658_v17, %v11642_v16  ;;  %v11676_v63 = vpack.c.bf16 %v11660_v34, %v11644_v43  ;;  %15968 = vmatpush3.bf16.msra.mxu0 %v16958_v1  ;;  %15990 = vmatpush3.bf16.msra.mxu1 %v16959_v9  ;;  %v16979_v16 = vld [vmem:[%s20941_s22 + $0xe80] sm:$0xff]   ;;  %v16980_v43 = vld [vmem:[%s20941_s22 + $0xe48] sm:$0xff]  }
0x3cf8   : > { %15969 = vmatprep.subr.bf16.mxu0 %v16960_v25  ;;  %15991 = vmatprep.subr.bf16.mxu1 %v16961_v6  ;;  %v16978_v6 = vld [vmem:[%s20941_s22 + $0xe00] sm:$0xff]   ;;  %v16981_v17 = vld [vmem:[%s20941_s22 + $0xec8] sm:$0xff]  }
0x3cf9   : > { %12832 = vmatprep.mubr.bf16.mxu0 %v11674_v36  ;;  %12873 = vmatprep.mubr.bf16.mxu1 %v11676_v63  ;;  %v16982_v34 = vld [vmem:[%s20941_s22 + $0xe08] sm:$0xff]   ;;  %v10941_v36 = vrot.slane %v20641_v38, %v17916_v21  ;;  %v10949_v63 = vrot.slane %v20641_v38, %v17919_v22  ;;  %v16985_v21 = vld [vmem:[%s20941_s22 + $0xed0] sm:$0xff]  }
0x3cfb   : > { %15970 = vmatpush3.bf16.msra.mxu0 %v16962_v49  ;;  %15992 = vmatpush3.bf16.msra.mxu1 %v16963_v37  ;;  %v10945_v49 = vrot.slane %v20641_v38, %v17922_v27  ;;  %v10953_v37 = vrot.slane %v20641_v38, %v17925_v30  ;;  %v16987_v27 = vld [vmem:[%s20941_s22 + $0xe90] sm:$0xff]   ;;  %v16988_v30 = vld [vmem:[%s20941_s22 + $0xe58] sm:$0xff]  }
0x3cfc   : > { %15971 = vmatprep.subr.bf16.mxu0 %v16964_v55  ;;  %15993 = vmatprep.subr.bf16.mxu1 %v16965_v44  ;;  %v16986_v44 = vld [vmem:[%s20941_s22 + $0xe10] sm:$0xff]  }
0x3cff   : > { %v11499_v56 = vpop.f32.mrb[184].mxu0  ;;  %v11542_v50 = vpop.f32.mrb[172].mxu1  ;;  %15972 = vmatpush3.bf16.msra.mxu0 %v16966_v24  ;;  %15994 = vmatpush3.bf16.msra.mxu1 %v16967_v35 }
0x3d00   : > { %v11500_v57 = vadd.f32 %v11499_v56, %v10925_v33  ;;  %v11543_v58 = vadd.f32 %v11542_v50, %v10933_v46  ;;  %v11501_v7 = vpop.f32.mrb[185].mxu0  ;;  %v11544_v60 = vpop.f32.mrb[173].mxu1  ;;  %15973 = vmatprep.subr.bf16.mxu0 %v16968_v51  ;;  %15995 = vmatprep.subr.bf16.mxu1 %v16969_v26 }
0x3d01   : > { %v11502_v20 = vadd.f32 %v11501_v7, %v10929_v42  ;;  %v11545_v18 = vadd.f32 %v11544_v60, %v10937_v28  ;;  %v11503_v62 = vpop.f32.mrb[186].mxu0  ;;  %v11546_v39 = vpop.f32.mrb[174].mxu1  ;;  %v16990_v7 = vld [vmem:[%s20941_s22 + $0xe18] sm:$0xff]  }
0x3d02   : > { %v11504_v41 = vadd.f32 %v11503_v62, %v10925_v33  ;;  %v11547_v47 = vadd.f32 %v11546_v39, %v10933_v46  ;;  %v11505_v61 = vpop.f32.mrb[187].mxu0  ;;  %v11548_v59 = vpop.f32.mrb[175].mxu1  ;;  %v11645_v2 = vmax.f32 %v11500_v57, 0.0  ;;  %v11647_v12 = vmax.f32 %v11543_v58, 0.0  ;;  %v16992_v62 = vld [vmem:[%s20941_s22 + $0xe60] sm:$0xff]  }
0x3d03   : > { %v11506_v0 = vadd.f32 %v11505_v61, %v10929_v42  ;;  %v11549_v5 = vadd.f32 %v11548_v59, %v10937_v28  ;;  %15974 = vmatpush3.bf16.msra.mxu0 %v16970_v29  ;;  %15996 = vmatpush3.bf16.msra.mxu1 %v16971_v45  ;;  %v11646_v32 = vmax.f32 %v11502_v20, 0.0  ;;  %v11648_v1 = vmax.f32 %v11545_v18, 0.0  ;;  %v16989_v28 = vld [vmem:[%s20941_s22 + $0xed8] sm:$0xff]   ;;  %v16993_v59 = vld [vmem:[%s20941_s22 + $0xee0] sm:$0xff]  }
0x3d04   : > { %v11661_v13 = vmax.f32 %v11504_v41, 0.0  ;;  %v11663_v14 = vmax.f32 %v11547_v47, 0.0  ;;  %15975 = vmatprep.subr.bf16.mxu0 %v16972_v31  ;;  %15997 = vmatprep.subr.bf16.mxu1 %v16973_v48  ;;  %v16991_v18 = vld [vmem:[%s20941_s22 + $0xe98] sm:$0xff]  }
0x3d05   : > { %v11662_v9 = vmax.f32 %v11506_v0, 0.0  ;;  %v11664_v10 = vmax.f32 %v11549_v5, 0.0 }
0x3d06   : > { %v20687_v40 = vpack.c.bf16 %v11661_v13, %v11645_v2  ;;  %v20689_v8 = vpack.c.bf16 %v11663_v14, %v11647_v12  ;;  %v16994_v2 = vld [vmem:[%s20941_s22 + $0xe20] sm:$0xff]   ;;  %v16996_v13 = vld [vmem:[%s20941_s22 + $0xe68] sm:$0xff]  }
0x3d07   : > { %v11678_v15 = vpack.c.bf16 %v11662_v9, %v11646_v32  ;;  %v11680_v25 = vpack.c.bf16 %v11664_v10, %v11648_v1  ;;  %15976 = vmatpush3.bf16.msra.mxu0 %v16974_v4  ;;  %15998 = vmatpush3.bf16.msra.mxu1 %v16975_v11  ;;  %v16995_v12 = vld [vmem:[%s20941_s22 + $0xea0] sm:$0xff]   ;;  %v16997_v14 = vld [vmem:[%s20941_s22 + $0xee8] sm:$0xff]   ;;  %v17000_v32 = vld [vmem:[%s20941_s22 + $0xe70] sm:$0xff]  }
0x3d08   : > { %16005 = vmatprep.subr.bf16.mxu0 %v16976_v19  ;;  %16027 = vmatprep.subr.bf16.mxu1 %v16977_v3  ;;  %v16998_v19 = vld [vmem:[%s20941_s22 + $0xe28] sm:$0xff]   ;;  %v17001_v1 = vld [vmem:[%s20941_s22 + $0xef0] sm:$0xff]  }
0x3d09   : > { %v16999_v3 = vld [vmem:[%s20941_s22 + $0xea8] sm:$0xff]   ;;  %v17002_v9 = vld [vmem:[%s20941_s22 + $0xe30] sm:$0xff]  }
0x3d0a   : > { %12833 = vmatmul.mubr.bf16.vlgmr.msra.gmra.mrb[196].mxu0 %v20622_v23  ;;  %12874 = vmatmul.mubr.bf16.vlgmr.msra.gmra.mrb[184].mxu1 %v20624_v53  ;;  %v16983_v23 = vld [vmem:[%s20941_s22 + $0xe88] sm:$0xff]   ;;  %v16984_v53 = vld [vmem:[%s20941_s22 + $0xe50] sm:$0xff]  }
0x3d0b   : > { %16006 = vmatpush3.bf16.msra.mxu0 %v16978_v6  ;;  %12914 = vmatprep.mubr.bf16.mxu0 %v11678_v15  ;;  %v17003_v10 = vld [vmem:[%s20941_s22 + $0xeb0] sm:$0xff]   ;;  %v17004_v15 = vld [vmem:[%s20941_s22 + $0xe78] sm:$0xff]  }
0x3d0c   : > { %16028 = vmatpush3.bf16.msra.mxu1 %v16979_v16  ;;  %12955 = vmatprep.mubr.bf16.mxu1 %v11680_v25  ;;  %v17005_v25 = vld [vmem:[%s20941_s22 + $0xef8] sm:$0xff]  }
0x3d0d   : > { %16007 = vmatprep.subr.bf16.mxu0 %v16980_v43  ;;  %16029 = vmatprep.subr.bf16.mxu1 %v16981_v17  ;;  %v17006_v6 = vld [vmem:[%s20941_s22 + $0xe38] sm:$0xff]   ;;  %v17008_v43 = vld [vmem:[%s20941_s22 + $0xf40] sm:$0xff]  }
0x3d0e   : > { %v17007_v16 = vld [vmem:[%s20941_s22 + $0xeb8] sm:$0xff]   ;;  %v17009_v17 = vld [vmem:[%s20941_s22 + $0xfc0] sm:$0xff]  }
0x3d0f   : > { %v11585_v22 = vpop.f32.mrb[188].mxu0  ;;  %v11628_v55 = vpop.f32.mrb[176].mxu1  ;;  %16008 = vmatpush3.bf16.msra.mxu0 %v16982_v34  ;;  %v17010_v34 = vld [vmem:[%s20941_s22 + $0xf00] sm:$0xff]  }
0x3d10   : > { %v11586_v24 = vadd.f32 %v11585_v22, %v10941_v36  ;;  %v11629_v35 = vadd.f32 %v11628_v55, %v10949_v63  ;;  %16030 = vmatpush3.bf16.msra.mxu1 %v16983_v23  ;;  %v11587_v33 = vpop.f32.mrb[189].mxu0  ;;  %v11630_v46 = vpop.f32.mrb[177].mxu1  ;;  %16009 = vmatprep.subr.bf16.mxu0 %v16984_v53  ;;  %v17013_v23 = vld [vmem:[%s20941_s22 + $0xfc8] sm:$0xff]   ;;  %v17020_v22 = vld [vmem:[%s20941_s22 + $0xf58] sm:$0xff]  }
0x3d11   : > { %v11588_v38 = vadd.f32 %v11587_v33, %v10945_v49  ;;  %v11631_v51 = vadd.f32 %v11630_v46, %v10953_v37  ;;  %v11589_v26 = vpop.f32.mrb[190].mxu0  ;;  %v11632_v42 = vpop.f32.mrb[178].mxu1  ;;  %16031 = vmatprep.subr.bf16.mxu1 %v16985_v21  ;;  %v17014_v53 = vld [vmem:[%s20941_s22 + $0xf08] sm:$0xff]   ;;  %v17019_v21 = vld [vmem:[%s20941_s22 + $0xf90] sm:$0xff]   ;;  %v17021_v55 = vld [vmem:[%s20941_s22 + $0xfd8] sm:$0xff]  }
0x3d12   : > { %v11590_v56 = vadd.f32 %v11589_v26, %v10941_v36  ;;  %v11633_v50 = vadd.f32 %v11632_v42, %v10949_v63  ;;  %v11591_v29 = vpop.f32.mrb[191].mxu0  ;;  %v11634_v45 = vpop.f32.mrb[179].mxu1  ;;  %v11649_v60 = vmax.f32 %v11586_v24, 0.0  ;;  %v11651_v31 = vmax.f32 %v11629_v35, 0.0  ;;  %v17011_v36 = vld [vmem:[%s20941_s22 + $0xf80] sm:$0xff]   ;;  %v17012_v63 = vld [vmem:[%s20941_s22 + $0xf48] sm:$0xff]  }
0x3d13   : > { %v11592_v57 = vadd.f32 %v11591_v29, %v10945_v49  ;;  %v11635_v58 = vadd.f32 %v11634_v45, %v10953_v37  ;;  %16010 = vmatpush3.bf16.msra.mxu0 %v16986_v44  ;;  %v11650_v39 = vmax.f32 %v11588_v38, 0.0  ;;  %v11652_v41 = vmax.f32 %v11631_v51, 0.0  ;;  %v17015_v49 = vld [vmem:[%s20941_s22 + $0xf88] sm:$0xff]   ;;  %v17018_v37 = vld [vmem:[%s20941_s22 + $0xf10] sm:$0xff]   ;;  %v17022_v44 = vld [vmem:[%s20941_s22 + $0xf18] sm:$0xff]  }
0x3d14   : > { %v11665_v48 = vmax.f32 %v11590_v56, 0.0  ;;  %v11667_v20 = vmax.f32 %v11633_v50, 0.0  ;;  %16032 = vmatpush3.bf16.msra.mxu1 %v16987_v27  ;;  %16011 = vmatprep.subr.bf16.mxu0 %v16988_v30  ;;  %v17023_v24 = vld [vmem:[%s20941_s22 + $0xf98] sm:$0xff]   ;;  %v17024_v35 = vld [vmem:[%s20941_s22 + $0xf60] sm:$0xff]   ;;  %v17028_v30 = vld [vmem:[%s20941_s22 + $0xf68] sm:$0xff]  }
0x3d15   : > { %v11666_v47 = vmax.f32 %v11592_v57, 0.0  ;;  %v11668_v61 = vmax.f32 %v11635_v58, 0.0  ;;  %16033 = vmatprep.subr.bf16.mxu1 %v16989_v28  ;;  %v17025_v33 = vld [vmem:[%s20941_s22 + $0xfe0] sm:$0xff]   ;;  %v17029_v38 = vld [vmem:[%s20941_s22 + $0xfe8] sm:$0xff]   ;;  %v17032_v42 = vld [vmem:[%s20941_s22 + $0xf70] sm:$0xff]  }
0x3d16   : > { %v20749_v0 = vpack.c.bf16 %v11665_v48, %v11649_v60  ;;  %v20751_v5 = vpack.c.bf16 %v11667_v20, %v11651_v31  ;;  %v17026_v46 = vld [vmem:[%s20941_s22 + $0xf20] sm:$0xff]   ;;  %v17030_v51 = vld [vmem:[%s20941_s22 + $0xf28] sm:$0xff]   ;;  %v17033_v28 = vld [vmem:[%s20941_s22 + $0xff0] sm:$0xff]  }
0x3d17   : > { %v11682_v4 = vpack.c.bf16 %v11666_v47, %v11650_v39  ;;  %v11684_v11 = vpack.c.bf16 %v11668_v61, %v11652_v41  ;;  %16012 = vmatpush3.bf16.msra.mxu0 %v16990_v7  ;;  %v17027_v27 = vld [vmem:[%s20941_s22 + $0xfa0] sm:$0xff]   ;;  %v17031_v26 = vld [vmem:[%s20941_s22 + $0xfa8] sm:$0xff]   ;;  %v17034_v56 = vld [vmem:[%s20941_s22 + $0xf30] sm:$0xff]  }
0x3d18   : > { %16034 = vmatpush3.bf16.msra.mxu1 %v16991_v18  ;;  %16013 = vmatprep.subr.bf16.mxu0 %v16992_v62  ;;  %v17035_v50 = vld [vmem:[%s20941_s22 + $0xfb0] sm:$0xff]   ;;  %v17036_v29 = vld [vmem:[%s20941_s22 + $0xf78] sm:$0xff]   ;;  %v15133_v31 = vld [vmem:[%s20942_s23 + $0x3] ss:$0 sm:$0xff] }
0x3d19   : > { %16035 = vmatprep.subr.bf16.mxu1 %v16993_v59  ;;  %v17037_v45 = vld [vmem:[%s20941_s22 + $0xff8] sm:$0xff]  }
0x3d1a   : > { %v17038_v57 = vld [vmem:[%s20941_s22 + $0xf38] sm:$0xff]  }
0x3d1b   : > { %16014 = vmatpush3.bf16.msra.mxu0 %v16994_v2  ;;  %v17039_v58 = vld [vmem:[%s20941_s22 + $0xfb8] sm:$0xff]  }
0x3d1c   : > { %16036 = vmatpush3.bf16.msra.mxu1 %v16995_v12  ;;  %16015 = vmatprep.subr.bf16.mxu0 %v16996_v13 }
0x3d1d   : > { %16037 = vmatprep.subr.bf16.mxu1 %v16997_v14 }
0x3d1f   : > { %16016 = vmatpush3.bf16.msra.mxu0 %v16998_v19 }
0x3d20   : > { %16038 = vmatpush3.bf16.msra.mxu1 %v16999_v3  ;;  %16017 = vmatprep.subr.bf16.mxu0 %v17000_v32 }
0x3d21   : > { %16039 = vmatprep.subr.bf16.mxu1 %v17001_v1 }
0x3d23   : > { %16018 = vmatpush3.bf16.msra.mxu0 %v17002_v9 }
0x3d24   : > { %16040 = vmatpush3.bf16.msra.mxu1 %v17003_v10  ;;  %16019 = vmatprep.subr.bf16.mxu0 %v17004_v15 }
0x3d25   : > { %16041 = vmatprep.subr.bf16.mxu1 %v17005_v25 }
0x3d27   : > { %16020 = vmatpush3.bf16.msra.mxu0 %v17006_v6 }
0x3d28   : > { %16042 = vmatpush3.bf16.msra.mxu1 %v17007_v16  ;;  %16049 = vmatprep.subr.bf16.mxu0 %v17008_v43 }
0x3d29   : > { %16071 = vmatprep.subr.bf16.mxu1 %v17009_v17 }
0x3d2a   : > { %12915 = vmatmul.mubr.bf16.vlgmr.msra.gmra.mrb[200].mxu0 %v20687_v40  ;;  %v17016_v40 = vld [vmem:[%s20941_s22 + $0xf50] sm:$0xff]  }
0x3d2b   : > { %12956 = vmatmul.mubr.bf16.vlgmr.msra.gmra.mrb[188].mxu1 %v20689_v8  ;;  %16050 = vmatpush3.bf16.msra.mxu0 %v17010_v34  ;;  %v17017_v8 = vld [vmem:[%s20941_s22 + $0xfd0] sm:$0xff]  }
0x3d2c   : > { %12996 = vmatprep.mubr.bf16.mxu0 %v11682_v4  ;;  %16072 = vmatpush3.bf16.msra.mxu1 %v17011_v36 }
0x3d2d   : > { %13037 = vmatprep.mubr.bf16.mxu1 %v11684_v11  ;;  %16051 = vmatprep.subr.bf16.mxu0 %v17012_v63 }
0x3d2e   : > { %16073 = vmatprep.subr.bf16.mxu1 %v17013_v23 }
0x3d2f   : > { %16052 = vmatpush3.bf16.msra.mxu0 %v17014_v53 }
0x3d30   : > { %16074 = vmatpush3.bf16.msra.mxu1 %v17015_v49  ;;  %16053 = vmatprep.subr.bf16.mxu0 %v17016_v40 }
0x3d31   : > { %16075 = vmatprep.subr.bf16.mxu1 %v17017_v8 }
0x3d33   : > { %16054 = vmatpush3.bf16.msra.mxu0 %v17018_v37 }
0x3d34   : > { %16076 = vmatpush3.bf16.msra.mxu1 %v17019_v21  ;;  %16055 = vmatprep.subr.bf16.mxu0 %v17020_v22 }
0x3d35   : > { %16077 = vmatprep.subr.bf16.mxu1 %v17021_v55 }
0x3d37   : > { %16056 = vmatpush3.bf16.msra.mxu0 %v17022_v44 }
0x3d38   : > { %16078 = vmatpush3.bf16.msra.mxu1 %v17023_v24  ;;  %16057 = vmatprep.subr.bf16.mxu0 %v17024_v35 }
0x3d39   : > { %16079 = vmatprep.subr.bf16.mxu1 %v17025_v33 }
0x3d3b   : > { %16058 = vmatpush3.bf16.msra.mxu0 %v17026_v46 }
0x3d3c   : > { %16080 = vmatpush3.bf16.msra.mxu1 %v17027_v27  ;;  %16059 = vmatprep.subr.bf16.mxu0 %v17028_v30 }
0x3d3d   : > { %16081 = vmatprep.subr.bf16.mxu1 %v17029_v38 }
0x3d3f   : > { %16060 = vmatpush3.bf16.msra.mxu0 %v17030_v51 }
0x3d40   : > { %16082 = vmatpush3.bf16.msra.mxu1 %v17031_v26  ;;  %16061 = vmatprep.subr.bf16.mxu0 %v17032_v42 }
0x3d41   : > { %16083 = vmatprep.subr.bf16.mxu1 %v17033_v28 }
0x3d43   : > { %16062 = vmatpush3.bf16.msra.mxu0 %v17034_v56 }
0x3d44   : > { %16084 = vmatpush3.bf16.msra.mxu1 %v17035_v50  ;;  %16063 = vmatprep.subr.bf16.mxu0 %v17036_v29 }
0x3d45   : > { %16085 = vmatprep.subr.bf16.mxu1 %v17037_v45 }
0x3d47   : > { %16064 = vmatpush3.bf16.msra.mxu0 %v17038_v57 }
0x3d48   : > { %16086 = vmatpush3.bf16.msra.mxu1 %v17039_v58 }
0x3d4a   : > { %12997 = vmatmul.mubr.bf16.vlgmr.msra.gmra.mrb[204].mxu0 %v20749_v0 }
0x3d4b   : > { %13038 = vmatmul.mubr.bf16.vlgmr.msra.gmra.mrb[192].mxu1 %v20751_v5 }
0x3dbd   : > { %v15933_v7 = vpop.f32.mrb[192].mxu0  ;;  %v15955_v60 = vpop.f32.mrb[180].mxu1 }
0x3dbe   : > { %v15934_v48 = vpop.f32.mrb[193].mxu0  ;;  %v15956_v20 = vpop.f32.mrb[181].mxu1 }
0x3dbf   : > { %v15935_v18 = vadd.f32 %v15934_v48, %v15933_v7  ;;  %v15957_v62 = vadd.f32 %v15956_v20, %v15955_v60  ;;  %v15936_v39 = vpop.f32.mrb[194].mxu0  ;;  %v15958_v41 = vpop.f32.mrb[182].mxu1 }
0x3dc0   : > { %v15937_v47 = vpop.f32.mrb[195].mxu0  ;;  %v15959_v61 = vpop.f32.mrb[183].mxu1 }
0x3dc1   : > { %v12753_v59 = vadd.f32 %v15935_v18, %v15133_v31  ;;  %v15938_v4 = vadd.f32 %v15937_v47, %v15936_v39  ;;  %v15960_v11 = vadd.f32 %v15959_v61, %v15958_v41 }
0x3dc3   : > { %v12794_v0 = vadd.f32 %v15957_v62, %v12753_v59  ;;  %v12756_v2 = vadd.f32 %v15938_v4, %v15133_v31 }
0x3dc5   : > { %v12797_v5 = vadd.f32 %v15960_v11, %v12756_v2 }
0x3ddd   : > { %v15977_v12 = vpop.f32.mrb[196].mxu0  ;;  %v15999_v13 = vpop.f32.mrb[184].mxu1 }
0x3dde   : > { %v15978_v14 = vpop.f32.mrb[197].mxu0  ;;  %v16000_v19 = vpop.f32.mrb[185].mxu1 }
0x3ddf   : > { %v15979_v3 = vadd.f32 %v15978_v14, %v15977_v12  ;;  %v16001_v32 = vadd.f32 %v16000_v19, %v15999_v13  ;;  %v15980_v1 = vpop.f32.mrb[198].mxu0  ;;  %v16002_v9 = vpop.f32.mrb[186].mxu1 }
0x3de0   : > { %v15981_v10 = vpop.f32.mrb[199].mxu0  ;;  %v16003_v15 = vpop.f32.mrb[187].mxu1 }
0x3de1   : > { %v12835_v25 = vadd.f32 %v15979_v3, %v12794_v0  ;;  %v15982_v6 = vadd.f32 %v15981_v10, %v15980_v1  ;;  %v16004_v16 = vadd.f32 %v16003_v15, %v16002_v9  ;;  %v15265_v9 = vld [vmem:[%s20938_s19 + $0x3] ss:$0 sm:$0xff] }
0x3de3   : > { %v12876_v43 = vadd.f32 %v16001_v32, %v12835_v25  ;;  %v12838_v17 = vadd.f32 %v15982_v6, %v12797_v5  ;;  %v15264_v32 = vld [vmem:[%s20937_s18 + $0x3] ss:$0 sm:$0xff] }
0x3de5   : > { %v12879_v34 = vadd.f32 %v16004_v16, %v12838_v17 }
0x3dfd   : > { %v16021_v36 = vpop.f32.mrb[200].mxu0 }
0x3dfe   : > { %v16043_v63 = vpop.f32.mrb[188].mxu1  ;;  %v16022_v23 = vpop.f32.mrb[201].mxu0 }
0x3dff   : > { %v16023_v53 = vadd.f32 %v16022_v23, %v16021_v36  ;;  %v16044_v49 = vpop.f32.mrb[189].mxu1  ;;  %v16024_v40 = vpop.f32.mrb[202].mxu0 }
0x3e00   : > { %v16045_v8 = vadd.f32 %v16044_v49, %v16043_v63  ;;  %v16046_v37 = vpop.f32.mrb[190].mxu1  ;;  %v16025_v21 = vpop.f32.mrb[203].mxu0 }
0x3e01   : > { %v12917_v22 = vadd.f32 %v16023_v53, %v12876_v43  ;;  %v16026_v55 = vadd.f32 %v16025_v21, %v16024_v40  ;;  %v16047_v44 = vpop.f32.mrb[191].mxu1 }
0x3e02   : > { %v16048_v24 = vadd.f32 %v16047_v44, %v16046_v37 }
0x3e03   : > { %v12958_v35 = vadd.f32 %v16045_v8, %v12917_v22  ;;  %v12920_v33 = vadd.f32 %v16026_v55, %v12879_v34 }
0x3e05   : > { %v12961_v46 = vadd.f32 %v16048_v24, %v12920_v33 }
0x3e1d   : > { %v16065_v27 = vpop.f32.mrb[204].mxu0 }
0x3e1e   : > { %v16087_v30 = vpop.f32.mrb[192].mxu1  ;;  %v16066_v38 = vpop.f32.mrb[205].mxu0 }
0x3e1f   : > { %v16067_v51 = vadd.f32 %v16066_v38, %v16065_v27  ;;  %v16088_v26 = vpop.f32.mrb[193].mxu1  ;;  %v16068_v42 = vpop.f32.mrb[206].mxu0 }
0x3e20   : > { %v16089_v28 = vadd.f32 %v16088_v26, %v16087_v30  ;;  %v16090_v56 = vpop.f32.mrb[194].mxu1  ;;  %v16069_v50 = vpop.f32.mrb[207].mxu0 }
0x3e21   : > { %v12999_v29 = vadd.f32 %v16067_v51, %v12958_v35  ;;  %v16070_v45 = vadd.f32 %v16069_v50, %v16068_v42  ;;  %v16091_v57 = vpop.f32.mrb[195].mxu1 }
0x3e22   : > { %v16092_v58 = vadd.f32 %v16091_v57, %v16090_v56 }
0x3e23   : > { %v13040_v7 = vadd.f32 %v16089_v28, %v12999_v29  ;;  %v13002_v60 = vadd.f32 %v16070_v45, %v12961_v46 }
0x3e25   : > { %v13043_v31 = vadd.f32 %v16092_v58, %v13002_v60  ;;  %v13046_v48 = vadd.f32 %v13040_v7, %v20311_v54 }
0x3e27   : > { %v13052_v20 = vsel %vm902_vm3, %v13046_v48, 0.0  ;;  %v13047_v18 = vadd.f32 %v13043_v31, %v20313_v52 }
0x3e28   : > { %13053 = vadd.xlane.f32.xlu1 %v13052_v20 }
0x3e29   : > { %v13055_v62 = vsel %vm902_vm3, %v13047_v18, 0.0 }
0x3e2c   : > { %13056 = vadd.xlane.f32.xlu1 %v13055_v62 }
0x3eb5   : > { %v13054_v39 = vpop.xlane.xlu1 %13053 }
0x3eb6   : > { %v13058_v41 = vmul.f32 0.015625, %v13054_v39 }
0x3eb8   : > { %v13060_v47 = vsub.f32 %v13046_v48, %v13058_v41 }
0x3eb9   : > { %v13057_v61 = vpop.xlane.xlu1 %13056 }
0x3eba   : > { %v13059_v59 = vmul.f32 0.015625, %v13057_v61  ;;  %v13062_v4 = vmul.f32 %v13060_v47, %v13060_v47 }
0x3ebc   : > { %v13061_v11 = vsub.f32 %v13047_v18, %v13059_v59  ;;  %v13064_v0 = vsel %vm902_vm3, %v13062_v4, 0.0 }
0x3ebd   : > { %13065 = vadd.xlane.f32.xlu0 %v13064_v0 }
0x3ebe   : > { %v13063_v54 = vmul.f32 %v13061_v11, %v13061_v11 }
0x3ec0   : > { %v13067_v2 = vsel %vm902_vm3, %v13063_v54, 0.0 }
0x3ec1   : > { %13068 = vadd.xlane.f32.xlu1 %v13067_v2 }
0x3f4a   : > { %v13066_v52 = vpop.xlane.xlu0 %13065 }
0x3f4b   : > { %v13070_v5 = vmul.f32 0.015625, %v13066_v52 }
0x3f4d   : > { %v13072_v12 = vadd.f32 1e-05, %v13070_v5 }
0x3f4e   : > { %v13069_v13 = vpop.xlane.xlu1 %13068 }
0x3f4f   : > { %17148 = vrsqrt.f32 %v13072_v12  ;;  %v13071_v14 = vmul.f32 0.015625, %v13069_v13 }
0x3f51   : > { %v13073_v19 = vadd.f32 1e-05, %v13071_v14 }
0x3f53   : > { %17150 = vrsqrt.f32 %v13073_v19 }
0x3f59   : > { %v17149_v3 = vpop.eup %17148 }
0x3f5a   : > { %v13076_v1 = vmul.f32 %v17149_v3, %v13060_v47 }
0x3f5c   : > { %v13084_v10 = vmul.f32 %v15264_v32, %v13076_v1 }
0x3f5d   : > { %v17151_v15 = vpop.eup %17150 }
0x3f5e   : > { %v13092_v25 = vadd.f32 %v15265_v9, %v13084_v10  ;;  %v13077_v6 = vmul.f32 %v17151_v15, %v13061_v11 }
0x3f60   : > { %13094 = vst.msk [vmem:[%s737_s8] sm:$0xff] %vm902_vm3, %v13092_v25  ;;  %v13085_v16 = vmul.f32 %v15264_v32, %v13077_v6 }
0x3f62   : > { %v13093_v43 = vadd.f32 %v15265_v9, %v13085_v16 }
0x3f64   : > { %13095 = vst.msk [vmem:[%s737_s8 + $0x8] sm:$0xff] %vm902_vm3, %v13093_v43 }
0x3f65 PF: > { %s20988_s2 = sld [smem:[#allocation2_spill]] }
0x3f6b   : > { %s34_s5 = sadd.s32 1, %s20988_s2  }
0x3f6c   : > { %p31_p4 = scmp.ge.s32.totalorder %s34_s5, 4  }
0x3f6e   :  { %33 = sbr.rel (!%p31_p4) target bundleno = 12 (0xc), region = 206 }

</bundles_post_ra>
